<compile_context>
chip_gen: v6e
topology: v6e:2x2x1
jax: 0.10.0
libtpu: 0.0.40
codegen_flags: <defaults>
</compile_context>

<pallas_src>
import numpy as np

import jax
import jax.numpy as jnp
from jax.experimental import pallas as pl
from jax.experimental.pallas import tpu as pltpu


def _round_up(x, m):
    return (x + m - 1) // m * m


# ----------------------------------------------------------------------------
# Fused [BN+ReLU ->] 3x3 conv -> BN statistics kernel
# ----------------------------------------------------------------------------
def _make_conv_bn_stats_kernel(M, W, p0, fuse_input_bn):
    """Builds the fused (BN+ReLU ->) conv3x3 -> BN-stats kernel body."""

    def kernel(*refs):
        if fuse_input_bn:
            (x_ref, mask_ref, scale_ref, shift_ref, w_ref,
             o_ref, sum_ref, sq_ref, xpad_ref, acc_ref) = refs
        else:
            (x_ref, mask_ref, w_ref,
             o_ref, sum_ref, sq_ref, xpad_ref, acc_ref) = refs
            scale_ref = shift_ref = None

        # Zero persistent state once: the zero border of the halo scratch and
        # the per-channel stat accumulators (same output block every step).
        @pl.when(pl.program_id(0) == 0)
        def _():
            xpad_ref[...] = jnp.zeros_like(xpad_ref)
            sum_ref[...] = jnp.zeros_like(sum_ref)
            sq_ref[...] = jnp.zeros_like(sq_ref)

        xin = x_ref[...]                                        # (M, Cin)
        if fuse_input_bn:
            # Previous layer's BatchNorm affine + ReLU fused into this load.
            xin = jnp.maximum(
                xin.astype(jnp.float32) * scale_ref[...] + shift_ref[...],
                jnp.float32(0.0),
            ).astype(x_ref.dtype)

        # Place the block in the middle of the zero-bordered flat scratch so
        # every tap below is a plain static row-slice (border rows stay zero).
        xpad_ref[p0:p0 + M, :] = xin

        # Tap-wise accumulation: 9 MXU matmuls into an f32 VMEM accumulator
        # (no im2col concat/reshape).
        acc_ref[...] = jnp.zeros_like(acc_ref)
        t = 0
        for dh in (-1, 0, 1):
            for dw in (-1, 0, 1):
                s = dh * W + dw                                  # static shift
                xs = xpad_ref[p0 + s:p0 + s + M, :]              # shifted rows
                xs = xs * mask_ref[:, t:t + 1].astype(xs.dtype)  # zero edge taps
                acc_ref[...] += jnp.dot(xs, w_ref[t],
                                        preferred_element_type=jnp.float32)
                t += 1

        acc = acc_ref[...]
        o_ref[...] = acc.astype(o_ref.dtype)
        # BatchNorm statistics of THIS conv's output, accumulated across the
        # batch grid axis; finalized (mean/var -> scale/shift) in the wrapper.
        sum_ref[...] += jnp.sum(acc, axis=0, keepdims=True)
        sq_ref[...] += jnp.sum(acc * acc, axis=0, keepdims=True)

    return kernel


def _tap_edge_mask(nb, H, W):
    """(nb*H*W, 9) f32 mask: 1 where the tap's source pixel is inside the image."""
    h = np.arange(H)[:, None]
    w = np.arange(W)[None, :]
    cols = []
    for dh in (-1, 0, 1):
        for dw in (-1, 0, 1):
            valid = ((h + dh >= 0) & (h + dh < H) &
                     (w + dw >= 0) & (w + dw < W))
            cols.append(np.broadcast_to(valid[None], (nb, H, W)).reshape(-1))
    return jnp.asarray(np.stack(cols, axis=-1), dtype=jnp.float32)


def _pick_batch_block(N, H, W, Cin, Cout, itemsize, budget_bytes=6 << 20):
    """Images per grid step, sized so double-buffered blocks stay well under
    the scoped VMEM limit on all generations (lane padding to 128 included)."""
    cl_in = _round_up(max(Cin, 1), 128)
    cl_out = _round_up(max(Cout, 1), 128)
    rows = H * W
    per_img = (2 * rows * cl_in * itemsize        # input block, double-buffered
               + 2 * rows * cl_out * itemsize     # output block, double-buffered
               + rows * cl_in * itemsize          # halo scratch
               + rows * cl_out * 4)               # f32 accumulator scratch
    nb = max(1, min(N, budget_bytes // max(per_img, 1)))
    while N % nb:
        nb -= 1
    return nb


def conv3x3_bn_stats(x2d, w_taps, *, N, H, W, scale_shift=None,
                     out_dtype=jnp.float32):
    """Fused [BN+ReLU ->] 3x3 same-conv -> per-channel (sum, sumsq).

    x2d    : (N*H*W, Cin) activations, row order (n, h, w).
    w_taps : (9, Cin, Cout) weights, tap order (kh, kw).
    Returns (y2d (N*H*W, Cout), sum (1, Cout) f32, sumsq (1, Cout) f32).
    """
    R, Cin = x2d.shape
    assert R == N * H * W
    Cout = w_taps.shape[-1]

    nb = _pick_batch_block(N, H, W, Cin, Cout, jnp.dtype(x2d.dtype).itemsize)
    M = nb * H * W
    p0 = _round_up(W + 1, 8)          # sublane-aligned halo offset
    grid = (N // nb,)
    fuse = scale_shift is not None

    mask = _tap_edge_mask(nb, H, W)   # (M, 9), same for every block

    in_specs = [
        pl.BlockSpec((M, Cin), lambda n: (n, 0)),
        pl.BlockSpec((M, 9), lambda n: (0, 0)),
    ]
    args = [x2d, mask]
    if fuse:
        scale, shift = scale_shift
        in_specs += [pl.BlockSpec((1, Cin), lambda n: (0, 0)),
                     pl.BlockSpec((1, Cin), lambda n: (0, 0))]
        args += [scale.reshape(1, Cin).astype(jnp.float32),
                 shift.reshape(1, Cin).astype(jnp.float32)]
    in_specs.append(pl.BlockSpec((9, Cin, Cout), lambda n: (0, 0, 0)))
    args.append(w_taps)

    kernel = _make_conv_bn_stats_kernel(M, W, p0, fuse)
    y, s, q = pl.pallas_call(
        kernel,
        out_shape=(jax.ShapeDtypeStruct((R, Cout), out_dtype),
                   jax.ShapeDtypeStruct((1, Cout), jnp.float32),
                   jax.ShapeDtypeStruct((1, Cout), jnp.float32)),
        grid_spec=pltpu.PrefetchScalarGridSpec(
            num_scalar_prefetch=0,
            grid=grid,
            in_specs=in_specs,
            out_specs=(pl.BlockSpec((M, Cout), lambda n: (n, 0)),
                       pl.BlockSpec((1, Cout), lambda n: (0, 0)),
                       pl.BlockSpec((1, Cout), lambda n: (0, 0))),
            scratch_shapes=[pltpu.VMEM((M + 2 * p0, Cin), x2d.dtype),
                            pltpu.VMEM((M, Cout), jnp.float32)],
        ),
        # Stats accumulate across the grid axis -> it must stay sequential.
        compiler_params=pltpu.CompilerParams(dimension_semantics=("arbitrary",)),
    )(*args)
    return y, s, q


# ----------------------------------------------------------------------------
# Final BN + ReLU (flat 2-D elementwise pass)
# ----------------------------------------------------------------------------
def _bn_relu_kernel(y_ref, scale_ref, shift_ref, o_ref):
    y = y_ref[...].astype(jnp.float32)
    o_ref[...] = jnp.maximum(y * scale_ref[...] + shift_ref[...],
                             jnp.float32(0.0)).astype(o_ref.dtype)


def bn_relu(y2d, scale, shift, *, out_dtype=jnp.float32, max_rows=4096):
    R, C = y2d.shape
    if R <= max_rows:
        tr = R
    else:
        tr = next((t for t in range(max_rows, 7, -8) if R % t == 0), R)
    return pl.pallas_call(
        _bn_relu_kernel,
        out_shape=jax.ShapeDtypeStruct((R, C), out_dtype),
        grid_spec=pltpu.PrefetchScalarGridSpec(
            num_scalar_prefetch=0,
            grid=(R // tr,),
            in_specs=[pl.BlockSpec((tr, C), lambda i: (i, 0)),
                      pl.BlockSpec((1, C), lambda i: (0, 0)),
                      pl.BlockSpec((1, C), lambda i: (0, 0))],
            out_specs=pl.BlockSpec((tr, C), lambda i: (i, 0)),
        ),
        compiler_params=pltpu.CompilerParams(dimension_semantics=("parallel",)),
    )(y2d, scale.reshape(1, C).astype(jnp.float32),
      shift.reshape(1, C).astype(jnp.float32))


def _bn_affine(s, q, gamma, beta, count, eps=1e-5):
    """BatchNorm (batch statistics, biased variance) -> per-channel scale/shift."""
    mean = s[0] / count
    # Clamp guards the E[x^2]-E[x]^2 cancellation before rsqrt.
    var = jnp.maximum(q[0] / count - mean * mean, jnp.float32(0.0))
    inv_std = jax.lax.rsqrt(var + jnp.float32(eps))
    scale = gamma * inv_std
    shift = beta - mean * scale
    return scale, shift


# ----------------------------------------------------------------------------
# DoubleConv: parameter init + forward
# ----------------------------------------------------------------------------
def init_double_conv_params(key, in_channels, out_channels, mid_channels=None):
    if mid_channels is None:
        mid_channels = out_channels
    k1, k2, k3, k4 = jax.random.split(key, 4)
    fan1 = in_channels * 9
    fan2 = mid_channels * 9
    return {
        # conv1 (BBBConv2d, deterministic mean weights)
        "w1": jax.random.normal(k1, (mid_channels, in_channels, 3, 3), jnp.float32)
        * (1.0 / jnp.sqrt(fan1)),
        "b1": jax.random.normal(k2, (mid_channels,), jnp.float32) * 0.01,
        "gamma1": jnp.ones((mid_channels,), jnp.float32),
        "beta1": jnp.zeros((mid_channels,), jnp.float32),
        # conv2 (nn.Conv2d)
        "w2": jax.random.normal(k3, (out_channels, mid_channels, 3, 3), jnp.float32)
        * (1.0 / jnp.sqrt(fan2)),
        "b2": jax.random.normal(k4, (out_channels,), jnp.float32) * 0.01,
        "gamma2": jnp.ones((out_channels,), jnp.float32),
        "beta2": jnp.zeros((out_channels,), jnp.float32),
    }


def double_conv(x_nchw, params, *, act_dtype=jnp.float32, eps=1e-5):
    N, _, H, W = x_nchw.shape
    Cmid = params["w1"].shape[0]
    Cout = params["w2"].shape[0]

    # NCHW -> NHWC -> flat (N*H*W, C): channel axis in lanes, big sublane tiles.
    x = jnp.transpose(x_nchw, (0, 2, 3, 1)).astype(act_dtype)
    Cin = x.shape[-1]
    x = x.reshape(N * H * W, Cin)

    # PyTorch (Cout, Cin, KH, KW) -> per-tap (9, Cin, Cout) matrices.
    w1 = jnp.transpose(params["w1"], (2, 3, 1, 0)).reshape(9, Cin, Cmid).astype(act_dtype)
    w2 = jnp.transpose(params["w2"], (2, 3, 1, 0)).reshape(9, Cmid, Cout).astype(act_dtype)
    # NOTE: conv biases (params["b1"], params["b2"]) are NOT applied: a
    # per-channel constant before BatchNorm is removed exactly by the mean
    # subtraction, so the module output is unchanged.

    cnt = jnp.float32(N * H * W)

    # conv1 (+ fused BN1 statistics)
    y1, s1, q1 = conv3x3_bn_stats(x, w1, N=N, H=H, W=W, out_dtype=act_dtype)
    scale1, shift1 = _bn_affine(s1, q1, params["gamma1"], params["beta1"], cnt, eps)

    # BN1 + ReLU fused into conv2's input load; conv2 (+ fused BN2 statistics)
    y2, s2, q2 = conv3x3_bn_stats(y1, w2, N=N, H=H, W=W,
                                  scale_shift=(scale1, shift1),
                                  out_dtype=act_dtype)
    scale2, shift2 = _bn_affine(s2, q2, params["gamma2"], params["beta2"], cnt, eps)

    # final BN2 + ReLU (flat elementwise pass)
    out = bn_relu(y2, scale2, shift2, out_dtype=jnp.float32)      # (N*H*W, Cout)
    # flat -> NHWC -> NCHW
    return jnp.transpose(out.reshape(N, H, W, Cout), (0, 3, 1, 2))


if __name__ == "__main__":
    key = jax.random.PRNGKey(0)
    kx, kp = jax.random.split(key)
    in_channels, out_channels = 4, 8
    x = jax.random.normal(kx, (2, in_channels, 16, 16), jnp.float32)  # NCHW
    params = init_double_conv_params(kp, in_channels, out_channels)
    y = double_conv(x, params)
    jax.block_until_ready(y)
    assert y.shape == (2, out_channels, 16, 16), y.shape
    assert bool(jnp.all(y >= 0.0))  # final ReLU
    assert bool(jnp.all(jnp.isfinite(y)))
    print("KERNEL_OK")
</pallas_src>

<mosaic_0001>
module attributes {stable_mosaic.version = 11 : i64} {
  func.func @kernel(%arg0: i32, %arg1: memref<512x4xf32, #tpu.memory_space<vmem>>, %arg2: memref<512x9xf32, #tpu.memory_space<vmem>>, %arg3: memref<9x4x8xf32, #tpu.memory_space<vmem>>, %arg4: memref<512x8xf32, #tpu.memory_space<vmem>>, %arg5: memref<1x8xf32, #tpu.memory_space<vmem>>, %arg6: memref<1x8xf32, #tpu.memory_space<vmem>>, %arg7: memref<560x4xf32, #tpu.memory_space<vmem>>, %arg8: memref<512x8xf32, #tpu.memory_space<vmem>>) attributes {dimension_semantics = [#tpu.dimension_semantics<arbitrary>], iteration_bounds = array<i64: 1>, scalar_prefetch = 0 : i64, scratch_operands = 2 : i64, tpu.core_type = #tpu.core_type<tc>, window_params = [{transform_indices = @transform_0, window_bounds = array<i64: 512, 4>}, {pipeline_mode = #tpu.pipeline_mode<synchronous>, transform_indices = @transform_1, window_bounds = array<i64: 512, 9>}, {pipeline_mode = #tpu.pipeline_mode<synchronous>, transform_indices = @transform_2, window_bounds = array<i64: 9, 4, 8>}, {transform_indices = @transform_3, window_bounds = array<i64: 512, 8>}, {pipeline_mode = #tpu.pipeline_mode<synchronous>, transform_indices = @transform_4, window_bounds = array<i64: 1, 8>}, {pipeline_mode = #tpu.pipeline_mode<synchronous>, transform_indices = @transform_5, window_bounds = array<i64: 1, 8>}]} {
    %c0_i32 = arith.constant 0 : i32
    %0 = arith.cmpi eq, %arg0, %c0_i32 : i32
    %1 = arith.extui %0 : i1 to i32
    %c0_i32_0 = arith.constant 0 : i32
    %2 = arith.cmpi ne, %1, %c0_i32_0 : i32
    scf.if %2 {
      %cst_113 = arith.constant 0.000000e+00 : f32
      %110 = vector.broadcast %cst_113 : f32 to vector<560x4xf32>
      %c0_114 = arith.constant 0 : index
      %c0_115 = arith.constant 0 : index
      %111 = vector.load %arg7[%c0_114, %c0_115] : memref<560x4xf32, #tpu.memory_space<vmem>>, vector<560x4xf32>
      tpu.vector_store %arg7[%c0_114, %c0_115], %110 {strides = array<i32>} : memref<560x4xf32, #tpu.memory_space<vmem>>, vector<560x4xf32>,
      %cst_116 = arith.constant 0.000000e+00 : f32
      %112 = vector.broadcast %cst_116 : f32 to vector<1x8xf32>
      %c0_117 = arith.constant 0 : index
      %c0_118 = arith.constant 0 : index
      %113 = vector.load %arg5[%c0_117, %c0_118] : memref<1x8xf32, #tpu.memory_space<vmem>>, vector<1x8xf32>
      tpu.vector_store %arg5[%c0_117, %c0_118], %112 {strides = array<i32>} : memref<1x8xf32, #tpu.memory_space<vmem>>, vector<1x8xf32>,
      %cst_119 = arith.constant 0.000000e+00 : f32
      %114 = vector.broadcast %cst_119 : f32 to vector<1x8xf32>
      %c0_120 = arith.constant 0 : index
      %c0_121 = arith.constant 0 : index
      %115 = vector.load %arg6[%c0_120, %c0_121] : memref<1x8xf32, #tpu.memory_space<vmem>>, vector<1x8xf32>
      tpu.vector_store %arg6[%c0_120, %c0_121], %114 {strides = array<i32>} : memref<1x8xf32, #tpu.memory_space<vmem>>, vector<1x8xf32>,
    } else {
    }
    %c0 = arith.constant 0 : index
    %c0_1 = arith.constant 0 : index
    %3 = vector.load %arg1[%c0, %c0_1] : memref<512x4xf32, #tpu.memory_space<vmem>>, vector<512x4xf32>
    %c24 = arith.constant 24 : index
    %c0_2 = arith.constant 0 : index
    %4 = vector.load %arg7[%c24, %c0_2] : memref<560x4xf32, #tpu.memory_space<vmem>>, vector<512x4xf32>
    tpu.vector_store %arg7[%c24, %c0_2], %3 {strides = array<i32>} : memref<560x4xf32, #tpu.memory_space<vmem>>, vector<512x4xf32>,
    %cst = arith.constant 0.000000e+00 : f32
    %5 = vector.broadcast %cst : f32 to vector<512x8xf32>
    %c0_3 = arith.constant 0 : index
    %c0_4 = arith.constant 0 : index
    %6 = vector.load %arg8[%c0_3, %c0_4] : memref<512x8xf32, #tpu.memory_space<vmem>>, vector<512x8xf32>
    tpu.vector_store %arg8[%c0_3, %c0_4], %5 {strides = array<i32>} : memref<512x8xf32, #tpu.memory_space<vmem>>, vector<512x8xf32>,
    %c7 = arith.constant 7 : index
    %c0_5 = arith.constant 0 : index
    %7 = vector.load %arg7[%c7, %c0_5] : memref<560x4xf32, #tpu.memory_space<vmem>>, vector<512x4xf32>
    %c0_6 = arith.constant 0 : index
    %c0_7 = arith.constant 0 : index
    %8 = vector.load %arg2[%c0_6, %c0_7] : memref<512x9xf32, #tpu.memory_space<vmem>>, vector<512x1xf32>
    %9 = vector.broadcast %8 : vector<512x1xf32> to vector<512x4xf32>
    %10 = arith.mulf %7, %9 : vector<512x4xf32>
    %c0_8 = arith.constant 0 : index
    %c0_9 = arith.constant 0 : index
    %11 = vector.load %arg8[%c0_8, %c0_9] : memref<512x8xf32, #tpu.memory_space<vmem>>, vector<512x8xf32>
    %c0_10 = arith.constant 0 : index
    %c0_11 = arith.constant 0 : index
    %c0_12 = arith.constant 0 : index
    %12 = vector.load %arg3[%c0_10, %c0_11, %c0_12] : memref<9x4x8xf32, #tpu.memory_space<vmem>>, vector<1x4x8xf32>
    %13 = vector.shape_cast %12 : vector<1x4x8xf32> to vector<4x8xf32>
    %cst_13 = arith.constant dense<0.000000e+00> : vector<512x8xf32>
    %14 = tpu.matmul %10, %13, %cst_13 {dimension_numbers = #tpu.dot_dimension_numbers<[1], [0], [0], [1], [0, 0, 1, 1], [], []>} : vector<512x4xf32>, vector<4x8xf32>, vector<512x8xf32> -> vector<512x8xf32>
    %15 = arith.addf %11, %14 : vector<512x8xf32>
    %c0_14 = arith.constant 0 : index
    %c0_15 = arith.constant 0 : index
    %16 = vector.load %arg8[%c0_14, %c0_15] : memref<512x8xf32, #tpu.memory_space<vmem>>, vector<512x8xf32>
    tpu.vector_store %arg8[%c0_14, %c0_15], %15 {strides = array<i32>} : memref<512x8xf32, #tpu.memory_space<vmem>>, vector<512x8xf32>,
    %c8 = arith.constant 8 : index
    %c0_16 = arith.constant 0 : index
    %17 = vector.load %arg7[%c8, %c0_16] : memref<560x4xf32, #tpu.memory_space<vmem>>, vector<512x4xf32>
    %c0_17 = arith.constant 0 : index
    %c1 = arith.constant 1 : index
    %18 = vector.load %arg2[%c0_17, %c1] : memref<512x9xf32, #tpu.memory_space<vmem>>, vector<512x1xf32>
    %19 = vector.broadcast %18 : vector<512x1xf32> to vector<512x4xf32>
    %20 = arith.mulf %17, %19 : vector<512x4xf32>
    %c0_18 = arith.constant 0 : index
    %c0_19 = arith.constant 0 : index
    %21 = vector.load %arg8[%c0_18, %c0_19] : memref<512x8xf32, #tpu.memory_space<vmem>>, vector<512x8xf32>
    %c1_20 = arith.constant 1 : index
    %c0_21 = arith.constant 0 : index
    %c0_22 = arith.constant 0 : index
    %22 = vector.load %arg3[%c1_20, %c0_21, %c0_22] : memref<9x4x8xf32, #tpu.memory_space<vmem>>, vector<1x4x8xf32>
    %23 = vector.shape_cast %22 : vector<1x4x8xf32> to vector<4x8xf32>
    %cst_23 = arith.constant dense<0.000000e+00> : vector<512x8xf32>
    %24 = tpu.matmul %20, %23, %cst_23 {dimension_numbers = #tpu.dot_dimension_numbers<[1], [0], [0], [1], [0, 0, 1, 1], [], []>} : vector<512x4xf32>, vector<4x8xf32>, vector<512x8xf32> -> vector<512x8xf32>
    %25 = arith.addf %21, %24 : vector<512x8xf32>
    %c0_24 = arith.constant 0 : index
    %c0_25 = arith.constant 0 : index
    %26 = vector.load %arg8[%c0_24, %c0_25] : memref<512x8xf32, #tpu.memory_space<vmem>>, vector<512x8xf32>
    tpu.vector_store %arg8[%c0_24, %c0_25], %25 {strides = array<i32>} : memref<512x8xf32, #tpu.memory_space<vmem>>, vector<512x8xf32>,
    %c9 = arith.constant 9 : index
    %c0_26 = arith.constant 0 : index
    %27 = vector.load %arg7[%c9, %c0_26] : memref<560x4xf32, #tpu.memory_space<vmem>>, vector<512x4xf32>
    %c0_27 = arith.constant 0 : index
    %c2 = arith.constant 2 : index
    %28 = vector.load %arg2[%c0_27, %c2] : memref<512x9xf32, #tpu.memory_space<vmem>>, vector<512x1xf32>
    %29 = vector.broadcast %28 : vector<512x1xf32> to vector<512x4xf32>
    %30 = arith.mulf %27, %29 : vector<512x4xf32>
    %c0_28 = arith.constant 0 : index
    %c0_29 = arith.constant 0 : index
    %31 = vector.load %arg8[%c0_28, %c0_29] : memref<512x8xf32, #tpu.memory_space<vmem>>, vector<512x8xf32>
    %c2_30 = arith.constant 2 : index
    %c0_31 = arith.constant 0 : index
    %c0_32 = arith.constant 0 : index
    %32 = vector.load %arg3[%c2_30, %c0_31, %c0_32] : memref<9x4x8xf32, #tpu.memory_space<vmem>>, vector<1x4x8xf32>
    %33 = vector.shape_cast %32 : vector<1x4x8xf32> to vector<4x8xf32>
    %cst_33 = arith.constant dense<0.000000e+00> : vector<512x8xf32>
    %34 = tpu.matmul %30, %33, %cst_33 {dimension_numbers = #tpu.dot_dimension_numbers<[1], [0], [0], [1], [0, 0, 1, 1], [], []>} : vector<512x4xf32>, vector<4x8xf32>, vector<512x8xf32> -> vector<512x8xf32>
    %35 = arith.addf %31, %34 : vector<512x8xf32>
    %c0_34 = arith.constant 0 : index
    %c0_35 = arith.constant 0 : index
    %36 = vector.load %arg8[%c0_34, %c0_35] : memref<512x8xf32, #tpu.memory_space<vmem>>, vector<512x8xf32>
    tpu.vector_store %arg8[%c0_34, %c0_35], %35 {strides = array<i32>} : memref<512x8xf32, #tpu.memory_space<vmem>>, vector<512x8xf32>,
    %c23 = arith.constant 23 : index
    %c0_36 = arith.constant 0 : index
    %37 = vector.load %arg7[%c23, %c0_36] : memref<560x4xf32, #tpu.memory_space<vmem>>, vector<512x4xf32>
    %c0_37 = arith.constant 0 : index
    %c3 = arith.constant 3 : index
    %38 = vector.load %arg2[%c0_37, %c3] : memref<512x9xf32, #tpu.memory_space<vmem>>, vector<512x1xf32>
    %39 = vector.broadcast %38 : vector<512x1xf32> to vector<512x4xf32>
    %40 = arith.mulf %37, %39 : vector<512x4xf32>
    %c0_38 = arith.constant 0 : index
    %c0_39 = arith.constant 0 : index
    %41 = vector.load %arg8[%c0_38, %c0_39] : memref<512x8xf32, #tpu.memory_space<vmem>>, vector<512x8xf32>
    %c3_40 = arith.constant 3 : index
    %c0_41 = arith.constant 0 : index
    %c0_42 = arith.constant 0 : index
    %42 = vector.load %arg3[%c3_40, %c0_41, %c0_42] : memref<9x4x8xf32, #tpu.memory_space<vmem>>, vector<1x4x8xf32>
    %43 = vector.shape_cast %42 : vector<1x4x8xf32> to vector<4x8xf32>
    %cst_43 = arith.constant dense<0.000000e+00> : vector<512x8xf32>
    %44 = tpu.matmul %40, %43, %cst_43 {dimension_numbers = #tpu.dot_dimension_numbers<[1], [0], [0], [1], [0, 0, 1, 1], [], []>} : vector<512x4xf32>, vector<4x8xf32>, vector<512x8xf32> -> vector<512x8xf32>
    %45 = arith.addf %41, %44 : vector<512x8xf32>
    %c0_44 = arith.constant 0 : index
    %c0_45 = arith.constant 0 : index
    %46 = vector.load %arg8[%c0_44, %c0_45] : memref<512x8xf32, #tpu.memory_space<vmem>>, vector<512x8xf32>
    tpu.vector_store %arg8[%c0_44, %c0_45], %45 {strides = array<i32>} : memref<512x8xf32, #tpu.memory_space<vmem>>, vector<512x8xf32>,
    %c24_46 = arith.constant 24 : index
    %c0_47 = arith.constant 0 : index
    %47 = vector.load %arg7[%c24_46, %c0_47] : memref<560x4xf32, #tpu.memory_space<vmem>>, vector<512x4xf32>
    %c0_48 = arith.constant 0 : index
    %c4 = arith.constant 4 : index
    %48 = vector.load %arg2[%c0_48, %c4] : memref<512x9xf32, #tpu.memory_space<vmem>>, vector<512x1xf32>
    %49 = vector.broadcast %48 : vector<512x1xf32> to vector<512x4xf32>
    %50 = arith.mulf %47, %49 : vector<512x4xf32>
    %c0_49 = arith.constant 0 : index
    %c0_50 = arith.constant 0 : index
    %51 = vector.load %arg8[%c0_49, %c0_50] : memref<512x8xf32, #tpu.memory_space<vmem>>, vector<512x8xf32>
    %c4_51 = arith.constant 4 : index
    %c0_52 = arith.constant 0 : index
    %c0_53 = arith.constant 0 : index
    %52 = vector.load %arg3[%c4_51, %c0_52, %c0_53] : memref<9x4x8xf32, #tpu.memory_space<vmem>>, vector<1x4x8xf32>
    %53 = vector.shape_cast %52 : vector<1x4x8xf32> to vector<4x8xf32>
    %cst_54 = arith.constant dense<0.000000e+00> : vector<512x8xf32>
    %54 = tpu.matmul %50, %53, %cst_54 {dimension_numbers = #tpu.dot_dimension_numbers<[1], [0], [0], [1], [0, 0, 1, 1], [], []>} : vector<512x4xf32>, vector<4x8xf32>, vector<512x8xf32> -> vector<512x8xf32>
    %55 = arith.addf %51, %54 : vector<512x8xf32>
    %c0_55 = arith.constant 0 : index
    %c0_56 = arith.constant 0 : index
    %56 = vector.load %arg8[%c0_55, %c0_56] : memref<512x8xf32, #tpu.memory_space<vmem>>, vector<512x8xf32>
    tpu.vector_store %arg8[%c0_55, %c0_56], %55 {strides = array<i32>} : memref<512x8xf32, #tpu.memory_space<vmem>>, vector<512x8xf32>,
    %c25 = arith.constant 25 : index
    %c0_57 = arith.constant 0 : index
    %57 = vector.load %arg7[%c25, %c0_57] : memref<560x4xf32, #tpu.memory_space<vmem>>, vector<512x4xf32>
    %c0_58 = arith.constant 0 : index
    %c5 = arith.constant 5 : index
    %58 = vector.load %arg2[%c0_58, %c5] : memref<512x9xf32, #tpu.memory_space<vmem>>, vector<512x1xf32>
    %59 = vector.broadcast %58 : vector<512x1xf32> to vector<512x4xf32>
    %60 = arith.mulf %57, %59 : vector<512x4xf32>
    %c0_59 = arith.constant 0 : index
    %c0_60 = arith.constant 0 : index
    %61 = vector.load %arg8[%c0_59, %c0_60] : memref<512x8xf32, #tpu.memory_space<vmem>>, vector<512x8xf32>
    %c5_61 = arith.constant 5 : index
    %c0_62 = arith.constant 0 : index
    %c0_63 = arith.constant 0 : index
    %62 = vector.load %arg3[%c5_61, %c0_62, %c0_63] : memref<9x4x8xf32, #tpu.memory_space<vmem>>, vector<1x4x8xf32>
    %63 = vector.shape_cast %62 : vector<1x4x8xf32> to vector<4x8xf32>
    %cst_64 = arith.constant dense<0.000000e+00> : vector<512x8xf32>
    %64 = tpu.matmul %60, %63, %cst_64 {dimension_numbers = #tpu.dot_dimension_numbers<[1], [0], [0], [1], [0, 0, 1, 1], [], []>} : vector<512x4xf32>, vector<4x8xf32>, vector<512x8xf32> -> vector<512x8xf32>
    %65 = arith.addf %61, %64 : vector<512x8xf32>
    %c0_65 = arith.constant 0 : index
    %c0_66 = arith.constant 0 : index
    %66 = vector.load %arg8[%c0_65, %c0_66] : memref<512x8xf32, #tpu.memory_space<vmem>>, vector<512x8xf32>
    tpu.vector_store %arg8[%c0_65, %c0_66], %65 {strides = array<i32>} : memref<512x8xf32, #tpu.memory_space<vmem>>, vector<512x8xf32>,
    %c39 = arith.constant 39 : index
    %c0_67 = arith.constant 0 : index
    %67 = vector.load %arg7[%c39, %c0_67] : memref<560x4xf32, #tpu.memory_space<vmem>>, vector<512x4xf32>
    %c0_68 = arith.constant 0 : index
    %c6 = arith.constant 6 : index
    %68 = vector.load %arg2[%c0_68, %c6] : memref<512x9xf32, #tpu.memory_space<vmem>>, vector<512x1xf32>
    %69 = vector.broadcast %68 : vector<512x1xf32> to vector<512x4xf32>
    %70 = arith.mulf %67, %69 : vector<512x4xf32>
    %c0_69 = arith.constant 0 : index
    %c0_70 = arith.constant 0 : index
    %71 = vector.load %arg8[%c0_69, %c0_70] : memref<512x8xf32, #tpu.memory_space<vmem>>, vector<512x8xf32>
    %c6_71 = arith.constant 6 : index
    %c0_72 = arith.constant 0 : index
    %c0_73 = arith.constant 0 : index
    %72 = vector.load %arg3[%c6_71, %c0_72, %c0_73] : memref<9x4x8xf32, #tpu.memory_space<vmem>>, vector<1x4x8xf32>
    %73 = vector.shape_cast %72 : vector<1x4x8xf32> to vector<4x8xf32>
    %cst_74 = arith.constant dense<0.000000e+00> : vector<512x8xf32>
    %74 = tpu.matmul %70, %73, %cst_74 {dimension_numbers = #tpu.dot_dimension_numbers<[1], [0], [0], [1], [0, 0, 1, 1], [], []>} : vector<512x4xf32>, vector<4x8xf32>, vector<512x8xf32> -> vector<512x8xf32>
    %75 = arith.addf %71, %74 : vector<512x8xf32>
    %c0_75 = arith.constant 0 : index
    %c0_76 = arith.constant 0 : index
    %76 = vector.load %arg8[%c0_75, %c0_76] : memref<512x8xf32, #tpu.memory_space<vmem>>, vector<512x8xf32>
    tpu.vector_store %arg8[%c0_75, %c0_76], %75 {strides = array<i32>} : memref<512x8xf32, #tpu.memory_space<vmem>>, vector<512x8xf32>,
    %c40 = arith.constant 40 : index
    %c0_77 = arith.constant 0 : index
    %77 = vector.load %arg7[%c40, %c0_77] : memref<560x4xf32, #tpu.memory_space<vmem>>, vector<512x4xf32>
    %c0_78 = arith.constant 0 : index
    %c7_79 = arith.constant 7 : index
    %78 = vector.load %arg2[%c0_78, %c7_79] : memref<512x9xf32, #tpu.memory_space<vmem>>, vector<512x1xf32>
    %79 = vector.broadcast %78 : vector<512x1xf32> to vector<512x4xf32>
    %80 = arith.mulf %77, %79 : vector<512x4xf32>
    %c0_80 = arith.constant 0 : index
    %c0_81 = arith.constant 0 : index
    %81 = vector.load %arg8[%c0_80, %c0_81] : memref<512x8xf32, #tpu.memory_space<vmem>>, vector<512x8xf32>
    %c7_82 = arith.constant 7 : index
    %c0_83 = arith.constant 0 : index
    %c0_84 = arith.constant 0 : index
    %82 = vector.load %arg3[%c7_82, %c0_83, %c0_84] : memref<9x4x8xf32, #tpu.memory_space<vmem>>, vector<1x4x8xf32>
    %83 = vector.shape_cast %82 : vector<1x4x8xf32> to vector<4x8xf32>
    %cst_85 = arith.constant dense<0.000000e+00> : vector<512x8xf32>
    %84 = tpu.matmul %80, %83, %cst_85 {dimension_numbers = #tpu.dot_dimension_numbers<[1], [0], [0], [1], [0, 0, 1, 1], [], []>} : vector<512x4xf32>, vector<4x8xf32>, vector<512x8xf32> -> vector<512x8xf32>
    %85 = arith.addf %81, %84 : vector<512x8xf32>
    %c0_86 = arith.constant 0 : index
    %c0_87 = arith.constant 0 : index
    %86 = vector.load %arg8[%c0_86, %c0_87] : memref<512x8xf32, #tpu.memory_space<vmem>>, vector<512x8xf32>
    tpu.vector_store %arg8[%c0_86, %c0_87], %85 {strides = array<i32>} : memref<512x8xf32, #tpu.memory_space<vmem>>, vector<512x8xf32>,
    %c41 = arith.constant 41 : index
    %c0_88 = arith.constant 0 : index
    %87 = vector.load %arg7[%c41, %c0_88] : memref<560x4xf32, #tpu.memory_space<vmem>>, vector<512x4xf32>
    %c0_89 = arith.constant 0 : index
    %c8_90 = arith.constant 8 : index
    %88 = vector.load %arg2[%c0_89, %c8_90] : memref<512x9xf32, #tpu.memory_space<vmem>>, vector<512x1xf32>
    %89 = vector.broadcast %88 : vector<512x1xf32> to vector<512x4xf32>
    %90 = arith.mulf %87, %89 : vector<512x4xf32>
    %c0_91 = arith.constant 0 : index
    %c0_92 = arith.constant 0 : index
    %91 = vector.load %arg8[%c0_91, %c0_92] : memref<512x8xf32, #tpu.memory_space<vmem>>, vector<512x8xf32>
    %c8_93 = arith.constant 8 : index
    %c0_94 = arith.constant 0 : index
    %c0_95 = arith.constant 0 : index
    %92 = vector.load %arg3[%c8_93, %c0_94, %c0_95] : memref<9x4x8xf32, #tpu.memory_space<vmem>>, vector<1x4x8xf32>
    %93 = vector.shape_cast %92 : vector<1x4x8xf32> to vector<4x8xf32>
    %cst_96 = arith.constant dense<0.000000e+00> : vector<512x8xf32>
    %94 = tpu.matmul %90, %93, %cst_96 {dimension_numbers = #tpu.dot_dimension_numbers<[1], [0], [0], [1], [0, 0, 1, 1], [], []>} : vector<512x4xf32>, vector<4x8xf32>, vector<512x8xf32> -> vector<512x8xf32>
    %95 = arith.addf %91, %94 : vector<512x8xf32>
    %c0_97 = arith.constant 0 : index
    %c0_98 = arith.constant 0 : index
    %96 = vector.load %arg8[%c0_97, %c0_98] : memref<512x8xf32, #tpu.memory_space<vmem>>, vector<512x8xf32>
    tpu.vector_store %arg8[%c0_97, %c0_98], %95 {strides = array<i32>} : memref<512x8xf32, #tpu.memory_space<vmem>>, vector<512x8xf32>,
    %c0_99 = arith.constant 0 : index
    %c0_100 = arith.constant 0 : index
    %97 = vector.load %arg8[%c0_99, %c0_100] : memref<512x8xf32, #tpu.memory_space<vmem>>, vector<512x8xf32>
    %c0_101 = arith.constant 0 : index
    %c0_102 = arith.constant 0 : index
    %98 = vector.load %arg4[%c0_101, %c0_102] : memref<512x8xf32, #tpu.memory_space<vmem>>, vector<512x8xf32>
    tpu.vector_store %arg4[%c0_101, %c0_102], %97 {strides = array<i32>} : memref<512x8xf32, #tpu.memory_space<vmem>>, vector<512x8xf32>,
    %c0_103 = arith.constant 0 : index
    %c0_104 = arith.constant 0 : index
    %99 = vector.load %arg5[%c0_103, %c0_104] : memref<1x8xf32, #tpu.memory_space<vmem>>, vector<1x8xf32>
    %cst_105 = arith.constant dense<0.000000e+00> : vector<8xf32>
    %100 = vector.multi_reduction <add>, %97, %cst_105 [0] : vector<512x8xf32> to vector<8xf32>
    %101 = vector.shape_cast %100 : vector<8xf32> to vector<1x8xf32>
    %102 = arith.addf %99, %101 : vector<1x8xf32>
    %c0_106 = arith.constant 0 : index
    %c0_107 = arith.constant 0 : index
    %103 = vector.load %arg5[%c0_106, %c0_107] : memref<1x8xf32, #tpu.memory_space<vmem>>, vector<1x8xf32>
    tpu.vector_store %arg5[%c0_106, %c0_107], %102 {strides = array<i32>} : memref<1x8xf32, #tpu.memory_space<vmem>>, vector<1x8xf32>,
    %c0_108 = arith.constant 0 : index
    %c0_109 = arith.constant 0 : index
    %104 = vector.load %arg6[%c0_108, %c0_109] : memref<1x8xf32, #tpu.memory_space<vmem>>, vector<1x8xf32>
    %105 = arith.mulf %97, %97 : vector<512x8xf32>
    %cst_110 = arith.constant dense<0.000000e+00> : vector<8xf32>
    %106 = vector.multi_reduction <add>, %105, %cst_110 [0] : vector<512x8xf32> to vector<8xf32>
    %107 = vector.shape_cast %106 : vector<8xf32> to vector<1x8xf32>
    %108 = arith.addf %104, %107 : vector<1x8xf32>
    %c0_111 = arith.constant 0 : index
    %c0_112 = arith.constant 0 : index
    %109 = vector.load %arg6[%c0_111, %c0_112] : memref<1x8xf32, #tpu.memory_space<vmem>>, vector<1x8xf32>
    tpu.vector_store %arg6[%c0_111, %c0_112], %108 {strides = array<i32>} : memref<1x8xf32, #tpu.memory_space<vmem>>, vector<1x8xf32>,
    return
  }
  func.func @transform_0(%arg0: i32) -> (i32, i32) {
    %c0_i32 = arith.constant 0 : i32
    %c0_i32_0 = arith.constant 0 : i32
    return %arg0, %c0_i32 : i32, i32
  }
  func.func @transform_1(%arg0: i32) -> (i32, i32) {
    %c0_i32 = arith.constant 0 : i32
    %c0_i32_0 = arith.constant 0 : i32
    %c0_i32_1 = arith.constant 0 : i32
    return %c0_i32, %c0_i32_0 : i32, i32
  }
  func.func @transform_2(%arg0: i32) -> (i32, i32, i32) {
    %c0_i32 = arith.constant 0 : i32
    %c0_i32_0 = arith.constant 0 : i32
    %c0_i32_1 = arith.constant 0 : i32
    %c0_i32_2 = arith.constant 0 : i32
    return %c0_i32, %c0_i32_0, %c0_i32_1 : i32, i32, i32
  }
  func.func @transform_3(%arg0: i32) -> (i32, i32) {
    %c0_i32 = arith.constant 0 : i32
    %c0_i32_0 = arith.constant 0 : i32
    return %arg0, %c0_i32 : i32, i32
  }
  func.func @transform_4(%arg0: i32) -> (i32, i32) {
    %c0_i32 = arith.constant 0 : i32
    %c0_i32_0 = arith.constant 0 : i32
    %c0_i32_1 = arith.constant 0 : i32
    return %c0_i32, %c0_i32_0 : i32, i32
  }
  func.func @transform_5(%arg0: i32) -> (i32, i32) {
    %c0_i32 = arith.constant 0 : i32
    %c0_i32_0 = arith.constant 0 : i32
    %c0_i32_1 = arith.constant 0 : i32
    return %c0_i32, %c0_i32_0 : i32, i32
  }
}

</mosaic_0001>

<bundles_post_ra>
// kernel: tpu_custom_call.1
= control target key start
LH: loop header
LB: loop body
LE: loop exit
PB: predicated region body
PF: predicated region fallthrough
CT: control target
= control target key end

     0   :  { %11 = vsyncpa [#allocation5], 0  ;;  %vm23_vm0 = vcmask 31744   ;;  %v14541_v2 = vmov 0   ;;  %v18910_v3 = vmov 0.0   ;;  %vm1060_vm1 = vcmask 1043456   ;;  %s18904_s0 = inlined_call_operand.vmem [shape: f32[512,4], index: 0, kind: input, shape index: {}]   ;;  %s18905_s1 = inlined_call_operand.vmem [shape: f32[512,9], index: 1, kind: input, shape index: {}]   ;;  %s18906_s2 = inlined_call_operand.vmem [shape: f32[9,4,8], index: 2, kind: input, shape index: {}]   ;;  %s18907_s3 = inlined_call_operand.vmem [shape: f32[512,8], index: 3, kind: output, shape index: {0}]   ;;  %s18908_s4 = inlined_call_operand.hbm [shape: f32[1,8], index: 4, kind: output, shape index: {1}]   ;;  %s18909_s5 = inlined_call_operand.hbm [shape: f32[1,8], index: 5, kind: output, shape index: {2}]  }
   0x1   :  { %v14586_v0 = vld [vmem:[%s18905_s1 + $0x10] sm:$0xff]  ;;  %v14591_v1 = vld [vmem:[%s18905_s1] sm:$0xff]  ;;  %14437 = vset.pattern.permute.xlu1 %v14541_v2  ;;  %14436 = vset.pattern.permute.xlu0 %v14541_v2  ;;  %26 = vst.msk [vmem:[#allocation2 + $0x10] sm:$0xff] %vm23_vm0, %v18910_v3  ;;  %27 = vst.msk [vmem:[#allocation2 + $0x18] sm:$0xff] %vm23_vm0, %v18910_v3 }
   0x2   :  { %24 = vst.msk [vmem:[#allocation2] sm:$0xff] %vm23_vm0, %v18910_v3  ;;  %25 = vst.msk [vmem:[#allocation2 + $0x8] sm:$0xff] %vm23_vm0, %v18910_v3  ;;  %431 = vperm.xlu1 %14437, %v14586_v0   ;;  %421 = vperm.xlu0 %14436, %v14591_v1   ;;  %v14738_v4 = vld [vmem:[%s18905_s1 + $0x18] sm:$0xff]  ;;  %v14743_v5 = vld [vmem:[%s18905_s1 + $0x8] sm:$0xff] }
   0x3   :  { %28 = vst.msk [vmem:[#allocation2 + $0x20] sm:$0xff] %vm23_vm0, %v18910_v3  ;;  %29 = vst.msk [vmem:[#allocation2 + $0x28] sm:$0xff] %vm23_vm0, %v18910_v3  ;;  %v14750_v6 = vld [vmem:[%s18905_s1 + $0x28] sm:$0xff]  ;;  %v14755_v7 = vld [vmem:[%s18905_s1 + $0x20] sm:$0xff] }
   0x4   :  { %30 = vst.msk [vmem:[#allocation2 + $0x30] sm:$0xff] %vm23_vm0, %v18910_v3  ;;  %31 = vst.msk [vmem:[#allocation2 + $0x38] sm:$0xff] %vm23_vm0, %v18910_v3  ;;  %v14762_v8 = vld [vmem:[%s18905_s1 + $0x38] sm:$0xff]  ;;  %v14767_v9 = vld [vmem:[%s18905_s1 + $0x30] sm:$0xff] }
   0x5   :  { %32 = vst.msk [vmem:[#allocation2 + $0x40] sm:$0xff] %vm23_vm0, %v18910_v3  ;;  %33 = vst.msk [vmem:[#allocation2 + $0x48] sm:$0xff] %vm23_vm0, %v18910_v3  ;;  %v14774_v10 = vld [vmem:[%s18905_s1 + $0x48] sm:$0xff]  ;;  %v14779_v11 = vld [vmem:[%s18905_s1 + $0x40] sm:$0xff] }
   0x6   :  { %34 = vst.msk [vmem:[#allocation2 + $0x50] sm:$0xff] %vm23_vm0, %v18910_v3  ;;  %35 = vst.msk [vmem:[#allocation2 + $0x58] sm:$0xff] %vm23_vm0, %v18910_v3  ;;  %436 = vperm.xlu1 %14437, %v14738_v4   ;;  %426 = vperm.xlu0 %14436, %v14743_v5   ;;  %v14786_v12 = vld [vmem:[%s18905_s1 + $0x58] sm:$0xff]  ;;  %v14791_v13 = vld [vmem:[%s18905_s1 + $0x50] sm:$0xff] }
   0x7   :  { %36 = vst.msk [vmem:[#allocation2 + $0x60] sm:$0xff] %vm23_vm0, %v18910_v3  ;;  %37 = vst.msk [vmem:[#allocation2 + $0x68] sm:$0xff] %vm23_vm0, %v18910_v3  ;;  %v97_v14 = vld [vmem:[%s18904_s0] sm:$0xff]  ;;  %v98_v15 = vld [vmem:[%s18904_s0 + $0x8] sm:$0xff] }
   0x8   :  { %38 = vst.msk [vmem:[#allocation2 + $0x70] sm:$0xff] %vm23_vm0, %v18910_v3  ;;  %39 = vst.msk [vmem:[#allocation2 + $0x78] sm:$0xff] %vm23_vm0, %v18910_v3  ;;  %v14805_v16 = vld [vmem:[%s18905_s1 + $0x68] sm:$0xff]  ;;  %v14810_v17 = vld [vmem:[%s18905_s1 + $0x60] sm:$0xff] }
   0x9   :  { %40 = vst.msk [vmem:[#allocation2 + $0x80] sm:$0xff] %vm23_vm0, %v18910_v3  ;;  %41 = vst.msk [vmem:[#allocation2 + $0x88] sm:$0xff] %vm23_vm0, %v18910_v3  ;;  %v867_v18 = vld [vmem:[%s18906_s2] sm:$0xf]  ;;  %v99_v19 = vld [vmem:[%s18904_s0 + $0x10] sm:$0xff] }
   0xa   :  { %42 = vst.msk [vmem:[#allocation2 + $0x90] sm:$0xff] %vm23_vm0, %v18910_v3  ;;  %43 = vst.msk [vmem:[#allocation2 + $0x98] sm:$0xff] %vm23_vm0, %v18910_v3  ;;  %446 = vperm.xlu1 %14437, %v14750_v6   ;;  %441 = vperm.xlu0 %14436, %v14755_v7   ;;  %v100_v20 = vld [vmem:[%s18904_s0 + $0x18] sm:$0xff]  ;;  %v101_v21 = vld [vmem:[%s18904_s0 + $0x20] sm:$0xff] }
   0xb   :  { %44 = vst.msk [vmem:[#allocation2 + $0xa0] sm:$0xff] %vm23_vm0, %v18910_v3  ;;  %45 = vst.msk [vmem:[#allocation2 + $0xa8] sm:$0xff] %vm23_vm0, %v18910_v3  ;;  %13540 = vmatprep.subr.msk.mxu0 %vm1060_vm1, %v867_v18  ;;  %14422 = vmatprep.subr.msk.mxu1 %vm1060_vm1, %v867_v18  ;;  %v102_v22 = vld [vmem:[%s18904_s0 + $0x28] sm:$0xff]  ;;  %v103_v23 = vld [vmem:[%s18904_s0 + $0x30] sm:$0xff] }
   0xc   :  { %46 = vst.msk [vmem:[#allocation2 + $0xb0] sm:$0xff] %vm23_vm0, %v18910_v3  ;;  %47 = vst.msk [vmem:[#allocation2 + $0xb8] sm:$0xff] %vm23_vm0, %v18910_v3  ;;  %13541 = vmatpush3.msk.msra.mxu0 %vm1060_vm1, %v867_v18  ;;  %v104_v24 = vld [vmem:[%s18904_s0 + $0x38] sm:$0xff]  ;;  %14423 = vmatpush3.msk.msra.mxu1 %vm1060_vm1, %v867_v18  ;;  %v14849_v26 = vld [vmem:[%s18905_s1 + $0x70] sm:$0xff] }
   0xd   :  { %48 = vst.msk [vmem:[#allocation2 + $0xc0] sm:$0xff] %vm23_vm0, %v18910_v3  ;;  %49 = vst.msk [vmem:[#allocation2 + $0xc8] sm:$0xff] %vm23_vm0, %v18910_v3  ;;  %v14844_v25 = vld [vmem:[%s18905_s1 + $0x78] sm:$0xff]  ;;  %v105_v27 = vld [vmem:[%s18904_s0 + $0x40] sm:$0xff] }
   0xe   :  { %50 = vst.msk [vmem:[#allocation2 + $0xd0] sm:$0xff] %vm23_vm0, %v18910_v3  ;;  %51 = vst.msk [vmem:[#allocation2 + $0xd8] sm:$0xff] %vm23_vm0, %v18910_v3  ;;  %456 = vperm.xlu1 %14437, %v14762_v8   ;;  %451 = vperm.xlu0 %14436, %v14767_v9   ;;  %v106_v28 = vld [vmem:[%s18904_s0 + $0x48] sm:$0xff]  ;;  %v107_v29 = vld [vmem:[%s18904_s0 + $0x50] sm:$0xff] }
   0xf   :  { %52 = vst.msk [vmem:[#allocation2 + $0xe0] sm:$0xff] %vm23_vm0, %v18910_v3  ;;  %53 = vst.msk [vmem:[#allocation2 + $0xe8] sm:$0xff] %vm23_vm0, %v18910_v3  ;;  %v108_v30 = vld [vmem:[%s18904_s0 + $0x58] sm:$0xff]  ;;  %v109_v31 = vld [vmem:[%s18904_s0 + $0x60] sm:$0xff] }
  0x10   :  { %54 = vst.msk [vmem:[#allocation2 + $0xf0] sm:$0xff] %vm23_vm0, %v18910_v3  ;;  %55 = vst.msk [vmem:[#allocation2 + $0xf8] sm:$0xff] %vm23_vm0, %v18910_v3  ;;  %v110_v32 = vld [vmem:[%s18904_s0 + $0x68] sm:$0xff]  ;;  %v111_v33 = vld [vmem:[%s18904_s0 + $0x70] sm:$0xff] }
  0x11   :  { %56 = vst.msk [vmem:[#allocation2 + $0x100] sm:$0xff] %vm23_vm0, %v18910_v3  ;;  %57 = vst.msk [vmem:[#allocation2 + $0x108] sm:$0xff] %vm23_vm0, %v18910_v3  ;;  %v112_v34 = vld [vmem:[%s18904_s0 + $0x78] sm:$0xff]  ;;  %v113_v35 = vld [vmem:[%s18904_s0 + $0x80] sm:$0xff] }
  0x12   :  { %58 = vst.msk [vmem:[#allocation2 + $0x110] sm:$0xff] %vm23_vm0, %v18910_v3  ;;  %59 = vst.msk [vmem:[#allocation2 + $0x118] sm:$0xff] %vm23_vm0, %v18910_v3  ;;  %466 = vperm.xlu1 %14437, %v14774_v10   ;;  %461 = vperm.xlu0 %14436, %v14779_v11   ;;  %v114_v36 = vld [vmem:[%s18904_s0 + $0x88] sm:$0xff] }
  0x13   :  { %60 = vst.msk [vmem:[#allocation2 + $0x120] sm:$0xff] %vm23_vm0, %v18910_v3  ;;  %61 = vst.msk [vmem:[#allocation2 + $0x128] sm:$0xff] %vm23_vm0, %v18910_v3 }
  0x14   :  { %62 = vst.msk [vmem:[#allocation2 + $0x130] sm:$0xff] %vm23_vm0, %v18910_v3  ;;  %63 = vst.msk [vmem:[#allocation2 + $0x138] sm:$0xff] %vm23_vm0, %v18910_v3 }
  0x15   :  { %64 = vst.msk [vmem:[#allocation2 + $0x140] sm:$0xff] %vm23_vm0, %v18910_v3  ;;  %65 = vst.msk [vmem:[#allocation2 + $0x148] sm:$0xff] %vm23_vm0, %v18910_v3 }
  0x16   :  { %66 = vst.msk [vmem:[#allocation2 + $0x150] sm:$0xff] %vm23_vm0, %v18910_v3  ;;  %67 = vst.msk [vmem:[#allocation2 + $0x158] sm:$0xff] %vm23_vm0, %v18910_v3  ;;  %476 = vperm.xlu1 %14437, %v14786_v12   ;;  %471 = vperm.xlu0 %14436, %v14791_v13  }
  0x17   :  { %68 = vst.msk [vmem:[#allocation2 + $0x160] sm:$0xff] %vm23_vm0, %v18910_v3  ;;  %69 = vst.msk [vmem:[#allocation2 + $0x168] sm:$0xff] %vm23_vm0, %v18910_v3 }
  0x18   :  { %70 = vst.msk [vmem:[#allocation2 + $0x170] sm:$0xff] %vm23_vm0, %v18910_v3  ;;  %71 = vst.msk [vmem:[#allocation2 + $0x178] sm:$0xff] %vm23_vm0, %v18910_v3 }
  0x19   :  { %72 = vst.msk [vmem:[#allocation2 + $0x180] sm:$0xff] %vm23_vm0, %v18910_v3  ;;  %73 = vst.msk [vmem:[#allocation2 + $0x188] sm:$0xff] %vm23_vm0, %v18910_v3 }
  0x1a   :  { %74 = vst.msk [vmem:[#allocation2 + $0x190] sm:$0xff] %vm23_vm0, %v18910_v3  ;;  %75 = vst.msk [vmem:[#allocation2 + $0x198] sm:$0xff] %vm23_vm0, %v18910_v3  ;;  %486 = vperm.xlu1 %14437, %v14805_v16   ;;  %481 = vperm.xlu0 %14436, %v14810_v17  }
  0x1b   :  { %76 = vst.msk [vmem:[#allocation2 + $0x1a0] sm:$0xff] %vm23_vm0, %v18910_v3  ;;  %77 = vst.msk [vmem:[#allocation2 + $0x1a8] sm:$0xff] %vm23_vm0, %v18910_v3 }
  0x1c   :  { %78 = vst.msk [vmem:[#allocation2 + $0x1b0] sm:$0xff] %vm23_vm0, %v18910_v3  ;;  %79 = vst.msk [vmem:[#allocation2 + $0x1b8] sm:$0xff] %vm23_vm0, %v18910_v3 }
  0x1d   :  { %80 = vst.msk [vmem:[#allocation2 + $0x1c0] sm:$0xff] %vm23_vm0, %v18910_v3  ;;  %81 = vst.msk [vmem:[#allocation2 + $0x1c8] sm:$0xff] %vm23_vm0, %v18910_v3 }
  0x1e   :  { %82 = vst.msk [vmem:[#allocation2 + $0x1d0] sm:$0xff] %vm23_vm0, %v18910_v3  ;;  %83 = vst.msk [vmem:[#allocation2 + $0x1d8] sm:$0xff] %vm23_vm0, %v18910_v3 }
  0x1f   :  { %84 = vst.msk [vmem:[#allocation2 + $0x1e0] sm:$0xff] %vm23_vm0, %v18910_v3  ;;  %85 = vst.msk [vmem:[#allocation2 + $0x1e8] sm:$0xff] %vm23_vm0, %v18910_v3 }
  0x20   :  { %86 = vst.msk [vmem:[#allocation2 + $0x1f0] sm:$0xff] %vm23_vm0, %v18910_v3  ;;  %87 = vst.msk [vmem:[#allocation2 + $0x1f8] sm:$0xff] %vm23_vm0, %v18910_v3 }
  0x21   :  { %88 = vst.msk [vmem:[#allocation2 + $0x200] sm:$0xff] %vm23_vm0, %v18910_v3  ;;  %89 = vst.msk [vmem:[#allocation2 + $0x208] sm:$0xff] %vm23_vm0, %v18910_v3 }
  0x22   :  { %90 = vst.msk [vmem:[#allocation2 + $0x210] sm:$0xff] %vm23_vm0, %v18910_v3  ;;  %91 = vst.msk [vmem:[#allocation2 + $0x218] sm:$0xff] %vm23_vm0, %v18910_v3 }
  0x23   :  { %92 = vst.msk [vmem:[#allocation2 + $0x220] sm:$0xff] %vm23_vm0, %v18910_v3  ;;  %93 = vst.msk [vmem:[#allocation2 + $0x228] sm:$0xff] %vm23_vm0, %v18910_v3 }
  0x24   :  { %162 = vst.msk [vmem:[#allocation2 + $0x18] sm:$0xff] %vm23_vm0, %v97_v14  ;;  %163 = vst.msk [vmem:[#allocation2 + $0x20] sm:$0xff] %vm23_vm0, %v98_v15 }
  0x25   :  { %164 = vst.msk [vmem:[#allocation2 + $0x28] sm:$0xff] %vm23_vm0, %v99_v19  ;;  %165 = vst.msk [vmem:[#allocation2 + $0x30] sm:$0xff] %vm23_vm0, %v100_v20 }
  0x26   :  { %166 = vst.msk [vmem:[#allocation2 + $0x38] sm:$0xff] %vm23_vm0, %v101_v21  ;;  %167 = vst.msk [vmem:[#allocation2 + $0x40] sm:$0xff] %vm23_vm0, %v102_v22 }
  0x27   :  { %168 = vst.msk [vmem:[#allocation2 + $0x48] sm:$0xff] %vm23_vm0, %v103_v23  ;;  %169 = vst.msk [vmem:[#allocation2 + $0x50] sm:$0xff] %vm23_vm0, %v104_v24 }
  0x28   :  { %170 = vst.msk [vmem:[#allocation2 + $0x58] sm:$0xff] %vm23_vm0, %v105_v27  ;;  %171 = vst.msk [vmem:[#allocation2 + $0x60] sm:$0xff] %vm23_vm0, %v106_v28 }
  0x29   :  { %172 = vst.msk [vmem:[#allocation2 + $0x68] sm:$0xff] %vm23_vm0, %v107_v29  ;;  %173 = vst.msk [vmem:[#allocation2 + $0x70] sm:$0xff] %vm23_vm0, %v108_v30 }
  0x2a   :  { %174 = vst.msk [vmem:[#allocation2 + $0x78] sm:$0xff] %vm23_vm0, %v109_v31  ;;  %175 = vst.msk [vmem:[#allocation2 + $0x80] sm:$0xff] %vm23_vm0, %v110_v32 }
  0x2b   :  { %176 = vst.msk [vmem:[#allocation2 + $0x88] sm:$0xff] %vm23_vm0, %v111_v33  ;;  %177 = vst.msk [vmem:[#allocation2 + $0x90] sm:$0xff] %vm23_vm0, %v112_v34 }
  0x2c   :  { %178 = vst.msk [vmem:[#allocation2 + $0x98] sm:$0xff] %vm23_vm0, %v113_v35 }
  0x2d   :  { %12 = vsyncpa [#allocation7], 0  ;;  %179 = vst.msk [vmem:[#allocation2 + $0xa0] sm:$0xff] %vm23_vm0, %v114_v36  ;;  %v115_v37 = vld [vmem:[%s18904_s0 + $0x90] sm:$0xff]  ;;  %v116_v38 = vld [vmem:[%s18904_s0 + $0x98] sm:$0xff]  ;;  %496 = vperm.xlu1 %14437, %v14844_v25   ;;  %491 = vperm.xlu0 %14436, %v14849_v26   ;;  %vm226_vm2 = vcmask 64512  }
  0x2e   :  { %180 = vst.msk [vmem:[#allocation2 + $0xa8] sm:$0xff] %vm23_vm0, %v115_v37  ;;  %181 = vst.msk [vmem:[#allocation2 + $0xb0] sm:$0xff] %vm23_vm0, %v116_v38  ;;  %v14909_v39 = vld [vmem:[%s18905_s1 + $0x88] sm:$0xff]  ;;  %v14914_v40 = vld [vmem:[%s18905_s1 + $0x80] sm:$0xff]  ;;  %vm94_vm3 = vcmask 57344   ;;  %s14552_s25 = smov [#allocation6]  }
  0x2f   :  { %v14921_v41 = vld [vmem:[%s18905_s1 + $0x98] sm:$0xff]  ;;  %v14926_v42 = vld [vmem:[%s18905_s1 + $0x90] sm:$0xff]  ;;  %v117_v43 = vld [vmem:[%s18904_s0 + $0xa0] sm:$0xff]  ;;  %s12348_s26 = sshll.u32 %s14552_s25, 4  ;;  %s12349_s26 = int_to_ptr.vmem [resolvable:$true] %s12348_s26 }
  0x30   :  { %v118_v44 = vld [vmem:[%s18904_s0 + $0xa8] sm:$0xff]  ;;  %182 = vst.msk [vmem:[#allocation2 + $0xb8] sm:$0xff] %vm23_vm0, %v117_v43  ;;  %v119_v45 = vld [vmem:[%s18904_s0 + $0xb0] sm:$0xff]  ;;  %v120_v46 = vld [vmem:[%s18904_s0 + $0xb8] sm:$0xff] }
  0x31   :  { %506 = vperm.xlu1 %14437, %v14909_v39   ;;  %501 = vperm.xlu0 %14436, %v14914_v40   ;;  %183 = vst.msk [vmem:[#allocation2 + $0xc0] sm:$0xff] %vm23_vm0, %v118_v44  ;;  %184 = vst.msk [vmem:[#allocation2 + $0xc8] sm:$0xff] %vm23_vm0, %v119_v45  ;;  %v14949_v47 = vld [vmem:[%s18905_s1 + $0xa8] sm:$0xff]  ;;  %v14954_v48 = vld [vmem:[%s18905_s1 + $0xa0] sm:$0xff] }
  0x32   :  { %185 = vst.msk [vmem:[#allocation2 + $0xd0] sm:$0xff] %vm23_vm0, %v120_v46  ;;  %v121_v49 = vld [vmem:[%s18904_s0 + $0xc0] sm:$0xff]  ;;  %v122_v50 = vld [vmem:[%s18904_s0 + $0xc8] sm:$0xff]  ;;  %v14969_v51 = vld [vmem:[%s18905_s1 + $0xb8] sm:$0xff] }
  0x33   :  { %186 = vst.msk [vmem:[#allocation2 + $0xd8] sm:$0xff] %vm23_vm0, %v121_v49  ;;  %187 = vst.msk [vmem:[#allocation2 + $0xe0] sm:$0xff] %vm23_vm0, %v122_v50  ;;  %v14974_v52 = vld [vmem:[%s18905_s1 + $0xb0] sm:$0xff]  ;;  %v124_v54 = vld [vmem:[%s18904_s0 + $0xd8] sm:$0xff] }
  0x34   :  { %v123_v53 = vld [vmem:[%s18904_s0 + $0xd0] sm:$0xff]  ;;  %189 = vst.msk [vmem:[#allocation2 + $0xf0] sm:$0xff] %vm23_vm0, %v124_v54  ;;  %v14989_v55 = vld [vmem:[%s18905_s1 + $0xc8] sm:$0xff]  ;;  %v14994_v56 = vld [vmem:[%s18905_s1 + $0xc0] sm:$0xff] }
  0x35   :  { %516 = vperm.xlu1 %14437, %v14921_v41   ;;  %511 = vperm.xlu0 %14436, %v14926_v42   ;;  %188 = vst.msk [vmem:[#allocation2 + $0xe8] sm:$0xff] %vm23_vm0, %v123_v53  ;;  %v125_v57 = vld [vmem:[%s18904_s0 + $0xe0] sm:$0xff]  ;;  %v126_v58 = vld [vmem:[%s18904_s0 + $0xe8] sm:$0xff]  ;;  %v15009_v59 = vld [vmem:[%s18905_s1 + $0xd8] sm:$0xff] }
  0x36   :  { %190 = vst.msk [vmem:[#allocation2 + $0xf8] sm:$0xff] %vm23_vm0, %v125_v57  ;;  %191 = vst.msk [vmem:[#allocation2 + $0x100] sm:$0xff] %vm23_vm0, %v126_v58  ;;  %v15014_v60 = vld [vmem:[%s18905_s1 + $0xd0] sm:$0xff]  ;;  %v128_v62 = vld [vmem:[%s18904_s0 + $0xf8] sm:$0xff] }
  0x37   :  { %v127_v61 = vld [vmem:[%s18904_s0 + $0xf0] sm:$0xff]  ;;  %193 = vst.msk [vmem:[#allocation2 + $0x110] sm:$0xff] %vm23_vm0, %v128_v62  ;;  %v15029_v63 = vld [vmem:[%s18905_s1 + $0xe8] sm:$0xff]  ;;  %v15034_v2 = vld [vmem:[%s18905_s1 + $0xe0] sm:$0xff] }
  0x38   :  { %192 = vst.msk [vmem:[#allocation2 + $0x108] sm:$0xff] %vm23_vm0, %v127_v61  ;;  %v129_v14 = vld [vmem:[%s18904_s0 + $0x100] sm:$0xff]  ;;  %v130_v15 = vld [vmem:[%s18904_s0 + $0x108] sm:$0xff]  ;;  %v15049_v18 = vld [vmem:[%s18905_s1 + $0xf8] sm:$0xff] }
  0x39   :  { %526 = vperm.xlu1 %14437, %v14949_v47   ;;  %521 = vperm.xlu0 %14436, %v14954_v48   ;;  %194 = vst.msk [vmem:[#allocation2 + $0x118] sm:$0xff] %vm23_vm0, %v129_v14  ;;  %195 = vst.msk [vmem:[#allocation2 + $0x120] sm:$0xff] %vm23_vm0, %v130_v15  ;;  %v15054_v19 = vld [vmem:[%s18905_s1 + $0xf0] sm:$0xff]  ;;  %v132_v21 = vld [vmem:[%s18904_s0 + $0x118] sm:$0xff] }
  0x3a   :  { %v131_v20 = vld [vmem:[%s18904_s0 + $0x110] sm:$0xff]  ;;  %v15068_v22 = vld [vmem:[%s18905_s1 + $0x108] sm:$0xff]  ;;  %v15073_v23 = vld [vmem:[%s18905_s1 + $0x100] sm:$0xff]  ;;  %197 = vst.msk [vmem:[#allocation2 + $0x130] sm:$0xff] %vm23_vm0, %v132_v21 }
  0x3b   :  { %196 = vst.msk [vmem:[#allocation2 + $0x128] sm:$0xff] %vm23_vm0, %v131_v20  ;;  %v133_v24 = vld [vmem:[%s18904_s0 + $0x120] sm:$0xff]  ;;  %v134_v27 = vld [vmem:[%s18904_s0 + $0x128] sm:$0xff]  ;;  %v15088_v28 = vld [vmem:[%s18905_s1 + $0x118] sm:$0xff] }
  0x3c   :  { %198 = vst.msk [vmem:[#allocation2 + $0x138] sm:$0xff] %vm23_vm0, %v133_v24  ;;  %v15093_v29 = vld [vmem:[%s18905_s1 + $0x110] sm:$0xff]  ;;  %199 = vst.msk [vmem:[#allocation2 + $0x140] sm:$0xff] %vm23_vm0, %v134_v27  ;;  %v136_v31 = vld [vmem:[%s18904_s0 + $0x138] sm:$0xff] }
  0x3d   :  { %536 = vperm.xlu1 %14437, %v14969_v51   ;;  %531 = vperm.xlu0 %14436, %v14974_v52   ;;  %v135_v30 = vld [vmem:[%s18904_s0 + $0x130] sm:$0xff]  ;;  %201 = vst.msk [vmem:[#allocation2 + $0x150] sm:$0xff] %vm23_vm0, %v136_v31  ;;  %v15109_v32 = vld [vmem:[%s18905_s1 + $0x128] sm:$0xff]  ;;  %v15114_v33 = vld [vmem:[%s18905_s1 + $0x120] sm:$0xff] }
  0x3e   :  { %200 = vst.msk [vmem:[#allocation2 + $0x148] sm:$0xff] %vm23_vm0, %v135_v30  ;;  %v137_v34 = vld [vmem:[%s18904_s0 + $0x140] sm:$0xff]  ;;  %v138_v35 = vld [vmem:[%s18904_s0 + $0x148] sm:$0xff]  ;;  %v15129_v36 = vld [vmem:[%s18905_s1 + $0x138] sm:$0xff] }
  0x3f   :  { %202 = vst.msk [vmem:[#allocation2 + $0x158] sm:$0xff] %vm23_vm0, %v137_v34  ;;  %203 = vst.msk [vmem:[#allocation2 + $0x160] sm:$0xff] %vm23_vm0, %v138_v35  ;;  %v15134_v37 = vld [vmem:[%s18905_s1 + $0x130] sm:$0xff]  ;;  %v140_v43 = vld [vmem:[%s18904_s0 + $0x158] sm:$0xff] }
  0x40   :  { %v139_v38 = vld [vmem:[%s18904_s0 + $0x150] sm:$0xff]  ;;  %v15148_v44 = vld [vmem:[%s18905_s1 + $0x148] sm:$0xff]  ;;  %v15153_v45 = vld [vmem:[%s18905_s1 + $0x140] sm:$0xff]  ;;  %205 = vst.msk [vmem:[#allocation2 + $0x170] sm:$0xff] %vm23_vm0, %v140_v43 }
  0x41   :  { %546 = vperm.xlu1 %14437, %v14989_v55   ;;  %541 = vperm.xlu0 %14436, %v14994_v56   ;;  %204 = vst.msk [vmem:[#allocation2 + $0x168] sm:$0xff] %vm23_vm0, %v139_v38  ;;  %v141_v46 = vld [vmem:[%s18904_s0 + $0x160] sm:$0xff]  ;;  %v142_v49 = vld [vmem:[%s18904_s0 + $0x168] sm:$0xff]  ;;  %v15168_v50 = vld [vmem:[%s18905_s1 + $0x158] sm:$0xff] }
  0x42   :  { %206 = vst.msk [vmem:[#allocation2 + $0x178] sm:$0xff] %vm23_vm0, %v141_v46  ;;  %v15173_v53 = vld [vmem:[%s18905_s1 + $0x150] sm:$0xff]  ;;  %207 = vst.msk [vmem:[#allocation2 + $0x180] sm:$0xff] %vm23_vm0, %v142_v49  ;;  %v144_v57 = vld [vmem:[%s18904_s0 + $0x178] sm:$0xff] }
  0x43   :  { %v143_v54 = vld [vmem:[%s18904_s0 + $0x170] sm:$0xff]  ;;  %209 = vst.msk [vmem:[#allocation2 + $0x190] sm:$0xff] %vm23_vm0, %v144_v57  ;;  %v15189_v58 = vld [vmem:[%s18905_s1 + $0x168] sm:$0xff]  ;;  %v15194_v61 = vld [vmem:[%s18905_s1 + $0x160] sm:$0xff] }
  0x44   :  { %208 = vst.msk [vmem:[#allocation2 + $0x188] sm:$0xff] %vm23_vm0, %v143_v54  ;;  %v145_v62 = vld [vmem:[%s18904_s0 + $0x180] sm:$0xff]  ;;  %v146_v14 = vld [vmem:[%s18904_s0 + $0x188] sm:$0xff]  ;;  %v15209_v15 = vld [vmem:[%s18905_s1 + $0x178] sm:$0xff] }
  0x45   :  { %556 = vperm.xlu1 %14437, %v15009_v59   ;;  %551 = vperm.xlu0 %14436, %v15014_v60   ;;  %210 = vst.msk [vmem:[#allocation2 + $0x198] sm:$0xff] %vm23_vm0, %v145_v62  ;;  %211 = vst.msk [vmem:[#allocation2 + $0x1a0] sm:$0xff] %vm23_vm0, %v146_v14  ;;  %v15214_v20 = vld [vmem:[%s18905_s1 + $0x170] sm:$0xff]  ;;  %v148_v24 = vld [vmem:[%s18904_s0 + $0x198] sm:$0xff] }
  0x46   :  { %v147_v21 = vld [vmem:[%s18904_s0 + $0x190] sm:$0xff]  ;;  %v404_v27 = vld [vmem:[%s18905_s1 + $0x188] sm:$0xff]  ;;  %v403_v30 = vld [vmem:[%s18905_s1 + $0x180] sm:$0xff]  ;;  %213 = vst.msk [vmem:[#allocation2 + $0x1b0] sm:$0xff] %vm23_vm0, %v148_v24 }
  0x47   :  { %212 = vst.msk [vmem:[#allocation2 + $0x1a8] sm:$0xff] %vm23_vm0, %v147_v21  ;;  %v149_v31 = vld [vmem:[%s18904_s0 + $0x1a0] sm:$0xff]  ;;  %v150_v34 = vld [vmem:[%s18904_s0 + $0x1a8] sm:$0xff]  ;;  %v406_v35 = vld [vmem:[%s18905_s1 + $0x198] sm:$0xff] }
  0x48   :  { %214 = vst.msk [vmem:[#allocation2 + $0x1b8] sm:$0xff] %vm23_vm0, %v149_v31  ;;  %v405_v38 = vld [vmem:[%s18905_s1 + $0x190] sm:$0xff]  ;;  %215 = vst.msk [vmem:[#allocation2 + $0x1c0] sm:$0xff] %vm23_vm0, %v150_v34  ;;  %v152_v46 = vld [vmem:[%s18904_s0 + $0x1b8] sm:$0xff] }
  0x49   :  { %566 = vperm.xlu1 %14437, %v15029_v63   ;;  %561 = vperm.xlu0 %14436, %v15034_v2   ;;  %v151_v43 = vld [vmem:[%s18904_s0 + $0x1b0] sm:$0xff]  ;;  %217 = vst.msk [vmem:[#allocation2 + $0x1d0] sm:$0xff] %vm23_vm0, %v152_v46  ;;  %v408_v49 = vld [vmem:[%s18905_s1 + $0x1a8] sm:$0xff]  ;;  %v407_v54 = vld [vmem:[%s18905_s1 + $0x1a0] sm:$0xff] }
  0x4a   :  { %216 = vst.msk [vmem:[#allocation2 + $0x1c8] sm:$0xff] %vm23_vm0, %v151_v43  ;;  %v153_v57 = vld [vmem:[%s18904_s0 + $0x1c0] sm:$0xff]  ;;  %v154_v62 = vld [vmem:[%s18904_s0 + $0x1c8] sm:$0xff]  ;;  %v410_v14 = vld [vmem:[%s18905_s1 + $0x1b8] sm:$0xff] }
  0x4b   :  { %218 = vst.msk [vmem:[#allocation2 + $0x1d8] sm:$0xff] %vm23_vm0, %v153_v57  ;;  %219 = vst.msk [vmem:[#allocation2 + $0x1e0] sm:$0xff] %vm23_vm0, %v154_v62  ;;  %v409_v21 = vld [vmem:[%s18905_s1 + $0x1b0] sm:$0xff]  ;;  %v411_v31 = vld [vmem:[%s18905_s1 + $0x1c0] sm:$0xff] }
  0x4c   :  { %v155_v24 = vld [vmem:[%s18904_s0 + $0x1d0] sm:$0xff]  ;;  %v157_v34 = vld [vmem:[%s18904_s0 + $0x1e0] sm:$0xff]  ;;  %v416_v46 = vld [vmem:[%s18905_s1 + $0x1e8] sm:$0xff] }
  0x4d   :  { %576 = vperm.xlu1 %14437, %v15049_v18   ;;  %571 = vperm.xlu0 %14436, %v15054_v19   ;;  %220 = vst.msk [vmem:[#allocation2 + $0x1e8] sm:$0xff] %vm23_vm0, %v155_v24  ;;  %222 = vst.msk [vmem:[#allocation2 + $0x1f8] sm:$0xff] %vm23_vm0, %v157_v34  ;;  %v413_v43 = vld [vmem:[%s18905_s1 + $0x1d0] sm:$0xff]  ;;  %v291_v62 = vld [vmem:[#allocation2 + $0x7] sm:$0xff] }
  0x4e   :  { %v417_v57 = vld [vmem:[%s18905_s1 + $0x1f0] sm:$0xff] }
  0x4f   :  { %v296_v3 = vld [vmem:[#allocation2 + $0x2f] sm:$0xff] }
  0x51   :  { %586 = vperm.xlu1 %14437, %v15068_v22   ;;  %581 = vperm.xlu0 %14436, %v15073_v23  }
  0x55   :  { %596 = vperm.xlu1 %14437, %v15088_v28   ;;  %591 = vperm.xlu0 %14436, %v15093_v29  }
  0x59   :  { %606 = vperm.xlu1 %14437, %v15109_v32   ;;  %601 = vperm.xlu0 %14436, %v15114_v33  }
  0x5d   :  { %616 = vperm.xlu1 %14437, %v15129_v36   ;;  %611 = vperm.xlu0 %14436, %v15134_v37  }
  0x61   :  { %626 = vperm.xlu1 %14437, %v15148_v44   ;;  %621 = vperm.xlu0 %14436, %v15153_v45  }
  0x65   :  { %636 = vperm.xlu1 %14437, %v15168_v50   ;;  %631 = vperm.xlu0 %14436, %v15173_v53  }
  0x69   :  { %646 = vperm.xlu1 %14437, %v15189_v58   ;;  %641 = vperm.xlu0 %14436, %v15194_v61  }
  0x6d   :  { %656 = vperm.xlu1 %14437, %v15209_v15   ;;  %651 = vperm.xlu0 %14436, %v15214_v20  }
  0x71   :  { %666 = vperm.xlu1 %14437, %v404_v27   ;;  %661 = vperm.xlu0 %14436, %v403_v30   ;;  %v156_v27 = vld [vmem:[%s18904_s0 + $0x1d8] sm:$0xff]  ;;  %v412_v30 = vld [vmem:[%s18905_s1 + $0x1c8] sm:$0xff] }
  0x72   :  { %221 = vst.msk [vmem:[#allocation2 + $0x1f0] sm:$0xff] %vm23_vm0, %v156_v27  ;;  %v292_v27 = vld [vmem:[#allocation2 + $0xf] sm:$0xff] }
  0x75   :  { %676 = vperm.xlu1 %14437, %v406_v35   ;;  %671 = vperm.xlu0 %14436, %v405_v38   ;;  %v158_v35 = vld [vmem:[%s18904_s0 + $0x1e8] sm:$0xff]  ;;  %v414_v38 = vld [vmem:[%s18905_s1 + $0x1d8] sm:$0xff] }
  0x76   :  { %223 = vst.msk [vmem:[#allocation2 + $0x200] sm:$0xff] %vm23_vm0, %v158_v35 }
  0x79   :  { %686 = vperm.xlu1 %14437, %v408_v49   ;;  %681 = vperm.xlu0 %14436, %v407_v54   ;;  %v415_v49 = vld [vmem:[%s18905_s1 + $0x1e0] sm:$0xff]  ;;  %v418_v54 = vld [vmem:[%s18905_s1 + $0x1f8] sm:$0xff] }
  0x7d   :  { %696 = vperm.xlu1 %14437, %v410_v14   ;;  %691 = vperm.xlu0 %14436, %v409_v21   ;;  %v432_v14 = vpop.permute.xlu1 %431  ;;  %v422_v21 = vpop.permute.xlu0 %421 }
  0x7e   :  { %v739_v24 = vmul.f32 %v422_v21, %v291_v62 }
  0x80   :  { %13542 = vmatprep.mubr.msk.f32.mxu0 %vm23_vm0, %v739_v24 }
  0x81   :  { %706 = vperm.xlu1 %14437, %v412_v30   ;;  %701 = vperm.xlu0 %14436, %v411_v31   ;;  %v15317_v30 = vld [vmem:[%s18906_s2 + $0x4] sm:$0xf]  ;;  %v293_v31 = vld [vmem:[#allocation2 + $0x17] sm:$0xff]  ;;  %v437_v34 = vpop.permute.xlu1 %436  ;;  %v427_v35 = vpop.permute.xlu0 %426 }
  0x82   :  { %13638 = vmatprep.subr.msk.mxu1 %vm1060_vm1, %v15317_v30 }
  0x85   :  { %716 = vperm.xlu1 %14437, %v414_v38   ;;  %711 = vperm.xlu0 %14436, %v413_v43   ;;  %v740_v38 = vmul.f32 %v427_v35, %v292_v27  ;;  %v14543_v43 = vmov 1   ;;  %v442_v62 = vpop.permute.xlu0 %441  ;;  %v298_v35 = vld [vmem:[#allocation2 + $0x3f] sm:$0xff] }
  0x87   :  { %13543 = vmatmul.mubr.msk.f32.vlgmr.msra.gmra.mxu0 %vm23_vm0, %v740_v38 }
  0x89   :  { %726 = vperm.xlu1 %14437, %v416_v46   ;;  %721 = vperm.xlu0 %14436, %v415_v49   ;;  %v741_v46 = vmul.f32 %v432_v14, %v293_v31  ;;  %v294_v49 = vld [vmem:[#allocation2 + $0x1f] sm:$0xff]  ;;  %v297_v14 = vld [vmem:[#allocation2 + $0x37] sm:$0xff]  ;;  %v452_v27 = vpop.permute.xlu0 %451 }
  0x8a   :  { %v742_v21 = vmul.f32 %v437_v34, %v294_v49  ;;  %v745_v31 = vmul.f32 %v452_v27, %v297_v14  ;;  %v299_v34 = vld [vmem:[#allocation2 + $0x47] sm:$0xff]  ;;  %v304_v14 = vld [vmem:[#allocation2 + $0x6f] sm:$0xff] }
  0x8b   :  { %13545 = vmatprep.mubr.msk.f32.mxu0 %vm23_vm0, %v741_v46  ;;  %v300_v46 = vld [vmem:[#allocation2 + $0x4f] sm:$0xff] }
  0x8c   :  { %13546 = vmatmul.mubr.msk.f32.gmra.mxu0 %vm23_vm0, %v742_v21 }
  0x8d   :  { %736 = vperm.xlu1 %14437, %v418_v54   ;;  %731 = vperm.xlu0 %14436, %v417_v57   ;;  %v295_v54 = vld [vmem:[#allocation2 + $0x27] sm:$0xff]  ;;  %v447_v57 = vpop.permute.xlu1 %446  ;;  %v462_v38 = vpop.permute.xlu0 %461 }
  0x8e   :  { %v743_v24 = vmul.f32 %v442_v62, %v295_v54  ;;  %v303_v62 = vld [vmem:[#allocation2 + $0x67] sm:$0xff] }
  0x90   :  { %13548 = vmatprep.mubr.msk.f32.mxu0 %vm23_vm0, %v743_v24 }
  0x91   :  { %14439 = vset.pattern.permute.xlu1 %v14543_v43  ;;  %14438 = vset.pattern.permute.xlu0 %v14543_v43  ;;  %v747_v43 = vmul.f32 %v462_v38, %v299_v34  ;;  %v472_v49 = vpop.permute.xlu0 %471  ;;  %v308_v38 = vld [vmem:[#allocation2 + $0x8f] sm:$0xff] }
  0x92   :  { %1712 = vperm.xlu1 %14439, %v14743_v5   ;;  %1707 = vperm.xlu0 %14438, %v14591_v1   ;;  %v457_v5 = vpop.permute.xlu1 %456  ;;  %v744_v1 = vmul.f32 %v447_v57, %v296_v3  ;;  %v301_v3 = vld [vmem:[#allocation2 + $0x57] sm:$0xff]  ;;  %v302_v57 = vld [vmem:[#allocation2 + $0x5f] sm:$0xff] }
  0x93   :  { %v749_v54 = vmul.f32 %v472_v49, %v301_v3  ;;  %v310_v3 = vld [vmem:[#allocation2 + $0x9f] sm:$0xff] }
  0x94   :  { %13549 = vmatmul.mubr.msk.f32.gmra.mxu0 %vm23_vm0, %v744_v1 }
  0x95   :  { %13551 = vmatprep.mubr.msk.f32.mxu0 %vm23_vm0, %v745_v31  ;;  %v482_v21 = vpop.permute.xlu0 %481  ;;  %v306_v31 = vld [vmem:[#allocation2 + $0x7f] sm:$0xff] }
  0x96   :  { %1717 = vperm.xlu1 %14439, %v14586_v0   ;;  %1722 = vperm.xlu0 %14438, %v14738_v4   ;;  %v467_v0 = vpop.permute.xlu1 %466  ;;  %v746_v4 = vmul.f32 %v457_v5, %v298_v35  ;;  %v751_v24 = vmul.f32 %v482_v21, %v303_v62  ;;  %v305_v5 = vld [vmem:[#allocation2 + $0x77] sm:$0xff]  ;;  %v307_v35 = vld [vmem:[#allocation2 + $0x87] sm:$0xff]  ;;  %v314_v21 = vld [vmem:[#allocation2 + $0xbf] sm:$0xff] }
  0x98   :  { %13552 = vmatmul.mubr.msk.f32.gmra.mxu0 %vm23_vm0, %v746_v4  ;;  %v309_v4 = vld [vmem:[#allocation2 + $0x97] sm:$0xff] }
  0x99   :  { %13554 = vmatprep.mubr.msk.f32.mxu0 %vm23_vm0, %v747_v43 }
  0x9a   :  { %1727 = vperm.xlu1 %14439, %v14755_v7   ;;  %1732 = vperm.xlu0 %14438, %v14750_v6   ;;  %v477_v7 = vpop.permute.xlu1 %476  ;;  %v748_v6 = vmul.f32 %v467_v0, %v300_v46 }
  0x9c   :  { %13555 = vmatmul.mubr.msk.f32.gmra.mxu0 %vm23_vm0, %v748_v6 }
  0x9d   :  { %13557 = vmatprep.mubr.msk.f32.mxu0 %vm23_vm0, %v749_v54  ;;  %v312_v54 = vld [vmem:[#allocation2 + $0xaf] sm:$0xff] }
  0x9e   :  { %1737 = vperm.xlu1 %14439, %v14767_v9   ;;  %1742 = vperm.xlu0 %14438, %v14762_v8   ;;  %v487_v9 = vpop.permute.xlu1 %486  ;;  %v750_v8 = vmul.f32 %v477_v7, %v302_v57  ;;  %v311_v7 = vld [vmem:[#allocation2 + $0xa7] sm:$0xff]  ;;  %v313_v57 = vld [vmem:[#allocation2 + $0xb7] sm:$0xff] }
  0xa0   :  { %13558 = vmatmul.mubr.msk.f32.gmra.mxu0 %vm23_vm0, %v750_v8  ;;  %v315_v8 = vld [vmem:[#allocation2 + $0xc7] sm:$0xff] }
  0xa1   :  { %13560 = vmatprep.mubr.msk.f32.mxu0 %vm23_vm0, %v751_v24 }
  0xa2   :  { %1747 = vperm.xlu1 %14439, %v14779_v11   ;;  %1752 = vperm.xlu0 %14438, %v14774_v10   ;;  %v752_v10 = vmul.f32 %v487_v9, %v304_v14 }
  0xa4   :  { %13561 = vmatmul.mubr.msk.f32.gmra.mxu0 %vm23_vm0, %v752_v10 }
  0xa6   :  { %1757 = vperm.xlu1 %14439, %v14791_v13   ;;  %1762 = vperm.xlu0 %14438, %v14786_v12  }
  0xa8   :  { %v497_v11 = vpop.permute.xlu1 %496  ;;  %v492_v27 = vpop.permute.xlu0 %491 }
  0xa9   :  { %v753_v1 = vmul.f32 %v492_v27, %v305_v5  ;;  %v754_v12 = vmul.f32 %v497_v11, %v306_v31  ;;  %v316_v5 = vld [vmem:[#allocation2 + $0xcf] sm:$0xff]  ;;  %v317_v11 = vld [vmem:[#allocation2 + $0xd7] sm:$0xff]  ;;  %v319_v31 = vld [vmem:[#allocation2 + $0xe7] sm:$0xff] }
  0xaa   :  { %1767 = vperm.xlu1 %14439, %v14810_v17   ;;  %1772 = vperm.xlu0 %14438, %v14805_v16  }
  0xab   :  { %13563 = vmatprep.mubr.msk.f32.mxu0 %vm23_vm0, %v753_v1  ;;  %v318_v1 = vld [vmem:[#allocation2 + $0xdf] sm:$0xff] }
  0xac   :  { %v507_v13 = vpop.permute.xlu1 %506  ;;  %v502_v34 = vpop.permute.xlu0 %501  ;;  %13564 = vmatmul.mubr.msk.f32.gmra.mxu0 %vm23_vm0, %v754_v12  ;;  %v321_v12 = vld [vmem:[#allocation2 + $0xf7] sm:$0xff] }
  0xad   :  { %v755_v0 = vmul.f32 %v502_v34, %v307_v35  ;;  %v756_v16 = vmul.f32 %v507_v13, %v308_v38  ;;  %v320_v34 = vld [vmem:[#allocation2 + $0xef] sm:$0xff] }
  0xae   :  { %1777 = vperm.xlu1 %14439, %v14849_v26   ;;  %1782 = vperm.xlu0 %14438, %v14844_v25  }
  0xaf   :  { %13566 = vmatprep.mubr.msk.f32.mxu0 %vm23_vm0, %v755_v0 }
  0xb0   :  { %v517_v17 = vpop.permute.xlu1 %516  ;;  %v512_v43 = vpop.permute.xlu0 %511  ;;  %13567 = vmatmul.mubr.msk.f32.gmra.mxu0 %vm23_vm0, %v756_v16 }
  0xb1   :  { %v757_v46 = vmul.f32 %v512_v43, %v309_v4  ;;  %v758_v25 = vmul.f32 %v517_v17, %v310_v3  ;;  %v322_v4 = vld [vmem:[#allocation2 + $0xff] sm:$0xff]  ;;  %v324_v17 = vld [vmem:[#allocation2 + $0x10f] sm:$0xff]  ;;  %v323_v43 = vld [vmem:[#allocation2 + $0x107] sm:$0xff] }
  0xb2   :  { %1787 = vperm.xlu1 %14439, %v14914_v40   ;;  %1792 = vperm.xlu0 %14438, %v14909_v39  }
  0xb3   :  { %13569 = vmatprep.mubr.msk.f32.mxu0 %vm23_vm0, %v757_v46 }
  0xb4   :  { %v527_v26 = vpop.permute.xlu1 %526  ;;  %v522_v49 = vpop.permute.xlu0 %521  ;;  %13570 = vmatmul.mubr.msk.f32.gmra.mxu0 %vm23_vm0, %v758_v25  ;;  %v328_v25 = vld [vmem:[#allocation2 + $0x12f] sm:$0xff] }
  0xb5   :  { %v759_v6 = vmul.f32 %v522_v49, %v311_v7  ;;  %v760_v39 = vmul.f32 %v527_v26, %v312_v54  ;;  %v15384_v7 = vld [vmem:[#allocation2 + $0x11f] sm:$0xff]  ;;  %v18912_v49 = vmov 0.0  }
  0xb6   :  { %1797 = vperm.xlu1 %14439, %v14926_v42   ;;  %1802 = vperm.xlu0 %14438, %v14921_v41   ;;  %228 = vst.msk [vmem:[#allocation3 + $0x8] sm:$0xff] %vm226_vm2, %v18912_v49  ;;  %227 = vst.msk [vmem:[#allocation3] sm:$0xff] %vm226_vm2, %v18912_v49 }
  0xb7   :  { %13572 = vmatprep.mubr.msk.f32.mxu0 %vm23_vm0, %v759_v6  ;;  %229 = vst.msk [vmem:[#allocation3 + $0x10] sm:$0xff] %vm226_vm2, %v18912_v49  ;;  %230 = vst.msk [vmem:[#allocation3 + $0x18] sm:$0xff] %vm226_vm2, %v18912_v49  ;;  %v327_v6 = vld [vmem:[#allocation2 + $0x127] sm:$0xff] }
  0xb8   :  { %v537_v40 = vpop.permute.xlu1 %536  ;;  %v532_v62 = vpop.permute.xlu0 %531  ;;  %13573 = vmatmul.mubr.msk.f32.gmra.mxu0 %vm23_vm0, %v760_v39  ;;  %231 = vst.msk [vmem:[#allocation3 + $0x20] sm:$0xff] %vm226_vm2, %v18912_v49  ;;  %232 = vst.msk [vmem:[#allocation3 + $0x28] sm:$0xff] %vm226_vm2, %v18912_v49  ;;  %v330_v39 = vld [vmem:[#allocation2 + $0x13f] sm:$0xff] }
  0xb9   :  { %v761_v9 = vmul.f32 %v532_v62, %v313_v57  ;;  %v762_v41 = vmul.f32 %v537_v40, %v314_v21  ;;  %233 = vst.msk [vmem:[#allocation3 + $0x30] sm:$0xff] %vm226_vm2, %v18912_v49  ;;  %234 = vst.msk [vmem:[#allocation3 + $0x38] sm:$0xff] %vm226_vm2, %v18912_v49 }
  0xba   :  { %1807 = vperm.xlu1 %14439, %v14954_v48   ;;  %1812 = vperm.xlu0 %14438, %v14949_v47   ;;  %235 = vst.msk [vmem:[#allocation3 + $0x40] sm:$0xff] %vm226_vm2, %v18912_v49  ;;  %236 = vst.msk [vmem:[#allocation3 + $0x48] sm:$0xff] %vm226_vm2, %v18912_v49 }
  0xbb   :  { %13575 = vmatprep.mubr.msk.f32.mxu0 %vm23_vm0, %v761_v9  ;;  %237 = vst.msk [vmem:[#allocation3 + $0x50] sm:$0xff] %vm226_vm2, %v18912_v49  ;;  %238 = vst.msk [vmem:[#allocation3 + $0x58] sm:$0xff] %vm226_vm2, %v18912_v49 }
  0xbc   :  { %v547_v42 = vpop.permute.xlu1 %546  ;;  %v542_v24 = vpop.permute.xlu0 %541  ;;  %13576 = vmatmul.mubr.msk.f32.gmra.mxu0 %vm23_vm0, %v762_v41  ;;  %239 = vst.msk [vmem:[#allocation3 + $0x60] sm:$0xff] %vm226_vm2, %v18912_v49  ;;  %240 = vst.msk [vmem:[#allocation3 + $0x68] sm:$0xff] %vm226_vm2, %v18912_v49 }
  0xbd   :  { %v763_v14 = vmul.f32 %v542_v24, %v315_v8  ;;  %v764_v47 = vmul.f32 %v547_v42, %v316_v5  ;;  %241 = vst.msk [vmem:[#allocation3 + $0x70] sm:$0xff] %vm226_vm2, %v18912_v49  ;;  %242 = vst.msk [vmem:[#allocation3 + $0x78] sm:$0xff] %vm226_vm2, %v18912_v49  ;;  %v332_v8 = vld [vmem:[#allocation2 + $0x14f] sm:$0xff]  ;;  %v331_v42 = vld [vmem:[#allocation2 + $0x147] sm:$0xff] }
  0xbe   :  { %1817 = vperm.xlu1 %14439, %v14974_v52   ;;  %1822 = vperm.xlu0 %14438, %v14969_v51   ;;  %243 = vst.msk [vmem:[#allocation3 + $0x80] sm:$0xff] %vm226_vm2, %v18912_v49  ;;  %244 = vst.msk [vmem:[#allocation3 + $0x88] sm:$0xff] %vm226_vm2, %v18912_v49  ;;  %v333_v5 = vld [vmem:[#allocation2 + $0x157] sm:$0xff] }
  0xbf   :  { %13578 = vmatprep.mubr.msk.f32.mxu0 %vm23_vm0, %v763_v14  ;;  %245 = vst.msk [vmem:[#allocation3 + $0x90] sm:$0xff] %vm226_vm2, %v18912_v49  ;;  %246 = vst.msk [vmem:[#allocation3 + $0x98] sm:$0xff] %vm226_vm2, %v18912_v49  ;;  %v334_v14 = vld [vmem:[#allocation2 + $0x15f] sm:$0xff] }
  0xc0   :  { %v557_v48 = vpop.permute.xlu1 %556  ;;  %v552_v27 = vpop.permute.xlu0 %551  ;;  %13579 = vmatmul.mubr.msk.f32.gmra.mxu0 %vm23_vm0, %v764_v47  ;;  %247 = vst.msk [vmem:[#allocation3 + $0xa0] sm:$0xff] %vm226_vm2, %v18912_v49  ;;  %248 = vst.msk [vmem:[#allocation3 + $0xa8] sm:$0xff] %vm226_vm2, %v18912_v49  ;;  %v335_v47 = vld [vmem:[#allocation2 + $0x167] sm:$0xff] }
  0xc1   :  { %v765_v10 = vmul.f32 %v552_v27, %v317_v11  ;;  %v766_v51 = vmul.f32 %v557_v48, %v318_v1  ;;  %249 = vst.msk [vmem:[#allocation3 + $0xb0] sm:$0xff] %vm226_vm2, %v18912_v49  ;;  %250 = vst.msk [vmem:[#allocation3 + $0xb8] sm:$0xff] %vm226_vm2, %v18912_v49  ;;  %v336_v27 = vld [vmem:[#allocation2 + $0x16f] sm:$0xff] }
  0xc2   :  { %1827 = vperm.xlu1 %14439, %v14994_v56   ;;  %1832 = vperm.xlu0 %14438, %v14989_v55   ;;  %251 = vst.msk [vmem:[#allocation3 + $0xc0] sm:$0xff] %vm226_vm2, %v18912_v49  ;;  %252 = vst.msk [vmem:[#allocation3 + $0xc8] sm:$0xff] %vm226_vm2, %v18912_v49 }
  0xc3   :  { %13581 = vmatprep.mubr.msk.f32.mxu0 %vm23_vm0, %v765_v10  ;;  %253 = vst.msk [vmem:[#allocation3 + $0xd0] sm:$0xff] %vm226_vm2, %v18912_v49  ;;  %254 = vst.msk [vmem:[#allocation3 + $0xd8] sm:$0xff] %vm226_vm2, %v18912_v49 }
  0xc4   :  { %v567_v52 = vpop.permute.xlu1 %566  ;;  %v562_v35 = vpop.permute.xlu0 %561  ;;  %13582 = vmatmul.mubr.msk.f32.gmra.mxu0 %vm23_vm0, %v766_v51  ;;  %255 = vst.msk [vmem:[#allocation3 + $0xe0] sm:$0xff] %vm226_vm2, %v18912_v49  ;;  %256 = vst.msk [vmem:[#allocation3 + $0xe8] sm:$0xff] %vm226_vm2, %v18912_v49 }
  0xc5   :  { %v767_v13 = vmul.f32 %v562_v35, %v319_v31  ;;  %v768_v55 = vmul.f32 %v567_v52, %v320_v34  ;;  %257 = vst.msk [vmem:[#allocation3 + $0xf0] sm:$0xff] %vm226_vm2, %v18912_v49  ;;  %258 = vst.msk [vmem:[#allocation3 + $0xf8] sm:$0xff] %vm226_vm2, %v18912_v49  ;;  %v338_v31 = vld [vmem:[#allocation2 + $0x17f] sm:$0xff]  ;;  %v337_v52 = vld [vmem:[#allocation2 + $0x177] sm:$0xff] }
  0xc6   :  { %1837 = vperm.xlu1 %14439, %v15014_v60   ;;  %1842 = vperm.xlu0 %14438, %v15009_v59   ;;  %259 = vst.msk [vmem:[#allocation3 + $0x100] sm:$0xff] %vm226_vm2, %v18912_v49  ;;  %260 = vst.msk [vmem:[#allocation3 + $0x108] sm:$0xff] %vm226_vm2, %v18912_v49  ;;  %v339_v34 = vld [vmem:[#allocation2 + $0x187] sm:$0xff] }
  0xc7   :  { %13584 = vmatprep.mubr.msk.f32.mxu0 %vm23_vm0, %v767_v13  ;;  %261 = vst.msk [vmem:[#allocation3 + $0x110] sm:$0xff] %vm226_vm2, %v18912_v49  ;;  %262 = vst.msk [vmem:[#allocation3 + $0x118] sm:$0xff] %vm226_vm2, %v18912_v49  ;;  %v340_v13 = vld [vmem:[#allocation2 + $0x18f] sm:$0xff] }
  0xc8   :  { %v577_v56 = vpop.permute.xlu1 %576  ;;  %v572_v0 = vpop.permute.xlu0 %571  ;;  %13585 = vmatmul.mubr.msk.f32.gmra.mxu0 %vm23_vm0, %v768_v55  ;;  %263 = vst.msk [vmem:[#allocation3 + $0x120] sm:$0xff] %vm226_vm2, %v18912_v49  ;;  %264 = vst.msk [vmem:[#allocation3 + $0x128] sm:$0xff] %vm226_vm2, %v18912_v49  ;;  %v341_v55 = vld [vmem:[#allocation2 + $0x197] sm:$0xff] }
  0xc9   :  { %v769_v38 = vmul.f32 %v572_v0, %v321_v12  ;;  %v770_v16 = vmul.f32 %v577_v56, %v322_v4  ;;  %265 = vst.msk [vmem:[#allocation3 + $0x130] sm:$0xff] %vm226_vm2, %v18912_v49  ;;  %266 = vst.msk [vmem:[#allocation3 + $0x138] sm:$0xff] %vm226_vm2, %v18912_v49  ;;  %v342_v0 = vld [vmem:[#allocation2 + $0x19f] sm:$0xff] }
  0xca   :  { %1847 = vperm.xlu1 %14439, %v15034_v2   ;;  %1852 = vperm.xlu0 %14438, %v15029_v63   ;;  %v15386_v2 = vld [vmem:[#allocation2 + $0x117] sm:$0xff]  ;;  %267 = vst.msk [vmem:[#allocation3 + $0x140] sm:$0xff] %vm226_vm2, %v18912_v49  ;;  %268 = vst.msk [vmem:[#allocation3 + $0x148] sm:$0xff] %vm226_vm2, %v18912_v49 }
  0xcb   :  { %13587 = vmatprep.mubr.msk.f32.mxu0 %vm23_vm0, %v769_v38  ;;  %269 = vst.msk [vmem:[#allocation3 + $0x150] sm:$0xff] %vm226_vm2, %v18912_v49  ;;  %270 = vst.msk [vmem:[#allocation3 + $0x158] sm:$0xff] %vm226_vm2, %v18912_v49 }
  0xcc   :  { %v587_v60 = vpop.permute.xlu1 %586  ;;  %v582_v59 = vpop.permute.xlu0 %581  ;;  %13588 = vmatmul.mubr.msk.f32.gmra.mxu0 %vm23_vm0, %v770_v16  ;;  %271 = vst.msk [vmem:[#allocation3 + $0x160] sm:$0xff] %vm226_vm2, %v18912_v49  ;;  %272 = vst.msk [vmem:[#allocation3 + $0x168] sm:$0xff] %vm226_vm2, %v18912_v49 }
  0xcd   :  { %v772_v46 = vmul.f32 %v587_v60, %v324_v17  ;;  %v771_v3 = vmul.f32 %v582_v59, %v323_v43  ;;  %273 = vst.msk [vmem:[#allocation3 + $0x170] sm:$0xff] %vm226_vm2, %v18912_v49  ;;  %274 = vst.msk [vmem:[#allocation3 + $0x178] sm:$0xff] %vm226_vm2, %v18912_v49  ;;  %v343_v43 = vld [vmem:[#allocation2 + $0x1a7] sm:$0xff]  ;;  %v1691_v60 = vld [vmem:[%s18905_s1 + $0x190] sm:$0xff] }
  0xce   :  { %1857 = vperm.xlu1 %14439, %v15054_v19   ;;  %1862 = vperm.xlu0 %14438, %v15049_v18   ;;  %275 = vst.msk [vmem:[#allocation3 + $0x180] sm:$0xff] %vm226_vm2, %v18912_v49  ;;  %276 = vst.msk [vmem:[#allocation3 + $0x188] sm:$0xff] %vm226_vm2, %v18912_v49  ;;  %v1692_v59 = vld [vmem:[%s18905_s1 + $0x198] sm:$0xff] }
  0xcf   :  { %13590 = vmatprep.mubr.msk.f32.mxu1 %vm23_vm0, %v771_v3  ;;  %277 = vst.msk [vmem:[#allocation3 + $0x190] sm:$0xff] %vm226_vm2, %v18912_v49  ;;  %278 = vst.msk [vmem:[#allocation3 + $0x198] sm:$0xff] %vm226_vm2, %v18912_v49 }
  0xd0   :  { %v15390_v63 = vpop.permute.xlu1 %596  ;;  %v15392_v26 = vpop.permute.xlu0 %591  ;;  %13591 = vmatmul.mubr.msk.f32.vlgmr.msra.gmra.mxu1 %vm23_vm0, %v772_v46  ;;  %279 = vst.msk [vmem:[#allocation3 + $0x1a0] sm:$0xff] %vm226_vm2, %v18912_v49  ;;  %280 = vst.msk [vmem:[#allocation3 + $0x1a8] sm:$0xff] %vm226_vm2, %v18912_v49 }
  0xd1   :  { %281 = vst.msk [vmem:[#allocation3 + $0x1b0] sm:$0xff] %vm226_vm2, %v18912_v49  ;;  %282 = vst.msk [vmem:[#allocation3 + $0x1b8] sm:$0xff] %vm226_vm2, %v18912_v49  ;;  %v774_v18 = vmul.f32 %v15390_v63, %v15384_v7  ;;  %v773_v19 = vmul.f32 %v15392_v26, %v15386_v2  ;;  %13639 = vmatpush3.msk.msra.mxu1 %vm1060_vm1, %v15317_v30  ;;  %v329_v30 = vld [vmem:[#allocation2 + $0x137] sm:$0xff]  ;;  %v346_v2 = vld [vmem:[#allocation2 + $0x1bf] sm:$0xff] }
  0xd2   :  { %283 = vst.msk [vmem:[#allocation3 + $0x1c0] sm:$0xff] %vm226_vm2, %v18912_v49  ;;  %284 = vst.msk [vmem:[#allocation3 + $0x1c8] sm:$0xff] %vm226_vm2, %v18912_v49  ;;  %1867 = vperm.xlu1 %14439, %v15073_v23   ;;  %1872 = vperm.xlu0 %14438, %v15068_v22   ;;  %v345_v63 = vld [vmem:[#allocation2 + $0x1b7] sm:$0xff]  ;;  %v1693_v26 = vld [vmem:[%s18905_s1 + $0x1a0] sm:$0xff] }
  0xd3   :  { %285 = vst.msk [vmem:[#allocation3 + $0x1d0] sm:$0xff] %vm226_vm2, %v18912_v49  ;;  %286 = vst.msk [vmem:[#allocation3 + $0x1d8] sm:$0xff] %vm226_vm2, %v18912_v49  ;;  %13593 = vmatprep.mubr.msk.f32.mxu1 %vm23_vm0, %v773_v19 }
  0xd4   :  { %287 = vst.msk [vmem:[#allocation3 + $0x1e0] sm:$0xff] %vm226_vm2, %v18912_v49  ;;  %288 = vst.msk [vmem:[#allocation3 + $0x1e8] sm:$0xff] %vm226_vm2, %v18912_v49  ;;  %v607_v54 = vpop.permute.xlu1 %606  ;;  %v602_v57 = vpop.permute.xlu0 %601  ;;  %13594 = vmatmul.mubr.msk.f32.gmra.mxu1 %vm23_vm0, %v774_v18  ;;  %v1694_v18 = vld [vmem:[%s18905_s1 + $0x1a8] sm:$0xff] }
  0xd5   :  { %289 = vst.msk [vmem:[#allocation3 + $0x1f0] sm:$0xff] %vm226_vm2, %v18912_v49  ;;  %290 = vst.msk [vmem:[#allocation3 + $0x1f8] sm:$0xff] %vm226_vm2, %v18912_v49  ;;  %v776_v40 = vmul.f32 %v607_v54, %v328_v25  ;;  %v775_v62 = vmul.f32 %v602_v57, %v327_v6  ;;  %v348_v57 = vld [vmem:[#allocation2 + $0x1cf] sm:$0xff] }
  0xd6   :  { %1877 = vperm.xlu1 %14439, %v15093_v29   ;;  %1882 = vperm.xlu0 %14438, %v15088_v28   ;;  %95 = vst.msk [vmem:[#allocation4] sm:$0x1] %vm94_vm3, %v18912_v49  ;;  %96 = vst.msk [vmem:[#allocation6] sm:$0x1] %vm94_vm3, %v18912_v49 }
  0xd7   :  { %13596 = vmatprep.mubr.msk.f32.mxu1 %vm23_vm0, %v775_v62  ;;  %v1695_v62 = vld [vmem:[%s18905_s1 + $0x1b0] sm:$0xff] }
  0xd8   :  { %v617_v23 = vpop.permute.xlu1 %616  ;;  %v612_v22 = vpop.permute.xlu0 %611  ;;  %13597 = vmatmul.mubr.msk.f32.gmra.mxu1 %vm23_vm0, %v776_v40  ;;  %v347_v40 = vld [vmem:[#allocation2 + $0x1c7] sm:$0xff] }
  0xd9   :  { %v778_v9 = vmul.f32 %v617_v23, %v330_v39  ;;  %v777_v21 = vmul.f32 %v612_v22, %v329_v30  ;;  %v1696_v39 = vld [vmem:[%s18905_s1 + $0x1b8] sm:$0xff] }
  0xda   :  { %1887 = vperm.xlu1 %14439, %v15114_v33   ;;  %1892 = vperm.xlu0 %14438, %v15109_v32  }
  0xdb   :  { %13599 = vmatprep.mubr.msk.f32.mxu1 %vm23_vm0, %v777_v21  ;;  %v350_v21 = vld [vmem:[#allocation2 + $0x1df] sm:$0xff] }
  0xdc   :  { %v627_v29 = vpop.permute.xlu1 %626  ;;  %v622_v28 = vpop.permute.xlu0 %621  ;;  %13600 = vmatmul.mubr.msk.f32.gmra.mxu1 %vm23_vm0, %v778_v9 }
  0xdd   :  { %v780_v24 = vmul.f32 %v627_v29, %v332_v8  ;;  %v779_v41 = vmul.f32 %v622_v28, %v331_v42  ;;  %v349_v8 = vld [vmem:[#allocation2 + $0x1d7] sm:$0xff]  ;;  %v1697_v42 = vld [vmem:[%s18905_s1 + $0x1c0] sm:$0xff]  ;;  %v1698_v29 = vld [vmem:[%s18905_s1 + $0x1c8] sm:$0xff] }
  0xde   :  { %1897 = vperm.xlu1 %14439, %v15134_v37   ;;  %1902 = vperm.xlu0 %14438, %v15129_v36  }
  0xdf   :  { %13602 = vmatprep.mubr.msk.f32.mxu1 %vm23_vm0, %v779_v41 }
  0xe0   :  { %v637_v33 = vpop.permute.xlu1 %636  ;;  %v632_v32 = vpop.permute.xlu0 %631  ;;  %13603 = vmatmul.mubr.msk.f32.gmra.mxu1 %vm23_vm0, %v780_v24 }
  0xe1   :  { %v782_v11 = vmul.f32 %v637_v33, %v334_v14  ;;  %v781_v48 = vmul.f32 %v632_v32, %v333_v5  ;;  %v352_v5 = vld [vmem:[#allocation2 + $0x1ef] sm:$0xff]  ;;  %v351_v33 = vld [vmem:[#allocation2 + $0x1e7] sm:$0xff] }
  0xe2   :  { %1907 = vperm.xlu1 %14439, %v15153_v45   ;;  %1912 = vperm.xlu0 %14438, %v15148_v44   ;;  %v1699_v32 = vld [vmem:[%s18905_s1 + $0x1d0] sm:$0xff] }
  0xe3   :  { %13605 = vmatprep.mubr.msk.f32.mxu1 %vm23_vm0, %v781_v48 }
  0xe4   :  { %v647_v37 = vpop.permute.xlu1 %646  ;;  %v642_v36 = vpop.permute.xlu0 %641  ;;  %13606 = vmatmul.mubr.msk.f32.gmra.mxu1 %vm23_vm0, %v782_v11  ;;  %v1700_v11 = vld [vmem:[%s18905_s1 + $0x1d8] sm:$0xff] }
  0xe5   :  { %v784_v10 = vmul.f32 %v647_v37, %v336_v27  ;;  %v783_v1 = vmul.f32 %v642_v36, %v335_v47  ;;  %v354_v36 = vld [vmem:[#allocation2 + $0x1ff] sm:$0xff] }
  0xe6   :  { %1917 = vperm.xlu1 %14439, %v15173_v53   ;;  %1922 = vperm.xlu0 %14438, %v15168_v50  }
  0xe7   :  { %13608 = vmatprep.mubr.msk.f32.mxu1 %vm23_vm0, %v783_v1  ;;  %v1701_v1 = vld [vmem:[%s18905_s1 + $0x1e0] sm:$0xff] }
  0xe8   :  { %v657_v45 = vpop.permute.xlu1 %656  ;;  %v652_v44 = vpop.permute.xlu0 %651  ;;  %13609 = vmatmul.mubr.msk.f32.gmra.mxu1 %vm23_vm0, %v784_v10  ;;  %v353_v10 = vld [vmem:[#allocation2 + $0x1f7] sm:$0xff] }
  0xe9   :  { %v786_v35 = vmul.f32 %v657_v45, %v338_v31  ;;  %v785_v51 = vmul.f32 %v652_v44, %v337_v52  ;;  %v1702_v31 = vld [vmem:[%s18905_s1 + $0x1e8] sm:$0xff] }
  0xea   :  { %1927 = vperm.xlu1 %14439, %v15194_v61   ;;  %1932 = vperm.xlu0 %14438, %v15189_v58   ;;  %v1689_v58 = vld [vmem:[%s18905_s1 + $0x180] sm:$0xff]  ;;  %v1690_v61 = vld [vmem:[%s18905_s1 + $0x188] sm:$0xff] }
  0xeb   :  { %13611 = vmatprep.mubr.msk.f32.mxu1 %vm23_vm0, %v785_v51  ;;  %v1578_v51 = vld [vmem:[#allocation2 + $0x10] sm:$0xff] }
  0xec   :  { %v667_v53 = vpop.permute.xlu1 %666  ;;  %v662_v50 = vpop.permute.xlu0 %661  ;;  %13612 = vmatmul.mubr.msk.f32.gmra.mxu1 %vm23_vm0, %v786_v35 }
  0xed   :  { %v788_v12 = vmul.f32 %v667_v53, %v340_v13  ;;  %v787_v56 = vmul.f32 %v662_v50, %v339_v34  ;;  %v1577_v13 = vld [vmem:[#allocation2 + $0x8] sm:$0xff]  ;;  %v1703_v34 = vld [vmem:[%s18905_s1 + $0x1f0] sm:$0xff]  ;;  %v1704_v53 = vld [vmem:[%s18905_s1 + $0x1f8] sm:$0xff] }
  0xee   :  { %1937 = vperm.xlu1 %14439, %v15214_v20   ;;  %1942 = vperm.xlu0 %14438, %v15209_v15   ;;  %v344_v15 = vld [vmem:[#allocation2 + $0x1af] sm:$0xff] }
  0xef   :  { %13614 = vmatprep.mubr.msk.f32.mxu1 %vm23_vm0, %v787_v56 }
  0xf0   :  { %v677_v38 = vpop.permute.xlu1 %676  ;;  %v672_v4 = vpop.permute.xlu0 %671  ;;  %13615 = vmatmul.mubr.msk.f32.gmra.mxu1 %vm23_vm0, %v788_v12 }
  0xf1   :  { %v790_v17 = vmul.f32 %v677_v38, %v342_v0  ;;  %v789_v20 = vmul.f32 %v672_v4, %v341_v55  ;;  %v1579_v55 = vld [vmem:[#allocation2 + $0x18] sm:$0xff]  ;;  %v2927_v38 = vld [vmem:[%s18905_s1] sm:$0xff]  ;;  %v2928_v4 = vld [vmem:[%s18905_s1 + $0x8] sm:$0xff] }
  0xf2   :  { %1947 = vperm.xlu1 %14439, %v1689_v58   ;;  %1952 = vperm.xlu0 %14438, %v1690_v61   ;;  %v1580_v58 = vld [vmem:[#allocation2 + $0x20] sm:$0xff]  ;;  %v12493_v61 = vld [vmem:[%s18906_s2 + $0x8] sm:$0xf] }
  0xf3   :  { %13617 = vmatprep.mubr.msk.f32.mxu1 %vm23_vm0, %v789_v20  ;;  %13736 = vmatprep.subr.msk.mxu0 %vm1060_vm1, %v12493_v61 }
  0xf4   :  { %v687_v16 = vpop.permute.xlu1 %686  ;;  %v682_v46 = vpop.permute.xlu0 %681  ;;  %13618 = vmatmul.mubr.msk.f32.gmra.mxu1 %vm23_vm0, %v790_v17  ;;  %13737 = vmatpush3.msk.msra.mxu0 %vm1060_vm1, %v12493_v61 }
  0xf5   :  { %v792_v3 = vmul.f32 %v687_v16, %v344_v15  ;;  %v791_v7 = vmul.f32 %v682_v46, %v343_v43  ;;  %v14544_v43 = vmov 2   ;;  %v1582_v16 = vld [vmem:[#allocation2 + $0x30] sm:$0xff] }
  0xf6   :  { %1957 = vperm.xlu1 %14439, %v1691_v60   ;;  %1962 = vperm.xlu0 %14438, %v1692_v59   ;;  %v1581_v59 = vld [vmem:[#allocation2 + $0x28] sm:$0xff]  ;;  %v2929_v46 = vld [vmem:[%s18905_s1 + $0x10] sm:$0xff] }
  0xf7   :  { %13620 = vmatprep.mubr.msk.f32.mxu1 %vm23_vm0, %v791_v7 }
  0xf8   :  { %v697_v19 = vpop.permute.xlu1 %696  ;;  %v692_v25 = vpop.permute.xlu0 %691  ;;  %13621 = vmatmul.mubr.msk.f32.gmra.mxu1 %vm23_vm0, %v792_v3  ;;  %v2931_v3 = vld [vmem:[%s18905_s1 + $0x20] sm:$0xff] }
  0xf9   :  { %v794_v6 = vmul.f32 %v697_v19, %v346_v2  ;;  %v793_v54 = vmul.f32 %v692_v25, %v345_v63  ;;  %v1584_v19 = vld [vmem:[#allocation2 + $0x40] sm:$0xff]  ;;  %v2930_v25 = vld [vmem:[%s18905_s1 + $0x18] sm:$0xff] }
  0xfa   :  { %1967 = vperm.xlu1 %14439, %v1693_v26   ;;  %1972 = vperm.xlu0 %14438, %v1694_v18   ;;  %v1583_v18 = vld [vmem:[#allocation2 + $0x38] sm:$0xff] }
  0xfb   :  { %13623 = vmatprep.mubr.msk.f32.mxu1 %vm23_vm0, %v793_v54 }
  0xfc   :  { %v707_v30 = vpop.permute.xlu1 %706  ;;  %v702_v23 = vpop.permute.xlu0 %701  ;;  %13624 = vmatmul.mubr.msk.f32.gmra.mxu1 %vm23_vm0, %v794_v6  ;;  %v2933_v6 = vld [vmem:[%s18905_s1 + $0x30] sm:$0xff] }
  0xfd   :  { %v796_v22 = vmul.f32 %v707_v30, %v348_v57  ;;  %v795_v9 = vmul.f32 %v702_v23, %v347_v40  ;;  %v1586_v30 = vld [vmem:[#allocation2 + $0x50] sm:$0xff]  ;;  %v2932_v23 = vld [vmem:[%s18905_s1 + $0x28] sm:$0xff] }
  0xfe   :  { %1977 = vperm.xlu1 %14439, %v1695_v62   ;;  %1982 = vperm.xlu0 %14438, %v1696_v39   ;;  %v1585_v39 = vld [vmem:[#allocation2 + $0x48] sm:$0xff] }
  0xff   :  { %13626 = vmatprep.mubr.msk.f32.mxu1 %vm23_vm0, %v795_v9 }
 0x100   :  { %v717_v28 = vpop.permute.xlu1 %716  ;;  %v712_v24 = vpop.permute.xlu0 %711  ;;  %13627 = vmatmul.mubr.msk.f32.gmra.mxu1 %vm23_vm0, %v796_v22  ;;  %v2935_v22 = vld [vmem:[%s18905_s1 + $0x40] sm:$0xff] }
 0x101   :  { %v798_v41 = vmul.f32 %v717_v28, %v350_v21  ;;  %v797_v14 = vmul.f32 %v712_v24, %v349_v8  ;;  %v1588_v28 = vld [vmem:[#allocation2 + $0x60] sm:$0xff]  ;;  %v2934_v24 = vld [vmem:[%s18905_s1 + $0x38] sm:$0xff] }
 0x102   :  { %1987 = vperm.xlu1 %14439, %v1697_v42   ;;  %1992 = vperm.xlu0 %14438, %v1698_v29   ;;  %v1587_v29 = vld [vmem:[#allocation2 + $0x58] sm:$0xff] }
 0x103   :  { %13629 = vmatprep.mubr.msk.f32.mxu1 %vm23_vm0, %v797_v14 }
 0x104   :  { %v727_v48 = vpop.permute.xlu1 %726  ;;  %v722_v27 = vpop.permute.xlu0 %721  ;;  %13630 = vmatmul.mubr.msk.f32.gmra.mxu1 %vm23_vm0, %v798_v41  ;;  %v2937_v41 = vld [vmem:[%s18905_s1 + $0x50] sm:$0xff] }
 0x105   :  { %v800_v47 = vmul.f32 %v727_v48, %v352_v5  ;;  %v799_v37 = vmul.f32 %v722_v27, %v351_v33  ;;  %v1590_v48 = vld [vmem:[#allocation2 + $0x70] sm:$0xff]  ;;  %v2936_v27 = vld [vmem:[%s18905_s1 + $0x48] sm:$0xff] }
 0x106   :  { %1997 = vperm.xlu1 %14439, %v1699_v32   ;;  %2002 = vperm.xlu0 %14438, %v1700_v11   ;;  %v1589_v11 = vld [vmem:[#allocation2 + $0x68] sm:$0xff] }
 0x107   :  { %13632 = vmatprep.mubr.msk.f32.mxu1 %vm23_vm0, %v799_v37 }
 0x108   :  { %v737_v52 = vpop.permute.xlu1 %736  ;;  %v732_v45 = vpop.permute.xlu0 %731  ;;  %13633 = vmatmul.mubr.msk.f32.gmra.mxu1 %vm23_vm0, %v800_v47  ;;  %v2939_v47 = vld [vmem:[%s18905_s1 + $0x60] sm:$0xff] }
 0x109   :  { %v802_v44 = vmul.f32 %v737_v52, %v354_v36  ;;  %v801_v35 = vmul.f32 %v732_v45, %v353_v10  ;;  %v1592_v52 = vld [vmem:[#allocation2 + $0x80] sm:$0xff]  ;;  %v2938_v45 = vld [vmem:[%s18905_s1 + $0x58] sm:$0xff] }
 0x10a   :  { %2007 = vperm.xlu1 %14439, %v1701_v1   ;;  %2012 = vperm.xlu0 %14438, %v1702_v31   ;;  %v1591_v31 = vld [vmem:[#allocation2 + $0x78] sm:$0xff] }
 0x10b   :  { %13635 = vmatprep.mubr.msk.f32.mxu1 %vm23_vm0, %v801_v35 }
 0x10c   :  { %13636 = vmatmul.mubr.msk.f32.gmra.mxu1 %vm23_vm0, %v802_v44  ;;  %v2941_v44 = vld [vmem:[%s18905_s1 + $0x70] sm:$0xff] }
 0x10d   :  { %v1713_v50 = vpop.permute.xlu1 %1712  ;;  %v1708_v12 = vpop.permute.xlu0 %1707 }
 0x10e   :  { %v2026_v56 = vmul.f32 %v1713_v50, %v1578_v51  ;;  %v2025_v0 = vmul.f32 %v1708_v12, %v1577_v13  ;;  %2017 = vperm.xlu1 %14439, %v1703_v34   ;;  %2022 = vperm.xlu0 %14438, %v1704_v53   ;;  %v1593_v53 = vld [vmem:[#allocation2 + $0x88] sm:$0xff]  ;;  %v1594_v50 = vld [vmem:[#allocation2 + $0x90] sm:$0xff] }
 0x10f   :  { %v2940_v12 = vld [vmem:[%s18905_s1 + $0x68] sm:$0xff] }
 0x110   :  { %13640 = vmatprep.mubr.msk.f32.mxu1 %vm23_vm0, %v2025_v0 }
 0x111   :  { %v1718_v17 = vpop.permute.xlu1 %1717  ;;  %13641 = vmatmul.mubr.msk.f32.vlgmr.msra.gmra.mxu1 %vm23_vm0, %v2026_v56  ;;  %v1723_v20 = vpop.permute.xlu0 %1722  ;;  %v2943_v56 = vld [vmem:[%s18905_s1 + $0x80] sm:$0xff] }
 0x112   :  { %v2027_v15 = vmul.f32 %v1718_v17, %v1579_v55  ;;  %14440 = vset.pattern.permute.xlu1 %v14544_v43  ;;  %14441 = vset.pattern.permute.xlu0 %v14544_v43  ;;  %v2028_v60 = vmul.f32 %v1723_v20, %v1580_v58  ;;  %v2942_v17 = vld [vmem:[%s18905_s1 + $0x78] sm:$0xff]  ;;  %v2945_v20 = vld [vmem:[%s18905_s1 + $0x90] sm:$0xff] }
 0x113   :  { %2993 = vperm.xlu1 %14440, %v2927_v38   ;;  %2998 = vperm.xlu0 %14441, %v2928_v4   ;;  %v1595_v38 = vld [vmem:[#allocation2 + $0x98] sm:$0xff]  ;;  %v1596_v4 = vld [vmem:[#allocation2 + $0xa0] sm:$0xff] }
 0x114   :  { %13643 = vmatprep.mubr.msk.f32.mxu1 %vm23_vm0, %v2027_v15 }
 0x115   :  { %v1728_v7 = vpop.permute.xlu1 %1727  ;;  %13644 = vmatmul.mubr.msk.f32.gmra.mxu1 %vm23_vm0, %v2028_v60  ;;  %v1733_v2 = vpop.permute.xlu0 %1732 }
 0x116   :  { %v2029_v63 = vmul.f32 %v1728_v7, %v1581_v59  ;;  %v2030_v26 = vmul.f32 %v1733_v2, %v1582_v16  ;;  %v1597_v16 = vld [vmem:[#allocation2 + $0xa8] sm:$0xff]  ;;  %v2947_v7 = vld [vmem:[%s18905_s1 + $0xa0] sm:$0xff] }
 0x117   :  { %3003 = vperm.xlu1 %14440, %v2929_v46   ;;  %3013 = vperm.xlu0 %14441, %v2931_v3   ;;  %v1598_v46 = vld [vmem:[#allocation2 + $0xb0] sm:$0xff]  ;;  %v2944_v3 = vld [vmem:[%s18905_s1 + $0x88] sm:$0xff] }
 0x118   :  { %13646 = vmatprep.mubr.msk.f32.mxu1 %vm23_vm0, %v2029_v63 }
 0x119   :  { %v1738_v54 = vpop.permute.xlu1 %1737  ;;  %13647 = vmatmul.mubr.msk.f32.gmra.mxu1 %vm23_vm0, %v2030_v26  ;;  %v1743_v57 = vpop.permute.xlu0 %1742 }
 0x11a   :  { %v2031_v40 = vmul.f32 %v1738_v54, %v1583_v18  ;;  %v2032_v62 = vmul.f32 %v1743_v57, %v1584_v19  ;;  %v1599_v19 = vld [vmem:[#allocation2 + $0xb8] sm:$0xff]  ;;  %v2949_v54 = vld [vmem:[%s18905_s1 + $0xb0] sm:$0xff] }
 0x11b   :  { %3008 = vperm.xlu1 %14440, %v2930_v25   ;;  %3023 = vperm.xlu0 %14441, %v2933_v6   ;;  %v1600_v25 = vld [vmem:[#allocation2 + $0xc0] sm:$0xff]  ;;  %v2946_v6 = vld [vmem:[%s18905_s1 + $0x98] sm:$0xff] }
 0x11c   :  { %13649 = vmatprep.mubr.msk.f32.mxu1 %vm23_vm0, %v2031_v40 }
 0x11d   :  { %v1748_v9 = vpop.permute.xlu1 %1747  ;;  %13650 = vmatmul.mubr.msk.f32.gmra.mxu1 %vm23_vm0, %v2032_v62  ;;  %v1753_v21 = vpop.permute.xlu0 %1752 }
 0x11e   :  { %v2033_v8 = vmul.f32 %v1748_v9, %v1585_v39  ;;  %v2034_v42 = vmul.f32 %v1753_v21, %v1586_v30  ;;  %v1601_v30 = vld [vmem:[#allocation2 + $0xc8] sm:$0xff]  ;;  %v2951_v9 = vld [vmem:[%s18905_s1 + $0xc0] sm:$0xff] }
 0x11f   :  { %3018 = vperm.xlu1 %14440, %v2932_v23   ;;  %3033 = vperm.xlu0 %14441, %v2935_v22   ;;  %v1602_v23 = vld [vmem:[#allocation2 + $0xd0] sm:$0xff]  ;;  %v2948_v22 = vld [vmem:[%s18905_s1 + $0xa8] sm:$0xff] }
 0x120   :  { %13652 = vmatprep.mubr.msk.f32.mxu1 %vm23_vm0, %v2033_v8 }
 0x121   :  { %v1758_v14 = vpop.permute.xlu1 %1757  ;;  %13653 = vmatmul.mubr.msk.f32.gmra.mxu1 %vm23_vm0, %v2034_v42  ;;  %v1763_v5 = vpop.permute.xlu0 %1762 }
 0x122   :  { %v2035_v33 = vmul.f32 %v1758_v14, %v1587_v29  ;;  %v2036_v32 = vmul.f32 %v1763_v5, %v1588_v28  ;;  %v1603_v28 = vld [vmem:[#allocation2 + $0xd8] sm:$0xff]  ;;  %v2953_v14 = vld [vmem:[%s18905_s1 + $0xd0] sm:$0xff] }
 0x123   :  { %3028 = vperm.xlu1 %14440, %v2934_v24   ;;  %3043 = vperm.xlu0 %14441, %v2937_v41   ;;  %v1604_v24 = vld [vmem:[#allocation2 + $0xe0] sm:$0xff]  ;;  %v2950_v41 = vld [vmem:[%s18905_s1 + $0xb8] sm:$0xff] }
 0x124   :  { %13655 = vmatprep.mubr.msk.f32.mxu1 %vm23_vm0, %v2035_v33 }
 0x125   :  { %v1768_v37 = vpop.permute.xlu1 %1767  ;;  %13656 = vmatmul.mubr.msk.f32.gmra.mxu1 %vm23_vm0, %v2036_v32  ;;  %v1773_v36 = vpop.permute.xlu0 %1772 }
 0x126   :  { %v2037_v10 = vmul.f32 %v1768_v37, %v1589_v11  ;;  %v2038_v1 = vmul.f32 %v1773_v36, %v1590_v48  ;;  %v1605_v48 = vld [vmem:[#allocation2 + $0xe8] sm:$0xff]  ;;  %v2955_v37 = vld [vmem:[%s18905_s1 + $0xe0] sm:$0xff] }
 0x127   :  { %3038 = vperm.xlu1 %14440, %v2936_v27   ;;  %3053 = vperm.xlu0 %14441, %v2939_v47   ;;  %v1606_v27 = vld [vmem:[#allocation2 + $0xf0] sm:$0xff]  ;;  %v2952_v47 = vld [vmem:[%s18905_s1 + $0xc8] sm:$0xff] }
 0x128   :  { %13658 = vmatprep.mubr.msk.f32.mxu1 %vm23_vm0, %v2037_v10 }
 0x129   :  { %v1778_v35 = vpop.permute.xlu1 %1777  ;;  %13659 = vmatmul.mubr.msk.f32.gmra.mxu1 %vm23_vm0, %v2038_v1  ;;  %v1783_v51 = vpop.permute.xlu0 %1782 }
 0x12a   :  { %v2039_v13 = vmul.f32 %v1778_v35, %v1591_v31  ;;  %v2040_v34 = vmul.f32 %v1783_v51, %v1592_v52  ;;  %v1607_v52 = vld [vmem:[#allocation2 + $0xf8] sm:$0xff]  ;;  %v2957_v35 = vld [vmem:[%s18905_s1 + $0xf0] sm:$0xff] }
 0x12b   :  { %3048 = vperm.xlu1 %14440, %v2938_v45   ;;  %3063 = vperm.xlu0 %14441, %v2941_v44   ;;  %v1608_v45 = vld [vmem:[#allocation2 + $0x100] sm:$0xff]  ;;  %v2954_v44 = vld [vmem:[%s18905_s1 + $0xd8] sm:$0xff] }
 0x12c   :  { %13661 = vmatprep.mubr.msk.f32.mxu1 %vm23_vm0, %v2039_v13 }
 0x12d   :  { %v1788_v0 = vpop.permute.xlu1 %1787  ;;  %13662 = vmatmul.mubr.msk.f32.gmra.mxu1 %vm23_vm0, %v2040_v34  ;;  %v1793_v55 = vpop.permute.xlu0 %1792 }
 0x12e   :  { %v2041_v58 = vmul.f32 %v1788_v0, %v1593_v53  ;;  %v2042_v61 = vmul.f32 %v1793_v55, %v1594_v50  ;;  %v1609_v50 = vld [vmem:[#allocation2 + $0x108] sm:$0xff]  ;;  %v2959_v0 = vld [vmem:[%s18905_s1 + $0x100] sm:$0xff] }
 0x12f   :  { %3058 = vperm.xlu1 %14440, %v2940_v12   ;;  %3073 = vperm.xlu0 %14441, %v2943_v56   ;;  %v1610_v12 = vld [vmem:[#allocation2 + $0x110] sm:$0xff]  ;;  %v2956_v56 = vld [vmem:[%s18905_s1 + $0xe8] sm:$0xff] }
 0x130   :  { %13664 = vmatprep.mubr.msk.f32.mxu1 %vm23_vm0, %v2041_v58 }
 0x131   :  { %v1798_v15 = vpop.permute.xlu1 %1797  ;;  %13665 = vmatmul.mubr.msk.f32.gmra.mxu1 %vm23_vm0, %v2042_v61  ;;  %v1803_v43 = vpop.permute.xlu0 %1802 }
 0x132   :  { %v2043_v60 = vmul.f32 %v1798_v15, %v1595_v38  ;;  %v2044_v59 = vmul.f32 %v1803_v43, %v1596_v4  ;;  %v1611_v4 = vld [vmem:[#allocation2 + $0x118] sm:$0xff]  ;;  %v2961_v15 = vld [vmem:[%s18905_s1 + $0x110] sm:$0xff] }
 0x133   :  { %3068 = vperm.xlu1 %14440, %v2942_v17   ;;  %3083 = vperm.xlu0 %14441, %v2945_v20   ;;  %v1612_v17 = vld [vmem:[#allocation2 + $0x120] sm:$0xff]  ;;  %v2958_v20 = vld [vmem:[%s18905_s1 + $0xf8] sm:$0xff] }
 0x134   :  { %13667 = vmatprep.mubr.msk.f32.mxu1 %vm23_vm0, %v2043_v60 }
 0x135   :  { %v1808_v2 = vpop.permute.xlu1 %1807  ;;  %13668 = vmatmul.mubr.msk.f32.gmra.mxu1 %vm23_vm0, %v2044_v59  ;;  %v1813_v63 = vpop.permute.xlu0 %1812  ;;  %v804_v59 = vld [vmem:[#allocation3 + $0x8] sm:$0xff] }
 0x136   :  { %v2045_v26 = vmul.f32 %v1808_v2, %v1597_v16  ;;  %v2046_v18 = vmul.f32 %v1813_v63, %v1598_v46  ;;  %v803_v2 = vld [vmem:[#allocation3] sm:$0xff] }
 0x137   :  { %3078 = vperm.xlu1 %14440, %v2944_v3   ;;  %3093 = vperm.xlu0 %14441, %v2947_v7   ;;  %v1613_v7 = vld [vmem:[#allocation2 + $0x128] sm:$0xff] }
 0x138   :  { %13670 = vmatprep.mubr.msk.f32.mxu1 %vm23_vm0, %v2045_v26  ;;  %v1614_v26 = vld [vmem:[#allocation2 + $0x130] sm:$0xff] }
 0x139   :  { %v1818_v57 = vpop.permute.xlu1 %1817  ;;  %13671 = vmatmul.mubr.msk.f32.gmra.mxu1 %vm23_vm0, %v2046_v18  ;;  %v1823_v40 = vpop.permute.xlu0 %1822  ;;  %v2960_v18 = vld [vmem:[%s18905_s1 + $0x108] sm:$0xff] }
 0x13a   :  { %v2047_v62 = vmul.f32 %v1818_v57, %v1599_v19  ;;  %v2048_v39 = vmul.f32 %v1823_v40, %v1600_v25  ;;  %v2963_v19 = vld [vmem:[%s18905_s1 + $0x120] sm:$0xff] }
 0x13b   :  { %3088 = vperm.xlu1 %14440, %v2946_v6   ;;  %3103 = vperm.xlu0 %14441, %v2949_v54   ;;  %v806_v54 = vld [vmem:[#allocation3 + $0x18] sm:$0xff] }
 0x13c   :  { %13673 = vmatprep.mubr.msk.f32.mxu1 %vm23_vm0, %v2047_v62 }
 0x13d   :  { %v1828_v21 = vpop.permute.xlu1 %1827  ;;  %13674 = vmatmul.mubr.msk.f32.gmra.mxu1 %vm23_vm0, %v2048_v39  ;;  %v1833_v8 = vpop.permute.xlu0 %1832 }
 0x13e   :  { %v2049_v42 = vmul.f32 %v1828_v21, %v1601_v30  ;;  %v2050_v29 = vmul.f32 %v1833_v8, %v1602_v23  ;;  %v1615_v23 = vld [vmem:[#allocation2 + $0x138] sm:$0xff]  ;;  %v1616_v21 = vld [vmem:[#allocation2 + $0x140] sm:$0xff] }
 0x13f   :  { %3098 = vperm.xlu1 %14440, %v2948_v22   ;;  %3113 = vperm.xlu0 %14441, %v2951_v9   ;;  %v805_v22 = vld [vmem:[#allocation3 + $0x10] sm:$0xff]  ;;  %v2962_v8 = vld [vmem:[%s18905_s1 + $0x118] sm:$0xff] }
 0x140   :  { %13676 = vmatprep.mubr.msk.f32.mxu1 %vm23_vm0, %v2049_v42  ;;  %v2965_v42 = vld [vmem:[%s18905_s1 + $0x130] sm:$0xff] }
 0x141   :  { %v1838_v5 = vpop.permute.xlu1 %1837  ;;  %13677 = vmatmul.mubr.msk.f32.gmra.mxu1 %vm23_vm0, %v2050_v29  ;;  %v1843_v33 = vpop.permute.xlu0 %1842 }
 0x142   :  { %v2051_v32 = vmul.f32 %v1838_v5, %v1603_v28  ;;  %v2052_v11 = vmul.f32 %v1843_v33, %v1604_v24  ;;  %v808_v24 = vld [vmem:[#allocation3 + $0x28] sm:$0xff] }
 0x143   :  { %3108 = vperm.xlu1 %14440, %v2950_v41   ;;  %3123 = vperm.xlu0 %14441, %v2953_v14  }
 0x144   :  { %13679 = vmatprep.mubr.msk.f32.mxu1 %vm23_vm0, %v2051_v32 }
 0x145   :  { %v1848_v36 = vpop.permute.xlu1 %1847  ;;  %13680 = vmatmul.mubr.msk.f32.gmra.mxu1 %vm23_vm0, %v2052_v11  ;;  %v1853_v10 = vpop.permute.xlu0 %1852  ;;  %v1617_v11 = vld [vmem:[#allocation2 + $0x148] sm:$0xff] }
 0x146   :  { %v2053_v1 = vmul.f32 %v1848_v36, %v1605_v48  ;;  %v2054_v31 = vmul.f32 %v1853_v10, %v1606_v27  ;;  %v807_v48 = vld [vmem:[#allocation3 + $0x20] sm:$0xff]  ;;  %v2967_v36 = vld [vmem:[%s18905_s1 + $0x140] sm:$0xff] }
 0x147   :  { %3118 = vperm.xlu1 %14440, %v2952_v47   ;;  %3133 = vperm.xlu0 %14441, %v2955_v37   ;;  %v13544_v3 = vpop.f32.mrf.mxu0  ;;  %v1618_v47 = vld [vmem:[#allocation2 + $0x150] sm:$0xff]  ;;  %v2964_v37 = vld [vmem:[%s18905_s1 + $0x128] sm:$0xff] }
 0x148   :  { %13682 = vmatprep.mubr.msk.f32.mxu1 %vm23_vm0, %v2053_v1  ;;  %v1450_v63 = vadd.f32 %v13544_v3, %v804_v59  ;;  %v1622_v59 = vld [vmem:[#allocation2 + $0x170] sm:$0xff] }
 0x149   :  { %v1858_v51 = vpop.permute.xlu1 %1857  ;;  %13683 = vmatmul.mubr.msk.f32.gmra.mxu1 %vm23_vm0, %v2054_v31  ;;  %v1863_v13 = vpop.permute.xlu0 %1862  ;;  %v810_v31 = vld [vmem:[#allocation3 + $0x38] sm:$0xff] }
 0x14a   :  { %v2055_v34 = vmul.f32 %v1858_v51, %v1607_v52  ;;  %v2056_v53 = vmul.f32 %v1863_v13, %v1608_v45  ;;  %v1130_v6 = vpop.f32.mrf.mxu0  ;;  %1514 = vst.msk [vmem:[#allocation3 + $0x8] sm:$0xff] %vm226_vm2, %v1450_v63  ;;  %v1619_v13 = vld [vmem:[#allocation2 + $0x158] sm:$0xff] }
 0x14b   :  { %3128 = vperm.xlu1 %14440, %v2954_v44   ;;  %3143 = vperm.xlu0 %14441, %v2957_v35   ;;  %v1449_v40 = vadd.f32 %v1130_v6, %v803_v2  ;;  %v814_v2 = vld [vmem:[#allocation3 + $0x58] sm:$0xff]  ;;  %v1623_v6 = vld [vmem:[#allocation2 + $0x178] sm:$0xff] }
 0x14c   :  { %13685 = vmatprep.mubr.msk.f32.mxu1 %vm23_vm0, %v2055_v34  ;;  %v13547_v30 = vpop.f32.mrf.mxu0  ;;  %v809_v34 = vld [vmem:[#allocation3 + $0x30] sm:$0xff] }
 0x14d   :  { %v1868_v55 = vpop.permute.xlu1 %1867  ;;  %13686 = vmatmul.mubr.msk.f32.gmra.mxu1 %vm23_vm0, %v2056_v53  ;;  %v1873_v58 = vpop.permute.xlu0 %1872  ;;  %1513 = vst.msk [vmem:[#allocation3] sm:$0xff] %vm226_vm2, %v1449_v40  ;;  %v1452_v9 = vadd.f32 %v13547_v30, %v806_v54  ;;  %v813_v54 = vld [vmem:[#allocation3 + $0x50] sm:$0xff] }
 0x14e   :  { %v2057_v61 = vmul.f32 %v1868_v55, %v1609_v50  ;;  %v2058_v38 = vmul.f32 %v1873_v58, %v1610_v12  ;;  %v1140_v28 = vpop.f32.mrf.mxu0  ;;  %v1620_v50 = vld [vmem:[#allocation2 + $0x160] sm:$0xff]  ;;  %v2966_v12 = vld [vmem:[%s18905_s1 + $0x138] sm:$0xff] }
 0x14f   :  { %3138 = vperm.xlu1 %14440, %v2956_v56   ;;  %3153 = vperm.xlu0 %14441, %v2959_v0   ;;  %1516 = vst.msk [vmem:[#allocation3 + $0x18] sm:$0xff] %vm226_vm2, %v1452_v9  ;;  %v1451_v14 = vadd.f32 %v1140_v28, %v805_v22  ;;  %v2969_v56 = vld [vmem:[%s18905_s1 + $0x150] sm:$0xff]  ;;  %v812_v58 = vld [vmem:[#allocation3 + $0x48] sm:$0xff]  ;;  %v1624_v40 = vld [vmem:[#allocation2 + $0x180] sm:$0xff] }
 0x150   :  { %13688 = vmatprep.mubr.msk.f32.mxu1 %vm23_vm0, %v2057_v61  ;;  %v816_v22 = vld [vmem:[#allocation3 + $0x68] sm:$0xff]  ;;  %v1625_v28 = vld [vmem:[#allocation2 + $0x188] sm:$0xff] }
 0x151   :  { %v1878_v43 = vpop.permute.xlu1 %1877  ;;  %13689 = vmatmul.mubr.msk.f32.gmra.mxu1 %vm23_vm0, %v2058_v38  ;;  %v1883_v60 = vpop.permute.xlu0 %1882  ;;  %1515 = vst.msk [vmem:[#allocation3 + $0x10] sm:$0xff] %vm226_vm2, %v1451_v14  ;;  %v1626_v14 = vld [vmem:[#allocation2 + $0x190] sm:$0xff] }
 0x152   :  { %v2059_v16 = vmul.f32 %v1878_v43, %v1611_v4  ;;  %v2060_v46 = vmul.f32 %v1883_v60, %v1612_v17  ;;  %v811_v43 = vld [vmem:[#allocation3 + $0x40] sm:$0xff] }
 0x153   :  { %3148 = vperm.xlu1 %14440, %v2958_v20   ;;  %3163 = vperm.xlu0 %14441, %v2961_v15   ;;  %v1621_v15 = vld [vmem:[#allocation2 + $0x168] sm:$0xff] }
 0x154   :  { %13691 = vmatprep.mubr.msk.f32.mxu1 %vm23_vm0, %v2059_v16  ;;  %v13550_v32 = vpop.f32.mrf.mxu0  ;;  %v2968_v16 = vld [vmem:[%s18905_s1 + $0x148] sm:$0xff] }
 0x155   :  { %v1888_v25 = vpop.permute.xlu1 %1887  ;;  %13692 = vmatmul.mubr.msk.f32.gmra.mxu1 %vm23_vm0, %v2060_v46  ;;  %v1893_v62 = vpop.permute.xlu0 %1892  ;;  %v1454_v27 = vadd.f32 %v13550_v32, %v808_v24  ;;  %v2971_v46 = vld [vmem:[%s18905_s1 + $0x160] sm:$0xff]  ;;  %v815_v24 = vld [vmem:[#allocation3 + $0x60] sm:$0xff] }
 0x156   :  { %v2061_v57 = vmul.f32 %v1888_v25, %v1613_v7  ;;  %v2062_v39 = vmul.f32 %v1893_v62, %v1614_v26  ;;  %v1150_v1 = vpop.f32.mrf.mxu0  ;;  %v2970_v62 = vld [vmem:[%s18905_s1 + $0x158] sm:$0xff] }
 0x157   :  { %3158 = vperm.xlu1 %14440, %v2960_v18   ;;  %3173 = vperm.xlu0 %14441, %v2963_v19   ;;  %1518 = vst.msk [vmem:[#allocation3 + $0x28] sm:$0xff] %vm226_vm2, %v1454_v27  ;;  %v1453_v45 = vadd.f32 %v1150_v1, %v807_v48  ;;  %v818_v48 = vld [vmem:[#allocation3 + $0x78] sm:$0xff]  ;;  %v1627_v1 = vld [vmem:[#allocation2 + $0x198] sm:$0xff] }
 0x158   :  { %13694 = vmatprep.mubr.msk.f32.mxu1 %vm23_vm0, %v2061_v57  ;;  %v13553_v51 = vpop.f32.mrf.mxu0 }
 0x159   :  { %v1898_v29 = vpop.permute.xlu1 %1897  ;;  %13695 = vmatmul.mubr.msk.f32.gmra.mxu1 %vm23_vm0, %v2062_v39  ;;  %v1903_v5 = vpop.permute.xlu0 %1902  ;;  %1517 = vst.msk [vmem:[#allocation3 + $0x20] sm:$0xff] %vm226_vm2, %v1453_v45  ;;  %v1456_v53 = vadd.f32 %v13553_v51, %v810_v31  ;;  %v2973_v39 = vld [vmem:[%s18905_s1 + $0x170] sm:$0xff]  ;;  %v817_v31 = vld [vmem:[#allocation3 + $0x70] sm:$0xff] }
 0x15a   :  { %v2063_v41 = vmul.f32 %v1898_v29, %v1615_v23  ;;  %v2064_v33 = vmul.f32 %v1903_v5, %v1616_v21  ;;  %v1160_v55 = vpop.f32.mrf.mxu0  ;;  %v2972_v5 = vld [vmem:[%s18905_s1 + $0x168] sm:$0xff]  ;;  %v1628_v45 = vld [vmem:[#allocation2 + $0x1a0] sm:$0xff] }
 0x15b   :  { %3168 = vperm.xlu1 %14440, %v2962_v8   ;;  %3183 = vperm.xlu0 %14441, %v2965_v42   ;;  %1520 = vst.msk [vmem:[#allocation3 + $0x38] sm:$0xff] %vm226_vm2, %v1456_v53  ;;  %v1455_v38 = vadd.f32 %v1160_v55, %v809_v34  ;;  %v820_v34 = vld [vmem:[#allocation3 + $0x88] sm:$0xff]  ;;  %v1629_v55 = vld [vmem:[#allocation2 + $0x1a8] sm:$0xff] }
 0x15c   :  { %13697 = vmatprep.mubr.msk.f32.mxu1 %vm23_vm0, %v2063_v41  ;;  %v13556_v20 = vpop.f32.mrf.mxu0 }
 0x15d   :  { %v1908_v10 = vpop.permute.xlu1 %1907  ;;  %13698 = vmatmul.mubr.msk.f32.gmra.mxu1 %vm23_vm0, %v2064_v33  ;;  %v1913_v44 = vpop.permute.xlu0 %1912  ;;  %1519 = vst.msk [vmem:[#allocation3 + $0x30] sm:$0xff] %vm226_vm2, %v1455_v38  ;;  %v1458_v60 = vadd.f32 %v13556_v20, %v812_v58  ;;  %v2975_v33 = vld [vmem:[%s18905_s1 + $0x180] sm:$0xff]  ;;  %v819_v58 = vld [vmem:[#allocation3 + $0x80] sm:$0xff] }
 0x15e   :  { %v2065_v52 = vmul.f32 %v1908_v10, %v1617_v11  ;;  %v2066_v35 = vmul.f32 %v1913_v44, %v1618_v47  ;;  %v1170_v7 = vpop.f32.mrf.mxu0  ;;  %v2974_v44 = vld [vmem:[%s18905_s1 + $0x178] sm:$0xff]  ;;  %v1630_v38 = vld [vmem:[#allocation2 + $0x1b0] sm:$0xff] }
 0x15f   :  { %3178 = vperm.xlu1 %14440, %v2964_v37   ;;  %3193 = vperm.xlu0 %14441, %v2967_v36   ;;  %1522 = vst.msk [vmem:[#allocation3 + $0x48] sm:$0xff] %vm226_vm2, %v1458_v60  ;;  %v1457_v26 = vadd.f32 %v1170_v7, %v811_v43  ;;  %v822_v43 = vld [vmem:[#allocation3 + $0x98] sm:$0xff]  ;;  %v1631_v7 = vld [vmem:[#allocation2 + $0x1b8] sm:$0xff] }
 0x160   :  { %13700 = vmatprep.mubr.msk.f32.mxu1 %vm23_vm0, %v2065_v52  ;;  %v13559_v25 = vpop.f32.mrf.mxu0 }
 0x161   :  { %v1918_v0 = vpop.permute.xlu1 %1917  ;;  %13701 = vmatmul.mubr.msk.f32.gmra.mxu1 %vm23_vm0, %v2066_v35  ;;  %v1923_v4 = vpop.permute.xlu0 %1922  ;;  %1521 = vst.msk [vmem:[#allocation3 + $0x40] sm:$0xff] %vm226_vm2, %v1457_v26  ;;  %v1460_v57 = vadd.f32 %v13559_v25, %v814_v2  ;;  %v2977_v35 = vld [vmem:[%s18905_s1 + $0x190] sm:$0xff]  ;;  %v821_v2 = vld [vmem:[#allocation3 + $0x90] sm:$0xff] }
 0x162   :  { %v2067_v61 = vmul.f32 %v1918_v0, %v1619_v13  ;;  %v2068_v17 = vmul.f32 %v1923_v4, %v1620_v50  ;;  %v1180_v23 = vpop.f32.mrf.mxu0  ;;  %v2976_v4 = vld [vmem:[%s18905_s1 + $0x188] sm:$0xff]  ;;  %v1632_v26 = vld [vmem:[#allocation2 + $0x1c0] sm:$0xff] }
 0x163   :  { %3188 = vperm.xlu1 %14440, %v2966_v12   ;;  %3203 = vperm.xlu0 %14441, %v2969_v56   ;;  %1524 = vst.msk [vmem:[#allocation3 + $0x58] sm:$0xff] %vm226_vm2, %v1460_v57  ;;  %v1459_v21 = vadd.f32 %v1180_v23, %v813_v54  ;;  %v824_v54 = vld [vmem:[#allocation3 + $0xa8] sm:$0xff]  ;;  %v1633_v23 = vld [vmem:[#allocation2 + $0x1c8] sm:$0xff] }
 0x164   :  { %13703 = vmatprep.mubr.msk.f32.mxu1 %vm23_vm0, %v2067_v61  ;;  %v13562_v29 = vpop.f32.mrf.mxu0 }
 0x165   :  { %v1928_v3 = vpop.permute.xlu1 %1927  ;;  %13704 = vmatmul.mubr.msk.f32.gmra.mxu1 %vm23_vm0, %v2068_v17  ;;  %v1933_v18 = vpop.permute.xlu0 %1932  ;;  %1523 = vst.msk [vmem:[#allocation3 + $0x50] sm:$0xff] %vm226_vm2, %v1459_v21  ;;  %v1462_v41 = vadd.f32 %v13562_v29, %v816_v22  ;;  %v2979_v17 = vld [vmem:[%s18905_s1 + $0x1a0] sm:$0xff]  ;;  %v823_v22 = vld [vmem:[#allocation3 + $0xa0] sm:$0xff] }
 0x166   :  { %v2069_v63 = vmul.f32 %v1928_v3, %v1621_v15  ;;  %v2070_v19 = vmul.f32 %v1933_v18, %v1622_v59  ;;  %v1190_v11 = vpop.f32.mrf.mxu0  ;;  %v2978_v18 = vld [vmem:[%s18905_s1 + $0x198] sm:$0xff]  ;;  %v1634_v21 = vld [vmem:[#allocation2 + $0x1d0] sm:$0xff] }
 0x167   :  { %3198 = vperm.xlu1 %14440, %v2968_v16   ;;  %3213 = vperm.xlu0 %14441, %v2971_v46   ;;  %1526 = vst.msk [vmem:[#allocation3 + $0x68] sm:$0xff] %vm226_vm2, %v1462_v41  ;;  %v1461_v47 = vadd.f32 %v1190_v11, %v815_v24  ;;  %v826_v24 = vld [vmem:[#allocation3 + $0xb8] sm:$0xff]  ;;  %v1635_v11 = vld [vmem:[#allocation2 + $0x1d8] sm:$0xff] }
 0x168   :  { %13706 = vmatprep.mubr.msk.f32.mxu1 %vm23_vm0, %v2069_v63 }
 0x169   :  { %v1938_v30 = vpop.permute.xlu1 %1937  ;;  %13707 = vmatmul.mubr.msk.f32.gmra.mxu1 %vm23_vm0, %v2070_v19  ;;  %v1943_v8 = vpop.permute.xlu0 %1942  ;;  %1525 = vst.msk [vmem:[#allocation3 + $0x60] sm:$0xff] %vm226_vm2, %v1461_v47  ;;  %v2981_v19 = vld [vmem:[%s18905_s1 + $0x1b0] sm:$0xff]  ;;  %v1636_v47 = vld [vmem:[#allocation2 + $0x1e0] sm:$0xff] }
 0x16a   :  { %v2071_v9 = vmul.f32 %v1938_v30, %v1623_v6  ;;  %v2072_v42 = vmul.f32 %v1943_v8, %v1624_v40  ;;  %v2980_v8 = vld [vmem:[%s18905_s1 + $0x1a8] sm:$0xff] }
 0x16b   :  { %3208 = vperm.xlu1 %14440, %v2970_v62   ;;  %3223 = vperm.xlu0 %14441, %v2973_v39  }
 0x16c   :  { %13709 = vmatprep.mubr.msk.f32.mxu1 %vm23_vm0, %v2071_v9  ;;  %v13565_v10 = vpop.f32.mrf.mxu0 }
 0x16d   :  { %v1948_v32 = vpop.permute.xlu1 %1947  ;;  %13710 = vmatmul.mubr.msk.f32.gmra.mxu1 %vm23_vm0, %v2072_v42  ;;  %v1953_v37 = vpop.permute.xlu0 %1952  ;;  %v1464_v52 = vadd.f32 %v13565_v10, %v818_v48  ;;  %v2983_v42 = vld [vmem:[%s18905_s1 + $0x1c0] sm:$0xff] }
 0x16e   :  { %v2073_v27 = vmul.f32 %v1948_v32, %v1625_v28  ;;  %v2074_v36 = vmul.f32 %v1953_v37, %v1626_v14  ;;  %v1200_v13 = vpop.f32.mrf.mxu0  ;;  %v825_v48 = vld [vmem:[#allocation3 + $0xb0] sm:$0xff]  ;;  %v2982_v37 = vld [vmem:[%s18905_s1 + $0x1b8] sm:$0xff] }
 0x16f   :  { %3218 = vperm.xlu1 %14440, %v2972_v5   ;;  %3233 = vperm.xlu0 %14441, %v2975_v33   ;;  %1528 = vst.msk [vmem:[#allocation3 + $0x78] sm:$0xff] %vm226_vm2, %v1464_v52  ;;  %v1463_v50 = vadd.f32 %v1200_v13, %v817_v31  ;;  %v828_v31 = vld [vmem:[#allocation3 + $0xc8] sm:$0xff]  ;;  %v1637_v13 = vld [vmem:[#allocation2 + $0x1e8] sm:$0xff] }
 0x170   :  { %13712 = vmatprep.mubr.msk.f32.mxu1 %vm23_vm0, %v2073_v27  ;;  %v13568_v0 = vpop.f32.mrf.mxu0 }
 0x171   :  { %v1958_v51 = vpop.permute.xlu1 %1957  ;;  %13713 = vmatmul.mubr.msk.f32.gmra.mxu1 %vm23_vm0, %v2074_v36  ;;  %v1963_v12 = vpop.permute.xlu0 %1962  ;;  %1527 = vst.msk [vmem:[#allocation3 + $0x70] sm:$0xff] %vm226_vm2, %v1463_v50  ;;  %v1466_v61 = vadd.f32 %v13568_v0, %v820_v34  ;;  %v2985_v36 = vld [vmem:[%s18905_s1 + $0x1d0] sm:$0xff] }
 0x172   :  { %v2075_v53 = vmul.f32 %v1958_v51, %v1627_v1  ;;  %v2076_v56 = vmul.f32 %v1963_v12, %v1628_v45  ;;  %v1210_v15 = vpop.f32.mrf.mxu0  ;;  %v827_v34 = vld [vmem:[#allocation3 + $0xc0] sm:$0xff]  ;;  %v2984_v12 = vld [vmem:[%s18905_s1 + $0x1c8] sm:$0xff] }
 0x173   :  { %3228 = vperm.xlu1 %14440, %v2974_v44   ;;  %3243 = vperm.xlu0 %14441, %v2977_v35   ;;  %1530 = vst.msk [vmem:[#allocation3 + $0x88] sm:$0xff] %vm226_vm2, %v1466_v61  ;;  %v1465_v59 = vadd.f32 %v1210_v15, %v819_v58  ;;  %v1638_v50 = vld [vmem:[#allocation2 + $0x1f0] sm:$0xff]  ;;  %v830_v58 = vld [vmem:[#allocation3 + $0xd8] sm:$0xff] }
 0x174   :  { %13715 = vmatprep.mubr.msk.f32.mxu1 %vm23_vm0, %v2075_v53  ;;  %v13571_v3 = vpop.f32.mrf.mxu0 }
 0x175   :  { %v1968_v20 = vpop.permute.xlu1 %1967  ;;  %13716 = vmatmul.mubr.msk.f32.gmra.mxu1 %vm23_vm0, %v2076_v56  ;;  %v1973_v16 = vpop.permute.xlu0 %1972  ;;  %1529 = vst.msk [vmem:[#allocation3 + $0x80] sm:$0xff] %vm226_vm2, %v1465_v59  ;;  %v1468_v63 = vadd.f32 %v13571_v3, %v822_v43  ;;  %v2987_v56 = vld [vmem:[%s18905_s1 + $0x1e0] sm:$0xff]  ;;  %v1639_v43 = vld [vmem:[#allocation2 + $0x1f8] sm:$0xff]  ;;  %v2989_v3 = vld [vmem:[%s18905_s1 + $0x1f0] sm:$0xff] }
 0x176   :  { %v2077_v60 = vmul.f32 %v1968_v20, %v1629_v55  ;;  %v2078_v46 = vmul.f32 %v1973_v16, %v1630_v38  ;;  %v1220_v6 = vpop.f32.mrf.mxu0  ;;  %v1640_v16 = vld [vmem:[#allocation2 + $0x200] sm:$0xff] }
 0x177   :  { %3238 = vperm.xlu1 %14440, %v2976_v4   ;;  %3253 = vperm.xlu0 %14441, %v2979_v17   ;;  %1532 = vst.msk [vmem:[#allocation3 + $0x98] sm:$0xff] %vm226_vm2, %v1468_v63  ;;  %v1467_v40 = vadd.f32 %v1220_v6, %v821_v2  ;;  %v159_v17 = vld [vmem:[%s18904_s0 + $0x1f0] sm:$0xff]  ;;  %v832_v63 = vld [vmem:[#allocation3 + $0xe8] sm:$0xff] }
 0x178   :  { %13718 = vmatprep.mubr.msk.f32.mxu1 %vm23_vm0, %v2077_v60  ;;  %v13574_v30 = vpop.f32.mrf.mxu0  ;;  %v829_v60 = vld [vmem:[#allocation3 + $0xd0] sm:$0xff]  ;;  %224 = vst.msk [vmem:[#allocation2 + $0x208] sm:$0xff] %vm23_vm0, %v159_v17 }
 0x179   :  { %v1978_v25 = vpop.permute.xlu1 %1977  ;;  %13719 = vmatmul.mubr.msk.f32.gmra.mxu1 %vm23_vm0, %v2078_v46  ;;  %v1983_v62 = vpop.permute.xlu0 %1982  ;;  %1531 = vst.msk [vmem:[#allocation3 + $0x90] sm:$0xff] %vm226_vm2, %v1467_v40  ;;  %v1470_v9 = vadd.f32 %v13574_v30, %v824_v54  ;;  %v2986_v46 = vld [vmem:[%s18905_s1 + $0x1d8] sm:$0xff]  ;;  %v831_v54 = vld [vmem:[#allocation3 + $0xe0] sm:$0xff] }
 0x17a   :  { %v2079_v57 = vmul.f32 %v1978_v25, %v1631_v7  ;;  %v2080_v39 = vmul.f32 %v1983_v62, %v1632_v26  ;;  %v1230_v28 = vpop.f32.mrf.mxu0  ;;  %v2863_v40 = vld [vmem:[#allocation2 + $0x9] sm:$0xff] }
 0x17b   :  { %3248 = vperm.xlu1 %14440, %v2978_v18   ;;  %3263 = vperm.xlu0 %14441, %v2981_v19   ;;  %1534 = vst.msk [vmem:[#allocation3 + $0xa8] sm:$0xff] %vm226_vm2, %v1470_v9  ;;  %v1469_v14 = vadd.f32 %v1230_v28, %v823_v22  ;;  %v2988_v62 = vld [vmem:[%s18905_s1 + $0x1e8] sm:$0xff]  ;;  %v4213_v22 = vld [vmem:[%s18905_s1] sm:$0xff]  ;;  %v14545_v28 = vmov 3  }
 0x17c   :  { %13721 = vmatprep.mubr.msk.f32.mxu1 %vm23_vm0, %v2079_v57  ;;  %v13577_v32 = vpop.f32.mrf.mxu0 }
 0x17d   :  { %v1988_v29 = vpop.permute.xlu1 %1987  ;;  %13722 = vmatmul.mubr.msk.f32.gmra.mxu1 %vm23_vm0, %v2080_v39  ;;  %v1993_v5 = vpop.permute.xlu0 %1992  ;;  %1533 = vst.msk [vmem:[#allocation3 + $0xa0] sm:$0xff] %vm226_vm2, %v1469_v14  ;;  %v1472_v27 = vadd.f32 %v13577_v32, %v826_v24  ;;  %v2864_v39 = vld [vmem:[#allocation2 + $0x11] sm:$0xff]  ;;  %v833_v14 = vld [vmem:[#allocation3 + $0xf0] sm:$0xff] }
 0x17e   :  { %v2081_v41 = vmul.f32 %v1988_v29, %v1633_v23  ;;  %v2082_v33 = vmul.f32 %v1993_v5, %v1634_v21  ;;  %v1240_v1 = vpop.f32.mrf.mxu0  ;;  %v834_v23 = vld [vmem:[#allocation3 + $0xf8] sm:$0xff]  ;;  %v2865_v32 = vld [vmem:[#allocation2 + $0x19] sm:$0xff] }
 0x17f   :  { %3258 = vperm.xlu1 %14440, %v2980_v8   ;;  %3273 = vperm.xlu0 %14441, %v2983_v42   ;;  %1536 = vst.msk [vmem:[#allocation3 + $0xb8] sm:$0xff] %vm226_vm2, %v1472_v27  ;;  %v1471_v45 = vadd.f32 %v1240_v1, %v825_v48  ;;  %v836_v42 = vld [vmem:[#allocation3 + $0x108] sm:$0xff] }
 0x180   :  { %13724 = vmatprep.mubr.msk.f32.mxu1 %vm23_vm0, %v2081_v41  ;;  %v13580_v51 = vpop.f32.mrf.mxu0  ;;  %v2990_v48 = vld [vmem:[%s18905_s1 + $0x1f8] sm:$0xff] }
 0x181   :  { %v1998_v10 = vpop.permute.xlu1 %1997  ;;  %13725 = vmatmul.mubr.msk.f32.gmra.mxu1 %vm23_vm0, %v2082_v33  ;;  %v2003_v44 = vpop.permute.xlu0 %2002  ;;  %1535 = vst.msk [vmem:[#allocation3 + $0xb0] sm:$0xff] %vm226_vm2, %v1471_v45  ;;  %v1474_v53 = vadd.f32 %v13580_v51, %v828_v31  ;;  %v838_v31 = vld [vmem:[#allocation3 + $0x118] sm:$0xff] }
 0x182   :  { %v2083_v52 = vmul.f32 %v1998_v10, %v1635_v11  ;;  %v2084_v35 = vmul.f32 %v2003_v44, %v1636_v47  ;;  %v1250_v55 = vpop.f32.mrf.mxu0  ;;  %v835_v11 = vld [vmem:[#allocation3 + $0x100] sm:$0xff] }
 0x183   :  { %3268 = vperm.xlu1 %14440, %v2982_v37   ;;  %3283 = vperm.xlu0 %14441, %v2985_v36   ;;  %1538 = vst.msk [vmem:[#allocation3 + $0xc8] sm:$0xff] %vm226_vm2, %v1474_v53  ;;  %v1473_v38 = vadd.f32 %v1250_v55, %v827_v34  ;;  %v4216_v37 = vld [vmem:[%s18905_s1 + $0x18] sm:$0xff]  ;;  %v837_v34 = vld [vmem:[#allocation3 + $0x110] sm:$0xff]  ;;  %v12559_v53 = vld [vmem:[%s18906_s2 + $0xc] sm:$0xf] }
 0x184   :  { %13727 = vmatprep.mubr.msk.f32.mxu1 %vm23_vm0, %v2083_v52  ;;  %v13583_v15 = vpop.f32.mrf.mxu0  ;;  %13834 = vmatprep.subr.msk.mxu1 %vm1060_vm1, %v12559_v53 }
 0x185   :  { %v2008_v0 = vpop.permute.xlu1 %2007  ;;  %13728 = vmatmul.mubr.msk.f32.gmra.mxu1 %vm23_vm0, %v2084_v35  ;;  %v2013_v4 = vpop.permute.xlu0 %2012  ;;  %1537 = vst.msk [vmem:[#allocation3 + $0xc0] sm:$0xff] %vm226_vm2, %v1473_v38  ;;  %v1476_v59 = vadd.f32 %v13583_v15, %v830_v58  ;;  %v2867_v35 = vld [vmem:[#allocation2 + $0x29] sm:$0xff]  ;;  %v840_v58 = vld [vmem:[#allocation3 + $0x128] sm:$0xff] }
 0x186   :  { %v2085_v61 = vmul.f32 %v2008_v0, %v1637_v13  ;;  %v2086_v20 = vmul.f32 %v2013_v4, %v1638_v50  ;;  %v1260_v2 = vpop.f32.mrf.mxu0  ;;  %v2866_v13 = vld [vmem:[#allocation2 + $0x21] sm:$0xff]  ;;  %13835 = vmatpush3.msk.msra.mxu1 %vm1060_vm1, %v12559_v53 }
 0x187   :  { %3278 = vperm.xlu1 %14440, %v2984_v12   ;;  %3293 = vperm.xlu0 %14441, %v2987_v56   ;;  %1540 = vst.msk [vmem:[#allocation3 + $0xd8] sm:$0xff] %vm226_vm2, %v1476_v59  ;;  %v1475_v18 = vadd.f32 %v1260_v2, %v829_v60  ;;  %v4214_v12 = vld [vmem:[%s18905_s1 + $0x8] sm:$0xff]  ;;  %v839_v60 = vld [vmem:[#allocation3 + $0x120] sm:$0xff] }
 0x188   :  { %13730 = vmatprep.mubr.msk.f32.mxu1 %vm23_vm0, %v2085_v61  ;;  %v13586_v6 = vpop.f32.mrf.mxu0  ;;  %v4218_v56 = vld [vmem:[%s18905_s1 + $0x28] sm:$0xff] }
 0x189   :  { %v2018_v7 = vpop.permute.xlu1 %2017  ;;  %13731 = vmatmul.mubr.msk.f32.gmra.mxu1 %vm23_vm0, %v2086_v20  ;;  %v2023_v19 = vpop.permute.xlu0 %2022  ;;  %1539 = vst.msk [vmem:[#allocation3 + $0xd0] sm:$0xff] %vm226_vm2, %v1475_v18  ;;  %v1478_v57 = vadd.f32 %v13586_v6, %v832_v63  ;;  %v2869_v20 = vld [vmem:[#allocation2 + $0x39] sm:$0xff]  ;;  %v842_v2 = vld [vmem:[#allocation3 + $0x138] sm:$0xff] }
 0x18a   :  { %v2087_v26 = vmul.f32 %v2018_v7, %v1639_v43  ;;  %v2088_v25 = vmul.f32 %v2023_v19, %v1640_v16  ;;  %v1270_v30 = vpop.f32.mrf.mxu0  ;;  %v2868_v43 = vld [vmem:[#allocation2 + $0x31] sm:$0xff] }
 0x18b   :  { %3288 = vperm.xlu1 %14440, %v2986_v46   ;;  %3303 = vperm.xlu0 %14441, %v2989_v3   ;;  %1542 = vst.msk [vmem:[#allocation3 + $0xe8] sm:$0xff] %vm226_vm2, %v1478_v57  ;;  %v1477_v9 = vadd.f32 %v1270_v30, %v831_v54  ;;  %v4215_v16 = vld [vmem:[%s18905_s1 + $0x10] sm:$0xff]  ;;  %v4220_v46 = vld [vmem:[%s18905_s1 + $0x38] sm:$0xff]  ;;  %v2870_v54 = vld [vmem:[#allocation2 + $0x41] sm:$0xff] }
 0x18c   :  { %13733 = vmatprep.mubr.msk.f32.mxu1 %vm23_vm0, %v2087_v26  ;;  %v13589_v41 = vpop.f32.mrf.mxu0  ;;  %v841_v57 = vld [vmem:[#allocation3 + $0x130] sm:$0xff] }
 0x18d   :  { %13734 = vmatmul.mubr.msk.f32.gmra.mxu1 %vm23_vm0, %v2088_v25  ;;  %1541 = vst.msk [vmem:[#allocation3 + $0xe0] sm:$0xff] %vm226_vm2, %v1477_v9  ;;  %v1480_v5 = vadd.f32 %v13589_v41, %v834_v23  ;;  %v2871_v25 = vld [vmem:[#allocation2 + $0x49] sm:$0xff] }
 0x18e   :  { %v2994_v21 = vpop.permute.xlu1 %2993  ;;  %v2999_v8 = vpop.permute.xlu0 %2998  ;;  %v843_v41 = vld [vmem:[#allocation3 + $0x140] sm:$0xff] }
 0x18f   :  { %v3311_v29 = vmul.f32 %v2994_v21, %v2863_v40  ;;  %3298 = vperm.xlu1 %14440, %v2988_v62   ;;  %14442 = vset.pattern.permute.xlu0 %v14545_v28  ;;  %v3312_v24 = vmul.f32 %v2999_v8, %v2864_v39  ;;  %v1280_v47 = vpop.f32.mrf.mxu0  ;;  %1544 = vst.msk [vmem:[#allocation3 + $0xf8] sm:$0xff] %vm226_vm2, %v1480_v5  ;;  %v4217_v62 = vld [vmem:[%s18905_s1 + $0x20] sm:$0xff]  ;;  %v4222_v39 = vld [vmem:[%s18905_s1 + $0x48] sm:$0xff]  ;;  %v4219_v5 = vld [vmem:[%s18905_s1 + $0x30] sm:$0xff] }
 0x190   :  { %4279 = vperm.xlu0 %14442, %v4213_v22   ;;  %v13592_v33 = vpop.f32.mrf.mxu1  ;;  %v1479_v36 = vadd.f32 %v1280_v47, %v833_v14  ;;  %v844_v22 = vld [vmem:[#allocation3 + $0x148] sm:$0xff] }
 0x191   :  { %v1482_v27 = vadd.f32 %v13592_v33, %v836_v42  ;;  %13738 = vmatprep.mubr.msk.f32.mxu0 %vm23_vm0, %v3311_v29  ;;  %v2873_v29 = vld [vmem:[#allocation2 + $0x59] sm:$0xff] }
 0x192   :  { %v3004_v10 = vpop.permute.xlu1 %3003  ;;  %v1290_v1 = vpop.f32.mrf.mxu1  ;;  %13739 = vmatmul.mubr.msk.f32.vlgmr.msra.gmra.mxu0 %vm23_vm0, %v3312_v24  ;;  %1543 = vst.msk [vmem:[#allocation3 + $0xf0] sm:$0xff] %vm226_vm2, %v1479_v36  ;;  %v2872_v24 = vld [vmem:[#allocation2 + $0x51] sm:$0xff] }
 0x193   :  { %1546 = vst.msk [vmem:[#allocation3 + $0x108] sm:$0xff] %vm226_vm2, %v1482_v27  ;;  %v3313_v52 = vmul.f32 %v3004_v10, %v2865_v32  ;;  %v1481_v45 = vadd.f32 %v1290_v1, %v835_v11  ;;  %3308 = vperm.xlu1 %14440, %v2990_v48   ;;  %v3014_v44 = vpop.permute.xlu0 %3013  ;;  %v4224_v33 = vld [vmem:[%s18905_s1 + $0x58] sm:$0xff]  ;;  %v846_v48 = vld [vmem:[#allocation3 + $0x158] sm:$0xff] }
 0x194   :  { %4294 = vperm.xlu0 %14442, %v4216_v37   ;;  %v13595_v51 = vpop.f32.mrf.mxu1  ;;  %v3315_v61 = vmul.f32 %v3014_v44, %v2867_v35  ;;  %v2875_v10 = vld [vmem:[#allocation2 + $0x69] sm:$0xff]  ;;  %v4221_v44 = vld [vmem:[%s18905_s1 + $0x40] sm:$0xff] }
 0x195   :  { %1545 = vst.msk [vmem:[#allocation3 + $0x100] sm:$0xff] %vm226_vm2, %v1481_v45  ;;  %v1484_v50 = vadd.f32 %v13595_v51, %v838_v31  ;;  %13741 = vmatprep.mubr.msk.f32.mxu0 %vm23_vm0, %v3313_v52  ;;  %v2874_v31 = vld [vmem:[#allocation2 + $0x61] sm:$0xff] }
 0x196   :  { %v3009_v0 = vpop.permute.xlu1 %3008  ;;  %v1300_v55 = vpop.f32.mrf.mxu1  ;;  %v845_v52 = vld [vmem:[#allocation3 + $0x150] sm:$0xff]  ;;  %v4226_v35 = vld [vmem:[%s18905_s1 + $0x68] sm:$0xff] }
 0x197   :  { %1548 = vst.msk [vmem:[#allocation3 + $0x118] sm:$0xff] %vm226_vm2, %v1484_v50  ;;  %v3314_v38 = vmul.f32 %v3009_v0, %v2866_v13  ;;  %v1483_v4 = vadd.f32 %v1300_v55, %v837_v34  ;;  %14443 = vset.pattern.permute.xlu1 %v14545_v28  ;;  %v3024_v17 = vpop.permute.xlu0 %3023  ;;  %v848_v34 = vld [vmem:[#allocation3 + $0x168] sm:$0xff] }
 0x198   :  { %4284 = vperm.xlu1 %14443, %v4214_v12   ;;  %4304 = vperm.xlu0 %14442, %v4218_v56   ;;  %v13598_v15 = vpop.f32.mrf.mxu1  ;;  %v3317_v63 = vmul.f32 %v3024_v17, %v2869_v20  ;;  %v2877_v0 = vld [vmem:[#allocation2 + $0x79] sm:$0xff] }
 0x199   :  { %1547 = vst.msk [vmem:[#allocation3 + $0x110] sm:$0xff] %vm226_vm2, %v1483_v4  ;;  %v1486_v59 = vadd.f32 %v13598_v15, %v840_v58  ;;  %13742 = vmatmul.mubr.msk.f32.gmra.mxu0 %vm23_vm0, %v3314_v38  ;;  %v2876_v58 = vld [vmem:[#allocation2 + $0x71] sm:$0xff] }
 0x19a   :  { %v3019_v3 = vpop.permute.xlu1 %3018  ;;  %v1310_v7 = vpop.f32.mrf.mxu1  ;;  %13744 = vmatprep.mubr.msk.f32.mxu0 %vm23_vm0, %v3315_v61  ;;  %v847_v61 = vld [vmem:[#allocation3 + $0x160] sm:$0xff]  ;;  %v4228_v17 = vld [vmem:[%s18905_s1 + $0x78] sm:$0xff] }
 0x19b   :  { %1550 = vst.msk [vmem:[#allocation3 + $0x128] sm:$0xff] %vm226_vm2, %v1486_v59  ;;  %v3316_v26 = vmul.f32 %v3019_v3, %v2868_v43  ;;  %v1485_v18 = vadd.f32 %v1310_v7, %v839_v60  ;;  %v3034_v19 = vpop.permute.xlu0 %3033  ;;  %v4223_v4 = vld [vmem:[%s18905_s1 + $0x50] sm:$0xff]  ;;  %v850_v43 = vld [vmem:[#allocation3 + $0x178] sm:$0xff] }
 0x19c   :  { %4289 = vperm.xlu1 %14443, %v4215_v16   ;;  %4314 = vperm.xlu0 %14442, %v4220_v46   ;;  %v13601_v6 = vpop.f32.mrf.mxu1  ;;  %v3319_v9 = vmul.f32 %v3034_v19, %v2871_v25  ;;  %v2879_v3 = vld [vmem:[#allocation2 + $0x89] sm:$0xff] }
 0x19d   :  { %1549 = vst.msk [vmem:[#allocation3 + $0x120] sm:$0xff] %vm226_vm2, %v1485_v18  ;;  %v1488_v40 = vadd.f32 %v13601_v6, %v842_v2  ;;  %13745 = vmatmul.mubr.msk.f32.gmra.mxu0 %vm23_vm0, %v3316_v26  ;;  %v2878_v2 = vld [vmem:[#allocation2 + $0x81] sm:$0xff] }
 0x19e   :  { %v3029_v30 = vpop.permute.xlu1 %3028  ;;  %v1320_v23 = vpop.f32.mrf.mxu1  ;;  %13747 = vmatprep.mubr.msk.f32.mxu0 %vm23_vm0, %v3317_v63  ;;  %v849_v63 = vld [vmem:[#allocation3 + $0x170] sm:$0xff]  ;;  %v4230_v19 = vld [vmem:[%s18905_s1 + $0x88] sm:$0xff] }
 0x19f   :  { %1552 = vst.msk [vmem:[#allocation3 + $0x138] sm:$0xff] %vm226_vm2, %v1488_v40  ;;  %v3318_v21 = vmul.f32 %v3029_v30, %v2870_v54  ;;  %v1487_v8 = vadd.f32 %v1320_v23, %v841_v57  ;;  %v3044_v42 = vpop.permute.xlu0 %3043  ;;  %v4225_v18 = vld [vmem:[%s18905_s1 + $0x60] sm:$0xff]  ;;  %v852_v54 = vld [vmem:[#allocation3 + $0x188] sm:$0xff] }
 0x1a0   :  { %4299 = vperm.xlu1 %14443, %v4217_v62   ;;  %4324 = vperm.xlu0 %14442, %v4222_v39   ;;  %v13604_v28 = vpop.f32.mrf.mxu1  ;;  %v3321_v27 = vmul.f32 %v3044_v42, %v2873_v29  ;;  %v2881_v30 = vld [vmem:[#allocation2 + $0x99] sm:$0xff] }
 0x1a1   :  { %1551 = vst.msk [vmem:[#allocation3 + $0x130] sm:$0xff] %vm226_vm2, %v1487_v8  ;;  %v1490_v14 = vadd.f32 %v13604_v28, %v844_v22  ;;  %13748 = vmatmul.mubr.msk.f32.gmra.mxu0 %vm23_vm0, %v3318_v21  ;;  %v2880_v22 = vld [vmem:[#allocation2 + $0x91] sm:$0xff] }
 0x1a2   :  { %v3039_v32 = vpop.permute.xlu1 %3038  ;;  %v1330_v11 = vpop.f32.mrf.mxu1  ;;  %13750 = vmatprep.mubr.msk.f32.mxu0 %vm23_vm0, %v3319_v9  ;;  %v851_v9 = vld [vmem:[#allocation3 + $0x180] sm:$0xff]  ;;  %v4232_v42 = vld [vmem:[%s18905_s1 + $0x98] sm:$0xff] }
 0x1a3   :  { %1554 = vst.msk [vmem:[#allocation3 + $0x148] sm:$0xff] %vm226_vm2, %v1490_v14  ;;  %v3320_v47 = vmul.f32 %v3039_v32, %v2872_v24  ;;  %v1489_v37 = vadd.f32 %v1330_v11, %v843_v41  ;;  %v3054_v36 = vpop.permute.xlu0 %3053  ;;  %v4227_v8 = vld [vmem:[%s18905_s1 + $0x70] sm:$0xff]  ;;  %v854_v24 = vld [vmem:[#allocation3 + $0x198] sm:$0xff] }
 0x1a4   :  { %4309 = vperm.xlu1 %14443, %v4219_v5   ;;  %4334 = vperm.xlu0 %14442, %v4224_v33   ;;  %v13607_v1 = vpop.f32.mrf.mxu1  ;;  %v3323_v53 = vmul.f32 %v3054_v36, %v2875_v10  ;;  %v2883_v32 = vld [vmem:[#allocation2 + $0xa9] sm:$0xff] }
 0x1a5   :  { %1553 = vst.msk [vmem:[#allocation3 + $0x140] sm:$0xff] %vm226_vm2, %v1489_v37  ;;  %v1492_v45 = vadd.f32 %v13607_v1, %v846_v48  ;;  %13751 = vmatmul.mubr.msk.f32.gmra.mxu0 %vm23_vm0, %v3320_v47  ;;  %v2882_v48 = vld [vmem:[#allocation2 + $0xa1] sm:$0xff] }
 0x1a6   :  { %v3049_v51 = vpop.permute.xlu1 %3048  ;;  %v1340_v13 = vpop.f32.mrf.mxu1  ;;  %13753 = vmatprep.mubr.msk.f32.mxu0 %vm23_vm0, %v3321_v27  ;;  %v853_v27 = vld [vmem:[#allocation3 + $0x190] sm:$0xff]  ;;  %v4234_v36 = vld [vmem:[%s18905_s1 + $0xa8] sm:$0xff] }
 0x1a7   :  { %1556 = vst.msk [vmem:[#allocation3 + $0x158] sm:$0xff] %vm226_vm2, %v1492_v45  ;;  %v3322_v50 = vmul.f32 %v3049_v51, %v2874_v31  ;;  %v1491_v12 = vadd.f32 %v1340_v13, %v845_v52  ;;  %v3064_v56 = vpop.permute.xlu0 %3063  ;;  %v4229_v37 = vld [vmem:[%s18905_s1 + $0x80] sm:$0xff]  ;;  %v856_v31 = vld [vmem:[#allocation3 + $0x1a8] sm:$0xff] }
 0x1a8   :  { %4319 = vperm.xlu1 %14443, %v4221_v44   ;;  %4344 = vperm.xlu0 %14442, %v4226_v35   ;;  %v13610_v55 = vpop.f32.mrf.mxu1  ;;  %v3325_v60 = vmul.f32 %v3064_v56, %v2877_v0  ;;  %v2885_v51 = vld [vmem:[#allocation2 + $0xb9] sm:$0xff] }
 0x1a9   :  { %1555 = vst.msk [vmem:[#allocation3 + $0x150] sm:$0xff] %vm226_vm2, %v1491_v12  ;;  %v1494_v38 = vadd.f32 %v13610_v55, %v848_v34  ;;  %13754 = vmatmul.mubr.msk.f32.gmra.mxu0 %vm23_vm0, %v3322_v50  ;;  %v2884_v34 = vld [vmem:[#allocation2 + $0xb1] sm:$0xff] }
 0x1aa   :  { %v3059_v20 = vpop.permute.xlu1 %3058  ;;  %v1350_v15 = vpop.f32.mrf.mxu1  ;;  %13756 = vmatprep.mubr.msk.f32.mxu0 %vm23_vm0, %v3323_v53  ;;  %v855_v53 = vld [vmem:[#allocation3 + $0x1a0] sm:$0xff]  ;;  %v4236_v56 = vld [vmem:[%s18905_s1 + $0xb8] sm:$0xff] }
 0x1ab   :  { %1558 = vst.msk [vmem:[#allocation3 + $0x168] sm:$0xff] %vm226_vm2, %v1494_v38  ;;  %v3324_v59 = vmul.f32 %v3059_v20, %v2876_v58  ;;  %v1493_v16 = vadd.f32 %v1350_v15, %v847_v61  ;;  %v3074_v46 = vpop.permute.xlu0 %3073  ;;  %v4231_v12 = vld [vmem:[%s18905_s1 + $0x90] sm:$0xff]  ;;  %v858_v58 = vld [vmem:[#allocation3 + $0x1b8] sm:$0xff] }
 0x1ac   :  { %4329 = vperm.xlu1 %14443, %v4223_v4   ;;  %4354 = vperm.xlu0 %14442, %v4228_v17   ;;  %v13613_v7 = vpop.f32.mrf.mxu1  ;;  %v3327_v57 = vmul.f32 %v3074_v46, %v2879_v3  ;;  %v2887_v20 = vld [vmem:[#allocation2 + $0xc9] sm:$0xff] }
 0x1ad   :  { %1557 = vst.msk [vmem:[#allocation3 + $0x160] sm:$0xff] %vm226_vm2, %v1493_v16  ;;  %v1496_v26 = vadd.f32 %v13613_v7, %v850_v43  ;;  %13757 = vmatmul.mubr.msk.f32.gmra.mxu0 %vm23_vm0, %v3324_v59  ;;  %v2886_v43 = vld [vmem:[#allocation2 + $0xc1] sm:$0xff] }
 0x1ae   :  { %v3069_v25 = vpop.permute.xlu1 %3068  ;;  %v1360_v6 = vpop.f32.mrf.mxu1  ;;  %13759 = vmatprep.mubr.msk.f32.mxu0 %vm23_vm0, %v3325_v60  ;;  %v857_v60 = vld [vmem:[#allocation3 + $0x1b0] sm:$0xff]  ;;  %v4238_v46 = vld [vmem:[%s18905_s1 + $0xc8] sm:$0xff] }
 0x1af   :  { %1560 = vst.msk [vmem:[#allocation3 + $0x178] sm:$0xff] %vm226_vm2, %v1496_v26  ;;  %v3326_v40 = vmul.f32 %v3069_v25, %v2878_v2  ;;  %v1495_v62 = vadd.f32 %v1360_v6, %v849_v63  ;;  %v3084_v39 = vpop.permute.xlu0 %3083  ;;  %v4233_v16 = vld [vmem:[%s18905_s1 + $0xa0] sm:$0xff]  ;;  %v860_v2 = vld [vmem:[#allocation3 + $0x1c8] sm:$0xff] }
 0x1b0   :  { %4339 = vperm.xlu1 %14443, %v4225_v18   ;;  %4364 = vperm.xlu0 %14442, %v4230_v19   ;;  %v13616_v23 = vpop.f32.mrf.mxu1  ;;  %v3329_v41 = vmul.f32 %v3084_v39, %v2881_v30  ;;  %v2889_v25 = vld [vmem:[#allocation2 + $0xd9] sm:$0xff] }
 0x1b1   :  { %1559 = vst.msk [vmem:[#allocation3 + $0x170] sm:$0xff] %vm226_vm2, %v1495_v62  ;;  %v1498_v21 = vadd.f32 %v13616_v23, %v852_v54  ;;  %13760 = vmatmul.mubr.msk.f32.gmra.mxu0 %vm23_vm0, %v3326_v40  ;;  %v2888_v54 = vld [vmem:[#allocation2 + $0xd1] sm:$0xff] }
 0x1b2   :  { %v3079_v29 = vpop.permute.xlu1 %3078  ;;  %v1370_v28 = vpop.f32.mrf.mxu1  ;;  %13762 = vmatprep.mubr.msk.f32.mxu0 %vm23_vm0, %v3327_v57  ;;  %v859_v57 = vld [vmem:[#allocation3 + $0x1c0] sm:$0xff]  ;;  %v4240_v39 = vld [vmem:[%s18905_s1 + $0xd8] sm:$0xff] }
 0x1b3   :  { %1562 = vst.msk [vmem:[#allocation3 + $0x188] sm:$0xff] %vm226_vm2, %v1498_v21  ;;  %v3328_v14 = vmul.f32 %v3079_v29, %v2880_v22  ;;  %v1497_v5 = vadd.f32 %v1370_v28, %v851_v9  ;;  %v3094_v33 = vpop.permute.xlu0 %3093  ;;  %v4235_v62 = vld [vmem:[%s18905_s1 + $0xb0] sm:$0xff]  ;;  %v862_v22 = vld [vmem:[#allocation3 + $0x1d8] sm:$0xff] }
 0x1b4   :  { %4349 = vperm.xlu1 %14443, %v4227_v8   ;;  %4374 = vperm.xlu0 %14442, %v4232_v42   ;;  %v13619_v11 = vpop.f32.mrf.mxu1  ;;  %v3331_v52 = vmul.f32 %v3094_v33, %v2883_v32  ;;  %v2891_v29 = vld [vmem:[#allocation2 + $0xe9] sm:$0xff] }
 0x1b5   :  { %1561 = vst.msk [vmem:[#allocation3 + $0x180] sm:$0xff] %vm226_vm2, %v1497_v5  ;;  %v1500_v47 = vadd.f32 %v13619_v11, %v854_v24  ;;  %13763 = vmatmul.mubr.msk.f32.gmra.mxu0 %vm23_vm0, %v3328_v14  ;;  %v2890_v24 = vld [vmem:[#allocation2 + $0xe1] sm:$0xff] }
 0x1b6   :  { %v3089_v10 = vpop.permute.xlu1 %3088  ;;  %v1380_v1 = vpop.f32.mrf.mxu1  ;;  %13765 = vmatprep.mubr.msk.f32.mxu0 %vm23_vm0, %v3329_v41  ;;  %v861_v41 = vld [vmem:[#allocation3 + $0x1d0] sm:$0xff]  ;;  %v4242_v33 = vld [vmem:[%s18905_s1 + $0xe8] sm:$0xff] }
 0x1b7   :  { %1564 = vst.msk [vmem:[#allocation3 + $0x198] sm:$0xff] %vm226_vm2, %v1500_v47  ;;  %v3330_v45 = vmul.f32 %v3089_v10, %v2882_v48  ;;  %v1499_v44 = vadd.f32 %v1380_v1, %v853_v27  ;;  %v3104_v35 = vpop.permute.xlu0 %3103  ;;  %v4237_v5 = vld [vmem:[%s18905_s1 + $0xc0] sm:$0xff]  ;;  %v864_v48 = vld [vmem:[#allocation3 + $0x1e8] sm:$0xff] }
 0x1b8   :  { %4359 = vperm.xlu1 %14443, %v4229_v37   ;;  %4384 = vperm.xlu0 %14442, %v4234_v36   ;;  %v13622_v13 = vpop.f32.mrf.mxu1  ;;  %v3333_v61 = vmul.f32 %v3104_v35, %v2885_v51  ;;  %v2893_v10 = vld [vmem:[#allocation2 + $0xf9] sm:$0xff] }
 0x1b9   :  { %1563 = vst.msk [vmem:[#allocation3 + $0x190] sm:$0xff] %vm226_vm2, %v1499_v44  ;;  %v1502_v50 = vadd.f32 %v13622_v13, %v856_v31  ;;  %13766 = vmatmul.mubr.msk.f32.gmra.mxu0 %vm23_vm0, %v3330_v45  ;;  %v2892_v31 = vld [vmem:[#allocation2 + $0xf1] sm:$0xff] }
 0x1ba   :  { %v3099_v0 = vpop.permute.xlu1 %3098  ;;  %v1390_v55 = vpop.f32.mrf.mxu1  ;;  %13768 = vmatprep.mubr.msk.f32.mxu0 %vm23_vm0, %v3331_v52  ;;  %v863_v52 = vld [vmem:[#allocation3 + $0x1e0] sm:$0xff]  ;;  %v4244_v35 = vld [vmem:[%s18905_s1 + $0xf8] sm:$0xff] }
 0x1bb   :  { %1566 = vst.msk [vmem:[#allocation3 + $0x1a8] sm:$0xff] %vm226_vm2, %v1502_v50  ;;  %v3332_v38 = vmul.f32 %v3099_v0, %v2884_v34  ;;  %v1501_v4 = vadd.f32 %v1390_v55, %v855_v53  ;;  %v3114_v17 = vpop.permute.xlu0 %3113  ;;  %v4239_v44 = vld [vmem:[%s18905_s1 + $0xd0] sm:$0xff]  ;;  %v866_v34 = vld [vmem:[#allocation3 + $0x1f8] sm:$0xff] }
 0x1bc   :  { %4369 = vperm.xlu1 %14443, %v4231_v12   ;;  %4394 = vperm.xlu0 %14442, %v4236_v56   ;;  %v13625_v15 = vpop.f32.mrf.mxu1  ;;  %v3335_v63 = vmul.f32 %v3114_v17, %v2887_v20  ;;  %v2895_v0 = vld [vmem:[#allocation2 + $0x109] sm:$0xff] }
 0x1bd   :  { %1565 = vst.msk [vmem:[#allocation3 + $0x1a0] sm:$0xff] %vm226_vm2, %v1501_v4  ;;  %v1504_v59 = vadd.f32 %v13625_v15, %v858_v58  ;;  %13769 = vmatmul.mubr.msk.f32.gmra.mxu0 %vm23_vm0, %v3332_v38  ;;  %v2894_v58 = vld [vmem:[#allocation2 + $0x101] sm:$0xff] }
 0x1be   :  { %v3109_v3 = vpop.permute.xlu1 %3108  ;;  %v1400_v7 = vpop.f32.mrf.mxu1  ;;  %13771 = vmatprep.mubr.msk.f32.mxu0 %vm23_vm0, %v3333_v61  ;;  %v865_v61 = vld [vmem:[#allocation3 + $0x1f0] sm:$0xff]  ;;  %v4246_v17 = vld [vmem:[%s18905_s1 + $0x108] sm:$0xff] }
 0x1bf   :  { %1568 = vst.msk [vmem:[#allocation3 + $0x1b8] sm:$0xff] %vm226_vm2, %v1504_v59  ;;  %v3334_v26 = vmul.f32 %v3109_v3, %v2886_v43  ;;  %v1503_v18 = vadd.f32 %v1400_v7, %v857_v60  ;;  %v3124_v19 = vpop.permute.xlu0 %3123  ;;  %v4241_v4 = vld [vmem:[%s18905_s1 + $0xe0] sm:$0xff]  ;;  %v2896_v7 = vld [vmem:[#allocation2 + $0x111] sm:$0xff] }
 0x1c0   :  { %4379 = vperm.xlu1 %14443, %v4233_v16   ;;  %4404 = vperm.xlu0 %14442, %v4238_v46   ;;  %v13628_v6 = vpop.f32.mrf.mxu1  ;;  %v3337_v9 = vmul.f32 %v3124_v19, %v2889_v25  ;;  %v2090_v16 = vld [vmem:[#allocation3 + $0x8] sm:$0xff] }
 0x1c1   :  { %1567 = vst.msk [vmem:[#allocation3 + $0x1b0] sm:$0xff] %vm226_vm2, %v1503_v18  ;;  %v1506_v40 = vadd.f32 %v13628_v6, %v860_v2  ;;  %13772 = vmatmul.mubr.msk.f32.gmra.mxu0 %vm23_vm0, %v3334_v26  ;;  %v2897_v3 = vld [vmem:[#allocation2 + $0x119] sm:$0xff]  ;;  %v4243_v26 = vld [vmem:[%s18905_s1 + $0xf0] sm:$0xff] }
 0x1c2   :  { %v3119_v30 = vpop.permute.xlu1 %3118  ;;  %v1410_v23 = vpop.f32.mrf.mxu1  ;;  %13774 = vmatprep.mubr.msk.f32.mxu0 %vm23_vm0, %v3335_v63  ;;  %v2089_v63 = vld [vmem:[#allocation3] sm:$0xff]  ;;  %v4248_v18 = vld [vmem:[%s18905_s1 + $0x118] sm:$0xff] }
 0x1c3   :  { %1570 = vst.msk [vmem:[#allocation3 + $0x1c8] sm:$0xff] %vm226_vm2, %v1506_v40  ;;  %v3336_v21 = vmul.f32 %v3119_v30, %v2888_v54  ;;  %v1505_v8 = vadd.f32 %v1410_v23, %v859_v57  ;;  %v3134_v42 = vpop.permute.xlu0 %3133  ;;  %v2898_v30 = vld [vmem:[#allocation2 + $0x121] sm:$0xff] }
 0x1c4   :  { %4389 = vperm.xlu1 %14443, %v4235_v62   ;;  %4414 = vperm.xlu0 %14442, %v4240_v39   ;;  %v13631_v28 = vpop.f32.mrf.mxu1  ;;  %v3339_v27 = vmul.f32 %v3134_v42, %v2891_v29  ;;  %v2899_v62 = vld [vmem:[#allocation2 + $0x129] sm:$0xff] }
 0x1c5   :  { %1569 = vst.msk [vmem:[#allocation3 + $0x1c0] sm:$0xff] %vm226_vm2, %v1505_v8  ;;  %v1508_v14 = vadd.f32 %v13631_v28, %v862_v22  ;;  %13775 = vmatmul.mubr.msk.f32.gmra.mxu0 %vm23_vm0, %v3336_v21  ;;  %v2092_v23 = vld [vmem:[#allocation3 + $0x18] sm:$0xff] }
 0x1c6   :  { %v3129_v32 = vpop.permute.xlu1 %3128  ;;  %v1420_v11 = vpop.f32.mrf.mxu1  ;;  %13777 = vmatprep.mubr.msk.f32.mxu0 %vm23_vm0, %v3337_v9  ;;  %v4245_v9 = vld [vmem:[%s18905_s1 + $0x100] sm:$0xff]  ;;  %v4250_v21 = vld [vmem:[%s18905_s1 + $0x128] sm:$0xff] }
 0x1c7   :  { %1572 = vst.msk [vmem:[#allocation3 + $0x1d8] sm:$0xff] %vm226_vm2, %v1508_v14  ;;  %v3338_v47 = vmul.f32 %v3129_v32, %v2890_v24  ;;  %v1507_v37 = vadd.f32 %v1420_v11, %v861_v41  ;;  %v3144_v36 = vpop.permute.xlu0 %3143  ;;  %v2091_v24 = vld [vmem:[#allocation3 + $0x10] sm:$0xff]  ;;  %v2900_v32 = vld [vmem:[#allocation2 + $0x131] sm:$0xff] }
 0x1c8   :  { %4399 = vperm.xlu1 %14443, %v4237_v5   ;;  %4424 = vperm.xlu0 %14442, %v4242_v33   ;;  %v13634_v1 = vpop.f32.mrf.mxu1  ;;  %v3341_v53 = vmul.f32 %v3144_v36, %v2893_v10  ;;  %v2901_v5 = vld [vmem:[#allocation2 + $0x139] sm:$0xff] }
 0x1c9   :  { %1571 = vst.msk [vmem:[#allocation3 + $0x1d0] sm:$0xff] %vm226_vm2, %v1507_v37  ;;  %v1510_v45 = vadd.f32 %v13634_v1, %v864_v48  ;;  %13778 = vmatmul.mubr.msk.f32.gmra.mxu0 %vm23_vm0, %v3338_v47  ;;  %v2094_v11 = vld [vmem:[#allocation3 + $0x28] sm:$0xff] }
 0x1ca   :  { %v3139_v51 = vpop.permute.xlu1 %3138  ;;  %v1430_v13 = vpop.f32.mrf.mxu1  ;;  %13780 = vmatprep.mubr.msk.f32.mxu0 %vm23_vm0, %v3339_v27  ;;  %v4247_v27 = vld [vmem:[%s18905_s1 + $0x110] sm:$0xff]  ;;  %v4252_v47 = vld [vmem:[%s18905_s1 + $0x138] sm:$0xff] }
 0x1cb   :  { %1574 = vst.msk [vmem:[#allocation3 + $0x1e8] sm:$0xff] %vm226_vm2, %v1510_v45  ;;  %v3340_v50 = vmul.f32 %v3139_v51, %v2892_v31  ;;  %v1509_v12 = vadd.f32 %v1430_v13, %v863_v52  ;;  %v3154_v56 = vpop.permute.xlu0 %3153  ;;  %v2093_v31 = vld [vmem:[#allocation3 + $0x20] sm:$0xff]  ;;  %v2902_v51 = vld [vmem:[#allocation2 + $0x141] sm:$0xff] }
 0x1cc   :  { %4409 = vperm.xlu1 %14443, %v4239_v44   ;;  %4434 = vperm.xlu0 %14442, %v4244_v35   ;;  %v13637_v55 = vpop.f32.mrf.mxu1  ;;  %v3343_v43 = vmul.f32 %v3154_v56, %v2895_v0  ;;  %v2903_v44 = vld [vmem:[#allocation2 + $0x149] sm:$0xff] }
 0x1cd   :  { %1573 = vst.msk [vmem:[#allocation3 + $0x1e0] sm:$0xff] %vm226_vm2, %v1509_v12  ;;  %v1512_v38 = vadd.f32 %v13637_v55, %v866_v34  ;;  %13781 = vmatmul.mubr.msk.f32.gmra.mxu0 %vm23_vm0, %v3340_v50  ;;  %v2096_v13 = vld [vmem:[#allocation3 + $0x38] sm:$0xff] }
 0x1ce   :  { %v3149_v20 = vpop.permute.xlu1 %3148  ;;  %v1440_v15 = vpop.f32.mrf.mxu1  ;;  %13783 = vmatprep.mubr.msk.f32.mxu0 %vm23_vm0, %v3341_v53  ;;  %v4249_v53 = vld [vmem:[%s18905_s1 + $0x120] sm:$0xff]  ;;  %v4254_v50 = vld [vmem:[%s18905_s1 + $0x148] sm:$0xff] }
 0x1cf   :  { %1576 = vst.msk [vmem:[#allocation3 + $0x1f8] sm:$0xff] %vm226_vm2, %v1512_v38  ;;  %v3342_v60 = vmul.f32 %v3149_v20, %v2894_v58  ;;  %v1511_v59 = vadd.f32 %v1440_v15, %v865_v61  ;;  %v3164_v46 = vpop.permute.xlu0 %3163  ;;  %v2095_v58 = vld [vmem:[#allocation3 + $0x30] sm:$0xff]  ;;  %v2904_v20 = vld [vmem:[#allocation2 + $0x151] sm:$0xff] }
 0x1d0   :  { %4419 = vperm.xlu1 %14443, %v4241_v4   ;;  %4444 = vperm.xlu0 %14442, %v4246_v17   ;;  %v3345_v6 = vmul.f32 %v3164_v46, %v2897_v3  ;;  %v2905_v4 = vld [vmem:[#allocation2 + $0x159] sm:$0xff] }
 0x1d1   :  { %1575 = vst.msk [vmem:[#allocation3 + $0x1f0] sm:$0xff] %vm226_vm2, %v1511_v59  ;;  %v13642_v2 = vpop.f32.mrf.mxu1  ;;  %13784 = vmatmul.mubr.msk.f32.gmra.mxu0 %vm23_vm0, %v3342_v60  ;;  %v2098_v15 = vld [vmem:[#allocation3 + $0x48] sm:$0xff]  ;;  %v4251_v60 = vld [vmem:[%s18905_s1 + $0x130] sm:$0xff] }
 0x1d2   :  { %v2736_v19 = vadd.f32 %v13642_v2, %v2090_v16  ;;  %v3159_v25 = vpop.permute.xlu1 %3158  ;;  %13786 = vmatprep.mubr.msk.f32.mxu0 %vm23_vm0, %v3343_v43  ;;  %v4256_v59 = vld [vmem:[%s18905_s1 + $0x158] sm:$0xff]  ;;  %v2097_v2 = vld [vmem:[#allocation3 + $0x40] sm:$0xff] }
 0x1d3   :  { %v3344_v54 = vmul.f32 %v3159_v25, %v2896_v7  ;;  %v2416_v57 = vpop.f32.mrf.mxu1  ;;  %v3174_v40 = vpop.permute.xlu0 %3173  ;;  %v2906_v25 = vld [vmem:[#allocation2 + $0x161] sm:$0xff] }
 0x1d4   :  { %2800 = vst.msk [vmem:[#allocation3 + $0x8] sm:$0xff] %vm226_vm2, %v2736_v19  ;;  %v2735_v39 = vadd.f32 %v2416_v57, %v2089_v63  ;;  %4429 = vperm.xlu1 %14443, %v4243_v26   ;;  %4454 = vperm.xlu0 %14442, %v4248_v18   ;;  %v3347_v29 = vmul.f32 %v3174_v40, %v2899_v62  ;;  %v2907_v18 = vld [vmem:[#allocation2 + $0x169] sm:$0xff]  ;;  %v4253_v57 = vld [vmem:[%s18905_s1 + $0x140] sm:$0xff] }
 0x1d5   :  { %v13645_v22 = vpop.f32.mrf.mxu1  ;;  %13787 = vmatmul.mubr.msk.f32.gmra.mxu0 %vm23_vm0, %v3344_v54  ;;  %v4258_v40 = vld [vmem:[%s18905_s1 + $0x168] sm:$0xff] }
 0x1d6   :  { %2799 = vst.msk [vmem:[#allocation3] sm:$0xff] %vm226_vm2, %v2735_v39  ;;  %v2738_v8 = vadd.f32 %v13645_v22, %v2092_v23  ;;  %v3169_v42 = vpop.permute.xlu1 %3168  ;;  %13789 = vmatprep.mubr.msk.f32.mxu0 %vm23_vm0, %v3345_v6  ;;  %v2100_v6 = vld [vmem:[#allocation3 + $0x58] sm:$0xff]  ;;  %v2099_v22 = vld [vmem:[#allocation3 + $0x50] sm:$0xff] }
 0x1d7   :  { %v3346_v28 = vmul.f32 %v3169_v42, %v2898_v30  ;;  %v2426_v41 = vpop.f32.mrf.mxu1  ;;  %v3184_v14 = vpop.permute.xlu0 %3183 }
 0x1d8   :  { %2802 = vst.msk [vmem:[#allocation3 + $0x18] sm:$0xff] %vm226_vm2, %v2738_v8  ;;  %v2737_v33 = vadd.f32 %v2426_v41, %v2091_v24  ;;  %4439 = vperm.xlu1 %14443, %v4245_v9   ;;  %4464 = vperm.xlu0 %14442, %v4250_v21   ;;  %v3349_v10 = vmul.f32 %v3184_v14, %v2901_v5  ;;  %v2909_v8 = vld [vmem:[#allocation2 + $0x179] sm:$0xff]  ;;  %v4255_v41 = vld [vmem:[%s18905_s1 + $0x150] sm:$0xff] }
 0x1d9   :  { %v13648_v48 = vpop.f32.mrf.mxu1  ;;  %13790 = vmatmul.mubr.msk.f32.gmra.mxu0 %vm23_vm0, %v3346_v28  ;;  %v2102_v28 = vld [vmem:[#allocation3 + $0x68] sm:$0xff] }
 0x1da   :  { %2801 = vst.msk [vmem:[#allocation3 + $0x10] sm:$0xff] %vm226_vm2, %v2737_v33  ;;  %v2740_v37 = vadd.f32 %v13648_v48, %v2094_v11  ;;  %v3179_v36 = vpop.permute.xlu1 %3178  ;;  %13792 = vmatprep.mubr.msk.f32.mxu0 %vm23_vm0, %v3347_v29  ;;  %v2908_v29 = vld [vmem:[#allocation2 + $0x171] sm:$0xff] }
 0x1db   :  { %v3348_v1 = vmul.f32 %v3179_v36, %v2900_v32  ;;  %v2436_v52 = vpop.f32.mrf.mxu1  ;;  %v3194_v45 = vpop.permute.xlu0 %3193  ;;  %v4260_v14 = vld [vmem:[%s18905_s1 + $0x178] sm:$0xff]  ;;  %v2101_v48 = vld [vmem:[#allocation3 + $0x60] sm:$0xff] }
 0x1dc   :  { %2804 = vst.msk [vmem:[#allocation3 + $0x28] sm:$0xff] %vm226_vm2, %v2740_v37  ;;  %v2739_v35 = vadd.f32 %v2436_v52, %v2093_v31  ;;  %4449 = vperm.xlu1 %14443, %v4247_v27   ;;  %4474 = vperm.xlu0 %14442, %v4252_v47   ;;  %v3351_v0 = vmul.f32 %v3194_v45, %v2903_v44  ;;  %v2911_v37 = vld [vmem:[#allocation2 + $0x189] sm:$0xff]  ;;  %v4257_v52 = vld [vmem:[%s18905_s1 + $0x160] sm:$0xff] }
 0x1dd   :  { %v13651_v34 = vpop.f32.mrf.mxu1  ;;  %13793 = vmatmul.mubr.msk.f32.gmra.mxu0 %vm23_vm0, %v3348_v1  ;;  %v2104_v1 = vld [vmem:[#allocation3 + $0x78] sm:$0xff] }
 0x1de   :  { %2803 = vst.msk [vmem:[#allocation3 + $0x20] sm:$0xff] %vm226_vm2, %v2739_v35  ;;  %v2742_v12 = vadd.f32 %v13651_v34, %v2096_v13  ;;  %v3189_v56 = vpop.permute.xlu1 %3188  ;;  %13795 = vmatprep.mubr.msk.f32.mxu0 %vm23_vm0, %v3349_v10  ;;  %v2910_v10 = vld [vmem:[#allocation2 + $0x181] sm:$0xff] }
 0x1df   :  { %v3350_v55 = vmul.f32 %v3189_v56, %v2902_v51  ;;  %v2446_v61 = vpop.f32.mrf.mxu1  ;;  %v3204_v38 = vpop.permute.xlu0 %3203  ;;  %v4262_v45 = vld [vmem:[%s18905_s1 + $0x188] sm:$0xff]  ;;  %v2103_v34 = vld [vmem:[#allocation3 + $0x70] sm:$0xff] }
 0x1e0   :  { %2806 = vst.msk [vmem:[#allocation3 + $0x38] sm:$0xff] %vm226_vm2, %v2742_v12  ;;  %v2741_v17 = vadd.f32 %v2446_v61, %v2095_v58  ;;  %4459 = vperm.xlu1 %14443, %v4249_v53   ;;  %4484 = vperm.xlu0 %14442, %v4254_v50   ;;  %v3353_v3 = vmul.f32 %v3204_v38, %v2905_v4  ;;  %v2913_v12 = vld [vmem:[#allocation2 + $0x199] sm:$0xff]  ;;  %v4259_v61 = vld [vmem:[%s18905_s1 + $0x170] sm:$0xff] }
 0x1e1   :  { %v13654_v43 = vpop.f32.mrf.mxu1  ;;  %13796 = vmatmul.mubr.msk.f32.gmra.mxu0 %vm23_vm0, %v3350_v55  ;;  %v2106_v55 = vld [vmem:[#allocation3 + $0x88] sm:$0xff] }
 0x1e2   :  { %2805 = vst.msk [vmem:[#allocation3 + $0x30] sm:$0xff] %vm226_vm2, %v2741_v17  ;;  %v2744_v16 = vadd.f32 %v13654_v43, %v2098_v15  ;;  %v3199_v46 = vpop.permute.xlu1 %3198  ;;  %13798 = vmatprep.mubr.msk.f32.mxu0 %vm23_vm0, %v3351_v0  ;;  %v2912_v0 = vld [vmem:[#allocation2 + $0x191] sm:$0xff] }
 0x1e3   :  { %v3352_v7 = vmul.f32 %v3199_v46, %v2904_v20  ;;  %v2456_v63 = vpop.f32.mrf.mxu1  ;;  %v3214_v26 = vpop.permute.xlu0 %3213  ;;  %v4264_v38 = vld [vmem:[%s18905_s1 + $0x198] sm:$0xff]  ;;  %v2105_v43 = vld [vmem:[#allocation3 + $0x80] sm:$0xff] }
 0x1e4   :  { %2808 = vst.msk [vmem:[#allocation3 + $0x48] sm:$0xff] %vm226_vm2, %v2744_v16  ;;  %v2743_v19 = vadd.f32 %v2456_v63, %v2097_v2  ;;  %4469 = vperm.xlu1 %14443, %v4251_v60   ;;  %4494 = vperm.xlu0 %14442, %v4256_v59   ;;  %v3355_v30 = vmul.f32 %v3214_v26, %v2907_v18  ;;  %v2915_v16 = vld [vmem:[#allocation2 + $0x1a9] sm:$0xff]  ;;  %v4261_v63 = vld [vmem:[%s18905_s1 + $0x180] sm:$0xff] }
 0x1e5   :  { %v13657_v54 = vpop.f32.mrf.mxu1  ;;  %13799 = vmatmul.mubr.msk.f32.gmra.mxu0 %vm23_vm0, %v3352_v7  ;;  %v2108_v7 = vld [vmem:[#allocation3 + $0x98] sm:$0xff] }
 0x1e6   :  { %2807 = vst.msk [vmem:[#allocation3 + $0x40] sm:$0xff] %vm226_vm2, %v2743_v19  ;;  %v2746_v62 = vadd.f32 %v13657_v54, %v2100_v6  ;;  %v3209_v39 = vpop.permute.xlu1 %3208  ;;  %13801 = vmatprep.mubr.msk.f32.mxu0 %vm23_vm0, %v3353_v3  ;;  %v2914_v3 = vld [vmem:[#allocation2 + $0x1a1] sm:$0xff] }
 0x1e7   :  { %v3354_v23 = vmul.f32 %v3209_v39, %v2906_v25  ;;  %v2466_v9 = vpop.f32.mrf.mxu1  ;;  %v3224_v21 = vpop.permute.xlu0 %3223  ;;  %v4266_v26 = vld [vmem:[%s18905_s1 + $0x1a8] sm:$0xff]  ;;  %v2107_v54 = vld [vmem:[#allocation3 + $0x90] sm:$0xff] }
 0x1e8   :  { %2810 = vst.msk [vmem:[#allocation3 + $0x58] sm:$0xff] %vm226_vm2, %v2746_v62  ;;  %v2745_v42 = vadd.f32 %v2466_v9, %v2099_v22  ;;  %4479 = vperm.xlu1 %14443, %v4253_v57   ;;  %4504 = vperm.xlu0 %14442, %v4258_v40   ;;  %v3357_v32 = vmul.f32 %v3224_v21, %v2909_v8  ;;  %v2917_v62 = vld [vmem:[#allocation2 + $0x1b9] sm:$0xff]  ;;  %v4263_v9 = vld [vmem:[%s18905_s1 + $0x190] sm:$0xff] }
 0x1e9   :  { %v13660_v24 = vpop.f32.mrf.mxu1  ;;  %13802 = vmatmul.mubr.msk.f32.gmra.mxu0 %vm23_vm0, %v3354_v23  ;;  %v2110_v23 = vld [vmem:[#allocation3 + $0xa8] sm:$0xff] }
 0x1ea   :  { %2809 = vst.msk [vmem:[#allocation3 + $0x50] sm:$0xff] %vm226_vm2, %v2745_v42  ;;  %v2748_v5 = vadd.f32 %v13660_v24, %v2102_v28  ;;  %v3219_v33 = vpop.permute.xlu1 %3218  ;;  %13804 = vmatprep.mubr.msk.f32.mxu0 %vm23_vm0, %v3355_v30  ;;  %v2916_v30 = vld [vmem:[#allocation2 + $0x1b1] sm:$0xff] }
 0x1eb   :  { %v3356_v11 = vmul.f32 %v3219_v33, %v2908_v29  ;;  %v2476_v27 = vpop.f32.mrf.mxu1  ;;  %v3234_v47 = vpop.permute.xlu0 %3233  ;;  %v4268_v21 = vld [vmem:[%s18905_s1 + $0x1b8] sm:$0xff]  ;;  %v2109_v24 = vld [vmem:[#allocation3 + $0xa0] sm:$0xff] }
 0x1ec   :  { %2812 = vst.msk [vmem:[#allocation3 + $0x68] sm:$0xff] %vm226_vm2, %v2748_v5  ;;  %v2747_v36 = vadd.f32 %v2476_v27, %v2101_v48  ;;  %4489 = vperm.xlu1 %14443, %v4255_v41   ;;  %4514 = vperm.xlu0 %14442, %v4260_v14   ;;  %v3359_v51 = vmul.f32 %v3234_v47, %v2911_v37  ;;  %v2919_v5 = vld [vmem:[#allocation2 + $0x1c9] sm:$0xff]  ;;  %v4265_v27 = vld [vmem:[%s18905_s1 + $0x1a0] sm:$0xff] }
 0x1ed   :  { %v13663_v31 = vpop.f32.mrf.mxu1  ;;  %13805 = vmatmul.mubr.msk.f32.gmra.mxu0 %vm23_vm0, %v3356_v11  ;;  %v2112_v11 = vld [vmem:[#allocation3 + $0xb8] sm:$0xff] }
 0x1ee   :  { %2811 = vst.msk [vmem:[#allocation3 + $0x60] sm:$0xff] %vm226_vm2, %v2747_v36  ;;  %v2750_v44 = vadd.f32 %v13663_v31, %v2104_v1  ;;  %v3229_v35 = vpop.permute.xlu1 %3228  ;;  %13807 = vmatprep.mubr.msk.f32.mxu0 %vm23_vm0, %v3357_v32  ;;  %v2918_v32 = vld [vmem:[#allocation2 + $0x1c1] sm:$0xff] }
 0x1ef   :  { %v3358_v13 = vmul.f32 %v3229_v35, %v2910_v10  ;;  %v2486_v53 = vpop.f32.mrf.mxu1  ;;  %v3244_v50 = vpop.permute.xlu0 %3243  ;;  %v4270_v47 = vld [vmem:[%s18905_s1 + $0x1c8] sm:$0xff]  ;;  %v2111_v31 = vld [vmem:[#allocation3 + $0xb0] sm:$0xff] }
 0x1f0   :  { %2814 = vst.msk [vmem:[#allocation3 + $0x78] sm:$0xff] %vm226_vm2, %v2750_v44  ;;  %v2749_v56 = vadd.f32 %v2486_v53, %v2103_v34  ;;  %4499 = vperm.xlu1 %14443, %v4257_v52   ;;  %4524 = vperm.xlu0 %14442, %v4262_v45   ;;  %v3361_v20 = vmul.f32 %v3244_v50, %v2913_v12  ;;  %v2921_v44 = vld [vmem:[#allocation2 + $0x1d9] sm:$0xff]  ;;  %v4267_v53 = vld [vmem:[%s18905_s1 + $0x1b0] sm:$0xff] }
 0x1f1   :  { %v13666_v58 = vpop.f32.mrf.mxu1  ;;  %13808 = vmatmul.mubr.msk.f32.gmra.mxu0 %vm23_vm0, %v3358_v13  ;;  %v2114_v13 = vld [vmem:[#allocation3 + $0xc8] sm:$0xff] }
 0x1f2   :  { %2813 = vst.msk [vmem:[#allocation3 + $0x70] sm:$0xff] %vm226_vm2, %v2749_v56  ;;  %v2752_v4 = vadd.f32 %v13666_v58, %v2106_v55  ;;  %v3239_v17 = vpop.permute.xlu1 %3238  ;;  %13810 = vmatprep.mubr.msk.f32.mxu0 %vm23_vm0, %v3359_v51  ;;  %v2920_v51 = vld [vmem:[#allocation2 + $0x1d1] sm:$0xff] }
 0x1f3   :  { %v3360_v15 = vmul.f32 %v3239_v17, %v2912_v0  ;;  %v2496_v60 = vpop.f32.mrf.mxu1  ;;  %v3254_v59 = vpop.permute.xlu0 %3253  ;;  %v4272_v50 = vld [vmem:[%s18905_s1 + $0x1d8] sm:$0xff]  ;;  %v2113_v58 = vld [vmem:[#allocation3 + $0xc0] sm:$0xff] }
 0x1f4   :  { %2816 = vst.msk [vmem:[#allocation3 + $0x88] sm:$0xff] %vm226_vm2, %v2752_v4  ;;  %v2751_v46 = vadd.f32 %v2496_v60, %v2105_v43  ;;  %4509 = vperm.xlu1 %14443, %v4259_v61   ;;  %4534 = vperm.xlu0 %14442, %v4264_v38   ;;  %v3363_v25 = vmul.f32 %v3254_v59, %v2915_v16  ;;  %v2923_v4 = vld [vmem:[#allocation2 + $0x1e9] sm:$0xff]  ;;  %v4269_v60 = vld [vmem:[%s18905_s1 + $0x1c0] sm:$0xff] }
 0x1f5   :  { %v13669_v2 = vpop.f32.mrf.mxu1  ;;  %13811 = vmatmul.mubr.msk.f32.gmra.mxu0 %vm23_vm0, %v3360_v15  ;;  %v2116_v15 = vld [vmem:[#allocation3 + $0xd8] sm:$0xff] }
 0x1f6   :  { %2815 = vst.msk [vmem:[#allocation3 + $0x80] sm:$0xff] %vm226_vm2, %v2751_v46  ;;  %v2754_v18 = vadd.f32 %v13669_v2, %v2108_v7  ;;  %v3249_v19 = vpop.permute.xlu1 %3248  ;;  %13813 = vmatprep.mubr.msk.f32.mxu0 %vm23_vm0, %v3361_v20  ;;  %v2922_v20 = vld [vmem:[#allocation2 + $0x1e1] sm:$0xff] }
 0x1f7   :  { %v3362_v6 = vmul.f32 %v3249_v19, %v2914_v3  ;;  %v2506_v57 = vpop.f32.mrf.mxu1  ;;  %v3264_v40 = vpop.permute.xlu0 %3263  ;;  %v4274_v59 = vld [vmem:[%s18905_s1 + $0x1e8] sm:$0xff]  ;;  %v2115_v2 = vld [vmem:[#allocation3 + $0xd0] sm:$0xff] }
 0x1f8   :  { %2818 = vst.msk [vmem:[#allocation3 + $0x98] sm:$0xff] %vm226_vm2, %v2754_v18  ;;  %v2753_v39 = vadd.f32 %v2506_v57, %v2107_v54  ;;  %4519 = vperm.xlu1 %14443, %v4261_v63   ;;  %4544 = vperm.xlu0 %14442, %v4266_v26   ;;  %v3365_v29 = vmul.f32 %v3264_v40, %v2917_v62  ;;  %v2925_v18 = vld [vmem:[#allocation2 + $0x1f9] sm:$0xff] }
 0x1f9   :  { %v13672_v22 = vpop.f32.mrf.mxu1  ;;  %13814 = vmatmul.mubr.msk.f32.gmra.mxu0 %vm23_vm0, %v3362_v6  ;;  %v4271_v6 = vld [vmem:[%s18905_s1 + $0x1d0] sm:$0xff]  ;;  %v160_v54 = vld [vmem:[%s18904_s0 + $0x1f8] sm:$0xff] }
 0x1fa   :  { %2817 = vst.msk [vmem:[#allocation3 + $0x90] sm:$0xff] %vm226_vm2, %v2753_v39  ;;  %v2756_v8 = vadd.f32 %v13672_v22, %v2110_v23  ;;  %v3259_v42 = vpop.permute.xlu1 %3258  ;;  %13816 = vmatprep.mubr.msk.f32.mxu0 %vm23_vm0, %v3363_v25  ;;  %v2924_v25 = vld [vmem:[#allocation2 + $0x1f1] sm:$0xff] }
 0x1fb   :  { %v3364_v28 = vmul.f32 %v3259_v42, %v2916_v30  ;;  %v2516_v41 = vpop.f32.mrf.mxu1  ;;  %v3274_v14 = vpop.permute.xlu0 %3273  ;;  %v2118_v57 = vld [vmem:[#allocation3 + $0xe8] sm:$0xff]  ;;  %225 = vst.msk [vmem:[#allocation2 + $0x210] sm:$0xff] %vm23_vm0, %v160_v54  ;;  %v2125_v54 = vld [vmem:[#allocation3 + $0x120] sm:$0xff] }
 0x1fc   :  { %2820 = vst.msk [vmem:[#allocation3 + $0xa8] sm:$0xff] %vm226_vm2, %v2756_v8  ;;  %v2755_v33 = vadd.f32 %v2516_v41, %v2109_v24  ;;  %4529 = vperm.xlu1 %14443, %v4263_v9   ;;  %4554 = vperm.xlu0 %14442, %v4268_v21   ;;  %v3367_v10 = vmul.f32 %v3274_v14, %v2919_v5  ;;  %v4276_v62 = vld [vmem:[%s18905_s1 + $0x1f8] sm:$0xff]  ;;  %v2117_v21 = vld [vmem:[#allocation3 + $0xe0] sm:$0xff]  ;;  %v2120_v41 = vld [vmem:[#allocation3 + $0xf8] sm:$0xff] }
 0x1fd   :  { %v13675_v48 = vpop.f32.mrf.mxu1  ;;  %13817 = vmatmul.mubr.msk.f32.gmra.mxu0 %vm23_vm0, %v3364_v28  ;;  %v4149_v39 = vld [vmem:[#allocation2 + $0x17] sm:$0xff]  ;;  %v2926_v28 = vld [vmem:[#allocation2 + $0x201] sm:$0xff] }
 0x1fe   :  { %2819 = vst.msk [vmem:[#allocation3 + $0xa0] sm:$0xff] %vm226_vm2, %v2755_v33  ;;  %v2758_v37 = vadd.f32 %v13675_v48, %v2112_v11  ;;  %v3269_v36 = vpop.permute.xlu1 %3268  ;;  %13819 = vmatprep.mubr.msk.f32.mxu0 %vm23_vm0, %v3365_v29  ;;  %v4273_v5 = vld [vmem:[%s18905_s1 + $0x1e0] sm:$0xff]  ;;  %v5500_v11 = vld [vmem:[%s18905_s1 + $0x8] sm:$0xff] }
 0x1ff   :  { %v3366_v1 = vmul.f32 %v3269_v36, %v2918_v32  ;;  %v2526_v52 = vpop.f32.mrf.mxu1  ;;  %v3284_v45 = vpop.permute.xlu0 %3283 }
 0x200   :  { %2822 = vst.msk [vmem:[#allocation3 + $0xb8] sm:$0xff] %vm226_vm2, %v2758_v37  ;;  %v2757_v35 = vadd.f32 %v2526_v52, %v2111_v31  ;;  %4539 = vperm.xlu1 %14443, %v4265_v27   ;;  %4564 = vperm.xlu0 %14442, %v4270_v47   ;;  %v3369_v0 = vmul.f32 %v3284_v45, %v2921_v44  ;;  %v2119_v27 = vld [vmem:[#allocation3 + $0xf0] sm:$0xff]  ;;  %v4275_v45 = vld [vmem:[%s18905_s1 + $0x1f0] sm:$0xff] }
 0x201   :  { %v13678_v34 = vpop.f32.mrf.mxu1  ;;  %13820 = vmatmul.mubr.msk.f32.gmra.mxu0 %vm23_vm0, %v3366_v1  ;;  %v2122_v1 = vld [vmem:[#allocation3 + $0x108] sm:$0xff] }
 0x202   :  { %2821 = vst.msk [vmem:[#allocation3 + $0xb0] sm:$0xff] %vm226_vm2, %v2757_v35  ;;  %v2760_v12 = vadd.f32 %v13678_v34, %v2114_v13  ;;  %v3279_v56 = vpop.permute.xlu1 %3278  ;;  %13822 = vmatprep.mubr.msk.f32.mxu0 %vm23_vm0, %v3367_v10  ;;  %v14546_v10 = vmov 4   ;;  %v4150_v52 = vld [vmem:[#allocation2 + $0x1f] sm:$0xff]  ;;  %v2121_v13 = vld [vmem:[#allocation3 + $0x100] sm:$0xff] }
 0x203   :  { %v3368_v55 = vmul.f32 %v3279_v56, %v2920_v51  ;;  %v2536_v61 = vpop.f32.mrf.mxu1  ;;  %v3294_v38 = vpop.permute.xlu0 %3293  ;;  %v5503_v35 = vld [vmem:[%s18905_s1 + $0x20] sm:$0xff] }
 0x204   :  { %2824 = vst.msk [vmem:[#allocation3 + $0xc8] sm:$0xff] %vm226_vm2, %v2760_v12  ;;  %v2759_v17 = vadd.f32 %v2536_v61, %v2113_v58  ;;  %4549 = vperm.xlu1 %14443, %v4267_v53   ;;  %4574 = vperm.xlu0 %14442, %v4272_v50   ;;  %v3371_v3 = vmul.f32 %v3294_v38, %v2923_v4  ;;  %v4152_v12 = vld [vmem:[#allocation2 + $0x2f] sm:$0xff]  ;;  %v4151_v58 = vld [vmem:[#allocation2 + $0x27] sm:$0xff] }
 0x205   :  { %v13681_v43 = vpop.f32.mrf.mxu1  ;;  %13823 = vmatmul.mubr.msk.f32.gmra.mxu0 %vm23_vm0, %v3368_v55  ;;  %v12625_v61 = vld [vmem:[%s18906_s2 + $0x10] sm:$0xf]  ;;  %v5499_v4 = vld [vmem:[%s18905_s1] sm:$0xff] }
 0x206   :  { %2823 = vst.msk [vmem:[#allocation3 + $0xc0] sm:$0xff] %vm226_vm2, %v2759_v17  ;;  %v2762_v16 = vadd.f32 %v13681_v43, %v2116_v15  ;;  %v3289_v46 = vpop.permute.xlu1 %3288  ;;  %13825 = vmatprep.mubr.msk.f32.mxu0 %vm23_vm0, %v3369_v0  ;;  %v2124_v0 = vld [vmem:[#allocation3 + $0x118] sm:$0xff]  ;;  %v5505_v17 = vld [vmem:[%s18905_s1 + $0x30] sm:$0xff]  ;;  %13932 = vmatprep.subr.msk.mxu0 %vm1060_vm1, %v12625_v61  ;;  %v2123_v43 = vld [vmem:[#allocation3 + $0x110] sm:$0xff] }
 0x207   :  { %v3370_v7 = vmul.f32 %v3289_v46, %v2922_v20  ;;  %v2546_v63 = vpop.f32.mrf.mxu1  ;;  %v3304_v26 = vpop.permute.xlu0 %3303  ;;  %13933 = vmatpush3.msk.msra.mxu0 %vm1060_vm1, %v12625_v61  ;;  %v4154_v46 = vld [vmem:[#allocation2 + $0x3f] sm:$0xff] }
 0x208   :  { %2826 = vst.msk [vmem:[#allocation3 + $0xd8] sm:$0xff] %vm226_vm2, %v2762_v16  ;;  %v2761_v19 = vadd.f32 %v2546_v63, %v2115_v2  ;;  %4559 = vperm.xlu1 %14443, %v4269_v60   ;;  %4584 = vperm.xlu0 %14442, %v4274_v59   ;;  %v3373_v22 = vmul.f32 %v3304_v26, %v2925_v18  ;;  %v4153_v63 = vld [vmem:[#allocation2 + $0x37] sm:$0xff] }
 0x209   :  { %v13684_v40 = vpop.f32.mrf.mxu1  ;;  %13826 = vmatmul.mubr.msk.f32.gmra.mxu0 %vm23_vm0, %v3370_v7  ;;  %v2126_v7 = vld [vmem:[#allocation3 + $0x128] sm:$0xff]  ;;  %v5501_v18 = vld [vmem:[%s18905_s1 + $0x10] sm:$0xff] }
 0x20a   :  { %2825 = vst.msk [vmem:[#allocation3 + $0xd0] sm:$0xff] %vm226_vm2, %v2761_v19  ;;  %v2764_v30 = vadd.f32 %v13684_v40, %v2118_v57  ;;  %v3299_v23 = vpop.permute.xlu1 %3298  ;;  %13828 = vmatprep.mubr.msk.f32.mxu0 %vm23_vm0, %v3371_v3  ;;  %v5507_v19 = vld [vmem:[%s18905_s1 + $0x40] sm:$0xff] }
 0x20b   :  { %v3372_v9 = vmul.f32 %v3299_v23, %v2924_v25  ;;  %v2556_v8 = vpop.f32.mrf.mxu1  ;;  %v4280_v42 = vpop.permute.xlu0 %4279  ;;  %v2128_v23 = vld [vmem:[#allocation3 + $0x138] sm:$0xff] }
 0x20c   :  { %2828 = vst.msk [vmem:[#allocation3 + $0xe8] sm:$0xff] %vm226_vm2, %v2764_v30  ;;  %v2763_v29 = vadd.f32 %v2556_v8, %v2117_v21  ;;  %4569 = vperm.xlu1 %14443, %v4271_v6   ;;  %4594 = vperm.xlu0 %14442, %v4276_v62   ;;  %v4597_v24 = vmul.f32 %v4280_v42, %v4149_v39  ;;  %v4156_v39 = vld [vmem:[#allocation2 + $0x4f] sm:$0xff]  ;;  %v5502_v8 = vld [vmem:[%s18905_s1 + $0x18] sm:$0xff] }
 0x20d   :  { %v13687_v14 = vpop.f32.mrf.mxu1  ;;  %13829 = vmatmul.mubr.msk.f32.gmra.mxu0 %vm23_vm0, %v3372_v9  ;;  %v4155_v9 = vld [vmem:[#allocation2 + $0x47] sm:$0xff]  ;;  %v5509_v42 = vld [vmem:[%s18905_s1 + $0x50] sm:$0xff] }
 0x20e   :  { %2827 = vst.msk [vmem:[#allocation3 + $0xe0] sm:$0xff] %vm226_vm2, %v2763_v29  ;;  %v2766_v33 = vadd.f32 %v13687_v14, %v2120_v41  ;;  %v3309_v32 = vpop.permute.xlu1 %3308  ;;  %13831 = vmatprep.mubr.msk.f32.mxu0 %vm23_vm0, %v3373_v22  ;;  %13836 = vmatprep.mubr.msk.f32.mxu1 %vm23_vm0, %v4597_v24  ;;  %v2127_v24 = vld [vmem:[#allocation3 + $0x130] sm:$0xff] }
 0x20f   :  { %v3374_v48 = vmul.f32 %v3309_v32, %v2926_v28  ;;  %v2566_v47 = vpop.f32.mrf.mxu1  ;;  %v4295_v37 = vpop.permute.xlu0 %4294 }
 0x210   :  { %2830 = vst.msk [vmem:[#allocation3 + $0xf8] sm:$0xff] %vm226_vm2, %v2766_v33  ;;  %v2765_v36 = vadd.f32 %v2566_v47, %v2119_v27  ;;  %4579 = vperm.xlu1 %14443, %v4273_v5   ;;  %14445 = vset.pattern.permute.xlu0 %v14546_v10  ;;  %v4600_v20 = vmul.f32 %v4295_v37, %v4152_v12  ;;  %v4158_v33 = vld [vmem:[#allocation2 + $0x5f] sm:$0xff]  ;;  %v4157_v27 = vld [vmem:[#allocation2 + $0x57] sm:$0xff]  ;;  %v5504_v37 = vld [vmem:[%s18905_s1 + $0x28] sm:$0xff] }
 0x211   :  { %5570 = vperm.xlu0 %14445, %v5500_v11   ;;  %v13690_v31 = vpop.f32.mrf.mxu1  ;;  %13832 = vmatmul.mubr.msk.f32.gmra.mxu0 %vm23_vm0, %v3374_v48  ;;  %v2130_v11 = vld [vmem:[#allocation3 + $0x148] sm:$0xff] }
 0x212   :  { %2829 = vst.msk [vmem:[#allocation3 + $0xf0] sm:$0xff] %vm226_vm2, %v2765_v36  ;;  %v2768_v44 = vadd.f32 %v13690_v31, %v2122_v1  ;;  %v5511_v36 = vld [vmem:[%s18905_s1 + $0x60] sm:$0xff]  ;;  %v2129_v31 = vld [vmem:[#allocation3 + $0x140] sm:$0xff]  ;;  %v5506_v12 = vld [vmem:[%s18905_s1 + $0x38] sm:$0xff] }
 0x213   :  { %v4285_v51 = vpop.permute.xlu1 %4284  ;;  %v2576_v34 = vpop.f32.mrf.mxu1 }
 0x214   :  { %2832 = vst.msk [vmem:[#allocation3 + $0x108] sm:$0xff] %vm226_vm2, %v2768_v44  ;;  %v4598_v53 = vmul.f32 %v4285_v51, %v4150_v52  ;;  %v2767_v50 = vadd.f32 %v2576_v34, %v2121_v13  ;;  %4589 = vperm.xlu1 %14443, %v4275_v45   ;;  %v4305_v56 = vpop.permute.xlu0 %4304  ;;  %v2132_v13 = vld [vmem:[#allocation3 + $0x158] sm:$0xff] }
 0x215   :  { %5585 = vperm.xlu0 %14445, %v5503_v35   ;;  %v13693_v55 = vpop.f32.mrf.mxu1  ;;  %v4602_v25 = vmul.f32 %v4305_v56, %v4154_v46  ;;  %v4160_v35 = vld [vmem:[#allocation2 + $0x6f] sm:$0xff]  ;;  %v5515_v46 = vld [vmem:[%s18905_s1 + $0x80] sm:$0xff] }
 0x216   :  { %2831 = vst.msk [vmem:[#allocation3 + $0x100] sm:$0xff] %vm226_vm2, %v2767_v50  ;;  %v2770_v38 = vadd.f32 %v13693_v55, %v2124_v0  ;;  %13837 = vmatmul.mubr.msk.f32.vlgmr.msra.gmra.mxu1 %vm23_vm0, %v4598_v53  ;;  %v4159_v53 = vld [vmem:[#allocation2 + $0x67] sm:$0xff]  ;;  %v5513_v56 = vld [vmem:[%s18905_s1 + $0x70] sm:$0xff] }
 0x217   :  { %v4290_v15 = vpop.permute.xlu1 %4289  ;;  %v2586_v60 = vpop.f32.mrf.mxu1 }
 0x218   :  { %2834 = vst.msk [vmem:[#allocation3 + $0x118] sm:$0xff] %vm226_vm2, %v2770_v38  ;;  %v4599_v59 = vmul.f32 %v4290_v15, %v4151_v58  ;;  %v2769_v16 = vadd.f32 %v2586_v60, %v2123_v43  ;;  %14444 = vset.pattern.permute.xlu1 %v14546_v10  ;;  %v4315_v3 = vpop.permute.xlu0 %4314  ;;  %v2131_v58 = vld [vmem:[#allocation3 + $0x150] sm:$0xff]  ;;  %v2134_v15 = vld [vmem:[#allocation3 + $0x168] sm:$0xff] }
 0x219   :  { %5565 = vperm.xlu1 %14444, %v5499_v4   ;;  %5595 = vperm.xlu0 %14445, %v5505_v17   ;;  %v13696_v2 = vpop.f32.mrf.mxu1  ;;  %v4604_v29 = vmul.f32 %v4315_v3, %v4156_v39  ;;  %v4162_v17 = vld [vmem:[#allocation2 + $0x7f] sm:$0xff]  ;;  %v4161_v60 = vld [vmem:[#allocation2 + $0x77] sm:$0xff] }
 0x21a   :  { %2833 = vst.msk [vmem:[#allocation3 + $0x110] sm:$0xff] %vm226_vm2, %v2769_v16  ;;  %v2772_v26 = vadd.f32 %v13696_v2, %v2126_v7  ;;  %13839 = vmatprep.mubr.msk.f32.mxu1 %vm23_vm0, %v4599_v59  ;;  %v5508_v16 = vld [vmem:[%s18905_s1 + $0x48] sm:$0xff]  ;;  %v2133_v2 = vld [vmem:[#allocation3 + $0x160] sm:$0xff] }
 0x21b   :  { %v4300_v6 = vpop.permute.xlu1 %4299  ;;  %v2596_v57 = vpop.f32.mrf.mxu1  ;;  %13840 = vmatmul.mubr.msk.f32.gmra.mxu1 %vm23_vm0, %v4600_v20  ;;  %v5517_v39 = vld [vmem:[%s18905_s1 + $0x90] sm:$0xff] }
 0x21c   :  { %2836 = vst.msk [vmem:[#allocation3 + $0x128] sm:$0xff] %vm226_vm2, %v2772_v26  ;;  %v4601_v40 = vmul.f32 %v4300_v6, %v4153_v63  ;;  %v2771_v62 = vadd.f32 %v2596_v57, %v2125_v54  ;;  %v4325_v30 = vpop.permute.xlu0 %4324  ;;  %v2136_v6 = vld [vmem:[#allocation3 + $0x178] sm:$0xff] }
 0x21d   :  { %5575 = vperm.xlu1 %14444, %v5501_v18   ;;  %5605 = vperm.xlu0 %14445, %v5507_v19   ;;  %v13699_v22 = vpop.f32.mrf.mxu1  ;;  %v4606_v10 = vmul.f32 %v4325_v30, %v4158_v33  ;;  %v4164_v19 = vld [vmem:[#allocation2 + $0x8f] sm:$0xff]  ;;  %v4163_v57 = vld [vmem:[#allocation2 + $0x87] sm:$0xff] }
 0x21e   :  { %2835 = vst.msk [vmem:[#allocation3 + $0x120] sm:$0xff] %vm226_vm2, %v2771_v62  ;;  %v2774_v21 = vadd.f32 %v13699_v22, %v2128_v23  ;;  %13842 = vmatprep.mubr.msk.f32.mxu1 %vm23_vm0, %v4601_v40  ;;  %v5510_v62 = vld [vmem:[%s18905_s1 + $0x58] sm:$0xff]  ;;  %v2135_v22 = vld [vmem:[#allocation3 + $0x170] sm:$0xff] }
 0x21f   :  { %v4310_v28 = vpop.permute.xlu1 %4309  ;;  %v2606_v41 = vpop.f32.mrf.mxu1  ;;  %13843 = vmatmul.mubr.msk.f32.gmra.mxu1 %vm23_vm0, %v4602_v25  ;;  %v5519_v33 = vld [vmem:[%s18905_s1 + $0xa0] sm:$0xff] }
 0x220   :  { %2838 = vst.msk [vmem:[#allocation3 + $0x138] sm:$0xff] %vm226_vm2, %v2774_v21  ;;  %v4603_v14 = vmul.f32 %v4310_v28, %v4155_v9  ;;  %v2773_v5 = vadd.f32 %v2606_v41, %v2127_v24  ;;  %v4335_v32 = vpop.permute.xlu0 %4334  ;;  %v2138_v28 = vld [vmem:[#allocation3 + $0x188] sm:$0xff] }
 0x221   :  { %5580 = vperm.xlu1 %14444, %v5502_v8   ;;  %5615 = vperm.xlu0 %14445, %v5509_v42   ;;  %v13702_v48 = vpop.f32.mrf.mxu1  ;;  %v4608_v0 = vmul.f32 %v4335_v32, %v4160_v35  ;;  %v4166_v42 = vld [vmem:[#allocation2 + $0x9f] sm:$0xff]  ;;  %v4165_v41 = vld [vmem:[#allocation2 + $0x97] sm:$0xff] }
 0x222   :  { %2837 = vst.msk [vmem:[#allocation3 + $0x130] sm:$0xff] %vm226_vm2, %v2773_v5  ;;  %v2776_v47 = vadd.f32 %v13702_v48, %v2130_v11  ;;  %13845 = vmatprep.mubr.msk.f32.mxu1 %vm23_vm0, %v4603_v14  ;;  %v5512_v5 = vld [vmem:[%s18905_s1 + $0x68] sm:$0xff]  ;;  %v2137_v48 = vld [vmem:[#allocation3 + $0x180] sm:$0xff] }
 0x223   :  { %v4320_v1 = vpop.permute.xlu1 %4319  ;;  %v2616_v52 = vpop.f32.mrf.mxu1  ;;  %13846 = vmatmul.mubr.msk.f32.gmra.mxu1 %vm23_vm0, %v4604_v29  ;;  %v5521_v35 = vld [vmem:[%s18905_s1 + $0xb0] sm:$0xff] }
 0x224   :  { %2840 = vst.msk [vmem:[#allocation3 + $0x148] sm:$0xff] %vm226_vm2, %v2776_v47  ;;  %v4605_v45 = vmul.f32 %v4320_v1, %v4157_v27  ;;  %v2775_v44 = vadd.f32 %v2616_v52, %v2129_v31  ;;  %v4345_v51 = vpop.permute.xlu0 %4344  ;;  %v2140_v1 = vld [vmem:[#allocation3 + $0x198] sm:$0xff] }
 0x225   :  { %5590 = vperm.xlu1 %14444, %v5504_v37   ;;  %5625 = vperm.xlu0 %14445, %v5511_v36   ;;  %v13705_v34 = vpop.f32.mrf.mxu1  ;;  %v4610_v3 = vmul.f32 %v4345_v51, %v4162_v17  ;;  %v4168_v36 = vld [vmem:[#allocation2 + $0xaf] sm:$0xff]  ;;  %v4167_v52 = vld [vmem:[#allocation2 + $0xa7] sm:$0xff] }
 0x226   :  { %2839 = vst.msk [vmem:[#allocation3 + $0x140] sm:$0xff] %vm226_vm2, %v2775_v44  ;;  %v2778_v50 = vadd.f32 %v13705_v34, %v2132_v13  ;;  %13848 = vmatprep.mubr.msk.f32.mxu1 %vm23_vm0, %v4605_v45  ;;  %v5514_v44 = vld [vmem:[%s18905_s1 + $0x78] sm:$0xff]  ;;  %v2139_v34 = vld [vmem:[#allocation3 + $0x190] sm:$0xff] }
 0x227   :  { %v4330_v55 = vpop.permute.xlu1 %4329  ;;  %v2626_v61 = vpop.f32.mrf.mxu1  ;;  %13849 = vmatmul.mubr.msk.f32.gmra.mxu1 %vm23_vm0, %v4606_v10  ;;  %v5523_v17 = vld [vmem:[%s18905_s1 + $0xc0] sm:$0xff] }
 0x228   :  { %2842 = vst.msk [vmem:[#allocation3 + $0x158] sm:$0xff] %vm226_vm2, %v2778_v50  ;;  %v4607_v38 = vmul.f32 %v4330_v55, %v4159_v53  ;;  %v2777_v4 = vadd.f32 %v2626_v61, %v2131_v58  ;;  %v4355_v20 = vpop.permute.xlu0 %4354  ;;  %v2142_v55 = vld [vmem:[#allocation3 + $0x1a8] sm:$0xff] }
 0x229   :  { %5600 = vperm.xlu1 %14444, %v5506_v12   ;;  %5635 = vperm.xlu0 %14445, %v5513_v56   ;;  %v13708_v43 = vpop.f32.mrf.mxu1  ;;  %v4612_v30 = vmul.f32 %v4355_v20, %v4164_v19  ;;  %v4170_v56 = vld [vmem:[#allocation2 + $0xbf] sm:$0xff]  ;;  %v4169_v61 = vld [vmem:[#allocation2 + $0xb7] sm:$0xff] }
 0x22a   :  { %2841 = vst.msk [vmem:[#allocation3 + $0x150] sm:$0xff] %vm226_vm2, %v2777_v4  ;;  %v2780_v59 = vadd.f32 %v13708_v43, %v2134_v15  ;;  %13851 = vmatprep.mubr.msk.f32.mxu1 %vm23_vm0, %v4607_v38  ;;  %v5516_v4 = vld [vmem:[%s18905_s1 + $0x88] sm:$0xff]  ;;  %v2141_v43 = vld [vmem:[#allocation3 + $0x1a0] sm:$0xff] }
 0x22b   :  { %v4340_v7 = vpop.permute.xlu1 %4339  ;;  %v2636_v63 = vpop.f32.mrf.mxu1  ;;  %13852 = vmatmul.mubr.msk.f32.gmra.mxu1 %vm23_vm0, %v4608_v0  ;;  %v5525_v19 = vld [vmem:[%s18905_s1 + $0xd0] sm:$0xff] }
 0x22c   :  { %2844 = vst.msk [vmem:[#allocation3 + $0x168] sm:$0xff] %vm226_vm2, %v2780_v59  ;;  %v4609_v26 = vmul.f32 %v4340_v7, %v4161_v60  ;;  %v2779_v18 = vadd.f32 %v2636_v63, %v2133_v2  ;;  %v4365_v25 = vpop.permute.xlu0 %4364  ;;  %v2144_v7 = vld [vmem:[#allocation3 + $0x1b8] sm:$0xff] }
 0x22d   :  { %5610 = vperm.xlu1 %14444, %v5508_v16   ;;  %5645 = vperm.xlu0 %14445, %v5515_v46   ;;  %v13711_v54 = vpop.f32.mrf.mxu1  ;;  %v4614_v32 = vmul.f32 %v4365_v25, %v4166_v42  ;;  %v4172_v46 = vld [vmem:[#allocation2 + $0xcf] sm:$0xff]  ;;  %v4171_v63 = vld [vmem:[#allocation2 + $0xc7] sm:$0xff] }
 0x22e   :  { %2843 = vst.msk [vmem:[#allocation3 + $0x160] sm:$0xff] %vm226_vm2, %v2779_v18  ;;  %v2782_v40 = vadd.f32 %v13711_v54, %v2136_v6  ;;  %13854 = vmatprep.mubr.msk.f32.mxu1 %vm23_vm0, %v4609_v26  ;;  %v5518_v18 = vld [vmem:[%s18905_s1 + $0x98] sm:$0xff]  ;;  %v2143_v54 = vld [vmem:[#allocation3 + $0x1b0] sm:$0xff] }
 0x22f   :  { %v4350_v23 = vpop.permute.xlu1 %4349  ;;  %v2646_v9 = vpop.f32.mrf.mxu1  ;;  %13855 = vmatmul.mubr.msk.f32.gmra.mxu1 %vm23_vm0, %v4610_v3  ;;  %v5527_v42 = vld [vmem:[%s18905_s1 + $0xe0] sm:$0xff] }
 0x230   :  { %2846 = vst.msk [vmem:[#allocation3 + $0x178] sm:$0xff] %vm226_vm2, %v2782_v40  ;;  %v4611_v21 = vmul.f32 %v4350_v23, %v4163_v57  ;;  %v2781_v8 = vadd.f32 %v2646_v9, %v2135_v22  ;;  %v4375_v29 = vpop.permute.xlu0 %4374  ;;  %v2146_v23 = vld [vmem:[#allocation3 + $0x1c8] sm:$0xff] }
 0x231   :  { %5620 = vperm.xlu1 %14444, %v5510_v62   ;;  %5655 = vperm.xlu0 %14445, %v5517_v39   ;;  %v13714_v24 = vpop.f32.mrf.mxu1  ;;  %v4616_v51 = vmul.f32 %v4375_v29, %v4168_v36  ;;  %v4174_v39 = vld [vmem:[#allocation2 + $0xdf] sm:$0xff]  ;;  %v4173_v9 = vld [vmem:[#allocation2 + $0xd7] sm:$0xff] }
 0x232   :  { %2845 = vst.msk [vmem:[#allocation3 + $0x170] sm:$0xff] %vm226_vm2, %v2781_v8  ;;  %v2784_v14 = vadd.f32 %v13714_v24, %v2138_v28  ;;  %13857 = vmatprep.mubr.msk.f32.mxu1 %vm23_vm0, %v4611_v21  ;;  %v5520_v8 = vld [vmem:[%s18905_s1 + $0xa8] sm:$0xff]  ;;  %v2145_v24 = vld [vmem:[#allocation3 + $0x1c0] sm:$0xff] }
 0x233   :  { %v4360_v11 = vpop.permute.xlu1 %4359  ;;  %v2656_v27 = vpop.f32.mrf.mxu1  ;;  %13858 = vmatmul.mubr.msk.f32.gmra.mxu1 %vm23_vm0, %v4612_v30  ;;  %v5529_v36 = vld [vmem:[%s18905_s1 + $0xf0] sm:$0xff] }
 0x234   :  { %2848 = vst.msk [vmem:[#allocation3 + $0x188] sm:$0xff] %vm226_vm2, %v2784_v14  ;;  %v4613_v47 = vmul.f32 %v4360_v11, %v4165_v41  ;;  %v2783_v37 = vadd.f32 %v2656_v27, %v2137_v48  ;;  %v4385_v10 = vpop.permute.xlu0 %4384  ;;  %v2148_v11 = vld [vmem:[#allocation3 + $0x1d8] sm:$0xff] }
 0x235   :  { %5630 = vperm.xlu1 %14444, %v5512_v5   ;;  %5665 = vperm.xlu0 %14445, %v5519_v33   ;;  %v13717_v31 = vpop.f32.mrf.mxu1  ;;  %v4618_v20 = vmul.f32 %v4385_v10, %v4170_v56  ;;  %v4176_v33 = vld [vmem:[#allocation2 + $0xef] sm:$0xff]  ;;  %v4175_v27 = vld [vmem:[#allocation2 + $0xe7] sm:$0xff] }
 0x236   :  { %2847 = vst.msk [vmem:[#allocation3 + $0x180] sm:$0xff] %vm226_vm2, %v2783_v37  ;;  %v2786_v45 = vadd.f32 %v13717_v31, %v2140_v1  ;;  %13860 = vmatprep.mubr.msk.f32.mxu1 %vm23_vm0, %v4613_v47  ;;  %v5522_v37 = vld [vmem:[%s18905_s1 + $0xb8] sm:$0xff]  ;;  %v2147_v31 = vld [vmem:[#allocation3 + $0x1d0] sm:$0xff] }
 0x237   :  { %v4370_v13 = vpop.permute.xlu1 %4369  ;;  %v2666_v53 = vpop.f32.mrf.mxu1  ;;  %13861 = vmatmul.mubr.msk.f32.gmra.mxu1 %vm23_vm0, %v4614_v32  ;;  %v5531_v56 = vld [vmem:[%s18905_s1 + $0x100] sm:$0xff] }
 0x238   :  { %2850 = vst.msk [vmem:[#allocation3 + $0x198] sm:$0xff] %vm226_vm2, %v2786_v45  ;;  %v4615_v50 = vmul.f32 %v4370_v13, %v4167_v52  ;;  %v2785_v12 = vadd.f32 %v2666_v53, %v2139_v34  ;;  %v4395_v0 = vpop.permute.xlu0 %4394  ;;  %v2150_v13 = vld [vmem:[#allocation3 + $0x1e8] sm:$0xff] }
 0x239   :  { %5640 = vperm.xlu1 %14444, %v5514_v44   ;;  %5675 = vperm.xlu0 %14445, %v5521_v35   ;;  %v13720_v58 = vpop.f32.mrf.mxu1  ;;  %v4620_v25 = vmul.f32 %v4395_v0, %v4172_v46  ;;  %v4178_v35 = vld [vmem:[#allocation2 + $0xff] sm:$0xff]  ;;  %v4177_v53 = vld [vmem:[#allocation2 + $0xf7] sm:$0xff] }
 0x23a   :  { %2849 = vst.msk [vmem:[#allocation3 + $0x190] sm:$0xff] %vm226_vm2, %v2785_v12  ;;  %v2788_v38 = vadd.f32 %v13720_v58, %v2142_v55  ;;  %13863 = vmatprep.mubr.msk.f32.mxu1 %vm23_vm0, %v4615_v50  ;;  %v5524_v12 = vld [vmem:[%s18905_s1 + $0xc8] sm:$0xff]  ;;  %v2149_v58 = vld [vmem:[#allocation3 + $0x1e0] sm:$0xff] }
 0x23b   :  { %v4380_v15 = vpop.permute.xlu1 %4379  ;;  %v2676_v60 = vpop.f32.mrf.mxu1  ;;  %13864 = vmatmul.mubr.msk.f32.gmra.mxu1 %vm23_vm0, %v4616_v51  ;;  %v5533_v46 = vld [vmem:[%s18905_s1 + $0x110] sm:$0xff] }
 0x23c   :  { %2852 = vst.msk [vmem:[#allocation3 + $0x1a8] sm:$0xff] %vm226_vm2, %v2788_v38  ;;  %v4617_v59 = vmul.f32 %v4380_v15, %v4169_v61  ;;  %v2787_v16 = vadd.f32 %v2676_v60, %v2141_v43  ;;  %v4405_v3 = vpop.permute.xlu0 %4404  ;;  %v2152_v15 = vld [vmem:[#allocation3 + $0x1f8] sm:$0xff] }
 0x23d   :  { %5650 = vperm.xlu1 %14444, %v5516_v4   ;;  %5685 = vperm.xlu0 %14445, %v5523_v17   ;;  %v13723_v2 = vpop.f32.mrf.mxu1  ;;  %v4622_v29 = vmul.f32 %v4405_v3, %v4174_v39  ;;  %v4180_v17 = vld [vmem:[#allocation2 + $0x10f] sm:$0xff]  ;;  %v4179_v60 = vld [vmem:[#allocation2 + $0x107] sm:$0xff] }
 0x23e   :  { %2851 = vst.msk [vmem:[#allocation3 + $0x1a0] sm:$0xff] %vm226_vm2, %v2787_v16  ;;  %v2790_v26 = vadd.f32 %v13723_v2, %v2144_v7  ;;  %13866 = vmatprep.mubr.msk.f32.mxu1 %vm23_vm0, %v4617_v59  ;;  %v5526_v16 = vld [vmem:[%s18905_s1 + $0xd8] sm:$0xff]  ;;  %v2151_v2 = vld [vmem:[#allocation3 + $0x1f0] sm:$0xff] }
 0x23f   :  { %v4390_v6 = vpop.permute.xlu1 %4389  ;;  %v2686_v57 = vpop.f32.mrf.mxu1  ;;  %13867 = vmatmul.mubr.msk.f32.gmra.mxu1 %vm23_vm0, %v4618_v20 }
 0x240   :  { %2854 = vst.msk [vmem:[#allocation3 + $0x1b8] sm:$0xff] %vm226_vm2, %v2790_v26  ;;  %v4619_v40 = vmul.f32 %v4390_v6, %v4171_v63  ;;  %v2789_v62 = vadd.f32 %v2686_v57, %v2143_v54  ;;  %v4415_v30 = vpop.permute.xlu0 %4414  ;;  %v4181_v6 = vld [vmem:[#allocation2 + $0x117] sm:$0xff] }
 0x241   :  { %5660 = vperm.xlu1 %14444, %v5518_v18   ;;  %5695 = vperm.xlu0 %14445, %v5525_v19   ;;  %v13726_v22 = vpop.f32.mrf.mxu1  ;;  %v4624_v10 = vmul.f32 %v4415_v30, %v4176_v33  ;;  %v4182_v19 = vld [vmem:[#allocation2 + $0x11f] sm:$0xff] }
 0x242   :  { %2853 = vst.msk [vmem:[#allocation3 + $0x1b0] sm:$0xff] %vm226_vm2, %v2789_v62  ;;  %v2792_v21 = vadd.f32 %v13726_v22, %v2146_v23  ;;  %13869 = vmatprep.mubr.msk.f32.mxu1 %vm23_vm0, %v4619_v40  ;;  %v3376_v54 = vld [vmem:[#allocation3 + $0x8] sm:$0xff]  ;;  %v5528_v40 = vld [vmem:[%s18905_s1 + $0xe8] sm:$0xff]  ;;  %v5535_v62 = vld [vmem:[%s18905_s1 + $0x120] sm:$0xff] }
 0x243   :  { %v4400_v28 = vpop.permute.xlu1 %4399  ;;  %v2696_v41 = vpop.f32.mrf.mxu1  ;;  %13870 = vmatmul.mubr.msk.f32.gmra.mxu1 %vm23_vm0, %v4620_v25 }
 0x244   :  { %2856 = vst.msk [vmem:[#allocation3 + $0x1c8] sm:$0xff] %vm226_vm2, %v2792_v21  ;;  %v4621_v14 = vmul.f32 %v4400_v28, %v4173_v9  ;;  %v2791_v5 = vadd.f32 %v2696_v41, %v2145_v24  ;;  %v4425_v32 = vpop.permute.xlu0 %4424  ;;  %v3375_v9 = vld [vmem:[#allocation3] sm:$0xff]  ;;  %v4183_v28 = vld [vmem:[#allocation2 + $0x127] sm:$0xff]  ;;  %v5530_v24 = vld [vmem:[%s18905_s1 + $0xf8] sm:$0xff] }
 0x245   :  { %5670 = vperm.xlu1 %14444, %v5520_v8   ;;  %5705 = vperm.xlu0 %14445, %v5527_v42   ;;  %v13729_v48 = vpop.f32.mrf.mxu1  ;;  %v4626_v0 = vmul.f32 %v4425_v32, %v4178_v35  ;;  %v4184_v8 = vld [vmem:[#allocation2 + $0x12f] sm:$0xff]  ;;  %v4186_v32 = vld [vmem:[#allocation2 + $0x13f] sm:$0xff] }
 0x246   :  { %2855 = vst.msk [vmem:[#allocation3 + $0x1c0] sm:$0xff] %vm226_vm2, %v2791_v5  ;;  %v2794_v47 = vadd.f32 %v13729_v48, %v2148_v11  ;;  %13872 = vmatprep.mubr.msk.f32.mxu1 %vm23_vm0, %v4621_v14  ;;  %v5537_v41 = vld [vmem:[%s18905_s1 + $0x130] sm:$0xff]  ;;  %v3378_v48 = vld [vmem:[#allocation3 + $0x18] sm:$0xff] }
 0x247   :  { %v4410_v1 = vpop.permute.xlu1 %4409  ;;  %v2706_v52 = vpop.f32.mrf.mxu1  ;;  %13873 = vmatmul.mubr.msk.f32.gmra.mxu1 %vm23_vm0, %v4622_v29 }
 0x248   :  { %2858 = vst.msk [vmem:[#allocation3 + $0x1d8] sm:$0xff] %vm226_vm2, %v2794_v47  ;;  %v4623_v45 = vmul.f32 %v4410_v1, %v4175_v27  ;;  %v2793_v44 = vadd.f32 %v2706_v52, %v2147_v31  ;;  %v4435_v51 = vpop.permute.xlu0 %4434  ;;  %v4185_v47 = vld [vmem:[#allocation2 + $0x137] sm:$0xff]  ;;  %v3377_v52 = vld [vmem:[#allocation3 + $0x10] sm:$0xff] }
 0x249   :  { %5680 = vperm.xlu1 %14444, %v5522_v37   ;;  %5715 = vperm.xlu0 %14445, %v5529_v36   ;;  %v13732_v34 = vpop.f32.mrf.mxu1  ;;  %v4628_v3 = vmul.f32 %v4435_v51, %v4180_v17  ;;  %v5532_v36 = vld [vmem:[%s18905_s1 + $0x108] sm:$0xff] }
 0x24a   :  { %2857 = vst.msk [vmem:[#allocation3 + $0x1d0] sm:$0xff] %vm226_vm2, %v2793_v44  ;;  %v2796_v50 = vadd.f32 %v13732_v34, %v2150_v13  ;;  %13875 = vmatprep.mubr.msk.f32.mxu1 %vm23_vm0, %v4623_v45  ;;  %v4188_v51 = vld [vmem:[#allocation2 + $0x14f] sm:$0xff]  ;;  %v3380_v34 = vld [vmem:[#allocation3 + $0x28] sm:$0xff] }
 0x24b   :  { %v4420_v55 = vpop.permute.xlu1 %4419  ;;  %v2716_v61 = vpop.f32.mrf.mxu1  ;;  %13876 = vmatmul.mubr.msk.f32.gmra.mxu1 %vm23_vm0, %v4624_v10  ;;  %v5539_v10 = vld [vmem:[%s18905_s1 + $0x140] sm:$0xff] }
 0x24c   :  { %2860 = vst.msk [vmem:[#allocation3 + $0x1e8] sm:$0xff] %vm226_vm2, %v2796_v50  ;;  %v4625_v38 = vmul.f32 %v4420_v55, %v4177_v53  ;;  %v2795_v4 = vadd.f32 %v2716_v61, %v2149_v58  ;;  %v4445_v20 = vpop.permute.xlu0 %4444  ;;  %v4187_v50 = vld [vmem:[#allocation2 + $0x147] sm:$0xff]  ;;  %v3379_v61 = vld [vmem:[#allocation3 + $0x20] sm:$0xff] }
 0x24d   :  { %5690 = vperm.xlu1 %14444, %v5524_v12   ;;  %5725 = vperm.xlu0 %14445, %v5531_v56   ;;  %v13735_v43 = vpop.f32.mrf.mxu1  ;;  %v4630_v39 = vmul.f32 %v4445_v20, %v4182_v19  ;;  %v5534_v56 = vld [vmem:[%s18905_s1 + $0x118] sm:$0xff] }
 0x24e   :  { %2859 = vst.msk [vmem:[#allocation3 + $0x1e0] sm:$0xff] %vm226_vm2, %v2795_v4  ;;  %v2798_v59 = vadd.f32 %v13735_v43, %v2152_v15  ;;  %13878 = vmatprep.mubr.msk.f32.mxu1 %vm23_vm0, %v4625_v38  ;;  %v4190_v20 = vld [vmem:[#allocation2 + $0x15f] sm:$0xff]  ;;  %v3382_v43 = vld [vmem:[#allocation3 + $0x38] sm:$0xff] }
 0x24f   :  { %v4430_v7 = vpop.permute.xlu1 %4429  ;;  %v2726_v63 = vpop.f32.mrf.mxu1  ;;  %13879 = vmatmul.mubr.msk.f32.gmra.mxu1 %vm23_vm0, %v4626_v0  ;;  %v5541_v0 = vld [vmem:[%s18905_s1 + $0x150] sm:$0xff] }
 0x250   :  { %2862 = vst.msk [vmem:[#allocation3 + $0x1f8] sm:$0xff] %vm226_vm2, %v2798_v59  ;;  %v4627_v26 = vmul.f32 %v4430_v7, %v4179_v60  ;;  %v2797_v18 = vadd.f32 %v2726_v63, %v2151_v2  ;;  %v4455_v25 = vpop.permute.xlu0 %4454  ;;  %v4189_v59 = vld [vmem:[#allocation2 + $0x157] sm:$0xff]  ;;  %v3381_v63 = vld [vmem:[#allocation3 + $0x30] sm:$0xff] }
 0x251   :  { %5700 = vperm.xlu1 %14444, %v5526_v16   ;;  %5735 = vperm.xlu0 %14445, %v5533_v46   ;;  %v4632_v14 = vmul.f32 %v4455_v25, %v4184_v8  ;;  %v5536_v46 = vld [vmem:[%s18905_s1 + $0x128] sm:$0xff] }
 0x252   :  { %2861 = vst.msk [vmem:[#allocation3 + $0x1f0] sm:$0xff] %vm226_vm2, %v2797_v18  ;;  %v13740_v57 = vpop.f32.mrf.mxu0  ;;  %13881 = vmatprep.mubr.msk.f32.mxu1 %vm23_vm0, %v4627_v26  ;;  %v4192_v25 = vld [vmem:[#allocation2 + $0x16f] sm:$0xff] }
 0x253   :  { %v4022_v30 = vadd.f32 %v13740_v57, %v3376_v54  ;;  %v4440_v23 = vpop.permute.xlu1 %4439  ;;  %13882 = vmatmul.mubr.msk.f32.gmra.mxu1 %vm23_vm0, %v4628_v3  ;;  %v5543_v3 = vld [vmem:[%s18905_s1 + $0x160] sm:$0xff]  ;;  %v3384_v54 = vld [vmem:[#allocation3 + $0x48] sm:$0xff] }
 0x254   :  { %v4629_v22 = vmul.f32 %v4440_v23, %v4181_v6  ;;  %v3702_v21 = vpop.f32.mrf.mxu0  ;;  %v4465_v42 = vpop.permute.xlu0 %4464 }
 0x255   :  { %4086 = vst.msk [vmem:[#allocation3 + $0x8] sm:$0xff] %vm226_vm2, %v4022_v30  ;;  %v4021_v29 = vadd.f32 %v3702_v21, %v3375_v9  ;;  %5710 = vperm.xlu1 %14444, %v5528_v40   ;;  %5745 = vperm.xlu0 %14445, %v5535_v62   ;;  %v4634_v1 = vmul.f32 %v4465_v42, %v4186_v32  ;;  %v4191_v40 = vld [vmem:[#allocation2 + $0x167] sm:$0xff]  ;;  %v5545_v30 = vld [vmem:[%s18905_s1 + $0x170] sm:$0xff] }
 0x256   :  { %13884 = vmatprep.mubr.msk.f32.mxu1 %vm23_vm0, %v4629_v22  ;;  %v3383_v9 = vld [vmem:[#allocation3 + $0x40] sm:$0xff]  ;;  %v5547_v32 = vld [vmem:[%s18905_s1 + $0x180] sm:$0xff] }
 0x257   :  { %4085 = vst.msk [vmem:[#allocation3] sm:$0xff] %vm226_vm2, %v4021_v29  ;;  %v4450_v5 = vpop.permute.xlu1 %4449  ;;  %13885 = vmatmul.mubr.msk.f32.gmra.mxu1 %vm23_vm0, %v4630_v39  ;;  %v5538_v39 = vld [vmem:[%s18905_s1 + $0x138] sm:$0xff] }
 0x258   :  { %v4631_v33 = vmul.f32 %v4450_v5, %v4183_v28  ;;  %v4475_v11 = vpop.permute.xlu0 %4474  ;;  %v4194_v29 = vld [vmem:[#allocation2 + $0x17f] sm:$0xff] }
 0x259   :  { %5720 = vperm.xlu1 %14444, %v5530_v24   ;;  %5755 = vperm.xlu0 %14445, %v5537_v41   ;;  %v13743_v27 = vpop.f32.mrf.mxu0  ;;  %v4636_v55 = vmul.f32 %v4475_v11, %v4188_v51  ;;  %v3386_v24 = vld [vmem:[#allocation3 + $0x58] sm:$0xff]  ;;  %v5549_v51 = vld [vmem:[%s18905_s1 + $0x190] sm:$0xff] }
 0x25a   :  { %v4024_v37 = vadd.f32 %v13743_v27, %v3378_v48  ;;  %13887 = vmatprep.mubr.msk.f32.mxu1 %vm23_vm0, %v4631_v33  ;;  %v5540_v33 = vld [vmem:[%s18905_s1 + $0x148] sm:$0xff]  ;;  %v3385_v27 = vld [vmem:[#allocation3 + $0x50] sm:$0xff] }
 0x25b   :  { %v4460_v31 = vpop.permute.xlu1 %4459  ;;  %v3712_v45 = vpop.f32.mrf.mxu0  ;;  %13888 = vmatmul.mubr.msk.f32.gmra.mxu1 %vm23_vm0, %v4632_v14  ;;  %v4193_v14 = vld [vmem:[#allocation2 + $0x177] sm:$0xff] }
 0x25c   :  { %4088 = vst.msk [vmem:[#allocation3 + $0x18] sm:$0xff] %vm226_vm2, %v4024_v37  ;;  %v4633_v44 = vmul.f32 %v4460_v31, %v4185_v47  ;;  %v4023_v35 = vadd.f32 %v3712_v45, %v3377_v52  ;;  %v4485_v13 = vpop.permute.xlu0 %4484  ;;  %v3388_v31 = vld [vmem:[#allocation3 + $0x68] sm:$0xff]  ;;  %v4195_v45 = vld [vmem:[#allocation2 + $0x187] sm:$0xff] }
 0x25d   :  { %5730 = vperm.xlu1 %14444, %v5532_v36   ;;  %5765 = vperm.xlu0 %14445, %v5539_v10   ;;  %v13746_v53 = vpop.f32.mrf.mxu0  ;;  %v4638_v7 = vmul.f32 %v4485_v13, %v4190_v20  ;;  %v4196_v10 = vld [vmem:[#allocation2 + $0x18f] sm:$0xff]  ;;  %v5551_v20 = vld [vmem:[%s18905_s1 + $0x1a0] sm:$0xff] }
 0x25e   :  { %4087 = vst.msk [vmem:[#allocation3 + $0x10] sm:$0xff] %vm226_vm2, %v4023_v35  ;;  %v4026_v12 = vadd.f32 %v13746_v53, %v3380_v34  ;;  %13890 = vmatprep.mubr.msk.f32.mxu1 %vm23_vm0, %v4633_v44  ;;  %v5542_v35 = vld [vmem:[%s18905_s1 + $0x158] sm:$0xff]  ;;  %v3387_v53 = vld [vmem:[#allocation3 + $0x60] sm:$0xff] }
 0x25f   :  { %v4470_v58 = vpop.permute.xlu1 %4469  ;;  %v3722_v38 = vpop.f32.mrf.mxu0  ;;  %13891 = vmatmul.mubr.msk.f32.gmra.mxu1 %vm23_vm0, %v4634_v1 }
 0x260   :  { %4090 = vst.msk [vmem:[#allocation3 + $0x28] sm:$0xff] %vm226_vm2, %v4026_v12  ;;  %v4635_v4 = vmul.f32 %v4470_v58, %v4187_v50  ;;  %v4025_v17 = vadd.f32 %v3722_v38, %v3379_v61  ;;  %v4495_v15 = vpop.permute.xlu0 %4494  ;;  %v3390_v58 = vld [vmem:[#allocation3 + $0x78] sm:$0xff]  ;;  %v4197_v38 = vld [vmem:[#allocation2 + $0x197] sm:$0xff] }
 0x261   :  { %5740 = vperm.xlu1 %14444, %v5534_v56   ;;  %5775 = vperm.xlu0 %14445, %v5541_v0   ;;  %v13749_v60 = vpop.f32.mrf.mxu0  ;;  %v4640_v23 = vmul.f32 %v4495_v15, %v4192_v25  ;;  %v4198_v0 = vld [vmem:[#allocation2 + $0x19f] sm:$0xff]  ;;  %v5553_v25 = vld [vmem:[%s18905_s1 + $0x1b0] sm:$0xff] }
 0x262   :  { %4089 = vst.msk [vmem:[#allocation3 + $0x20] sm:$0xff] %vm226_vm2, %v4025_v17  ;;  %v4028_v16 = vadd.f32 %v13749_v60, %v3382_v43  ;;  %13893 = vmatprep.mubr.msk.f32.mxu1 %vm23_vm0, %v4635_v4  ;;  %v5544_v17 = vld [vmem:[%s18905_s1 + $0x168] sm:$0xff]  ;;  %v3389_v60 = vld [vmem:[#allocation3 + $0x70] sm:$0xff] }
 0x263   :  { %v4480_v2 = vpop.permute.xlu1 %4479  ;;  %v3732_v26 = vpop.f32.mrf.mxu0  ;;  %13894 = vmatmul.mubr.msk.f32.gmra.mxu1 %vm23_vm0, %v4636_v55 }
 0x264   :  { %4092 = vst.msk [vmem:[#allocation3 + $0x38] sm:$0xff] %vm226_vm2, %v4028_v16  ;;  %v4637_v18 = vmul.f32 %v4480_v2, %v4189_v59  ;;  %v4027_v19 = vadd.f32 %v3732_v26, %v3381_v63  ;;  %v4505_v6 = vpop.permute.xlu0 %4504  ;;  %v3392_v2 = vld [vmem:[#allocation3 + $0x88] sm:$0xff]  ;;  %v4199_v26 = vld [vmem:[#allocation2 + $0x1a7] sm:$0xff] }
 0x265   :  { %5750 = vperm.xlu1 %14444, %v5536_v46   ;;  %5785 = vperm.xlu0 %14445, %v5543_v3   ;;  %v13752_v57 = vpop.f32.mrf.mxu0  ;;  %v4642_v11 = vmul.f32 %v4505_v6, %v4194_v29  ;;  %v4200_v3 = vld [vmem:[#allocation2 + $0x1af] sm:$0xff]  ;;  %v5555_v29 = vld [vmem:[%s18905_s1 + $0x1c0] sm:$0xff] }
 0x266   :  { %4091 = vst.msk [vmem:[#allocation3 + $0x30] sm:$0xff] %vm226_vm2, %v4027_v19  ;;  %v4030_v62 = vadd.f32 %v13752_v57, %v3384_v54  ;;  %13896 = vmatprep.mubr.msk.f32.mxu1 %vm23_vm0, %v4637_v18  ;;  %v5546_v19 = vld [vmem:[%s18905_s1 + $0x178] sm:$0xff]  ;;  %v3391_v57 = vld [vmem:[#allocation3 + $0x80] sm:$0xff] }
 0x267   :  { %v4490_v22 = vpop.permute.xlu1 %4489  ;;  %v3742_v21 = vpop.f32.mrf.mxu0  ;;  %13897 = vmatmul.mubr.msk.f32.gmra.mxu1 %vm23_vm0, %v4638_v7 }
 0x268   :  { %4094 = vst.msk [vmem:[#allocation3 + $0x48] sm:$0xff] %vm226_vm2, %v4030_v62  ;;  %v4639_v8 = vmul.f32 %v4490_v22, %v4191_v40  ;;  %v4029_v42 = vadd.f32 %v3742_v21, %v3383_v9  ;;  %v4515_v28 = vpop.permute.xlu0 %4514  ;;  %v3394_v22 = vld [vmem:[#allocation3 + $0x98] sm:$0xff]  ;;  %v4201_v21 = vld [vmem:[#allocation2 + $0x1b7] sm:$0xff] }
 0x269   :  { %5760 = vperm.xlu1 %14444, %v5538_v39   ;;  %5795 = vperm.xlu0 %14445, %v5545_v30   ;;  %v13755_v41 = vpop.f32.mrf.mxu0  ;;  %v4644_v13 = vmul.f32 %v4515_v28, %v4196_v10  ;;  %v4202_v30 = vld [vmem:[#allocation2 + $0x1bf] sm:$0xff]  ;;  %v5557_v10 = vld [vmem:[%s18905_s1 + $0x1d0] sm:$0xff] }
 0x26a   :  { %4093 = vst.msk [vmem:[#allocation3 + $0x40] sm:$0xff] %vm226_vm2, %v4029_v42  ;;  %v4032_v5 = vadd.f32 %v13755_v41, %v3386_v24  ;;  %13899 = vmatprep.mubr.msk.f32.mxu1 %vm23_vm0, %v4639_v8  ;;  %v5548_v42 = vld [vmem:[%s18905_s1 + $0x188] sm:$0xff]  ;;  %v3393_v41 = vld [vmem:[#allocation3 + $0x90] sm:$0xff] }
 0x26b   :  { %v4500_v48 = vpop.permute.xlu1 %4499  ;;  %v3752_v47 = vpop.f32.mrf.mxu0  ;;  %13900 = vmatmul.mubr.msk.f32.gmra.mxu1 %vm23_vm0, %v4640_v23 }
 0x26c   :  { %4096 = vst.msk [vmem:[#allocation3 + $0x58] sm:$0xff] %vm226_vm2, %v4032_v5  ;;  %v4641_v37 = vmul.f32 %v4500_v48, %v4193_v14  ;;  %v4031_v36 = vadd.f32 %v3752_v47, %v3385_v27  ;;  %v4525_v1 = vpop.permute.xlu0 %4524  ;;  %v3396_v48 = vld [vmem:[#allocation3 + $0xa8] sm:$0xff]  ;;  %v4203_v47 = vld [vmem:[#allocation2 + $0x1c7] sm:$0xff] }
 0x26d   :  { %5770 = vperm.xlu1 %14444, %v5540_v33   ;;  %5805 = vperm.xlu0 %14445, %v5547_v32   ;;  %v13758_v52 = vpop.f32.mrf.mxu0  ;;  %v4646_v15 = vmul.f32 %v4525_v1, %v4198_v0  ;;  %v4204_v32 = vld [vmem:[#allocation2 + $0x1cf] sm:$0xff]  ;;  %v5559_v0 = vld [vmem:[%s18905_s1 + $0x1e0] sm:$0xff] }
 0x26e   :  { %4095 = vst.msk [vmem:[#allocation3 + $0x50] sm:$0xff] %vm226_vm2, %v4031_v36  ;;  %v4034_v44 = vadd.f32 %v13758_v52, %v3388_v31  ;;  %13902 = vmatprep.mubr.msk.f32.mxu1 %vm23_vm0, %v4641_v37  ;;  %v5550_v36 = vld [vmem:[%s18905_s1 + $0x198] sm:$0xff]  ;;  %v3395_v52 = vld [vmem:[#allocation3 + $0xa0] sm:$0xff] }
 0x26f   :  { %v4510_v34 = vpop.permute.xlu1 %4509  ;;  %v3762_v50 = vpop.f32.mrf.mxu0  ;;  %13903 = vmatmul.mubr.msk.f32.gmra.mxu1 %vm23_vm0, %v4642_v11 }
 0x270   :  { %4098 = vst.msk [vmem:[#allocation3 + $0x68] sm:$0xff] %vm226_vm2, %v4034_v44  ;;  %v4643_v12 = vmul.f32 %v4510_v34, %v4195_v45  ;;  %v4033_v56 = vadd.f32 %v3762_v50, %v3387_v53  ;;  %v4535_v55 = vpop.permute.xlu0 %4534  ;;  %v3398_v34 = vld [vmem:[#allocation3 + $0xb8] sm:$0xff]  ;;  %v4205_v50 = vld [vmem:[#allocation2 + $0x1d7] sm:$0xff] }
 0x271   :  { %5780 = vperm.xlu1 %14444, %v5542_v35   ;;  %5815 = vperm.xlu0 %14445, %v5549_v51   ;;  %v13761_v61 = vpop.f32.mrf.mxu0  ;;  %v4648_v6 = vmul.f32 %v4535_v55, %v4200_v3  ;;  %v4206_v51 = vld [vmem:[#allocation2 + $0x1df] sm:$0xff]  ;;  %v5561_v3 = vld [vmem:[%s18905_s1 + $0x1f0] sm:$0xff] }
 0x272   :  { %4097 = vst.msk [vmem:[#allocation3 + $0x60] sm:$0xff] %vm226_vm2, %v4033_v56  ;;  %v4036_v4 = vadd.f32 %v13761_v61, %v3390_v58  ;;  %13905 = vmatprep.mubr.msk.f32.mxu1 %vm23_vm0, %v4643_v12  ;;  %v5552_v56 = vld [vmem:[%s18905_s1 + $0x1a8] sm:$0xff]  ;;  %v3397_v61 = vld [vmem:[#allocation3 + $0xb0] sm:$0xff] }
 0x273   :  { %v4520_v43 = vpop.permute.xlu1 %4519  ;;  %v3772_v59 = vpop.f32.mrf.mxu0  ;;  %13906 = vmatmul.mubr.msk.f32.gmra.mxu1 %vm23_vm0, %v4644_v13 }
 0x274   :  { %4100 = vst.msk [vmem:[#allocation3 + $0x78] sm:$0xff] %vm226_vm2, %v4036_v4  ;;  %v4645_v16 = vmul.f32 %v4520_v43, %v4197_v38  ;;  %v4035_v46 = vadd.f32 %v3772_v59, %v3389_v60  ;;  %v4545_v7 = vpop.permute.xlu0 %4544  ;;  %v3400_v43 = vld [vmem:[#allocation3 + $0xc8] sm:$0xff]  ;;  %v4207_v59 = vld [vmem:[#allocation2 + $0x1e7] sm:$0xff] }
 0x275   :  { %5790 = vperm.xlu1 %14444, %v5544_v17   ;;  %5825 = vperm.xlu0 %14445, %v5551_v20   ;;  %v13764_v63 = vpop.f32.mrf.mxu0  ;;  %v4650_v28 = vmul.f32 %v4545_v7, %v4202_v30  ;;  %v4208_v20 = vld [vmem:[#allocation2 + $0x1ef] sm:$0xff] }
 0x276   :  { %4099 = vst.msk [vmem:[#allocation3 + $0x70] sm:$0xff] %vm226_vm2, %v4035_v46  ;;  %v4038_v18 = vadd.f32 %v13764_v63, %v3392_v2  ;;  %13908 = vmatprep.mubr.msk.f32.mxu1 %vm23_vm0, %v4645_v16  ;;  %v5554_v46 = vld [vmem:[%s18905_s1 + $0x1b8] sm:$0xff]  ;;  %v3399_v63 = vld [vmem:[#allocation3 + $0xc0] sm:$0xff] }
 0x277   :  { %v4530_v54 = vpop.permute.xlu1 %4529  ;;  %v3782_v40 = vpop.f32.mrf.mxu0  ;;  %13909 = vmatmul.mubr.msk.f32.gmra.mxu1 %vm23_vm0, %v4646_v15 }
 0x278   :  { %4102 = vst.msk [vmem:[#allocation3 + $0x88] sm:$0xff] %vm226_vm2, %v4038_v18  ;;  %v4647_v62 = vmul.f32 %v4530_v54, %v4199_v26  ;;  %v4037_v39 = vadd.f32 %v3782_v40, %v3391_v57  ;;  %v4555_v23 = vpop.permute.xlu0 %4554  ;;  %v3402_v54 = vld [vmem:[#allocation3 + $0xd8] sm:$0xff]  ;;  %v4209_v40 = vld [vmem:[#allocation2 + $0x1f7] sm:$0xff] }
 0x279   :  { %5800 = vperm.xlu1 %14444, %v5546_v19   ;;  %5835 = vperm.xlu0 %14445, %v5553_v25   ;;  %v13767_v9 = vpop.f32.mrf.mxu0  ;;  %v4652_v1 = vmul.f32 %v4555_v23, %v4204_v32  ;;  %v4210_v25 = vld [vmem:[#allocation2 + $0x1ff] sm:$0xff] }
 0x27a   :  { %4101 = vst.msk [vmem:[#allocation3 + $0x80] sm:$0xff] %vm226_vm2, %v4037_v39  ;;  %v4040_v8 = vadd.f32 %v13767_v9, %v3394_v22  ;;  %13911 = vmatprep.mubr.msk.f32.mxu1 %vm23_vm0, %v4647_v62  ;;  %v5556_v39 = vld [vmem:[%s18905_s1 + $0x1c8] sm:$0xff]  ;;  %v3401_v22 = vld [vmem:[#allocation3 + $0xd0] sm:$0xff]  ;;  %v5558_v32 = vld [vmem:[%s18905_s1 + $0x1d8] sm:$0xff] }
 0x27b   :  { %v4540_v24 = vpop.permute.xlu1 %4539  ;;  %v3792_v14 = vpop.f32.mrf.mxu0  ;;  %13912 = vmatmul.mubr.msk.f32.gmra.mxu1 %vm23_vm0, %v4648_v6 }
 0x27c   :  { %4104 = vst.msk [vmem:[#allocation3 + $0x98] sm:$0xff] %vm226_vm2, %v4040_v8  ;;  %v4649_v5 = vmul.f32 %v4540_v24, %v4201_v21  ;;  %v4039_v33 = vadd.f32 %v3792_v14, %v3393_v41  ;;  %v4565_v11 = vpop.permute.xlu0 %4564  ;;  %v6785_v21 = vld [vmem:[%s18905_s1] sm:$0xff]  ;;  %v14547_v24 = vmov 5   ;;  %v3404_v41 = vld [vmem:[#allocation3 + $0xe8] sm:$0xff] }
 0x27d   :  { %5810 = vperm.xlu1 %14444, %v5548_v42   ;;  %5845 = vperm.xlu0 %14445, %v5555_v29   ;;  %v13770_v27 = vpop.f32.mrf.mxu0  ;;  %v4654_v55 = vmul.f32 %v4565_v11, %v4206_v51  ;;  %v4212_v29 = vld [vmem:[#allocation2 + $0x20f] sm:$0xff] }
 0x27e   :  { %4103 = vst.msk [vmem:[#allocation3 + $0x90] sm:$0xff] %vm226_vm2, %v4039_v33  ;;  %v4042_v37 = vadd.f32 %v13770_v27, %v3396_v48  ;;  %13914 = vmatprep.mubr.msk.f32.mxu1 %vm23_vm0, %v4649_v5  ;;  %v4211_v5 = vld [vmem:[#allocation2 + $0x207] sm:$0xff]  ;;  %v3403_v27 = vld [vmem:[#allocation3 + $0xe0] sm:$0xff] }
 0x27f   :  { %v4550_v31 = vpop.permute.xlu1 %4549  ;;  %v3802_v45 = vpop.f32.mrf.mxu0  ;;  %13915 = vmatmul.mubr.msk.f32.gmra.mxu1 %vm23_vm0, %v4650_v28  ;;  %v5560_v51 = vld [vmem:[%s18905_s1 + $0x1e8] sm:$0xff] }
 0x280   :  { %4106 = vst.msk [vmem:[#allocation3 + $0xa8] sm:$0xff] %vm226_vm2, %v4042_v37  ;;  %v4651_v44 = vmul.f32 %v4550_v31, %v4203_v47  ;;  %v4041_v35 = vadd.f32 %v3802_v45, %v3395_v52  ;;  %v4575_v13 = vpop.permute.xlu0 %4574  ;;  %v6788_v37 = vld [vmem:[%s18905_s1 + $0x18] sm:$0xff]  ;;  %v5436_v31 = vld [vmem:[#allocation2 + $0x20] sm:$0xff]  ;;  %v3406_v52 = vld [vmem:[#allocation3 + $0xf8] sm:$0xff] }
 0x281   :  { %5820 = vperm.xlu1 %14444, %v5550_v36   ;;  %5855 = vperm.xlu0 %14445, %v5557_v10   ;;  %v13773_v53 = vpop.f32.mrf.mxu0  ;;  %v4656_v7 = vmul.f32 %v4575_v13, %v4208_v20  ;;  %v3405_v13 = vld [vmem:[#allocation3 + $0xf0] sm:$0xff]  ;;  %v3407_v20 = vld [vmem:[#allocation3 + $0x100] sm:$0xff] }
 0x282   :  { %4105 = vst.msk [vmem:[#allocation3 + $0xa0] sm:$0xff] %vm226_vm2, %v4041_v35  ;;  %v4044_v12 = vadd.f32 %v13773_v53, %v3398_v34  ;;  %13917 = vmatprep.mubr.msk.f32.mxu1 %vm23_vm0, %v4651_v44  ;;  %v5435_v35 = vld [vmem:[#allocation2 + $0x18] sm:$0xff]  ;;  %v6790_v53 = vld [vmem:[%s18905_s1 + $0x28] sm:$0xff] }
 0x283   :  { %v4560_v58 = vpop.permute.xlu1 %4559  ;;  %v3812_v38 = vpop.f32.mrf.mxu0  ;;  %13918 = vmatmul.mubr.msk.f32.gmra.mxu1 %vm23_vm0, %v4652_v1 }
 0x284   :  { %4108 = vst.msk [vmem:[#allocation3 + $0xb8] sm:$0xff] %vm226_vm2, %v4044_v12  ;;  %v4653_v4 = vmul.f32 %v4560_v58, %v4205_v50  ;;  %v4043_v17 = vadd.f32 %v3812_v38, %v3397_v61  ;;  %v4585_v15 = vpop.permute.xlu0 %4584  ;;  %v3408_v58 = vld [vmem:[#allocation3 + $0x108] sm:$0xff] }
 0x285   :  { %5830 = vperm.xlu1 %14444, %v5552_v56   ;;  %5865 = vperm.xlu0 %14445, %v5559_v0   ;;  %v13776_v60 = vpop.f32.mrf.mxu0  ;;  %v4658_v30 = vmul.f32 %v4585_v15, %v4210_v25 }
 0x286   :  { %4107 = vst.msk [vmem:[#allocation3 + $0xb0] sm:$0xff] %vm226_vm2, %v4043_v17  ;;  %v4046_v16 = vadd.f32 %v13776_v60, %v3400_v43  ;;  %13920 = vmatprep.mubr.msk.f32.mxu1 %vm23_vm0, %v4653_v4  ;;  %v5437_v4 = vld [vmem:[#allocation2 + $0x28] sm:$0xff]  ;;  %v5562_v17 = vld [vmem:[%s18905_s1 + $0x1f8] sm:$0xff] }
 0x287   :  { %v4570_v2 = vpop.permute.xlu1 %4569  ;;  %v3822_v26 = vpop.f32.mrf.mxu0  ;;  %13921 = vmatmul.mubr.msk.f32.gmra.mxu1 %vm23_vm0, %v4654_v55  ;;  %v6792_v43 = vld [vmem:[%s18905_s1 + $0x38] sm:$0xff] }
 0x288   :  { %4110 = vst.msk [vmem:[#allocation3 + $0xc8] sm:$0xff] %vm226_vm2, %v4046_v16  ;;  %v4655_v18 = vmul.f32 %v4570_v2, %v4207_v59  ;;  %v4045_v19 = vadd.f32 %v3822_v26, %v3399_v63  ;;  %v4595_v6 = vpop.permute.xlu0 %4594  ;;  %v5438_v26 = vld [vmem:[#allocation2 + $0x30] sm:$0xff] }
 0x289   :  { %5840 = vperm.xlu1 %14444, %v5554_v46   ;;  %5875 = vperm.xlu0 %14445, %v5561_v3   ;;  %v13779_v57 = vpop.f32.mrf.mxu0  ;;  %v4660_v11 = vmul.f32 %v4595_v6, %v4212_v29  ;;  %v5439_v46 = vld [vmem:[#allocation2 + $0x38] sm:$0xff]  ;;  %v6786_v6 = vld [vmem:[%s18905_s1 + $0x8] sm:$0xff] }
 0x28a   :  { %4109 = vst.msk [vmem:[#allocation3 + $0xc0] sm:$0xff] %vm226_vm2, %v4045_v19  ;;  %v4048_v62 = vadd.f32 %v13779_v57, %v3402_v54  ;;  %13923 = vmatprep.mubr.msk.f32.mxu1 %vm23_vm0, %v4655_v18  ;;  %v12691_v18 = vld [vmem:[%s18906_s2 + $0x14] sm:$0xf]  ;;  %v3409_v19 = vld [vmem:[#allocation3 + $0x110] sm:$0xff]  ;;  %v6794_v54 = vld [vmem:[%s18905_s1 + $0x48] sm:$0xff] }
 0x28b   :  { %v4580_v23 = vpop.permute.xlu1 %4579  ;;  %v3832_v9 = vpop.f32.mrf.mxu0  ;;  %13924 = vmatmul.mubr.msk.f32.gmra.mxu1 %vm23_vm0, %v4656_v7  ;;  %v3410_v7 = vld [vmem:[#allocation3 + $0x118] sm:$0xff]  ;;  %14030 = vmatprep.subr.msk.mxu1 %vm1060_vm1, %v12691_v18 }
 0x28c   :  { %4112 = vst.msk [vmem:[#allocation3 + $0xd8] sm:$0xff] %vm226_vm2, %v4048_v62  ;;  %v4657_v8 = vmul.f32 %v4580_v23, %v4209_v40  ;;  %v4047_v42 = vadd.f32 %v3832_v9, %v3401_v22  ;;  %v5571_v28 = vpop.permute.xlu0 %5570  ;;  %14031 = vmatpush3.msk.msra.mxu1 %vm1060_vm1, %v12691_v18  ;;  %v3412_v22 = vld [vmem:[#allocation3 + $0x128] sm:$0xff] }
 0x28d   :  { %5850 = vperm.xlu1 %14444, %v5556_v39   ;;  %14446 = vset.pattern.permute.xlu0 %v14547_v24  ;;  %v13782_v14 = vpop.f32.mrf.mxu0  ;;  %v5884_v50 = vmul.f32 %v5571_v28, %v5436_v31  ;;  %v6787_v28 = vld [vmem:[%s18905_s1 + $0x10] sm:$0xff]  ;;  %v6798_v31 = vld [vmem:[%s18905_s1 + $0x68] sm:$0xff] }
 0x28e   :  { %4111 = vst.msk [vmem:[#allocation3 + $0xd0] sm:$0xff] %vm226_vm2, %v4047_v42  ;;  %v4050_v33 = vadd.f32 %v13782_v14, %v3404_v41  ;;  %6851 = vperm.xlu0 %14446, %v6785_v21   ;;  %13926 = vmatprep.mubr.msk.f32.mxu1 %vm23_vm0, %v4657_v8  ;;  %v5440_v8 = vld [vmem:[#allocation2 + $0x40] sm:$0xff]  ;;  %v3411_v42 = vld [vmem:[#allocation3 + $0x120] sm:$0xff] }
 0x28f   :  { %v4590_v48 = vpop.permute.xlu1 %4589  ;;  %v3842_v47 = vpop.f32.mrf.mxu0  ;;  %13927 = vmatmul.mubr.msk.f32.gmra.mxu1 %vm23_vm0, %v4658_v30  ;;  %v5441_v30 = vld [vmem:[#allocation2 + $0x48] sm:$0xff] }
 0x290   :  { %4114 = vst.msk [vmem:[#allocation3 + $0xe8] sm:$0xff] %vm226_vm2, %v4050_v33  ;;  %v4659_v36 = vmul.f32 %v4590_v48, %v4211_v5  ;;  %v4049_v10 = vadd.f32 %v3842_v47, %v3403_v27  ;;  %v5586_v1 = vpop.permute.xlu0 %5585  ;;  %v3414_v48 = vld [vmem:[#allocation3 + $0x138] sm:$0xff] }
 0x291   :  { %5860 = vperm.xlu1 %14444, %v5558_v32   ;;  %v13785_v45 = vpop.f32.mrf.mxu0  ;;  %v5887_v57 = vmul.f32 %v5586_v1, %v5439_v46  ;;  %v5443_v32 = vld [vmem:[#allocation2 + $0x58] sm:$0xff]  ;;  %v6789_v1 = vld [vmem:[%s18905_s1 + $0x20] sm:$0xff] }
 0x292   :  { %4113 = vst.msk [vmem:[#allocation3 + $0xe0] sm:$0xff] %vm226_vm2, %v4049_v10  ;;  %v4052_v44 = vadd.f32 %v13785_v45, %v3406_v52  ;;  %6866 = vperm.xlu0 %14446, %v6788_v37   ;;  %13929 = vmatprep.mubr.msk.f32.mxu1 %vm23_vm0, %v4659_v36  ;;  %v5442_v37 = vld [vmem:[#allocation2 + $0x50] sm:$0xff]  ;;  %v3413_v36 = vld [vmem:[#allocation3 + $0x130] sm:$0xff] }
 0x293   :  { %v3852_v34 = vpop.f32.mrf.mxu0  ;;  %13930 = vmatmul.mubr.msk.f32.gmra.mxu1 %vm23_vm0, %v4660_v11  ;;  %v3417_v46 = vld [vmem:[#allocation3 + $0x150] sm:$0xff] }
 0x294   :  { %4116 = vst.msk [vmem:[#allocation3 + $0xf8] sm:$0xff] %vm226_vm2, %v4052_v44  ;;  %v4051_v12 = vadd.f32 %v3852_v34, %v3405_v13  ;;  %v5566_v56 = vpop.permute.xlu1 %5565  ;;  %v5596_v0 = vpop.permute.xlu0 %5595  ;;  %v3416_v34 = vld [vmem:[#allocation3 + $0x148] sm:$0xff] }
 0x295   :  { %v5883_v55 = vmul.f32 %v5566_v56, %v5435_v35  ;;  %5870 = vperm.xlu1 %14444, %v5560_v51   ;;  %v13788_v61 = vpop.f32.mrf.mxu0  ;;  %v5889_v41 = vmul.f32 %v5596_v0, %v5441_v30  ;;  %v5445_v51 = vld [vmem:[#allocation2 + $0x68] sm:$0xff]  ;;  %v3415_v56 = vld [vmem:[#allocation3 + $0x140] sm:$0xff] }
 0x296   :  { %4115 = vst.msk [vmem:[#allocation3 + $0xf0] sm:$0xff] %vm226_vm2, %v4051_v12  ;;  %v4054_v38 = vadd.f32 %v13788_v61, %v3408_v58  ;;  %6876 = vperm.xlu0 %14446, %v6790_v53   ;;  %v5444_v12 = vld [vmem:[#allocation2 + $0x60] sm:$0xff]  ;;  %v6800_v58 = vld [vmem:[%s18905_s1 + $0x78] sm:$0xff] }
 0x297   :  { %v3862_v15 = vpop.f32.mrf.mxu0  ;;  %13934 = vmatprep.mubr.msk.f32.mxu0 %vm23_vm0, %v5883_v55  ;;  %v6791_v55 = vld [vmem:[%s18905_s1 + $0x30] sm:$0xff] }
 0x298   :  { %4118 = vst.msk [vmem:[#allocation3 + $0x108] sm:$0xff] %vm226_vm2, %v4054_v38  ;;  %v4053_v60 = vadd.f32 %v3862_v15, %v3407_v20  ;;  %v5576_v59 = vpop.permute.xlu1 %5575  ;;  %13935 = vmatmul.mubr.msk.f32.vlgmr.msra.gmra.mxu0 %vm23_vm0, %v5884_v50  ;;  %v5606_v16 = vpop.permute.xlu0 %5605  ;;  %v5447_v20 = vld [vmem:[#allocation2 + $0x78] sm:$0xff] }
 0x299   :  { %v5885_v3 = vmul.f32 %v5576_v59, %v5437_v4  ;;  %5880 = vperm.xlu1 %14444, %v5562_v17   ;;  %v13791_v2 = vpop.f32.mrf.mxu0  ;;  %v5891_v52 = vmul.f32 %v5606_v16, %v5443_v32  ;;  %v5446_v16 = vld [vmem:[#allocation2 + $0x70] sm:$0xff] }
 0x29a   :  { %4117 = vst.msk [vmem:[#allocation3 + $0x100] sm:$0xff] %vm226_vm2, %v4053_v60  ;;  %v4056_v63 = vadd.f32 %v13791_v2, %v3410_v7  ;;  %6886 = vperm.xlu0 %14446, %v6792_v43   ;;  %v3418_v43 = vld [vmem:[#allocation3 + $0x158] sm:$0xff]  ;;  %v6793_v7 = vld [vmem:[%s18905_s1 + $0x40] sm:$0xff] }
 0x29b   :  { %v3872_v25 = vpop.f32.mrf.mxu0  ;;  %13937 = vmatprep.mubr.msk.f32.mxu0 %vm23_vm0, %v5885_v3  ;;  %v6802_v2 = vld [vmem:[%s18905_s1 + $0x88] sm:$0xff] }
 0x29c   :  { %4120 = vst.msk [vmem:[#allocation3 + $0x118] sm:$0xff] %vm226_vm2, %v4056_v63  ;;  %v4055_v40 = vadd.f32 %v3872_v25, %v3409_v19  ;;  %v5581_v62 = vpop.permute.xlu1 %5580  ;;  %v5616_v39 = vpop.permute.xlu0 %5615  ;;  %v5449_v25 = vld [vmem:[#allocation2 + $0x88] sm:$0xff] }
 0x29d   :  { %v5886_v23 = vmul.f32 %v5581_v62, %v5438_v26  ;;  %14447 = vset.pattern.permute.xlu1 %v14547_v24  ;;  %v13794_v9 = vpop.f32.mrf.mxu0  ;;  %v6796_v24 = vld [vmem:[%s18905_s1 + $0x58] sm:$0xff]  ;;  %v5893_v61 = vmul.f32 %v5616_v39, %v5445_v51  ;;  %v5448_v62 = vld [vmem:[#allocation2 + $0x80] sm:$0xff]  ;;  %v3419_v39 = vld [vmem:[#allocation3 + $0x160] sm:$0xff] }
 0x29e   :  { %4119 = vst.msk [vmem:[#allocation3 + $0x110] sm:$0xff] %vm226_vm2, %v4055_v40  ;;  %v4058_v21 = vadd.f32 %v13794_v9, %v3412_v22  ;;  %6856 = vperm.xlu1 %14447, %v6786_v6   ;;  %6896 = vperm.xlu0 %14446, %v6794_v54   ;;  %v3420_v54 = vld [vmem:[#allocation3 + $0x168] sm:$0xff] }
 0x29f   :  { %v3882_v29 = vpop.f32.mrf.mxu0  ;;  %13938 = vmatmul.mubr.msk.f32.gmra.mxu0 %vm23_vm0, %v5886_v23  ;;  %v6795_v23 = vld [vmem:[%s18905_s1 + $0x50] sm:$0xff]  ;;  %v6804_v22 = vld [vmem:[%s18905_s1 + $0x98] sm:$0xff] }
 0x2a0   :  { %4122 = vst.msk [vmem:[#allocation3 + $0x128] sm:$0xff] %vm226_vm2, %v4058_v21  ;;  %v4057_v14 = vadd.f32 %v3882_v29, %v3411_v42  ;;  %v5591_v5 = vpop.permute.xlu1 %5590  ;;  %13940 = vmatprep.mubr.msk.f32.mxu0 %vm23_vm0, %v5887_v57  ;;  %v5626_v33 = vpop.permute.xlu0 %5625  ;;  %v5451_v29 = vld [vmem:[#allocation2 + $0x98] sm:$0xff] }
 0x2a1   :  { %v5888_v11 = vmul.f32 %v5591_v5, %v5440_v8  ;;  %v13797_v27 = vpop.f32.mrf.mxu0  ;;  %v5895_v63 = vmul.f32 %v5626_v33, %v5447_v20  ;;  %v5450_v5 = vld [vmem:[#allocation2 + $0x90] sm:$0xff]  ;;  %v3421_v33 = vld [vmem:[#allocation3 + $0x170] sm:$0xff] }
 0x2a2   :  { %4121 = vst.msk [vmem:[#allocation3 + $0x120] sm:$0xff] %vm226_vm2, %v4057_v14  ;;  %v4060_v47 = vadd.f32 %v13797_v27, %v3414_v48  ;;  %6861 = vperm.xlu1 %14447, %v6787_v28   ;;  %6906 = vperm.xlu0 %14446, %v6796_v24   ;;  %v3422_v24 = vld [vmem:[#allocation3 + $0x178] sm:$0xff] }
 0x2a3   :  { %v3892_v10 = vpop.f32.mrf.mxu0  ;;  %13941 = vmatmul.mubr.msk.f32.gmra.mxu0 %vm23_vm0, %v5888_v11  ;;  %v6797_v11 = vld [vmem:[%s18905_s1 + $0x60] sm:$0xff]  ;;  %v6806_v48 = vld [vmem:[%s18905_s1 + $0xa8] sm:$0xff] }
 0x2a4   :  { %4124 = vst.msk [vmem:[#allocation3 + $0x138] sm:$0xff] %vm226_vm2, %v4060_v47  ;;  %v4059_v45 = vadd.f32 %v3892_v10, %v3413_v36  ;;  %v5601_v44 = vpop.permute.xlu1 %5600  ;;  %13943 = vmatprep.mubr.msk.f32.mxu0 %vm23_vm0, %v5889_v41  ;;  %v5636_v35 = vpop.permute.xlu0 %5635  ;;  %v5453_v10 = vld [vmem:[#allocation2 + $0xa8] sm:$0xff] }
 0x2a5   :  { %v5890_v13 = vmul.f32 %v5601_v44, %v5442_v37  ;;  %v13800_v53 = vpop.f32.mrf.mxu0  ;;  %v5897_v9 = vmul.f32 %v5636_v35, %v5449_v25  ;;  %v5452_v44 = vld [vmem:[#allocation2 + $0xa0] sm:$0xff]  ;;  %v3423_v35 = vld [vmem:[#allocation3 + $0x180] sm:$0xff] }
 0x2a6   :  { %4123 = vst.msk [vmem:[#allocation3 + $0x130] sm:$0xff] %vm226_vm2, %v4059_v45  ;;  %v4062_v50 = vadd.f32 %v13800_v53, %v3416_v34  ;;  %6871 = vperm.xlu1 %14447, %v6789_v1   ;;  %6916 = vperm.xlu0 %14446, %v6798_v31   ;;  %v3424_v31 = vld [vmem:[#allocation3 + $0x188] sm:$0xff] }
 0x2a7   :  { %v3902_v0 = vpop.f32.mrf.mxu0  ;;  %13944 = vmatmul.mubr.msk.f32.gmra.mxu0 %vm23_vm0, %v5890_v13  ;;  %v6799_v13 = vld [vmem:[%s18905_s1 + $0x70] sm:$0xff]  ;;  %v6808_v34 = vld [vmem:[%s18905_s1 + $0xb8] sm:$0xff] }
 0x2a8   :  { %4126 = vst.msk [vmem:[#allocation3 + $0x148] sm:$0xff] %vm226_vm2, %v4062_v50  ;;  %v4061_v38 = vadd.f32 %v3902_v0, %v3415_v56  ;;  %v5611_v4 = vpop.permute.xlu1 %5610  ;;  %13946 = vmatprep.mubr.msk.f32.mxu0 %vm23_vm0, %v5891_v52  ;;  %v5646_v17 = vpop.permute.xlu0 %5645  ;;  %v5455_v0 = vld [vmem:[#allocation2 + $0xb8] sm:$0xff] }
 0x2a9   :  { %v5892_v15 = vmul.f32 %v5611_v4, %v5444_v12  ;;  %v13803_v60 = vpop.f32.mrf.mxu0  ;;  %v5899_v27 = vmul.f32 %v5646_v17, %v5451_v29  ;;  %v5454_v4 = vld [vmem:[#allocation2 + $0xb0] sm:$0xff]  ;;  %v3425_v17 = vld [vmem:[#allocation3 + $0x190] sm:$0xff] }
 0x2aa   :  { %4125 = vst.msk [vmem:[#allocation3 + $0x140] sm:$0xff] %vm226_vm2, %v4061_v38  ;;  %v4064_v59 = vadd.f32 %v13803_v60, %v3418_v43  ;;  %6881 = vperm.xlu1 %14447, %v6791_v55   ;;  %6926 = vperm.xlu0 %14446, %v6800_v58   ;;  %v3426_v58 = vld [vmem:[#allocation3 + $0x198] sm:$0xff] }
 0x2ab   :  { %v3912_v3 = vpop.f32.mrf.mxu0  ;;  %13947 = vmatmul.mubr.msk.f32.gmra.mxu0 %vm23_vm0, %v5892_v15  ;;  %v6801_v15 = vld [vmem:[%s18905_s1 + $0x80] sm:$0xff]  ;;  %v6810_v43 = vld [vmem:[%s18905_s1 + $0xc8] sm:$0xff] }
 0x2ac   :  { %4128 = vst.msk [vmem:[#allocation3 + $0x158] sm:$0xff] %vm226_vm2, %v4064_v59  ;;  %v4063_v26 = vadd.f32 %v3912_v3, %v3417_v46  ;;  %v5621_v18 = vpop.permute.xlu1 %5620  ;;  %13949 = vmatprep.mubr.msk.f32.mxu0 %vm23_vm0, %v5893_v61  ;;  %v5656_v19 = vpop.permute.xlu0 %5655  ;;  %v5457_v3 = vld [vmem:[#allocation2 + $0xc8] sm:$0xff] }
 0x2ad   :  { %v5894_v6 = vmul.f32 %v5621_v18, %v5446_v16  ;;  %v13806_v57 = vpop.f32.mrf.mxu0  ;;  %v5901_v53 = vmul.f32 %v5656_v19, %v5453_v10  ;;  %v5456_v18 = vld [vmem:[#allocation2 + $0xc0] sm:$0xff]  ;;  %v3427_v19 = vld [vmem:[#allocation3 + $0x1a0] sm:$0xff] }
 0x2ae   :  { %4127 = vst.msk [vmem:[#allocation3 + $0x150] sm:$0xff] %vm226_vm2, %v4063_v26  ;;  %v4066_v40 = vadd.f32 %v13806_v57, %v3420_v54  ;;  %6891 = vperm.xlu1 %14447, %v6793_v7   ;;  %6936 = vperm.xlu0 %14446, %v6802_v2   ;;  %v3428_v2 = vld [vmem:[#allocation3 + $0x1a8] sm:$0xff] }
 0x2af   :  { %v3922_v30 = vpop.f32.mrf.mxu0  ;;  %13950 = vmatmul.mubr.msk.f32.gmra.mxu0 %vm23_vm0, %v5894_v6  ;;  %v6803_v6 = vld [vmem:[%s18905_s1 + $0x90] sm:$0xff]  ;;  %v6812_v54 = vld [vmem:[%s18905_s1 + $0xd8] sm:$0xff] }
 0x2b0   :  { %4130 = vst.msk [vmem:[#allocation3 + $0x168] sm:$0xff] %vm226_vm2, %v4066_v40  ;;  %v4065_v21 = vadd.f32 %v3922_v30, %v3419_v39  ;;  %v5631_v8 = vpop.permute.xlu1 %5630  ;;  %13952 = vmatprep.mubr.msk.f32.mxu0 %vm23_vm0, %v5895_v63  ;;  %v5666_v42 = vpop.permute.xlu0 %5665  ;;  %v5459_v30 = vld [vmem:[#allocation2 + $0xd8] sm:$0xff] }
 0x2b1   :  { %v5896_v28 = vmul.f32 %v5631_v8, %v5448_v62  ;;  %v13809_v41 = vpop.f32.mrf.mxu0  ;;  %v5903_v60 = vmul.f32 %v5666_v42, %v5455_v0  ;;  %v5458_v8 = vld [vmem:[#allocation2 + $0xd0] sm:$0xff]  ;;  %v3429_v42 = vld [vmem:[#allocation3 + $0x1b0] sm:$0xff] }
 0x2b2   :  { %4129 = vst.msk [vmem:[#allocation3 + $0x160] sm:$0xff] %vm226_vm2, %v4065_v21  ;;  %v4068_v14 = vadd.f32 %v13809_v41, %v3422_v24  ;;  %6901 = vperm.xlu1 %14447, %v6795_v23   ;;  %6946 = vperm.xlu0 %14446, %v6804_v22   ;;  %v3430_v22 = vld [vmem:[#allocation3 + $0x1b8] sm:$0xff] }
 0x2b3   :  { %v3932_v32 = vpop.f32.mrf.mxu0  ;;  %13953 = vmatmul.mubr.msk.f32.gmra.mxu0 %vm23_vm0, %v5896_v28  ;;  %v6805_v28 = vld [vmem:[%s18905_s1 + $0xa0] sm:$0xff]  ;;  %v6814_v24 = vld [vmem:[%s18905_s1 + $0xe8] sm:$0xff] }
 0x2b4   :  { %4132 = vst.msk [vmem:[#allocation3 + $0x178] sm:$0xff] %vm226_vm2, %v4068_v14  ;;  %v4067_v47 = vadd.f32 %v3932_v32, %v3421_v33  ;;  %v5641_v37 = vpop.permute.xlu1 %5640  ;;  %13955 = vmatprep.mubr.msk.f32.mxu0 %vm23_vm0, %v5897_v9  ;;  %v5676_v36 = vpop.permute.xlu0 %5675  ;;  %v5461_v32 = vld [vmem:[#allocation2 + $0xe8] sm:$0xff] }
 0x2b5   :  { %v5898_v1 = vmul.f32 %v5641_v37, %v5450_v5  ;;  %v13812_v52 = vpop.f32.mrf.mxu0  ;;  %v5905_v57 = vmul.f32 %v5676_v36, %v5457_v3  ;;  %v5460_v37 = vld [vmem:[#allocation2 + $0xe0] sm:$0xff]  ;;  %v3431_v36 = vld [vmem:[#allocation3 + $0x1c0] sm:$0xff] }
 0x2b6   :  { %4131 = vst.msk [vmem:[#allocation3 + $0x170] sm:$0xff] %vm226_vm2, %v4067_v47  ;;  %v4070_v45 = vadd.f32 %v13812_v52, %v3424_v31  ;;  %6911 = vperm.xlu1 %14447, %v6797_v11   ;;  %6956 = vperm.xlu0 %14446, %v6806_v48   ;;  %v3432_v48 = vld [vmem:[#allocation3 + $0x1c8] sm:$0xff] }
 0x2b7   :  { %v3942_v51 = vpop.f32.mrf.mxu0  ;;  %13956 = vmatmul.mubr.msk.f32.gmra.mxu0 %vm23_vm0, %v5898_v1  ;;  %v6807_v1 = vld [vmem:[%s18905_s1 + $0xb0] sm:$0xff]  ;;  %v6816_v31 = vld [vmem:[%s18905_s1 + $0xf8] sm:$0xff] }
 0x2b8   :  { %4134 = vst.msk [vmem:[#allocation3 + $0x188] sm:$0xff] %vm226_vm2, %v4070_v45  ;;  %v4069_v50 = vadd.f32 %v3942_v51, %v3423_v35  ;;  %v5651_v12 = vpop.permute.xlu1 %5650  ;;  %13958 = vmatprep.mubr.msk.f32.mxu0 %vm23_vm0, %v5899_v27  ;;  %v5686_v56 = vpop.permute.xlu0 %5685  ;;  %v5463_v51 = vld [vmem:[#allocation2 + $0xf8] sm:$0xff] }
 0x2b9   :  { %v5900_v55 = vmul.f32 %v5651_v12, %v5452_v44  ;;  %v13815_v61 = vpop.f32.mrf.mxu0  ;;  %v5907_v41 = vmul.f32 %v5686_v56, %v5459_v30  ;;  %v5462_v12 = vld [vmem:[#allocation2 + $0xf0] sm:$0xff]  ;;  %v3433_v56 = vld [vmem:[#allocation3 + $0x1d0] sm:$0xff] }
 0x2ba   :  { %4133 = vst.msk [vmem:[#allocation3 + $0x180] sm:$0xff] %vm226_vm2, %v4069_v50  ;;  %v4072_v38 = vadd.f32 %v13815_v61, %v3426_v58  ;;  %6921 = vperm.xlu1 %14447, %v6799_v13   ;;  %6966 = vperm.xlu0 %14446, %v6808_v34   ;;  %v3434_v34 = vld [vmem:[#allocation3 + $0x1d8] sm:$0xff] }
 0x2bb   :  { %v3952_v20 = vpop.f32.mrf.mxu0  ;;  %13959 = vmatmul.mubr.msk.f32.gmra.mxu0 %vm23_vm0, %v5900_v55  ;;  %v6809_v55 = vld [vmem:[%s18905_s1 + $0xc0] sm:$0xff]  ;;  %v6818_v58 = vld [vmem:[%s18905_s1 + $0x108] sm:$0xff] }
 0x2bc   :  { %4136 = vst.msk [vmem:[#allocation3 + $0x198] sm:$0xff] %vm226_vm2, %v4072_v38  ;;  %v4071_v59 = vadd.f32 %v3952_v20, %v3425_v17  ;;  %v5661_v16 = vpop.permute.xlu1 %5660  ;;  %13961 = vmatprep.mubr.msk.f32.mxu0 %vm23_vm0, %v5901_v53  ;;  %v5696_v46 = vpop.permute.xlu0 %5695  ;;  %v5465_v20 = vld [vmem:[#allocation2 + $0x108] sm:$0xff] }
 0x2bd   :  { %v5902_v7 = vmul.f32 %v5661_v16, %v5454_v4  ;;  %v13818_v63 = vpop.f32.mrf.mxu0  ;;  %v5909_v52 = vmul.f32 %v5696_v46, %v5461_v32  ;;  %v5464_v16 = vld [vmem:[#allocation2 + $0x100] sm:$0xff]  ;;  %v3435_v46 = vld [vmem:[#allocation3 + $0x1e0] sm:$0xff]  ;;  %v6824_v32 = vld [vmem:[%s18905_s1 + $0x138] sm:$0xff] }
 0x2be   :  { %4135 = vst.msk [vmem:[#allocation3 + $0x190] sm:$0xff] %vm226_vm2, %v4071_v59  ;;  %v4074_v26 = vadd.f32 %v13818_v63, %v3428_v2  ;;  %6931 = vperm.xlu1 %14447, %v6801_v15   ;;  %6976 = vperm.xlu0 %14446, %v6810_v43   ;;  %v3436_v43 = vld [vmem:[#allocation3 + $0x1e8] sm:$0xff] }
 0x2bf   :  { %v3962_v25 = vpop.f32.mrf.mxu0  ;;  %13962 = vmatmul.mubr.msk.f32.gmra.mxu0 %vm23_vm0, %v5902_v7  ;;  %v6811_v7 = vld [vmem:[%s18905_s1 + $0xd0] sm:$0xff]  ;;  %v6820_v2 = vld [vmem:[%s18905_s1 + $0x118] sm:$0xff] }
 0x2c0   :  { %4138 = vst.msk [vmem:[#allocation3 + $0x1a8] sm:$0xff] %vm226_vm2, %v4074_v26  ;;  %v4073_v40 = vadd.f32 %v3962_v25, %v3427_v19  ;;  %v5671_v62 = vpop.permute.xlu1 %5670  ;;  %13964 = vmatprep.mubr.msk.f32.mxu0 %vm23_vm0, %v5903_v60  ;;  %v5706_v39 = vpop.permute.xlu0 %5705  ;;  %v5467_v25 = vld [vmem:[#allocation2 + $0x118] sm:$0xff] }
 0x2c1   :  { %v5904_v23 = vmul.f32 %v5671_v62, %v5456_v18  ;;  %v13821_v9 = vpop.f32.mrf.mxu0  ;;  %v5911_v61 = vmul.f32 %v5706_v39, %v5463_v51  ;;  %v5466_v62 = vld [vmem:[#allocation2 + $0x110] sm:$0xff]  ;;  %v3437_v39 = vld [vmem:[#allocation3 + $0x1f0] sm:$0xff] }
 0x2c2   :  { %4137 = vst.msk [vmem:[#allocation3 + $0x1a0] sm:$0xff] %vm226_vm2, %v4073_v40  ;;  %v4076_v21 = vadd.f32 %v13821_v9, %v3430_v22  ;;  %6941 = vperm.xlu1 %14447, %v6803_v6   ;;  %6986 = vperm.xlu0 %14446, %v6812_v54   ;;  %v3438_v54 = vld [vmem:[#allocation3 + $0x1f8] sm:$0xff] }
 0x2c3   :  { %v3972_v29 = vpop.f32.mrf.mxu0  ;;  %13965 = vmatmul.mubr.msk.f32.gmra.mxu0 %vm23_vm0, %v5904_v23  ;;  %v6813_v23 = vld [vmem:[%s18905_s1 + $0xe0] sm:$0xff]  ;;  %v6822_v22 = vld [vmem:[%s18905_s1 + $0x128] sm:$0xff] }
 0x2c4   :  { %4140 = vst.msk [vmem:[#allocation3 + $0x1b8] sm:$0xff] %vm226_vm2, %v4076_v21  ;;  %v4075_v14 = vadd.f32 %v3972_v29, %v3429_v42  ;;  %v5681_v5 = vpop.permute.xlu1 %5680  ;;  %13967 = vmatprep.mubr.msk.f32.mxu0 %vm23_vm0, %v5905_v57  ;;  %v5716_v33 = vpop.permute.xlu0 %5715  ;;  %v5469_v29 = vld [vmem:[#allocation2 + $0x128] sm:$0xff] }
 0x2c5   :  { %v5906_v11 = vmul.f32 %v5681_v5, %v5458_v8  ;;  %v13824_v27 = vpop.f32.mrf.mxu0  ;;  %v5913_v63 = vmul.f32 %v5716_v33, %v5465_v20  ;;  %v6815_v33 = vld [vmem:[%s18905_s1 + $0xf0] sm:$0xff] }
 0x2c6   :  { %4139 = vst.msk [vmem:[#allocation3 + $0x1b0] sm:$0xff] %vm226_vm2, %v4075_v14  ;;  %v4078_v47 = vadd.f32 %v13824_v27, %v3432_v48  ;;  %6951 = vperm.xlu1 %14447, %v6805_v28   ;;  %6996 = vperm.xlu0 %14446, %v6814_v24   ;;  %v4662_v24 = vld [vmem:[#allocation3 + $0x8] sm:$0xff]  ;;  %v5468_v14 = vld [vmem:[#allocation2 + $0x120] sm:$0xff]  ;;  %v4661_v27 = vld [vmem:[#allocation3] sm:$0xff] }
 0x2c7   :  { %v3982_v10 = vpop.f32.mrf.mxu0  ;;  %13968 = vmatmul.mubr.msk.f32.gmra.mxu0 %vm23_vm0, %v5906_v11 }
 0x2c8   :  { %4142 = vst.msk [vmem:[#allocation3 + $0x1c8] sm:$0xff] %vm226_vm2, %v4078_v47  ;;  %v4077_v45 = vadd.f32 %v3982_v10, %v3431_v36  ;;  %v5691_v44 = vpop.permute.xlu1 %5690  ;;  %13970 = vmatprep.mubr.msk.f32.mxu0 %vm23_vm0, %v5907_v41  ;;  %v5726_v35 = vpop.permute.xlu0 %5725 }
 0x2c9   :  { %v5908_v13 = vmul.f32 %v5691_v44, %v5460_v37  ;;  %v13827_v53 = vpop.f32.mrf.mxu0  ;;  %v5915_v9 = vmul.f32 %v5726_v35, %v5467_v25  ;;  %v5471_v37 = vld [vmem:[#allocation2 + $0x138] sm:$0xff]  ;;  %v6817_v44 = vld [vmem:[%s18905_s1 + $0x100] sm:$0xff]  ;;  %v6826_v35 = vld [vmem:[%s18905_s1 + $0x148] sm:$0xff] }
 0x2ca   :  { %4141 = vst.msk [vmem:[#allocation3 + $0x1c0] sm:$0xff] %vm226_vm2, %v4077_v45  ;;  %v4080_v50 = vadd.f32 %v13827_v53, %v3434_v34  ;;  %6961 = vperm.xlu1 %14447, %v6807_v1   ;;  %7006 = vperm.xlu0 %14446, %v6816_v31   ;;  %v5470_v31 = vld [vmem:[#allocation2 + $0x130] sm:$0xff]  ;;  %v5473_v53 = vld [vmem:[#allocation2 + $0x148] sm:$0xff] }
 0x2cb   :  { %v3992_v0 = vpop.f32.mrf.mxu0  ;;  %13971 = vmatmul.mubr.msk.f32.gmra.mxu0 %vm23_vm0, %v5908_v13 }
 0x2cc   :  { %4144 = vst.msk [vmem:[#allocation3 + $0x1d8] sm:$0xff] %vm226_vm2, %v4080_v50  ;;  %v4079_v38 = vadd.f32 %v3992_v0, %v3433_v56  ;;  %v5701_v4 = vpop.permute.xlu1 %5700  ;;  %13973 = vmatprep.mubr.msk.f32.mxu0 %vm23_vm0, %v5909_v52  ;;  %v5736_v17 = vpop.permute.xlu0 %5735  ;;  %v4664_v52 = vld [vmem:[#allocation3 + $0x18] sm:$0xff] }
 0x2cd   :  { %v5910_v15 = vmul.f32 %v5701_v4, %v5462_v12  ;;  %v13830_v60 = vpop.f32.mrf.mxu0  ;;  %v5917_v11 = vmul.f32 %v5736_v17, %v5469_v29  ;;  %v4663_v12 = vld [vmem:[#allocation3 + $0x10] sm:$0xff]  ;;  %v6819_v4 = vld [vmem:[%s18905_s1 + $0x110] sm:$0xff]  ;;  %v6828_v17 = vld [vmem:[%s18905_s1 + $0x158] sm:$0xff] }
 0x2ce   :  { %4143 = vst.msk [vmem:[#allocation3 + $0x1d0] sm:$0xff] %vm226_vm2, %v4079_v38  ;;  %v4082_v59 = vadd.f32 %v13830_v60, %v3436_v43  ;;  %6971 = vperm.xlu1 %14447, %v6809_v55   ;;  %7016 = vperm.xlu0 %14446, %v6818_v58   ;;  %v5472_v58 = vld [vmem:[#allocation2 + $0x140] sm:$0xff]  ;;  %v5475_v60 = vld [vmem:[#allocation2 + $0x158] sm:$0xff] }
 0x2cf   :  { %v4002_v3 = vpop.f32.mrf.mxu0  ;;  %13974 = vmatmul.mubr.msk.f32.gmra.mxu0 %vm23_vm0, %v5910_v15 }
 0x2d0   :  { %4146 = vst.msk [vmem:[#allocation3 + $0x1e8] sm:$0xff] %vm226_vm2, %v4082_v59  ;;  %v4081_v26 = vadd.f32 %v4002_v3, %v3435_v46  ;;  %v5711_v18 = vpop.permute.xlu1 %5710  ;;  %13976 = vmatprep.mubr.msk.f32.mxu0 %vm23_vm0, %v5911_v61  ;;  %v5746_v19 = vpop.permute.xlu0 %5745  ;;  %v4666_v61 = vld [vmem:[#allocation3 + $0x28] sm:$0xff] }
 0x2d1   :  { %v5912_v6 = vmul.f32 %v5711_v18, %v5464_v16  ;;  %v13833_v57 = vpop.f32.mrf.mxu0  ;;  %v5919_v51 = vmul.f32 %v5746_v19, %v5471_v37  ;;  %v4665_v16 = vld [vmem:[#allocation3 + $0x20] sm:$0xff]  ;;  %v6821_v18 = vld [vmem:[%s18905_s1 + $0x120] sm:$0xff]  ;;  %v6830_v19 = vld [vmem:[%s18905_s1 + $0x168] sm:$0xff] }
 0x2d2   :  { %4145 = vst.msk [vmem:[#allocation3 + $0x1e0] sm:$0xff] %vm226_vm2, %v4081_v26  ;;  %v4084_v40 = vadd.f32 %v13833_v57, %v3438_v54  ;;  %6981 = vperm.xlu1 %14447, %v6811_v7   ;;  %7026 = vperm.xlu0 %14446, %v6820_v2   ;;  %v5474_v2 = vld [vmem:[#allocation2 + $0x150] sm:$0xff]  ;;  %v5477_v57 = vld [vmem:[#allocation2 + $0x168] sm:$0xff]  ;;  %v6825_v37 = vld [vmem:[%s18905_s1 + $0x140] sm:$0xff] }
 0x2d3   :  { %v4012_v30 = vpop.f32.mrf.mxu0  ;;  %13977 = vmatmul.mubr.msk.f32.gmra.mxu0 %vm23_vm0, %v5912_v6 }
 0x2d4   :  { %4148 = vst.msk [vmem:[#allocation3 + $0x1f8] sm:$0xff] %vm226_vm2, %v4084_v40  ;;  %v4083_v21 = vadd.f32 %v4012_v30, %v3437_v39  ;;  %v5721_v8 = vpop.permute.xlu1 %5720  ;;  %13979 = vmatprep.mubr.msk.f32.mxu0 %vm23_vm0, %v5913_v63  ;;  %v5756_v42 = vpop.permute.xlu0 %5755  ;;  %v4668_v63 = vld [vmem:[#allocation3 + $0x38] sm:$0xff] }
 0x2d5   :  { %v5914_v28 = vmul.f32 %v5721_v8, %v5466_v62  ;;  %v5921_v20 = vmul.f32 %v5756_v42, %v5473_v53  ;;  %v4667_v62 = vld [vmem:[#allocation3 + $0x30] sm:$0xff]  ;;  %v6823_v8 = vld [vmem:[%s18905_s1 + $0x130] sm:$0xff]  ;;  %v6832_v42 = vld [vmem:[%s18905_s1 + $0x178] sm:$0xff] }
 0x2d6   :  { %4147 = vst.msk [vmem:[#allocation3 + $0x1f0] sm:$0xff] %vm226_vm2, %v4083_v21  ;;  %6991 = vperm.xlu1 %14447, %v6813_v23   ;;  %7036 = vperm.xlu0 %14446, %v6822_v22   ;;  %v13838_v41 = vpop.f32.mrf.mxu1  ;;  %v5476_v22 = vld [vmem:[#allocation2 + $0x160] sm:$0xff]  ;;  %v4674_v53 = vld [vmem:[#allocation3 + $0x68] sm:$0xff] }
 0x2d7   :  { %v5308_v5 = vadd.f32 %v13838_v41, %v4662_v24  ;;  %13980 = vmatmul.mubr.msk.f32.gmra.mxu0 %vm23_vm0, %v5914_v28  ;;  %v5479_v41 = vld [vmem:[#allocation2 + $0x178] sm:$0xff] }
 0x2d8   :  { %v5731_v48 = vpop.permute.xlu1 %5730  ;;  %v4988_v47 = vpop.f32.mrf.mxu1  ;;  %13982 = vmatprep.mubr.msk.f32.mxu0 %vm23_vm0, %v5915_v9  ;;  %v4670_v9 = vld [vmem:[#allocation3 + $0x48] sm:$0xff] }
 0x2d9   :  { %5372 = vst.msk [vmem:[#allocation3 + $0x8] sm:$0xff] %vm226_vm2, %v5308_v5  ;;  %v5916_v36 = vmul.f32 %v5731_v48, %v5468_v14  ;;  %v5307_v10 = vadd.f32 %v4988_v47, %v4661_v27  ;;  %v5766_v1 = vpop.permute.xlu0 %5765  ;;  %v4669_v5 = vld [vmem:[#allocation3 + $0x40] sm:$0xff]  ;;  %v4672_v27 = vld [vmem:[#allocation3 + $0x58] sm:$0xff] }
 0x2da   :  { %7001 = vperm.xlu1 %14447, %v6815_v33   ;;  %7046 = vperm.xlu0 %14446, %v6824_v32   ;;  %v5923_v25 = vmul.f32 %v5766_v1, %v5475_v60  ;;  %v5478_v48 = vld [vmem:[#allocation2 + $0x170] sm:$0xff]  ;;  %v4676_v60 = vld [vmem:[#allocation3 + $0x78] sm:$0xff] }
 0x2db   :  { %5371 = vst.msk [vmem:[#allocation3] sm:$0xff] %vm226_vm2, %v5307_v10  ;;  %v13841_v45 = vpop.f32.mrf.mxu1  ;;  %13983 = vmatmul.mubr.msk.f32.gmra.mxu0 %vm23_vm0, %v5916_v36  ;;  %v6834_v36 = vld [vmem:[%s18905_s1 + $0x188] sm:$0xff] }
 0x2dc   :  { %v5310_v13 = vadd.f32 %v13841_v45, %v4664_v52  ;;  %v5741_v34 = vpop.permute.xlu1 %5740  ;;  %13985 = vmatprep.mubr.msk.f32.mxu0 %vm23_vm0, %v5917_v11  ;;  %v5481_v52 = vld [vmem:[#allocation2 + $0x188] sm:$0xff] }
 0x2dd   :  { %v5918_v50 = vmul.f32 %v5741_v34, %v5470_v31  ;;  %v4998_v56 = vpop.f32.mrf.mxu1  ;;  %v5776_v0 = vpop.permute.xlu0 %5775  ;;  %v5480_v34 = vld [vmem:[#allocation2 + $0x180] sm:$0xff] }
 0x2de   :  { %5374 = vst.msk [vmem:[#allocation3 + $0x18] sm:$0xff] %vm226_vm2, %v5310_v13  ;;  %v5309_v55 = vadd.f32 %v4998_v56, %v4663_v12  ;;  %7011 = vperm.xlu1 %14447, %v6817_v44   ;;  %7056 = vperm.xlu0 %14446, %v6826_v35   ;;  %v5925_v29 = vmul.f32 %v5776_v0, %v5477_v57  ;;  %v4671_v44 = vld [vmem:[#allocation3 + $0x50] sm:$0xff]  ;;  %v6827_v12 = vld [vmem:[%s18905_s1 + $0x150] sm:$0xff]  ;;  %v6836_v56 = vld [vmem:[%s18905_s1 + $0x198] sm:$0xff] }
 0x2df   :  { %v13844_v38 = vpop.f32.mrf.mxu1  ;;  %13986 = vmatmul.mubr.msk.f32.gmra.mxu0 %vm23_vm0, %v5918_v50  ;;  %v4678_v57 = vld [vmem:[#allocation3 + $0x88] sm:$0xff] }
 0x2e0   :  { %5373 = vst.msk [vmem:[#allocation3 + $0x10] sm:$0xff] %vm226_vm2, %v5309_v55  ;;  %v5312_v15 = vadd.f32 %v13844_v38, %v4666_v61  ;;  %v5751_v43 = vpop.permute.xlu1 %5750  ;;  %13988 = vmatprep.mubr.msk.f32.mxu0 %vm23_vm0, %v5919_v51  ;;  %v5483_v61 = vld [vmem:[#allocation2 + $0x198] sm:$0xff] }
 0x2e1   :  { %v5920_v59 = vmul.f32 %v5751_v43, %v5472_v58  ;;  %v5008_v46 = vpop.f32.mrf.mxu1  ;;  %v5786_v3 = vpop.permute.xlu0 %5785  ;;  %v5482_v43 = vld [vmem:[#allocation2 + $0x190] sm:$0xff] }
 0x2e2   :  { %5376 = vst.msk [vmem:[#allocation3 + $0x28] sm:$0xff] %vm226_vm2, %v5312_v15  ;;  %v5311_v7 = vadd.f32 %v5008_v46, %v4665_v16  ;;  %7021 = vperm.xlu1 %14447, %v6819_v4   ;;  %7066 = vperm.xlu0 %14446, %v6828_v17   ;;  %v5927_v10 = vmul.f32 %v5786_v3, %v5479_v41  ;;  %v4673_v4 = vld [vmem:[#allocation3 + $0x60] sm:$0xff]  ;;  %v6829_v16 = vld [vmem:[%s18905_s1 + $0x160] sm:$0xff]  ;;  %v6838_v46 = vld [vmem:[%s18905_s1 + $0x1a8] sm:$0xff] }
 0x2e3   :  { %v13847_v26 = vpop.f32.mrf.mxu1  ;;  %13989 = vmatmul.mubr.msk.f32.gmra.mxu0 %vm23_vm0, %v5920_v59  ;;  %v4680_v41 = vld [vmem:[#allocation3 + $0x98] sm:$0xff] }
 0x2e4   :  { %5375 = vst.msk [vmem:[#allocation3 + $0x20] sm:$0xff] %vm226_vm2, %v5311_v7  ;;  %v5314_v6 = vadd.f32 %v13847_v26, %v4668_v63  ;;  %v5761_v54 = vpop.permute.xlu1 %5760  ;;  %13991 = vmatprep.mubr.msk.f32.mxu0 %vm23_vm0, %v5921_v20  ;;  %v5485_v63 = vld [vmem:[#allocation2 + $0x1a8] sm:$0xff] }
 0x2e5   :  { %v5922_v40 = vmul.f32 %v5761_v54, %v5474_v2  ;;  %v5018_v39 = vpop.f32.mrf.mxu1  ;;  %v5796_v30 = vpop.permute.xlu0 %5795  ;;  %v5484_v54 = vld [vmem:[#allocation2 + $0x1a0] sm:$0xff] }
 0x2e6   :  { %5378 = vst.msk [vmem:[#allocation3 + $0x38] sm:$0xff] %vm226_vm2, %v5314_v6  ;;  %v5313_v23 = vadd.f32 %v5018_v39, %v4667_v62  ;;  %7031 = vperm.xlu1 %14447, %v6821_v18   ;;  %7076 = vperm.xlu0 %14446, %v6830_v19   ;;  %v5929_v0 = vmul.f32 %v5796_v30, %v5481_v52  ;;  %v4675_v18 = vld [vmem:[#allocation3 + $0x70] sm:$0xff]  ;;  %v6831_v62 = vld [vmem:[%s18905_s1 + $0x170] sm:$0xff]  ;;  %v6840_v39 = vld [vmem:[%s18905_s1 + $0x1b8] sm:$0xff] }
 0x2e7   :  { %v13850_v21 = vpop.f32.mrf.mxu1  ;;  %13992 = vmatmul.mubr.msk.f32.gmra.mxu0 %vm23_vm0, %v5922_v40  ;;  %v4682_v52 = vld [vmem:[#allocation3 + $0xa8] sm:$0xff] }
 0x2e8   :  { %5377 = vst.msk [vmem:[#allocation3 + $0x30] sm:$0xff] %vm226_vm2, %v5313_v23  ;;  %v5316_v28 = vadd.f32 %v13850_v21, %v4670_v9  ;;  %v5771_v24 = vpop.permute.xlu1 %5770  ;;  %13994 = vmatprep.mubr.msk.f32.mxu0 %vm23_vm0, %v5923_v25  ;;  %v5487_v9 = vld [vmem:[#allocation2 + $0x1b8] sm:$0xff] }
 0x2e9   :  { %v5924_v14 = vmul.f32 %v5771_v24, %v5476_v22  ;;  %v5028_v33 = vpop.f32.mrf.mxu1  ;;  %v5806_v32 = vpop.permute.xlu0 %5805  ;;  %v5486_v24 = vld [vmem:[#allocation2 + $0x1b0] sm:$0xff] }
 0x2ea   :  { %5380 = vst.msk [vmem:[#allocation3 + $0x48] sm:$0xff] %vm226_vm2, %v5316_v28  ;;  %v5315_v11 = vadd.f32 %v5028_v33, %v4669_v5  ;;  %7041 = vperm.xlu1 %14447, %v6823_v8   ;;  %7086 = vperm.xlu0 %14446, %v6832_v42   ;;  %v5931_v3 = vmul.f32 %v5806_v32, %v5483_v61  ;;  %v4677_v8 = vld [vmem:[#allocation3 + $0x80] sm:$0xff]  ;;  %v6833_v5 = vld [vmem:[%s18905_s1 + $0x180] sm:$0xff]  ;;  %v6842_v33 = vld [vmem:[%s18905_s1 + $0x1c8] sm:$0xff] }
 0x2eb   :  { %v13853_v47 = vpop.f32.mrf.mxu1  ;;  %13995 = vmatmul.mubr.msk.f32.gmra.mxu0 %vm23_vm0, %v5924_v14  ;;  %v4684_v61 = vld [vmem:[#allocation3 + $0xb8] sm:$0xff] }
 0x2ec   :  { %5379 = vst.msk [vmem:[#allocation3 + $0x40] sm:$0xff] %vm226_vm2, %v5315_v11  ;;  %v5318_v1 = vadd.f32 %v13853_v47, %v4672_v27  ;;  %v5781_v31 = vpop.permute.xlu1 %5780  ;;  %13997 = vmatprep.mubr.msk.f32.mxu0 %vm23_vm0, %v5925_v29  ;;  %v5489_v27 = vld [vmem:[#allocation2 + $0x1c8] sm:$0xff] }
 0x2ed   :  { %v5926_v45 = vmul.f32 %v5781_v31, %v5478_v48  ;;  %v5038_v35 = vpop.f32.mrf.mxu1  ;;  %v5816_v51 = vpop.permute.xlu0 %5815  ;;  %v5488_v31 = vld [vmem:[#allocation2 + $0x1c0] sm:$0xff] }
 0x2ee   :  { %5382 = vst.msk [vmem:[#allocation3 + $0x58] sm:$0xff] %vm226_vm2, %v5318_v1  ;;  %v5317_v13 = vadd.f32 %v5038_v35, %v4671_v44  ;;  %7051 = vperm.xlu1 %14447, %v6825_v37   ;;  %7096 = vperm.xlu0 %14446, %v6834_v36   ;;  %v5933_v30 = vmul.f32 %v5816_v51, %v5485_v63  ;;  %v4679_v37 = vld [vmem:[#allocation3 + $0x90] sm:$0xff]  ;;  %v6835_v44 = vld [vmem:[%s18905_s1 + $0x190] sm:$0xff]  ;;  %v6844_v35 = vld [vmem:[%s18905_s1 + $0x1d8] sm:$0xff] }
 0x2ef   :  { %v13856_v50 = vpop.f32.mrf.mxu1  ;;  %13998 = vmatmul.mubr.msk.f32.gmra.mxu0 %vm23_vm0, %v5926_v45  ;;  %v6839_v63 = vld [vmem:[%s18905_s1 + $0x1b0] sm:$0xff] }
 0x2f0   :  { %5381 = vst.msk [vmem:[#allocation3 + $0x50] sm:$0xff] %vm226_vm2, %v5317_v13  ;;  %v5320_v55 = vadd.f32 %v13856_v50, %v4674_v53  ;;  %v5791_v58 = vpop.permute.xlu1 %5790  ;;  %14000 = vmatprep.mubr.msk.f32.mxu0 %vm23_vm0, %v5927_v10  ;;  %v5491_v53 = vld [vmem:[#allocation2 + $0x1d8] sm:$0xff] }
 0x2f1   :  { %v5928_v38 = vmul.f32 %v5791_v58, %v5480_v34  ;;  %v5048_v17 = vpop.f32.mrf.mxu1  ;;  %v5826_v20 = vpop.permute.xlu0 %5825  ;;  %v5490_v58 = vld [vmem:[#allocation2 + $0x1d0] sm:$0xff] }
 0x2f2   :  { %5384 = vst.msk [vmem:[#allocation3 + $0x68] sm:$0xff] %vm226_vm2, %v5320_v55  ;;  %v5319_v15 = vadd.f32 %v5048_v17, %v4673_v4  ;;  %7061 = vperm.xlu1 %14447, %v6827_v12   ;;  %7106 = vperm.xlu0 %14446, %v6836_v56   ;;  %v5935_v32 = vmul.f32 %v5826_v20, %v5487_v9  ;;  %v4681_v12 = vld [vmem:[#allocation3 + $0xa0] sm:$0xff]  ;;  %v6837_v4 = vld [vmem:[%s18905_s1 + $0x1a0] sm:$0xff]  ;;  %v6846_v17 = vld [vmem:[%s18905_s1 + $0x1e8] sm:$0xff] }
 0x2f3   :  { %v13859_v59 = vpop.f32.mrf.mxu1  ;;  %14001 = vmatmul.mubr.msk.f32.gmra.mxu0 %vm23_vm0, %v5928_v38  ;;  %v5494_v9 = vld [vmem:[#allocation2 + $0x1f0] sm:$0xff] }
 0x2f4   :  { %5383 = vst.msk [vmem:[#allocation3 + $0x60] sm:$0xff] %vm226_vm2, %v5319_v15  ;;  %v5322_v7 = vadd.f32 %v13859_v59, %v4676_v60  ;;  %v5801_v2 = vpop.permute.xlu1 %5800  ;;  %14003 = vmatprep.mubr.msk.f32.mxu0 %vm23_vm0, %v5929_v0  ;;  %v5493_v60 = vld [vmem:[#allocation2 + $0x1e8] sm:$0xff] }
 0x2f5   :  { %v5930_v26 = vmul.f32 %v5801_v2, %v5482_v43  ;;  %v5058_v19 = vpop.f32.mrf.mxu1  ;;  %v5836_v25 = vpop.permute.xlu0 %5835  ;;  %v5492_v2 = vld [vmem:[#allocation2 + $0x1e0] sm:$0xff] }
 0x2f6   :  { %5386 = vst.msk [vmem:[#allocation3 + $0x78] sm:$0xff] %vm226_vm2, %v5322_v7  ;;  %v5321_v6 = vadd.f32 %v5058_v19, %v4675_v18  ;;  %7071 = vperm.xlu1 %14447, %v6829_v16   ;;  %7116 = vperm.xlu0 %14446, %v6838_v46   ;;  %v5937_v51 = vmul.f32 %v5836_v25, %v5489_v27  ;;  %v4683_v16 = vld [vmem:[#allocation3 + $0xb0] sm:$0xff]  ;;  %v6848_v19 = vld [vmem:[%s18905_s1 + $0x1f8] sm:$0xff] }
 0x2f7   :  { %v13862_v40 = vpop.f32.mrf.mxu1  ;;  %14004 = vmatmul.mubr.msk.f32.gmra.mxu0 %vm23_vm0, %v5930_v26  ;;  %v4686_v26 = vld [vmem:[#allocation3 + $0xc8] sm:$0xff] }
 0x2f8   :  { %5385 = vst.msk [vmem:[#allocation3 + $0x70] sm:$0xff] %vm226_vm2, %v5321_v6  ;;  %v5324_v23 = vadd.f32 %v13862_v40, %v4678_v57  ;;  %v5811_v22 = vpop.permute.xlu1 %5810  ;;  %14006 = vmatprep.mubr.msk.f32.mxu0 %vm23_vm0, %v5931_v3  ;;  %v6721_v25 = vld [vmem:[#allocation2 + $0x19] sm:$0xff] }
 0x2f9   :  { %v5932_v21 = vmul.f32 %v5811_v22, %v5484_v54  ;;  %v5068_v42 = vpop.f32.mrf.mxu1  ;;  %v5846_v29 = vpop.permute.xlu0 %5845  ;;  %v5495_v40 = vld [vmem:[#allocation2 + $0x1f8] sm:$0xff] }
 0x2fa   :  { %5388 = vst.msk [vmem:[#allocation3 + $0x88] sm:$0xff] %vm226_vm2, %v5324_v23  ;;  %v5323_v28 = vadd.f32 %v5068_v42, %v4677_v8  ;;  %7081 = vperm.xlu1 %14447, %v6831_v62   ;;  %7126 = vperm.xlu0 %14446, %v6840_v39   ;;  %v5939_v20 = vmul.f32 %v5846_v29, %v5491_v53  ;;  %v4685_v39 = vld [vmem:[#allocation3 + $0xc0] sm:$0xff]  ;;  %v4688_v8 = vld [vmem:[#allocation3 + $0xd8] sm:$0xff]  ;;  %v6841_v29 = vld [vmem:[%s18905_s1 + $0x1c0] sm:$0xff] }
 0x2fb   :  { %v13865_v14 = vpop.f32.mrf.mxu1  ;;  %14007 = vmatmul.mubr.msk.f32.gmra.mxu0 %vm23_vm0, %v5932_v21 }
 0x2fc   :  { %5387 = vst.msk [vmem:[#allocation3 + $0x80] sm:$0xff] %vm226_vm2, %v5323_v28  ;;  %v5326_v11 = vadd.f32 %v13865_v14, %v4680_v41  ;;  %v5821_v48 = vpop.permute.xlu1 %5820  ;;  %14009 = vmatprep.mubr.msk.f32.mxu0 %vm23_vm0, %v5933_v30  ;;  %v8072_v14 = vld [vmem:[%s18905_s1 + $0x8] sm:$0xff] }
 0x2fd   :  { %v5934_v47 = vmul.f32 %v5821_v48, %v5486_v24  ;;  %v5078_v36 = vpop.f32.mrf.mxu1  ;;  %v5856_v10 = vpop.permute.xlu0 %5855 }
 0x2fe   :  { %5390 = vst.msk [vmem:[#allocation3 + $0x98] sm:$0xff] %vm226_vm2, %v5326_v11  ;;  %v5325_v1 = vadd.f32 %v5078_v36, %v4679_v37  ;;  %7091 = vperm.xlu1 %14447, %v6833_v5   ;;  %7136 = vperm.xlu0 %14446, %v6842_v33   ;;  %v5941_v6 = vmul.f32 %v5856_v10, %v5493_v60  ;;  %v5497_v5 = vld [vmem:[#allocation2 + $0x208] sm:$0xff]  ;;  %v5496_v37 = vld [vmem:[#allocation2 + $0x200] sm:$0xff]  ;;  %v4690_v36 = vld [vmem:[#allocation3 + $0xe8] sm:$0xff] }
 0x2ff   :  { %v13868_v45 = vpop.f32.mrf.mxu1  ;;  %14010 = vmatmul.mubr.msk.f32.gmra.mxu0 %vm23_vm0, %v5934_v47  ;;  %v14548_v47 = vmov 6  }
 0x300   :  { %5389 = vst.msk [vmem:[#allocation3 + $0x90] sm:$0xff] %vm226_vm2, %v5325_v1  ;;  %v5328_v13 = vadd.f32 %v13868_v45, %v4682_v52  ;;  %v5831_v34 = vpop.permute.xlu1 %5830  ;;  %14012 = vmatprep.mubr.msk.f32.mxu0 %vm23_vm0, %v5935_v32  ;;  %v4687_v32 = vld [vmem:[#allocation3 + $0xd0] sm:$0xff]  ;;  %v6843_v1 = vld [vmem:[%s18905_s1 + $0x1d0] sm:$0xff] }
 0x301   :  { %v5936_v50 = vmul.f32 %v5831_v34, %v5488_v31  ;;  %v5088_v56 = vpop.f32.mrf.mxu1  ;;  %v5866_v0 = vpop.permute.xlu0 %5865 }
 0x302   :  { %5392 = vst.msk [vmem:[#allocation3 + $0xa8] sm:$0xff] %vm226_vm2, %v5328_v13  ;;  %v5327_v55 = vadd.f32 %v5088_v56, %v4681_v12  ;;  %7101 = vperm.xlu1 %14447, %v6835_v44   ;;  %7146 = vperm.xlu0 %14446, %v6844_v35   ;;  %v5943_v28 = vmul.f32 %v5866_v0, %v5495_v40  ;;  %v8075_v44 = vld [vmem:[%s18905_s1 + $0x20] sm:$0xff]  ;;  %v4692_v12 = vld [vmem:[#allocation3 + $0xf8] sm:$0xff]  ;;  %v12757_v40 = vld [vmem:[%s18906_s2 + $0x18] sm:$0xf] }
 0x303   :  { %v13871_v38 = vpop.f32.mrf.mxu1  ;;  %14013 = vmatmul.mubr.msk.f32.gmra.mxu0 %vm23_vm0, %v5936_v50  ;;  %v5498_v50 = vld [vmem:[#allocation2 + $0x210] sm:$0xff]  ;;  %v6845_v0 = vld [vmem:[%s18905_s1 + $0x1e0] sm:$0xff]  ;;  %14128 = vmatprep.subr.msk.mxu0 %vm1060_vm1, %v12757_v40 }
 0x304   :  { %5391 = vst.msk [vmem:[#allocation3 + $0xa0] sm:$0xff] %vm226_vm2, %v5327_v55  ;;  %v5330_v15 = vadd.f32 %v13871_v38, %v4684_v61  ;;  %v5841_v43 = vpop.permute.xlu1 %5840  ;;  %14015 = vmatprep.mubr.msk.f32.mxu0 %vm23_vm0, %v5937_v51  ;;  %v4689_v51 = vld [vmem:[#allocation3 + $0xe0] sm:$0xff]  ;;  %14129 = vmatpush3.msk.msra.mxu0 %vm1060_vm1, %v12757_v40 }
 0x305   :  { %v5938_v59 = vmul.f32 %v5841_v43, %v5490_v58  ;;  %v5098_v46 = vpop.f32.mrf.mxu1  ;;  %v5876_v3 = vpop.permute.xlu0 %5875  ;;  %v8077_v61 = vld [vmem:[%s18905_s1 + $0x30] sm:$0xff]  ;;  %v4694_v43 = vld [vmem:[#allocation3 + $0x108] sm:$0xff] }
 0x306   :  { %5394 = vst.msk [vmem:[#allocation3 + $0xb8] sm:$0xff] %vm226_vm2, %v5330_v15  ;;  %v5329_v7 = vadd.f32 %v5098_v46, %v4683_v16  ;;  %7111 = vperm.xlu1 %14447, %v6837_v4   ;;  %7156 = vperm.xlu0 %14446, %v6846_v17   ;;  %v5945_v31 = vmul.f32 %v5876_v3, %v5497_v5  ;;  %v4691_v4 = vld [vmem:[#allocation3 + $0xf0] sm:$0xff]  ;;  %v6847_v16 = vld [vmem:[%s18905_s1 + $0x1f0] sm:$0xff] }
 0x307   :  { %v13874_v18 = vpop.f32.mrf.mxu1  ;;  %14016 = vmatmul.mubr.msk.f32.gmra.mxu0 %vm23_vm0, %v5938_v59  ;;  %v6722_v59 = vld [vmem:[#allocation2 + $0x21] sm:$0xff] }
 0x308   :  { %5393 = vst.msk [vmem:[#allocation3 + $0xb0] sm:$0xff] %vm226_vm2, %v5329_v7  ;;  %v5332_v54 = vadd.f32 %v13874_v18, %v4686_v26  ;;  %v5851_v57 = vpop.permute.xlu1 %5850  ;;  %14018 = vmatprep.mubr.msk.f32.mxu0 %vm23_vm0, %v5939_v20  ;;  %v8079_v3 = vld [vmem:[%s18905_s1 + $0x40] sm:$0xff]  ;;  %v6724_v26 = vld [vmem:[#allocation2 + $0x31] sm:$0xff] }
 0x309   :  { %v5940_v62 = vmul.f32 %v5851_v57, %v5492_v2  ;;  %v5108_v30 = vpop.f32.mrf.mxu1  ;;  %v6852_v23 = vpop.permute.xlu0 %6851  ;;  %v4693_v2 = vld [vmem:[#allocation3 + $0x100] sm:$0xff] }
 0x30a   :  { %5396 = vst.msk [vmem:[#allocation3 + $0xc8] sm:$0xff] %vm226_vm2, %v5332_v54  ;;  %v5331_v22 = vadd.f32 %v5108_v30, %v4685_v39  ;;  %7121 = vperm.xlu1 %14447, %v6839_v63   ;;  %7166 = vperm.xlu0 %14446, %v6848_v19   ;;  %v7169_v21 = vmul.f32 %v6852_v23, %v6721_v25  ;;  %v6723_v57 = vld [vmem:[#allocation2 + $0x29] sm:$0xff]  ;;  %v8071_v39 = vld [vmem:[%s18905_s1] sm:$0xff] }
 0x30b   :  { %v13877_v42 = vpop.f32.mrf.mxu1  ;;  %14019 = vmatmul.mubr.msk.f32.gmra.mxu0 %vm23_vm0, %v5940_v62  ;;  %v8081_v30 = vld [vmem:[%s18905_s1 + $0x50] sm:$0xff] }
 0x30c   :  { %5395 = vst.msk [vmem:[#allocation3 + $0xc0] sm:$0xff] %vm226_vm2, %v5331_v22  ;;  %v5334_v24 = vadd.f32 %v13877_v42, %v4688_v8  ;;  %v5861_v41 = vpop.permute.xlu1 %5860  ;;  %14021 = vmatprep.mubr.msk.f32.mxu0 %vm23_vm0, %v5941_v6  ;;  %14032 = vmatprep.mubr.msk.f32.mxu1 %vm23_vm0, %v7169_v21  ;;  %v4696_v6 = vld [vmem:[#allocation3 + $0x118] sm:$0xff] }
 0x30d   :  { %v5942_v33 = vmul.f32 %v5861_v41, %v5494_v9  ;;  %v5118_v11 = vpop.f32.mrf.mxu1  ;;  %v16885_v48 = vpop.permute.xlu0 %6866  ;;  %v4695_v9 = vld [vmem:[#allocation3 + $0x110] sm:$0xff] }
 0x30e   :  { %5398 = vst.msk [vmem:[#allocation3 + $0xd8] sm:$0xff] %vm226_vm2, %v5334_v24  ;;  %v5333_v27 = vadd.f32 %v5118_v11, %v4687_v32  ;;  %7131 = vperm.xlu1 %14447, %v6841_v29   ;;  %14449 = vset.pattern.permute.xlu0 %v14548_v47  ;;  %v7172_v23 = vmul.f32 %v16885_v48, %v6724_v26  ;;  %v6726_v8 = vld [vmem:[#allocation2 + $0x41] sm:$0xff]  ;;  %v4698_v24 = vld [vmem:[#allocation3 + $0x128] sm:$0xff]  ;;  %v6731_v26 = vld [vmem:[#allocation2 + $0x69] sm:$0xff] }
 0x30f   :  { %8142 = vperm.xlu0 %14449, %v8072_v14   ;;  %v13880_v10 = vpop.f32.mrf.mxu1  ;;  %14022 = vmatmul.mubr.msk.f32.gmra.mxu0 %vm23_vm0, %v5942_v33  ;;  %v6725_v14 = vld [vmem:[#allocation2 + $0x39] sm:$0xff]  ;;  %v8073_v33 = vld [vmem:[%s18905_s1 + $0x10] sm:$0xff] }
 0x310   :  { %5397 = vst.msk [vmem:[#allocation3 + $0xd0] sm:$0xff] %vm226_vm2, %v5333_v27  ;;  %v5336_v52 = vadd.f32 %v13880_v10, %v4690_v36  ;;  %v5871_v45 = vpop.permute.xlu1 %5870  ;;  %14024 = vmatprep.mubr.msk.f32.mxu0 %vm23_vm0, %v5943_v28  ;;  %v8083_v32 = vld [vmem:[%s18905_s1 + $0x60] sm:$0xff]  ;;  %v4697_v27 = vld [vmem:[#allocation3 + $0x120] sm:$0xff] }
 0x311   :  { %v5944_v35 = vmul.f32 %v5871_v45, %v5496_v37  ;;  %v5128_v13 = vpop.f32.mrf.mxu1  ;;  %v16898_v34 = vpop.permute.xlu0 %6876  ;;  %v6728_v37 = vld [vmem:[#allocation2 + $0x51] sm:$0xff]  ;;  %v6727_v45 = vld [vmem:[#allocation2 + $0x49] sm:$0xff] }
 0x312   :  { %5400 = vst.msk [vmem:[#allocation3 + $0xe8] sm:$0xff] %vm226_vm2, %v5336_v52  ;;  %v5335_v53 = vadd.f32 %v5128_v13, %v4689_v51  ;;  %7141 = vperm.xlu1 %14447, %v6843_v1   ;;  %v7174_v11 = vmul.f32 %v16898_v34, %v6726_v8  ;;  %v8085_v51 = vld [vmem:[%s18905_s1 + $0x70] sm:$0xff] }
 0x313   :  { %8157 = vperm.xlu0 %14449, %v8075_v44   ;;  %v13883_v56 = vpop.f32.mrf.mxu1  ;;  %14025 = vmatmul.mubr.msk.f32.gmra.mxu0 %vm23_vm0, %v5944_v35  ;;  %v8074_v35 = vld [vmem:[%s18905_s1 + $0x18] sm:$0xff] }
 0x314   :  { %5399 = vst.msk [vmem:[#allocation3 + $0xe0] sm:$0xff] %vm226_vm2, %v5335_v53  ;;  %v5338_v55 = vadd.f32 %v13883_v56, %v4692_v12  ;;  %v5881_v58 = vpop.permute.xlu1 %5880  ;;  %14027 = vmatprep.mubr.msk.f32.mxu0 %vm23_vm0, %v5945_v31  ;;  %v4700_v31 = vld [vmem:[#allocation3 + $0x138] sm:$0xff]  ;;  %v4699_v53 = vld [vmem:[#allocation3 + $0x130] sm:$0xff] }
 0x315   :  { %v5946_v38 = vmul.f32 %v5881_v58, %v5498_v50  ;;  %v5138_v17 = vpop.f32.mrf.mxu1  ;;  %v16910_v20 = vpop.permute.xlu0 %6886  ;;  %v6730_v12 = vld [vmem:[#allocation2 + $0x61] sm:$0xff]  ;;  %v4702_v58 = vld [vmem:[#allocation3 + $0x148] sm:$0xff] }
 0x316   :  { %5402 = vst.msk [vmem:[#allocation3 + $0xf8] sm:$0xff] %vm226_vm2, %v5338_v55  ;;  %v5337_v15 = vadd.f32 %v5138_v17, %v4691_v4  ;;  %7151 = vperm.xlu1 %14447, %v6845_v0   ;;  %v7176_v13 = vmul.f32 %v16910_v20, %v6728_v37  ;;  %v8076_v17 = vld [vmem:[%s18905_s1 + $0x28] sm:$0xff]  ;;  %v8087_v20 = vld [vmem:[%s18905_s1 + $0x80] sm:$0xff] }
 0x317   :  { %8167 = vperm.xlu0 %14449, %v8077_v61   ;;  %v13886_v60 = vpop.f32.mrf.mxu1  ;;  %14028 = vmatmul.mubr.msk.f32.gmra.mxu0 %vm23_vm0, %v5946_v38  ;;  %v6729_v38 = vld [vmem:[#allocation2 + $0x59] sm:$0xff] }
 0x318   :  { %5401 = vst.msk [vmem:[#allocation3 + $0xf0] sm:$0xff] %vm226_vm2, %v5337_v15  ;;  %v5340_v46 = vadd.f32 %v13886_v60, %v4694_v43  ;;  %v4701_v60 = vld [vmem:[#allocation3 + $0x140] sm:$0xff] }
 0x319   :  { %v6857_v7 = vpop.permute.xlu1 %6856  ;;  %v5148_v63 = vpop.f32.mrf.mxu1 }
 0x31a   :  { %5404 = vst.msk [vmem:[#allocation3 + $0x108] sm:$0xff] %vm226_vm2, %v5340_v46  ;;  %v7170_v18 = vmul.f32 %v6857_v7, %v6722_v59  ;;  %v5339_v19 = vadd.f32 %v5148_v63, %v4693_v2  ;;  %7161 = vperm.xlu1 %14447, %v6847_v16   ;;  %v16922_v25 = vpop.permute.xlu0 %6896  ;;  %v6732_v16 = vld [vmem:[#allocation2 + $0x71] sm:$0xff]  ;;  %v4704_v2 = vld [vmem:[#allocation3 + $0x158] sm:$0xff] }
 0x31b   :  { %8177 = vperm.xlu0 %14449, %v8079_v3   ;;  %v13889_v54 = vpop.f32.mrf.mxu1  ;;  %v7178_v15 = vmul.f32 %v16922_v25, %v6730_v12  ;;  %v8089_v25 = vld [vmem:[%s18905_s1 + $0x90] sm:$0xff] }
 0x31c   :  { %5403 = vst.msk [vmem:[#allocation3 + $0x100] sm:$0xff] %vm226_vm2, %v5339_v19  ;;  %v5342_v62 = vadd.f32 %v13889_v54, %v4696_v6  ;;  %14033 = vmatmul.mubr.msk.f32.vlgmr.msra.gmra.mxu1 %vm23_vm0, %v7170_v18  ;;  %v8078_v19 = vld [vmem:[%s18905_s1 + $0x38] sm:$0xff] }
 0x31d   :  { %v6862_v22 = vpop.permute.xlu1 %6861  ;;  %v5158_v21 = vpop.f32.mrf.mxu1 }
 0x31e   :  { %5406 = vst.msk [vmem:[#allocation3 + $0x118] sm:$0xff] %vm226_vm2, %v5342_v62  ;;  %v7171_v42 = vmul.f32 %v6862_v22, %v6723_v57  ;;  %v5341_v29 = vadd.f32 %v5158_v21, %v4695_v9  ;;  %14448 = vset.pattern.permute.xlu1 %v14548_v47  ;;  %v16940_v28 = vpop.permute.xlu0 %6906  ;;  %v4703_v57 = vld [vmem:[#allocation3 + $0x150] sm:$0xff]  ;;  %v4706_v22 = vld [vmem:[#allocation3 + $0x168] sm:$0xff] }
 0x31f   :  { %8137 = vperm.xlu1 %14448, %v8071_v39   ;;  %8187 = vperm.xlu0 %14449, %v8081_v30   ;;  %v13892_v41 = vpop.f32.mrf.mxu1  ;;  %v7180_v6 = vmul.f32 %v16940_v28, %v6732_v16  ;;  %v6734_v62 = vld [vmem:[#allocation2 + $0x81] sm:$0xff]  ;;  %v6733_v21 = vld [vmem:[#allocation2 + $0x79] sm:$0xff] }
 0x320   :  { %5405 = vst.msk [vmem:[#allocation3 + $0x110] sm:$0xff] %vm226_vm2, %v5341_v29  ;;  %v5344_v5 = vadd.f32 %v13892_v41, %v4698_v24  ;;  %14035 = vmatprep.mubr.msk.f32.mxu1 %vm23_vm0, %v7171_v42  ;;  %v8080_v42 = vld [vmem:[%s18905_s1 + $0x48] sm:$0xff]  ;;  %v8091_v29 = vld [vmem:[%s18905_s1 + $0xa0] sm:$0xff]  ;;  %v4705_v41 = vld [vmem:[#allocation3 + $0x160] sm:$0xff] }
 0x321   :  { %v6872_v48 = vpop.permute.xlu1 %6871  ;;  %v5168_v47 = vpop.f32.mrf.mxu1  ;;  %14036 = vmatmul.mubr.msk.f32.gmra.mxu1 %vm23_vm0, %v7172_v23 }
 0x322   :  { %5408 = vst.msk [vmem:[#allocation3 + $0x128] sm:$0xff] %vm226_vm2, %v5344_v5  ;;  %v7173_v36 = vmul.f32 %v6872_v48, %v6725_v14  ;;  %v5343_v10 = vadd.f32 %v5168_v47, %v4697_v27  ;;  %v16953_v1 = vpop.permute.xlu0 %6916  ;;  %v6736_v5 = vld [vmem:[#allocation2 + $0x91] sm:$0xff]  ;;  %v4708_v48 = vld [vmem:[#allocation3 + $0x178] sm:$0xff] }
 0x323   :  { %8147 = vperm.xlu1 %14448, %v8073_v33   ;;  %8197 = vperm.xlu0 %14449, %v8083_v32   ;;  %v13895_v52 = vpop.f32.mrf.mxu1  ;;  %v7182_v28 = vmul.f32 %v16953_v1, %v6734_v62  ;;  %v6735_v47 = vld [vmem:[#allocation2 + $0x89] sm:$0xff] }
 0x324   :  { %5407 = vst.msk [vmem:[#allocation3 + $0x120] sm:$0xff] %vm226_vm2, %v5343_v10  ;;  %v5346_v44 = vadd.f32 %v13895_v52, %v4700_v31  ;;  %14038 = vmatprep.mubr.msk.f32.mxu1 %vm23_vm0, %v7173_v36  ;;  %v8082_v36 = vld [vmem:[%s18905_s1 + $0x58] sm:$0xff]  ;;  %v8093_v10 = vld [vmem:[%s18905_s1 + $0xb0] sm:$0xff]  ;;  %v4707_v52 = vld [vmem:[#allocation3 + $0x170] sm:$0xff] }
 0x325   :  { %v6882_v34 = vpop.permute.xlu1 %6881  ;;  %v5178_v50 = vpop.f32.mrf.mxu1  ;;  %14039 = vmatmul.mubr.msk.f32.gmra.mxu1 %vm23_vm0, %v7174_v11 }
 0x326   :  { %5410 = vst.msk [vmem:[#allocation3 + $0x138] sm:$0xff] %vm226_vm2, %v5346_v44  ;;  %v7175_v56 = vmul.f32 %v6882_v34, %v6727_v45  ;;  %v5345_v0 = vadd.f32 %v5178_v50, %v4699_v53  ;;  %v16966_v55 = vpop.permute.xlu0 %6926  ;;  %v6738_v44 = vld [vmem:[#allocation2 + $0xa1] sm:$0xff]  ;;  %v4710_v34 = vld [vmem:[#allocation3 + $0x188] sm:$0xff] }
 0x327   :  { %8152 = vperm.xlu1 %14448, %v8074_v35   ;;  %8207 = vperm.xlu0 %14449, %v8085_v51   ;;  %v13898_v61 = vpop.f32.mrf.mxu1  ;;  %v7184_v1 = vmul.f32 %v16966_v55, %v6736_v5  ;;  %v6737_v50 = vld [vmem:[#allocation2 + $0x99] sm:$0xff] }
 0x328   :  { %5409 = vst.msk [vmem:[#allocation3 + $0x130] sm:$0xff] %vm226_vm2, %v5345_v0  ;;  %v5348_v4 = vadd.f32 %v13898_v61, %v4702_v58  ;;  %14041 = vmatprep.mubr.msk.f32.mxu1 %vm23_vm0, %v7175_v56  ;;  %v8084_v56 = vld [vmem:[%s18905_s1 + $0x68] sm:$0xff]  ;;  %v8095_v0 = vld [vmem:[%s18905_s1 + $0xc0] sm:$0xff]  ;;  %v4709_v61 = vld [vmem:[#allocation3 + $0x180] sm:$0xff] }
 0x329   :  { %v6892_v43 = vpop.permute.xlu1 %6891  ;;  %v5188_v59 = vpop.f32.mrf.mxu1  ;;  %14042 = vmatmul.mubr.msk.f32.gmra.mxu1 %vm23_vm0, %v7176_v13 }
 0x32a   :  { %5412 = vst.msk [vmem:[#allocation3 + $0x148] sm:$0xff] %vm226_vm2, %v5348_v4  ;;  %v7177_v46 = vmul.f32 %v6892_v43, %v6729_v38  ;;  %v5347_v3 = vadd.f32 %v5188_v59, %v4701_v60  ;;  %v16979_v7 = vpop.permute.xlu0 %6936  ;;  %v6740_v4 = vld [vmem:[#allocation2 + $0xb1] sm:$0xff]  ;;  %v4712_v43 = vld [vmem:[#allocation3 + $0x198] sm:$0xff] }
 0x32b   :  { %8162 = vperm.xlu1 %14448, %v8076_v17   ;;  %8217 = vperm.xlu0 %14449, %v8087_v20   ;;  %v13901_v63 = vpop.f32.mrf.mxu1  ;;  %v7186_v55 = vmul.f32 %v16979_v7, %v6738_v44  ;;  %v6739_v59 = vld [vmem:[#allocation2 + $0xa9] sm:$0xff] }
 0x32c   :  { %5411 = vst.msk [vmem:[#allocation3 + $0x140] sm:$0xff] %vm226_vm2, %v5347_v3  ;;  %v5350_v18 = vadd.f32 %v13901_v63, %v4704_v2  ;;  %14044 = vmatprep.mubr.msk.f32.mxu1 %vm23_vm0, %v7177_v46  ;;  %v8086_v46 = vld [vmem:[%s18905_s1 + $0x78] sm:$0xff]  ;;  %v8097_v3 = vld [vmem:[%s18905_s1 + $0xd0] sm:$0xff]  ;;  %v4711_v63 = vld [vmem:[#allocation3 + $0x190] sm:$0xff] }
 0x32d   :  { %v6902_v54 = vpop.permute.xlu1 %6901  ;;  %v5198_v40 = vpop.f32.mrf.mxu1  ;;  %14045 = vmatmul.mubr.msk.f32.gmra.mxu1 %vm23_vm0, %v7178_v15 }
 0x32e   :  { %5414 = vst.msk [vmem:[#allocation3 + $0x158] sm:$0xff] %vm226_vm2, %v5350_v18  ;;  %v7179_v39 = vmul.f32 %v6902_v54, %v6731_v26  ;;  %v5349_v30 = vadd.f32 %v5198_v40, %v4703_v57  ;;  %v16992_v23 = vpop.permute.xlu0 %6946  ;;  %v6742_v18 = vld [vmem:[#allocation2 + $0xc1] sm:$0xff]  ;;  %v4714_v54 = vld [vmem:[#allocation3 + $0x1a8] sm:$0xff] }
 0x32f   :  { %8172 = vperm.xlu1 %14448, %v8078_v19   ;;  %8227 = vperm.xlu0 %14449, %v8089_v25   ;;  %v13904_v9 = vpop.f32.mrf.mxu1  ;;  %v7188_v7 = vmul.f32 %v16992_v23, %v6740_v4  ;;  %v6741_v40 = vld [vmem:[#allocation2 + $0xb9] sm:$0xff] }
 0x330   :  { %5413 = vst.msk [vmem:[#allocation3 + $0x150] sm:$0xff] %vm226_vm2, %v5349_v30  ;;  %v5352_v8 = vadd.f32 %v13904_v9, %v4706_v22  ;;  %14047 = vmatprep.mubr.msk.f32.mxu1 %vm23_vm0, %v7179_v39  ;;  %v8088_v39 = vld [vmem:[%s18905_s1 + $0x88] sm:$0xff]  ;;  %v8099_v30 = vld [vmem:[%s18905_s1 + $0xe0] sm:$0xff]  ;;  %v4713_v9 = vld [vmem:[#allocation3 + $0x1a0] sm:$0xff] }
 0x331   :  { %v6912_v24 = vpop.permute.xlu1 %6911  ;;  %v5208_v14 = vpop.f32.mrf.mxu1  ;;  %14048 = vmatmul.mubr.msk.f32.gmra.mxu1 %vm23_vm0, %v7180_v6 }
 0x332   :  { %5416 = vst.msk [vmem:[#allocation3 + $0x168] sm:$0xff] %vm226_vm2, %v5352_v8  ;;  %v7181_v33 = vmul.f32 %v6912_v24, %v6733_v21  ;;  %v5351_v32 = vadd.f32 %v5208_v14, %v4705_v41  ;;  %v17005_v11 = vpop.permute.xlu0 %6956  ;;  %v6744_v8 = vld [vmem:[#allocation2 + $0xd1] sm:$0xff]  ;;  %v4716_v24 = vld [vmem:[#allocation3 + $0x1b8] sm:$0xff] }
 0x333   :  { %8182 = vperm.xlu1 %14448, %v8080_v42   ;;  %8237 = vperm.xlu0 %14449, %v8091_v29   ;;  %v13907_v27 = vpop.f32.mrf.mxu1  ;;  %v7190_v23 = vmul.f32 %v17005_v11, %v6742_v18  ;;  %v6743_v14 = vld [vmem:[#allocation2 + $0xc9] sm:$0xff] }
 0x334   :  { %5415 = vst.msk [vmem:[#allocation3 + $0x160] sm:$0xff] %vm226_vm2, %v5351_v32  ;;  %v5354_v37 = vadd.f32 %v13907_v27, %v4708_v48  ;;  %14050 = vmatprep.mubr.msk.f32.mxu1 %vm23_vm0, %v7181_v33  ;;  %v8090_v33 = vld [vmem:[%s18905_s1 + $0x98] sm:$0xff]  ;;  %v8101_v32 = vld [vmem:[%s18905_s1 + $0xf0] sm:$0xff]  ;;  %v4715_v27 = vld [vmem:[#allocation3 + $0x1b0] sm:$0xff] }
 0x335   :  { %v6922_v31 = vpop.permute.xlu1 %6921  ;;  %v5218_v45 = vpop.f32.mrf.mxu1  ;;  %14051 = vmatmul.mubr.msk.f32.gmra.mxu1 %vm23_vm0, %v7182_v28 }
 0x336   :  { %5418 = vst.msk [vmem:[#allocation3 + $0x178] sm:$0xff] %vm226_vm2, %v5354_v37  ;;  %v7183_v35 = vmul.f32 %v6922_v31, %v6735_v47  ;;  %v5353_v51 = vadd.f32 %v5218_v45, %v4707_v52  ;;  %v17018_v13 = vpop.permute.xlu0 %6966  ;;  %v6746_v37 = vld [vmem:[#allocation2 + $0xe1] sm:$0xff]  ;;  %v4718_v31 = vld [vmem:[#allocation3 + $0x1c8] sm:$0xff] }
 0x337   :  { %8192 = vperm.xlu1 %14448, %v8082_v36   ;;  %8247 = vperm.xlu0 %14449, %v8093_v10   ;;  %v13910_v53 = vpop.f32.mrf.mxu1  ;;  %v7192_v11 = vmul.f32 %v17018_v13, %v6744_v8  ;;  %v6745_v45 = vld [vmem:[#allocation2 + $0xd9] sm:$0xff] }
 0x338   :  { %5417 = vst.msk [vmem:[#allocation3 + $0x170] sm:$0xff] %vm226_vm2, %v5353_v51  ;;  %v5356_v12 = vadd.f32 %v13910_v53, %v4710_v34  ;;  %14053 = vmatprep.mubr.msk.f32.mxu1 %vm23_vm0, %v7183_v35  ;;  %v8092_v35 = vld [vmem:[%s18905_s1 + $0xa8] sm:$0xff]  ;;  %v8103_v51 = vld [vmem:[%s18905_s1 + $0x100] sm:$0xff]  ;;  %v4717_v53 = vld [vmem:[#allocation3 + $0x1c0] sm:$0xff] }
 0x339   :  { %v6932_v58 = vpop.permute.xlu1 %6931  ;;  %v5228_v38 = vpop.f32.mrf.mxu1  ;;  %14054 = vmatmul.mubr.msk.f32.gmra.mxu1 %vm23_vm0, %v7184_v1 }
 0x33a   :  { %5420 = vst.msk [vmem:[#allocation3 + $0x188] sm:$0xff] %vm226_vm2, %v5356_v12  ;;  %v7185_v17 = vmul.f32 %v6932_v58, %v6737_v50  ;;  %v5355_v20 = vadd.f32 %v5228_v38, %v4709_v61  ;;  %v17031_v15 = vpop.permute.xlu0 %6976  ;;  %v6748_v12 = vld [vmem:[#allocation2 + $0xf1] sm:$0xff]  ;;  %v4720_v58 = vld [vmem:[#allocation3 + $0x1d8] sm:$0xff] }
 0x33b   :  { %8202 = vperm.xlu1 %14448, %v8084_v56   ;;  %8257 = vperm.xlu0 %14449, %v8095_v0   ;;  %v13913_v60 = vpop.f32.mrf.mxu1  ;;  %v7194_v13 = vmul.f32 %v17031_v15, %v6746_v37  ;;  %v6747_v38 = vld [vmem:[#allocation2 + $0xe9] sm:$0xff] }
 0x33c   :  { %5419 = vst.msk [vmem:[#allocation3 + $0x180] sm:$0xff] %vm226_vm2, %v5355_v20  ;;  %v5358_v16 = vadd.f32 %v13913_v60, %v4712_v43  ;;  %14056 = vmatprep.mubr.msk.f32.mxu1 %vm23_vm0, %v7185_v17  ;;  %v8094_v17 = vld [vmem:[%s18905_s1 + $0xb8] sm:$0xff]  ;;  %v8105_v20 = vld [vmem:[%s18905_s1 + $0x110] sm:$0xff]  ;;  %v4719_v60 = vld [vmem:[#allocation3 + $0x1d0] sm:$0xff] }
 0x33d   :  { %v6942_v2 = vpop.permute.xlu1 %6941  ;;  %v5238_v26 = vpop.f32.mrf.mxu1  ;;  %14057 = vmatmul.mubr.msk.f32.gmra.mxu1 %vm23_vm0, %v7186_v55  ;;  %v8100_v37 = vld [vmem:[%s18905_s1 + $0xe8] sm:$0xff] }
 0x33e   :  { %5422 = vst.msk [vmem:[#allocation3 + $0x198] sm:$0xff] %vm226_vm2, %v5358_v16  ;;  %v7187_v19 = vmul.f32 %v6942_v2, %v6739_v59  ;;  %v5357_v25 = vadd.f32 %v5238_v26, %v4711_v63  ;;  %v17044_v6 = vpop.permute.xlu0 %6986  ;;  %v6750_v16 = vld [vmem:[#allocation2 + $0x101] sm:$0xff]  ;;  %v4722_v2 = vld [vmem:[#allocation3 + $0x1e8] sm:$0xff] }
 0x33f   :  { %8212 = vperm.xlu1 %14448, %v8086_v46   ;;  %8267 = vperm.xlu0 %14449, %v8097_v3   ;;  %v13916_v57 = vpop.f32.mrf.mxu1  ;;  %v7196_v15 = vmul.f32 %v17044_v6, %v6748_v12  ;;  %v6749_v26 = vld [vmem:[#allocation2 + $0xf9] sm:$0xff] }
 0x340   :  { %5421 = vst.msk [vmem:[#allocation3 + $0x190] sm:$0xff] %vm226_vm2, %v5357_v25  ;;  %v5360_v62 = vadd.f32 %v13916_v57, %v4714_v54  ;;  %14059 = vmatprep.mubr.msk.f32.mxu1 %vm23_vm0, %v7187_v19  ;;  %v8096_v19 = vld [vmem:[%s18905_s1 + $0xc8] sm:$0xff]  ;;  %v8107_v25 = vld [vmem:[%s18905_s1 + $0x120] sm:$0xff]  ;;  %v4721_v57 = vld [vmem:[#allocation3 + $0x1e0] sm:$0xff] }
 0x341   :  { %v6952_v22 = vpop.permute.xlu1 %6951  ;;  %v5248_v21 = vpop.f32.mrf.mxu1  ;;  %14060 = vmatmul.mubr.msk.f32.gmra.mxu1 %vm23_vm0, %v7188_v7 }
 0x342   :  { %5424 = vst.msk [vmem:[#allocation3 + $0x1a8] sm:$0xff] %vm226_vm2, %v5360_v62  ;;  %v7189_v42 = vmul.f32 %v6952_v22, %v6741_v40  ;;  %v5359_v29 = vadd.f32 %v5248_v21, %v4713_v9  ;;  %v17057_v28 = vpop.permute.xlu0 %6996  ;;  %v6752_v62 = vld [vmem:[#allocation2 + $0x111] sm:$0xff]  ;;  %v4724_v22 = vld [vmem:[#allocation3 + $0x1f8] sm:$0xff] }
 0x343   :  { %8222 = vperm.xlu1 %14448, %v8088_v39   ;;  %8277 = vperm.xlu0 %14449, %v8099_v30   ;;  %v13919_v41 = vpop.f32.mrf.mxu1  ;;  %v7198_v6 = vmul.f32 %v17057_v28, %v6750_v16  ;;  %v6751_v21 = vld [vmem:[#allocation2 + $0x109] sm:$0xff] }
 0x344   :  { %5423 = vst.msk [vmem:[#allocation3 + $0x1a0] sm:$0xff] %vm226_vm2, %v5359_v29  ;;  %v5362_v5 = vadd.f32 %v13919_v41, %v4716_v24  ;;  %14062 = vmatprep.mubr.msk.f32.mxu1 %vm23_vm0, %v7189_v42  ;;  %v8098_v42 = vld [vmem:[%s18905_s1 + $0xd8] sm:$0xff]  ;;  %v8109_v29 = vld [vmem:[%s18905_s1 + $0x130] sm:$0xff]  ;;  %v4723_v41 = vld [vmem:[#allocation3 + $0x1f0] sm:$0xff] }
 0x345   :  { %v6962_v48 = vpop.permute.xlu1 %6961  ;;  %v5258_v47 = vpop.f32.mrf.mxu1  ;;  %14063 = vmatmul.mubr.msk.f32.gmra.mxu1 %vm23_vm0, %v7190_v23 }
 0x346   :  { %5426 = vst.msk [vmem:[#allocation3 + $0x1b8] sm:$0xff] %vm226_vm2, %v5362_v5  ;;  %v7191_v36 = vmul.f32 %v6962_v48, %v6743_v14  ;;  %v5361_v10 = vadd.f32 %v5258_v47, %v4715_v27  ;;  %v17070_v1 = vpop.permute.xlu0 %7006  ;;  %v6754_v5 = vld [vmem:[#allocation2 + $0x121] sm:$0xff]  ;;  %v6753_v48 = vld [vmem:[#allocation2 + $0x119] sm:$0xff] }
 0x347   :  { %8232 = vperm.xlu1 %14448, %v8090_v33   ;;  %8287 = vperm.xlu0 %14449, %v8101_v32   ;;  %v13922_v52 = vpop.f32.mrf.mxu1  ;;  %v7200_v28 = vmul.f32 %v17070_v1, %v6752_v62  ;;  %v5948_v27 = vld [vmem:[#allocation3 + $0x8] sm:$0xff] }
 0x348   :  { %5425 = vst.msk [vmem:[#allocation3 + $0x1b0] sm:$0xff] %vm226_vm2, %v5361_v10  ;;  %v5364_v44 = vadd.f32 %v13922_v52, %v4718_v31  ;;  %14065 = vmatprep.mubr.msk.f32.mxu1 %vm23_vm0, %v7191_v36  ;;  %v8111_v36 = vld [vmem:[%s18905_s1 + $0x140] sm:$0xff]  ;;  %v6756_v52 = vld [vmem:[#allocation2 + $0x131] sm:$0xff] }
 0x349   :  { %v6972_v34 = vpop.permute.xlu1 %6971  ;;  %v5268_v50 = vpop.f32.mrf.mxu1  ;;  %14066 = vmatmul.mubr.msk.f32.gmra.mxu1 %vm23_vm0, %v7192_v11 }
 0x34a   :  { %5428 = vst.msk [vmem:[#allocation3 + $0x1c8] sm:$0xff] %vm226_vm2, %v5364_v44  ;;  %v7193_v56 = vmul.f32 %v6972_v34, %v6745_v45  ;;  %v5363_v0 = vadd.f32 %v5268_v50, %v4717_v53  ;;  %v17083_v55 = vpop.permute.xlu0 %7016  ;;  %v5947_v44 = vld [vmem:[#allocation3] sm:$0xff]  ;;  %v8102_v53 = vld [vmem:[%s18905_s1 + $0xf8] sm:$0xff] }
 0x34b   :  { %8242 = vperm.xlu1 %14448, %v8092_v35   ;;  %8297 = vperm.xlu0 %14449, %v8103_v51   ;;  %v13925_v61 = vpop.f32.mrf.mxu1  ;;  %v7202_v10 = vmul.f32 %v17083_v55, %v6754_v5  ;;  %v6755_v34 = vld [vmem:[#allocation2 + $0x129] sm:$0xff] }
 0x34c   :  { %5427 = vst.msk [vmem:[#allocation3 + $0x1c0] sm:$0xff] %vm226_vm2, %v5363_v0  ;;  %v5366_v4 = vadd.f32 %v13925_v61, %v4720_v58  ;;  %14068 = vmatprep.mubr.msk.f32.mxu1 %vm23_vm0, %v7193_v56  ;;  %v8113_v50 = vld [vmem:[%s18905_s1 + $0x150] sm:$0xff]  ;;  %v6758_v0 = vld [vmem:[#allocation2 + $0x141] sm:$0xff] }
 0x34d   :  { %v6982_v43 = vpop.permute.xlu1 %6981  ;;  %v5278_v59 = vpop.f32.mrf.mxu1  ;;  %14069 = vmatmul.mubr.msk.f32.gmra.mxu1 %vm23_vm0, %v7194_v13  ;;  %v5950_v61 = vld [vmem:[#allocation3 + $0x18] sm:$0xff] }
 0x34e   :  { %5430 = vst.msk [vmem:[#allocation3 + $0x1d8] sm:$0xff] %vm226_vm2, %v5366_v4  ;;  %v7195_v46 = vmul.f32 %v6982_v43, %v6747_v38  ;;  %v5365_v3 = vadd.f32 %v5278_v59, %v4719_v60  ;;  %v17096_v7 = vpop.permute.xlu0 %7026  ;;  %v6757_v4 = vld [vmem:[#allocation2 + $0x139] sm:$0xff] }
 0x34f   :  { %8252 = vperm.xlu1 %14448, %v8094_v17   ;;  %8307 = vperm.xlu0 %14449, %v8105_v20   ;;  %v13928_v63 = vpop.f32.mrf.mxu1  ;;  %v7204_v12 = vmul.f32 %v17096_v7, %v6756_v52  ;;  %v8104_v20 = vld [vmem:[%s18905_s1 + $0x108] sm:$0xff]  ;;  %v5949_v59 = vld [vmem:[#allocation3 + $0x10] sm:$0xff] }
 0x350   :  { %5429 = vst.msk [vmem:[#allocation3 + $0x1d0] sm:$0xff] %vm226_vm2, %v5365_v3  ;;  %v5368_v18 = vadd.f32 %v13928_v63, %v4722_v2  ;;  %14071 = vmatprep.mubr.msk.f32.mxu1 %vm23_vm0, %v7195_v46  ;;  %v6760_v46 = vld [vmem:[#allocation2 + $0x151] sm:$0xff] }
 0x351   :  { %v6992_v54 = vpop.permute.xlu1 %6991  ;;  %v5288_v40 = vpop.f32.mrf.mxu1  ;;  %14072 = vmatmul.mubr.msk.f32.gmra.mxu1 %vm23_vm0, %v7196_v15  ;;  %v8115_v15 = vld [vmem:[%s18905_s1 + $0x160] sm:$0xff]  ;;  %v5952_v63 = vld [vmem:[#allocation3 + $0x28] sm:$0xff] }
 0x352   :  { %5432 = vst.msk [vmem:[#allocation3 + $0x1e8] sm:$0xff] %vm226_vm2, %v5368_v18  ;;  %v7197_v39 = vmul.f32 %v6992_v54, %v6749_v26  ;;  %v5367_v30 = vadd.f32 %v5288_v40, %v4721_v57  ;;  %v17109_v23 = vpop.permute.xlu0 %7036  ;;  %v6759_v18 = vld [vmem:[#allocation2 + $0x149] sm:$0xff] }
 0x353   :  { %8262 = vperm.xlu1 %14448, %v8096_v19   ;;  %8317 = vperm.xlu0 %14449, %v8107_v25   ;;  %v13931_v9 = vpop.f32.mrf.mxu1  ;;  %v7206_v43 = vmul.f32 %v17109_v23, %v6758_v0  ;;  %v8106_v25 = vld [vmem:[%s18905_s1 + $0x118] sm:$0xff]  ;;  %v5951_v40 = vld [vmem:[#allocation3 + $0x20] sm:$0xff]  ;;  %v8112_v0 = vld [vmem:[%s18905_s1 + $0x148] sm:$0xff] }
 0x354   :  { %5431 = vst.msk [vmem:[#allocation3 + $0x1e0] sm:$0xff] %vm226_vm2, %v5367_v30  ;;  %v5370_v8 = vadd.f32 %v13931_v9, %v4724_v22  ;;  %14074 = vmatprep.mubr.msk.f32.mxu1 %vm23_vm0, %v7197_v39  ;;  %v6762_v39 = vld [vmem:[#allocation2 + $0x161] sm:$0xff] }
 0x355   :  { %v7002_v24 = vpop.permute.xlu1 %7001  ;;  %v5298_v14 = vpop.f32.mrf.mxu1  ;;  %14075 = vmatmul.mubr.msk.f32.gmra.mxu1 %vm23_vm0, %v7198_v6  ;;  %v8117_v6 = vld [vmem:[%s18905_s1 + $0x170] sm:$0xff]  ;;  %v5954_v9 = vld [vmem:[#allocation3 + $0x38] sm:$0xff] }
 0x356   :  { %5434 = vst.msk [vmem:[#allocation3 + $0x1f8] sm:$0xff] %vm226_vm2, %v5370_v8  ;;  %v7199_v33 = vmul.f32 %v7002_v24, %v6751_v21  ;;  %v5369_v32 = vadd.f32 %v5298_v14, %v4723_v41  ;;  %v17122_v11 = vpop.permute.xlu0 %7046  ;;  %v6761_v8 = vld [vmem:[#allocation2 + $0x159] sm:$0xff] }
 0x357   :  { %8272 = vperm.xlu1 %14448, %v8098_v42   ;;  %8327 = vperm.xlu0 %14449, %v8109_v29   ;;  %v7208_v54 = vmul.f32 %v17122_v11, %v6760_v46  ;;  %v8108_v29 = vld [vmem:[%s18905_s1 + $0x128] sm:$0xff]  ;;  %v5953_v14 = vld [vmem:[#allocation3 + $0x30] sm:$0xff] }
 0x358   :  { %5433 = vst.msk [vmem:[#allocation3 + $0x1f0] sm:$0xff] %vm226_vm2, %v5369_v32  ;;  %v13936_v47 = vpop.f32.mrf.mxu0  ;;  %14077 = vmatprep.mubr.msk.f32.mxu1 %vm23_vm0, %v7199_v33  ;;  %v6764_v33 = vld [vmem:[#allocation2 + $0x171] sm:$0xff] }
 0x359   :  { %v6594_v1 = vadd.f32 %v13936_v47, %v5948_v27  ;;  %v7012_v31 = vpop.permute.xlu1 %7011  ;;  %14078 = vmatmul.mubr.msk.f32.gmra.mxu1 %vm23_vm0, %v7200_v28  ;;  %v8119_v28 = vld [vmem:[%s18905_s1 + $0x180] sm:$0xff]  ;;  %v5956_v27 = vld [vmem:[#allocation3 + $0x48] sm:$0xff] }
 0x35a   :  { %v7201_v45 = vmul.f32 %v7012_v31, %v6753_v48  ;;  %v6274_v35 = vpop.f32.mrf.mxu0  ;;  %v17134_v51 = vpop.permute.xlu0 %7056 }
 0x35b   :  { %6658 = vst.msk [vmem:[#allocation3 + $0x8] sm:$0xff] %vm226_vm2, %v6594_v1  ;;  %v6593_v13 = vadd.f32 %v6274_v35, %v5947_v44  ;;  %8282 = vperm.xlu1 %14448, %v8100_v37   ;;  %8337 = vperm.xlu0 %14449, %v8111_v36   ;;  %v7210_v24 = vmul.f32 %v17134_v51, %v6762_v39  ;;  %v6763_v37 = vld [vmem:[#allocation2 + $0x169] sm:$0xff]  ;;  %v6766_v35 = vld [vmem:[#allocation2 + $0x181] sm:$0xff] }
 0x35c   :  { %14080 = vmatprep.mubr.msk.f32.mxu1 %vm23_vm0, %v7201_v45  ;;  %v8121_v1 = vld [vmem:[%s18905_s1 + $0x190] sm:$0xff] }
 0x35d   :  { %6657 = vst.msk [vmem:[#allocation3] sm:$0xff] %vm226_vm2, %v6593_v13  ;;  %v7022_v56 = vpop.permute.xlu1 %7021  ;;  %14081 = vmatmul.mubr.msk.f32.gmra.mxu1 %vm23_vm0, %v7202_v10  ;;  %v8110_v10 = vld [vmem:[%s18905_s1 + $0x138] sm:$0xff]  ;;  %v5955_v45 = vld [vmem:[#allocation3 + $0x40] sm:$0xff] }
 0x35e   :  { %v7203_v55 = vmul.f32 %v7022_v56, %v6755_v34  ;;  %v17147_v58 = vpop.permute.xlu0 %7066 }
 0x35f   :  { %8292 = vperm.xlu1 %14448, %v8102_v53   ;;  %8347 = vperm.xlu0 %14449, %v8113_v50   ;;  %v13939_v38 = vpop.f32.mrf.mxu0  ;;  %v7212_v31 = vmul.f32 %v17147_v58, %v6764_v33  ;;  %v5958_v53 = vld [vmem:[#allocation3 + $0x58] sm:$0xff] }
 0x360   :  { %v6596_v17 = vadd.f32 %v13939_v38, %v5950_v61  ;;  %14083 = vmatprep.mubr.msk.f32.mxu1 %vm23_vm0, %v7203_v55  ;;  %v8123_v55 = vld [vmem:[%s18905_s1 + $0x1a0] sm:$0xff] }
 0x361   :  { %v7032_v60 = vpop.permute.xlu1 %7031  ;;  %v6284_v16 = vpop.f32.mrf.mxu0  ;;  %14084 = vmatmul.mubr.msk.f32.gmra.mxu1 %vm23_vm0, %v7204_v12  ;;  %v6765_v12 = vld [vmem:[#allocation2 + $0x179] sm:$0xff] }
 0x362   :  { %6660 = vst.msk [vmem:[#allocation3 + $0x18] sm:$0xff] %vm226_vm2, %v6596_v17  ;;  %v7205_v3 = vmul.f32 %v7032_v60, %v6757_v4  ;;  %v6595_v7 = vadd.f32 %v6284_v16, %v5949_v59  ;;  %v17159_v2 = vpop.permute.xlu0 %7076  ;;  %v5957_v38 = vld [vmem:[#allocation3 + $0x50] sm:$0xff]  ;;  %v6768_v17 = vld [vmem:[#allocation2 + $0x191] sm:$0xff]  ;;  %v6767_v16 = vld [vmem:[#allocation2 + $0x189] sm:$0xff] }
 0x363   :  { %8302 = vperm.xlu1 %14448, %v8104_v20   ;;  %8357 = vperm.xlu0 %14449, %v8115_v15   ;;  %v13942_v26 = vpop.f32.mrf.mxu0  ;;  %v7214_v58 = vmul.f32 %v17159_v2, %v6766_v35  ;;  %v5960_v60 = vld [vmem:[#allocation3 + $0x68] sm:$0xff] }
 0x364   :  { %6659 = vst.msk [vmem:[#allocation3 + $0x10] sm:$0xff] %vm226_vm2, %v6595_v7  ;;  %v6598_v19 = vadd.f32 %v13942_v26, %v5952_v63  ;;  %14086 = vmatprep.mubr.msk.f32.mxu1 %vm23_vm0, %v7205_v3  ;;  %v8114_v3 = vld [vmem:[%s18905_s1 + $0x158] sm:$0xff]  ;;  %v8125_v7 = vld [vmem:[%s18905_s1 + $0x1b0] sm:$0xff] }
 0x365   :  { %v7042_v57 = vpop.permute.xlu1 %7041  ;;  %v6294_v62 = vpop.f32.mrf.mxu0  ;;  %14087 = vmatmul.mubr.msk.f32.gmra.mxu1 %vm23_vm0, %v7206_v43  ;;  %v5959_v26 = vld [vmem:[#allocation3 + $0x60] sm:$0xff] }
 0x366   :  { %6662 = vst.msk [vmem:[#allocation3 + $0x28] sm:$0xff] %vm226_vm2, %v6598_v19  ;;  %v7207_v30 = vmul.f32 %v7042_v57, %v6759_v18  ;;  %v6597_v23 = vadd.f32 %v6294_v62, %v5951_v40  ;;  %v17172_v22 = vpop.permute.xlu0 %7086  ;;  %v6770_v19 = vld [vmem:[#allocation2 + $0x1a1] sm:$0xff]  ;;  %v6769_v62 = vld [vmem:[#allocation2 + $0x199] sm:$0xff] }
 0x367   :  { %8312 = vperm.xlu1 %14448, %v8106_v25   ;;  %8367 = vperm.xlu0 %14449, %v8117_v6   ;;  %v13945_v21 = vpop.f32.mrf.mxu0  ;;  %v7216_v2 = vmul.f32 %v17172_v22, %v6768_v17  ;;  %v5962_v57 = vld [vmem:[#allocation3 + $0x78] sm:$0xff] }
 0x368   :  { %6661 = vst.msk [vmem:[#allocation3 + $0x20] sm:$0xff] %vm226_vm2, %v6597_v23  ;;  %v6600_v42 = vadd.f32 %v13945_v21, %v5954_v9  ;;  %14089 = vmatprep.mubr.msk.f32.mxu1 %vm23_vm0, %v7207_v30  ;;  %v8116_v30 = vld [vmem:[%s18905_s1 + $0x168] sm:$0xff]  ;;  %v8127_v23 = vld [vmem:[%s18905_s1 + $0x1c0] sm:$0xff] }
 0x369   :  { %v7052_v41 = vpop.permute.xlu1 %7051  ;;  %v6304_v5 = vpop.f32.mrf.mxu0  ;;  %14090 = vmatmul.mubr.msk.f32.gmra.mxu1 %vm23_vm0, %v7208_v54  ;;  %v5961_v21 = vld [vmem:[#allocation3 + $0x70] sm:$0xff] }
 0x36a   :  { %6664 = vst.msk [vmem:[#allocation3 + $0x38] sm:$0xff] %vm226_vm2, %v6600_v42  ;;  %v7209_v32 = vmul.f32 %v7052_v41, %v6761_v8  ;;  %v6599_v11 = vadd.f32 %v6304_v5, %v5953_v14  ;;  %v17185_v48 = vpop.permute.xlu0 %7096  ;;  %v6772_v42 = vld [vmem:[#allocation2 + $0x1b1] sm:$0xff]  ;;  %v6771_v5 = vld [vmem:[#allocation2 + $0x1a9] sm:$0xff] }
 0x36b   :  { %8322 = vperm.xlu1 %14448, %v8108_v29   ;;  %8377 = vperm.xlu0 %14449, %v8119_v28   ;;  %v13948_v47 = vpop.f32.mrf.mxu0  ;;  %v7218_v22 = vmul.f32 %v17185_v48, %v6770_v19  ;;  %v5964_v41 = vld [vmem:[#allocation3 + $0x88] sm:$0xff] }
 0x36c   :  { %6663 = vst.msk [vmem:[#allocation3 + $0x30] sm:$0xff] %vm226_vm2, %v6599_v11  ;;  %v6602_v36 = vadd.f32 %v13948_v47, %v5956_v27  ;;  %14092 = vmatprep.mubr.msk.f32.mxu1 %vm23_vm0, %v7209_v32  ;;  %v8118_v32 = vld [vmem:[%s18905_s1 + $0x178] sm:$0xff]  ;;  %v8129_v11 = vld [vmem:[%s18905_s1 + $0x1d0] sm:$0xff] }
 0x36d   :  { %v7062_v52 = vpop.permute.xlu1 %7061  ;;  %v6314_v44 = vpop.f32.mrf.mxu0  ;;  %14093 = vmatmul.mubr.msk.f32.gmra.mxu1 %vm23_vm0, %v7210_v24  ;;  %v5963_v47 = vld [vmem:[#allocation3 + $0x80] sm:$0xff] }
 0x36e   :  { %6666 = vst.msk [vmem:[#allocation3 + $0x48] sm:$0xff] %vm226_vm2, %v6602_v36  ;;  %v7211_v51 = vmul.f32 %v7062_v52, %v6763_v37  ;;  %v6601_v13 = vadd.f32 %v6314_v44, %v5955_v45  ;;  %v17198_v34 = vpop.permute.xlu0 %7106  ;;  %v6774_v36 = vld [vmem:[#allocation2 + $0x1c1] sm:$0xff]  ;;  %v6773_v44 = vld [vmem:[#allocation2 + $0x1b9] sm:$0xff] }
 0x36f   :  { %8332 = vperm.xlu1 %14448, %v8110_v10   ;;  %8387 = vperm.xlu0 %14449, %v8121_v1   ;;  %v13951_v50 = vpop.f32.mrf.mxu0  ;;  %v7220_v48 = vmul.f32 %v17198_v34, %v6772_v42  ;;  %v5966_v52 = vld [vmem:[#allocation3 + $0x98] sm:$0xff] }
 0x370   :  { %6665 = vst.msk [vmem:[#allocation3 + $0x40] sm:$0xff] %vm226_vm2, %v6601_v13  ;;  %v6604_v56 = vadd.f32 %v13951_v50, %v5958_v53  ;;  %14095 = vmatprep.mubr.msk.f32.mxu1 %vm23_vm0, %v7211_v51  ;;  %v8120_v51 = vld [vmem:[%s18905_s1 + $0x188] sm:$0xff]  ;;  %v17260_v13 = vld [vmem:[%s18905_s1 + $0x1e0] sm:$0xff] }
 0x371   :  { %v7072_v61 = vpop.permute.xlu1 %7071  ;;  %v6324_v4 = vpop.f32.mrf.mxu0  ;;  %14096 = vmatmul.mubr.msk.f32.gmra.mxu1 %vm23_vm0, %v7212_v31  ;;  %v5965_v50 = vld [vmem:[#allocation3 + $0x90] sm:$0xff]  ;;  %v6779_v42 = vld [vmem:[#allocation2 + $0x1e9] sm:$0xff] }
 0x372   :  { %6668 = vst.msk [vmem:[#allocation3 + $0x58] sm:$0xff] %vm226_vm2, %v6604_v56  ;;  %v7213_v20 = vmul.f32 %v7072_v61, %v6765_v12  ;;  %v6603_v15 = vadd.f32 %v6324_v4, %v5957_v38  ;;  %v17211_v43 = vpop.permute.xlu0 %7116  ;;  %v6776_v56 = vld [vmem:[#allocation2 + $0x1d1] sm:$0xff]  ;;  %v6775_v4 = vld [vmem:[#allocation2 + $0x1c9] sm:$0xff] }
 0x373   :  { %8342 = vperm.xlu1 %14448, %v8112_v0   ;;  %8397 = vperm.xlu0 %14449, %v8123_v55   ;;  %v13954_v59 = vpop.f32.mrf.mxu0  ;;  %v7222_v34 = vmul.f32 %v17211_v43, %v6774_v36  ;;  %v5968_v61 = vld [vmem:[#allocation3 + $0xa8] sm:$0xff] }
 0x374   :  { %6667 = vst.msk [vmem:[#allocation3 + $0x50] sm:$0xff] %vm226_vm2, %v6603_v15  ;;  %v6606_v46 = vadd.f32 %v13954_v59, %v5960_v60  ;;  %14098 = vmatprep.mubr.msk.f32.mxu1 %vm23_vm0, %v7213_v20  ;;  %v8122_v20 = vld [vmem:[%s18905_s1 + $0x198] sm:$0xff]  ;;  %v8133_v15 = vld [vmem:[%s18905_s1 + $0x1f0] sm:$0xff] }
 0x375   :  { %v7082_v63 = vpop.permute.xlu1 %7081  ;;  %v6334_v18 = vpop.f32.mrf.mxu0  ;;  %14099 = vmatmul.mubr.msk.f32.gmra.mxu1 %vm23_vm0, %v7214_v58  ;;  %v5967_v59 = vld [vmem:[#allocation3 + $0xa0] sm:$0xff]  ;;  %v6781_v36 = vld [vmem:[#allocation2 + $0x1f9] sm:$0xff] }
 0x376   :  { %6670 = vst.msk [vmem:[#allocation3 + $0x68] sm:$0xff] %vm226_vm2, %v6606_v46  ;;  %v7215_v25 = vmul.f32 %v7082_v63, %v6767_v16  ;;  %v6605_v6 = vadd.f32 %v6334_v18, %v5959_v26  ;;  %v17224_v54 = vpop.permute.xlu0 %7126  ;;  %v6778_v46 = vld [vmem:[#allocation2 + $0x1e1] sm:$0xff]  ;;  %v6777_v18 = vld [vmem:[#allocation2 + $0x1d9] sm:$0xff] }
 0x377   :  { %8352 = vperm.xlu1 %14448, %v8114_v3   ;;  %8407 = vperm.xlu0 %14449, %v8125_v7   ;;  %v13957_v40 = vpop.f32.mrf.mxu0  ;;  %v7224_v43 = vmul.f32 %v17224_v54, %v6776_v56  ;;  %v5970_v63 = vld [vmem:[#allocation3 + $0xb8] sm:$0xff]  ;;  %v5976_v56 = vld [vmem:[#allocation3 + $0xe8] sm:$0xff] }
 0x378   :  { %6669 = vst.msk [vmem:[#allocation3 + $0x60] sm:$0xff] %vm226_vm2, %v6605_v6  ;;  %v6608_v39 = vadd.f32 %v13957_v40, %v5962_v57  ;;  %14101 = vmatprep.mubr.msk.f32.mxu1 %vm23_vm0, %v7215_v25  ;;  %v8124_v25 = vld [vmem:[%s18905_s1 + $0x1a8] sm:$0xff]  ;;  %v5969_v57 = vld [vmem:[#allocation3 + $0xb0] sm:$0xff] }
 0x379   :  { %v7092_v9 = vpop.permute.xlu1 %7091  ;;  %v6344_v8 = vpop.f32.mrf.mxu0  ;;  %14102 = vmatmul.mubr.msk.f32.gmra.mxu1 %vm23_vm0, %v7216_v2 }
 0x37a   :  { %6672 = vst.msk [vmem:[#allocation3 + $0x78] sm:$0xff] %vm226_vm2, %v6608_v39  ;;  %v7217_v29 = vmul.f32 %v7092_v9, %v6769_v62  ;;  %v6607_v28 = vadd.f32 %v6344_v8, %v5961_v21  ;;  %v17237_v24 = vpop.permute.xlu0 %7136  ;;  %v17291_v62 = vld [vmem:[%s18905_s1 + $0x8] sm:$0xff]  ;;  %v6780_v39 = vld [vmem:[#allocation2 + $0x1f1] sm:$0xff]  ;;  %v14549_v9 = vmov 8  }
 0x37b   :  { %8362 = vperm.xlu1 %14448, %v8116_v30   ;;  %8417 = vperm.xlu0 %14449, %v8127_v23   ;;  %v13960_v14 = vpop.f32.mrf.mxu0  ;;  %v7226_v6 = vmul.f32 %v17237_v24, %v6778_v46  ;;  %v5972_v21 = vld [vmem:[#allocation3 + $0xc8] sm:$0xff]  ;;  %v5978_v46 = vld [vmem:[#allocation3 + $0xf8] sm:$0xff] }
 0x37c   :  { %6671 = vst.msk [vmem:[#allocation3 + $0x70] sm:$0xff] %vm226_vm2, %v6607_v28  ;;  %v6610_v33 = vadd.f32 %v13960_v14, %v5964_v41  ;;  %14104 = vmatprep.mubr.msk.f32.mxu1 %vm23_vm0, %v7217_v29  ;;  %v8126_v28 = vld [vmem:[%s18905_s1 + $0x1b8] sm:$0xff]  ;;  %v5971_v14 = vld [vmem:[#allocation3 + $0xc0] sm:$0xff] }
 0x37d   :  { %v7102_v27 = vpop.permute.xlu1 %7101  ;;  %v6354_v37 = vpop.f32.mrf.mxu0  ;;  %14105 = vmatmul.mubr.msk.f32.gmra.mxu1 %vm23_vm0, %v7218_v22 }
 0x37e   :  { %6674 = vst.msk [vmem:[#allocation3 + $0x88] sm:$0xff] %vm226_vm2, %v6610_v33  ;;  %v7219_v10 = vmul.f32 %v7102_v27, %v6771_v5  ;;  %v6609_v1 = vadd.f32 %v6354_v37, %v5963_v47  ;;  %v17250_v31 = vpop.permute.xlu0 %7146  ;;  %v6782_v33 = vld [vmem:[#allocation2 + $0x201] sm:$0xff] }
 0x37f   :  { %8372 = vperm.xlu1 %14448, %v8118_v32   ;;  %8427 = vperm.xlu0 %14449, %v8129_v11   ;;  %v13963_v45 = vpop.f32.mrf.mxu0  ;;  %v7228_v24 = vmul.f32 %v17250_v31, %v6780_v39  ;;  %v5974_v47 = vld [vmem:[#allocation3 + $0xd8] sm:$0xff]  ;;  %v5980_v39 = vld [vmem:[#allocation3 + $0x108] sm:$0xff] }
 0x380   :  { %6673 = vst.msk [vmem:[#allocation3 + $0x80] sm:$0xff] %vm226_vm2, %v6609_v1  ;;  %v6612_v35 = vadd.f32 %v13963_v45, %v5966_v52  ;;  %14107 = vmatprep.mubr.msk.f32.mxu1 %vm23_vm0, %v7219_v10  ;;  %v14550_v1 = vmov 7   ;;  %v8128_v31 = vld [vmem:[%s18905_s1 + $0x1c8] sm:$0xff] }
 0x381   :  { %v7112_v53 = vpop.permute.xlu1 %7111  ;;  %v6364_v12 = vpop.f32.mrf.mxu0  ;;  %14108 = vmatmul.mubr.msk.f32.gmra.mxu1 %vm23_vm0, %v7220_v48  ;;  %v17309_v48 = vld [vmem:[%s18905_s1] sm:$0xff] }
 0x382   :  { %6676 = vst.msk [vmem:[#allocation3 + $0x98] sm:$0xff] %vm226_vm2, %v6612_v35  ;;  %v7221_v0 = vmul.f32 %v7112_v53, %v6773_v44  ;;  %v6611_v55 = vadd.f32 %v6364_v12, %v5965_v50  ;;  %v17265_v58 = vpop.permute.xlu0 %7156  ;;  %v5973_v44 = vld [vmem:[#allocation3 + $0xd0] sm:$0xff]  ;;  %v17326_v50 = vld [vmem:[%s18905_s1 + $0x18] sm:$0xff] }
 0x383   :  { %8382 = vperm.xlu1 %14448, %v8120_v51   ;;  %8437 = vperm.xlu0 %14449, %v17260_v13   ;;  %v13966_v38 = vpop.f32.mrf.mxu0  ;;  %v7230_v52 = vmul.f32 %v17265_v58, %v6782_v33  ;;  %v6784_v51 = vld [vmem:[#allocation2 + $0x211] sm:$0xff]  ;;  %v5982_v33 = vld [vmem:[#allocation3 + $0x118] sm:$0xff] }
 0x384   :  { %6675 = vst.msk [vmem:[#allocation3 + $0x90] sm:$0xff] %vm226_vm2, %v6611_v55  ;;  %v6614_v17 = vadd.f32 %v13966_v38, %v5968_v61  ;;  %14110 = vmatprep.mubr.msk.f32.mxu1 %vm23_vm0, %v7221_v0  ;;  %v6783_v55 = vld [vmem:[#allocation2 + $0x209] sm:$0xff]  ;;  %v8130_v61 = vld [vmem:[%s18905_s1 + $0x1d8] sm:$0xff] }
 0x385   :  { %v7122_v60 = vpop.permute.xlu1 %7121  ;;  %v6374_v16 = vpop.f32.mrf.mxu0  ;;  %14111 = vmatmul.mubr.msk.f32.gmra.mxu1 %vm23_vm0, %v7222_v34 }
 0x386   :  { %6678 = vst.msk [vmem:[#allocation3 + $0xa8] sm:$0xff] %vm226_vm2, %v6614_v17  ;;  %v7223_v3 = vmul.f32 %v7122_v60, %v6775_v4  ;;  %v6613_v7 = vadd.f32 %v6374_v16, %v5967_v59  ;;  %v17279_v2 = vpop.permute.xlu0 %7166  ;;  %v5975_v17 = vld [vmem:[#allocation3 + $0xe0] sm:$0xff]  ;;  %v17342_v60 = vld [vmem:[%s18905_s1 + $0x28] sm:$0xff] }
 0x387   :  { %8392 = vperm.xlu1 %14448, %v8122_v20   ;;  %8447 = vperm.xlu0 %14449, %v8133_v15   ;;  %v13969_v26 = vpop.f32.mrf.mxu0  ;;  %v7232_v38 = vmul.f32 %v17279_v2, %v6784_v51  ;;  %v8008_v16 = vld [vmem:[#allocation2 + $0x2f] sm:$0xff]  ;;  %v8007_v2 = vld [vmem:[#allocation2 + $0x27] sm:$0xff]  ;;  %v8013_v51 = vld [vmem:[#allocation2 + $0x57] sm:$0xff] }
 0x388   :  { %6677 = vst.msk [vmem:[#allocation3 + $0xa0] sm:$0xff] %vm226_vm2, %v6613_v7  ;;  %v6616_v19 = vadd.f32 %v13969_v26, %v5970_v63  ;;  %14113 = vmatprep.mubr.msk.f32.mxu1 %vm23_vm0, %v7223_v3  ;;  %v8132_v63 = vld [vmem:[%s18905_s1 + $0x1e8] sm:$0xff]  ;;  %v5977_v26 = vld [vmem:[#allocation3 + $0xf0] sm:$0xff] }
 0x389   :  { %v7132_v54 = vpop.permute.xlu1 %7131  ;;  %v6384_v40 = vpop.f32.mrf.mxu0  ;;  %14114 = vmatmul.mubr.msk.f32.gmra.mxu1 %vm23_vm0, %v7224_v43 }
 0x38a   :  { %6680 = vst.msk [vmem:[#allocation3 + $0xb8] sm:$0xff] %vm226_vm2, %v6616_v19  ;;  %v7225_v30 = vmul.f32 %v7132_v54, %v6777_v18  ;;  %v6615_v23 = vadd.f32 %v6384_v40, %v5969_v57  ;;  %v17294_v22 = vpop.permute.xlu0 %8142  ;;  %v17358_v54 = vld [vmem:[%s18905_s1 + $0x38] sm:$0xff] }
 0x38b   :  { %8402 = vperm.xlu1 %14448, %v8124_v25   ;;  %14452 = vset.pattern.permute.xlu0 %v14549_v9  ;;  %v13972_v8 = vpop.f32.mrf.mxu0  ;;  %v8456_v19 = vmul.f32 %v17294_v22, %v8008_v16  ;;  %v8134_v22 = vld [vmem:[%s18905_s1 + $0x1f8] sm:$0xff]  ;;  %v5986_v16 = vld [vmem:[#allocation3 + $0x138] sm:$0xff] }
 0x38c   :  { %6679 = vst.msk [vmem:[#allocation3 + $0xb0] sm:$0xff] %vm226_vm2, %v6615_v23  ;;  %v6618_v29 = vadd.f32 %v13972_v8, %v5972_v21  ;;  %10714 = vperm.xlu0 %14452, %v17291_v62   ;;  %14116 = vmatprep.mubr.msk.f32.mxu1 %vm23_vm0, %v7225_v30  ;;  %v8009_v21 = vld [vmem:[#allocation2 + $0x37] sm:$0xff] }
 0x38d   :  { %v7142_v41 = vpop.permute.xlu1 %7141  ;;  %v6394_v5 = vpop.f32.mrf.mxu0  ;;  %14117 = vmatmul.mubr.msk.f32.gmra.mxu1 %vm23_vm0, %v7226_v6  ;;  %v5979_v8 = vld [vmem:[#allocation3 + $0x100] sm:$0xff] }
 0x38e   :  { %6682 = vst.msk [vmem:[#allocation3 + $0xc8] sm:$0xff] %vm226_vm2, %v6618_v29  ;;  %v7227_v32 = vmul.f32 %v7142_v41, %v6779_v42  ;;  %v6617_v11 = vadd.f32 %v6394_v5, %v5971_v14  ;;  %v17311_v27 = vpop.permute.xlu0 %8157  ;;  %v8011_v14 = vld [vmem:[#allocation2 + $0x47] sm:$0xff] }
 0x38f   :  { %8412 = vperm.xlu1 %14448, %v8126_v28   ;;  %v13975_v37 = vpop.f32.mrf.mxu0 }
 0x390   :  { %6681 = vst.msk [vmem:[#allocation3 + $0xc0] sm:$0xff] %vm226_vm2, %v6617_v11  ;;  %v6620_v10 = vadd.f32 %v13975_v37, %v5974_v47  ;;  %14453 = vset.pattern.permute.xlu0 %v14550_v1  ;;  %14119 = vmatprep.mubr.msk.f32.mxu1 %vm23_vm0, %v7227_v32  ;;  %v8010_v47 = vld [vmem:[#allocation2 + $0x3f] sm:$0xff] }
 0x391   :  { %v7152_v45 = vpop.permute.xlu1 %7151  ;;  %9423 = vperm.xlu0 %14453, %v17309_v48   ;;  %v6404_v35 = vpop.f32.mrf.mxu0  ;;  %14120 = vmatmul.mubr.msk.f32.gmra.mxu1 %vm23_vm0, %v7228_v24  ;;  %v17373_v24 = vld [vmem:[%s18905_s1 + $0x48] sm:$0xff]  ;;  %v12823_v37 = vld [vmem:[%s18906_s2 + $0x1c] sm:$0xf] }
 0x392   :  { %6684 = vst.msk [vmem:[#allocation3 + $0xd8] sm:$0xff] %vm226_vm2, %v6620_v10  ;;  %v7229_v34 = vmul.f32 %v7152_v45, %v6781_v36  ;;  %v6619_v53 = vadd.f32 %v6404_v35, %v5973_v44  ;;  %v17328_v12 = vpop.permute.xlu0 %8167  ;;  %v5981_v36 = vld [vmem:[#allocation3 + $0x110] sm:$0xff]  ;;  %v17388_v44 = vld [vmem:[%s18905_s1 + $0x58] sm:$0xff]  ;;  %14226 = vmatprep.subr.msk.mxu1 %vm1060_vm1, %v12823_v37 }
 0x393   :  { %8422 = vperm.xlu1 %14448, %v8128_v31   ;;  %v13978_v0 = vpop.f32.mrf.mxu0  ;;  %v8459_v31 = vmul.f32 %v17311_v27, %v8011_v14  ;;  %14227 = vmatpush3.msk.msra.mxu1 %vm1060_vm1, %v12823_v37 }
 0x394   :  { %6683 = vst.msk [vmem:[#allocation3 + $0xd0] sm:$0xff] %vm226_vm2, %v6619_v53  ;;  %v6622_v58 = vadd.f32 %v13978_v0, %v5976_v56  ;;  %14122 = vmatprep.mubr.msk.f32.mxu1 %vm23_vm0, %v7229_v34  ;;  %v5984_v53 = vld [vmem:[#allocation3 + $0x128] sm:$0xff]  ;;  %v8012_v0 = vld [vmem:[#allocation2 + $0x4f] sm:$0xff] }
 0x395   :  { %v7162_v4 = vpop.permute.xlu1 %7161  ;;  %9438 = vperm.xlu0 %14453, %v17326_v50   ;;  %v6414_v20 = vpop.f32.mrf.mxu0  ;;  %14123 = vmatmul.mubr.msk.f32.gmra.mxu1 %vm23_vm0, %v7230_v52 }
 0x396   :  { %6686 = vst.msk [vmem:[#allocation3 + $0xe8] sm:$0xff] %vm226_vm2, %v6622_v58  ;;  %v7231_v15 = vmul.f32 %v7162_v4, %v6783_v55  ;;  %v6621_v43 = vadd.f32 %v6414_v20, %v5975_v17  ;;  %v17344_v59 = vpop.permute.xlu0 %8177  ;;  %v5983_v55 = vld [vmem:[#allocation3 + $0x120] sm:$0xff] }
 0x397   :  { %8432 = vperm.xlu1 %14448, %v8130_v61   ;;  %v13981_v3 = vpop.f32.mrf.mxu0  ;;  %v17402_v61 = vld [vmem:[%s18905_s1 + $0x10] sm:$0xff] }
 0x398   :  { %6685 = vst.msk [vmem:[#allocation3 + $0xe0] sm:$0xff] %vm226_vm2, %v6621_v43  ;;  %v6624_v7 = vadd.f32 %v13981_v3, %v5978_v46  ;;  %14125 = vmatprep.mubr.msk.f32.mxu1 %vm23_vm0, %v7231_v15  ;;  %v8015_v15 = vld [vmem:[#allocation2 + $0x67] sm:$0xff]  ;;  %v8014_v3 = vld [vmem:[#allocation2 + $0x5f] sm:$0xff] }
 0x399   :  { %9448 = vperm.xlu0 %14453, %v17342_v60   ;;  %v6424_v18 = vpop.f32.mrf.mxu0  ;;  %14126 = vmatmul.mubr.msk.f32.gmra.mxu1 %vm23_vm0, %v7232_v38  ;;  %v8461_v38 = vmul.f32 %v17328_v12, %v8013_v51 }
 0x39a   :  { %6688 = vst.msk [vmem:[#allocation3 + $0xf8] sm:$0xff] %vm226_vm2, %v6624_v7  ;;  %v6623_v25 = vadd.f32 %v6424_v18, %v5977_v26  ;;  %v8138_v6 = vpop.permute.xlu1 %8137  ;;  %v17360_v57 = vpop.permute.xlu0 %8187  ;;  %v5985_v7 = vld [vmem:[#allocation3 + $0x130] sm:$0xff]  ;;  %v8463_v26 = vmul.f32 %v17344_v59, %v8015_v15  ;;  %v17478_v15 = vld [vmem:[%s18905_s1 + $0x50] sm:$0xff] }
 0x39b   :  { %v8455_v40 = vmul.f32 %v8138_v6, %v8007_v2  ;;  %8442 = vperm.xlu1 %14448, %v8132_v63   ;;  %v13984_v30 = vpop.f32.mrf.mxu0  ;;  %v17421_v63 = vld [vmem:[%s18905_s1 + $0x20] sm:$0xff] }
 0x39c   :  { %6687 = vst.msk [vmem:[#allocation3 + $0xf0] sm:$0xff] %vm226_vm2, %v6623_v25  ;;  %v6626_v23 = vadd.f32 %v13984_v30, %v5980_v39  ;;  %v17429_v25 = vld [vmem:[%s18905_s1 + $0x78] sm:$0xff] }
 0x39d   :  { %9458 = vperm.xlu0 %14453, %v17358_v54   ;;  %v6434_v42 = vpop.f32.mrf.mxu0  ;;  %14130 = vmatprep.mubr.msk.f32.mxu0 %vm23_vm0, %v8455_v40  ;;  %v8017_v40 = vld [vmem:[#allocation2 + $0x77] sm:$0xff] }
 0x39e   :  { %6690 = vst.msk [vmem:[#allocation3 + $0x108] sm:$0xff] %vm226_vm2, %v6626_v23  ;;  %v6625_v29 = vadd.f32 %v6434_v42, %v5979_v8  ;;  %v8148_v28 = vpop.permute.xlu1 %8147  ;;  %14131 = vmatmul.mubr.msk.f32.vlgmr.msra.gmra.mxu0 %vm23_vm0, %v8456_v19  ;;  %v17375_v41 = vpop.permute.xlu0 %8197  ;;  %v5988_v30 = vld [vmem:[#allocation3 + $0x148] sm:$0xff]  ;;  %v17440_v42 = vld [vmem:[%s18905_s1 + $0x30] sm:$0xff] }
 0x39f   :  { %v8457_v5 = vmul.f32 %v8148_v28, %v8009_v21  ;;  %8452 = vperm.xlu1 %14448, %v8134_v22   ;;  %v13987_v32 = vpop.f32.mrf.mxu0  ;;  %v8016_v21 = vld [vmem:[#allocation2 + $0x6f] sm:$0xff] }
 0x3a0   :  { %6689 = vst.msk [vmem:[#allocation3 + $0x100] sm:$0xff] %vm226_vm2, %v6625_v29  ;;  %v6628_v11 = vadd.f32 %v13987_v32, %v5982_v33  ;;  %v5987_v22 = vld [vmem:[#allocation3 + $0x140] sm:$0xff]  ;;  %v8465_v29 = vmul.f32 %v17360_v57, %v8017_v40  ;;  %v8019_v32 = vld [vmem:[#allocation2 + $0x87] sm:$0xff] }
 0x3a1   :  { %9468 = vperm.xlu0 %14453, %v17373_v24   ;;  %v6444_v10 = vpop.f32.mrf.mxu0  ;;  %14133 = vmatprep.mubr.msk.f32.mxu0 %vm23_vm0, %v8457_v5  ;;  %v17448_v5 = vld [vmem:[%s18905_s1 + $0x88] sm:$0xff]  ;;  %v5993_v40 = vld [vmem:[#allocation3 + $0x170] sm:$0xff] }
 0x3a2   :  { %6692 = vst.msk [vmem:[#allocation3 + $0x118] sm:$0xff] %vm226_vm2, %v6628_v11  ;;  %v6627_v52 = vadd.f32 %v6444_v10, %v5981_v36  ;;  %v8153_v45 = vpop.permute.xlu1 %8152  ;;  %v17390_v35 = vpop.permute.xlu0 %8207  ;;  %v8018_v36 = vld [vmem:[#allocation2 + $0x7f] sm:$0xff] }
 0x3a3   :  { %v8458_v34 = vmul.f32 %v8153_v45, %v8010_v47  ;;  %14450 = vset.pattern.permute.xlu1 %v14550_v1  ;;  %v13990_v56 = vpop.f32.mrf.mxu0  ;;  %v5990_v47 = vld [vmem:[#allocation3 + $0x158] sm:$0xff]  ;;  %v5989_v10 = vld [vmem:[#allocation3 + $0x150] sm:$0xff]  ;;  %v8467_v45 = vmul.f32 %v17375_v41, %v8019_v32 }
 0x3a4   :  { %6691 = vst.msk [vmem:[#allocation3 + $0x110] sm:$0xff] %vm226_vm2, %v6627_v52  ;;  %v6630_v27 = vadd.f32 %v13990_v56, %v5984_v53  ;;  %9428 = vperm.xlu1 %14450, %v17291_v62   ;;  %v17410_v62 = vld [vmem:[%s18905_s1 + $0x68] sm:$0xff]  ;;  %v17459_v52 = vld [vmem:[%s18905_s1 + $0x40] sm:$0xff]  ;;  %v17467_v53 = vld [vmem:[%s18905_s1 + $0x98] sm:$0xff] }
 0x3a5   :  { %9478 = vperm.xlu0 %14453, %v17388_v44   ;;  %v6454_v58 = vpop.f32.mrf.mxu0  ;;  %14134 = vmatmul.mubr.msk.f32.gmra.mxu0 %vm23_vm0, %v8458_v34 }
 0x3a6   :  { %6694 = vst.msk [vmem:[#allocation3 + $0x128] sm:$0xff] %vm226_vm2, %v6630_v27  ;;  %v6629_v4 = vadd.f32 %v6454_v58, %v5983_v55  ;;  %v8163_v17 = vpop.permute.xlu1 %8162  ;;  %14136 = vmatprep.mubr.msk.f32.mxu0 %vm23_vm0, %v8459_v31  ;;  %v17412_v20 = vpop.permute.xlu0 %8217  ;;  %v8021_v27 = vld [vmem:[#allocation2 + $0x97] sm:$0xff] }
 0x3a7   :  { %v8460_v43 = vmul.f32 %v8163_v17, %v8012_v0  ;;  %v13993_v46 = vpop.f32.mrf.mxu0  ;;  %v5992_v55 = vld [vmem:[#allocation3 + $0x168] sm:$0xff] }
 0x3a8   :  { %6693 = vst.msk [vmem:[#allocation3 + $0x120] sm:$0xff] %vm226_vm2, %v6629_v4  ;;  %v6632_v12 = vadd.f32 %v13993_v46, %v5986_v16  ;;  %9433 = vperm.xlu1 %14450, %v17402_v61   ;;  %v5991_v4 = vld [vmem:[#allocation3 + $0x160] sm:$0xff] }
 0x3a9   :  { %9488 = vperm.xlu0 %14453, %v17410_v62   ;;  %v6464_v2 = vpop.f32.mrf.mxu0  ;;  %14137 = vmatmul.mubr.msk.f32.gmra.mxu0 %vm23_vm0, %v8460_v43  ;;  %v8469_v43 = vmul.f32 %v17390_v35, %v8021_v27 }
 0x3aa   :  { %6696 = vst.msk [vmem:[#allocation3 + $0x138] sm:$0xff] %vm226_vm2, %v6632_v12  ;;  %v6631_v18 = vadd.f32 %v6464_v2, %v5985_v7  ;;  %v8173_v19 = vpop.permute.xlu1 %8172  ;;  %14139 = vmatprep.mubr.msk.f32.mxu0 %vm23_vm0, %v8461_v38  ;;  %v17431_v6 = vpop.permute.xlu0 %8227  ;;  %v8020_v38 = vld [vmem:[#allocation2 + $0x8f] sm:$0xff]  ;;  %v8023_v7 = vld [vmem:[#allocation2 + $0xa7] sm:$0xff] }
 0x3ab   :  { %v8462_v39 = vmul.f32 %v8173_v19, %v8014_v3  ;;  %v13996_v23 = vpop.f32.mrf.mxu0  ;;  %v17486_v12 = vld [vmem:[%s18905_s1 + $0xa8] sm:$0xff]  ;;  %v8022_v19 = vld [vmem:[#allocation2 + $0x9f] sm:$0xff] }
 0x3ac   :  { %6695 = vst.msk [vmem:[#allocation3 + $0x130] sm:$0xff] %vm226_vm2, %v6631_v18  ;;  %v6634_v59 = vadd.f32 %v13996_v23, %v5988_v30  ;;  %9443 = vperm.xlu1 %14450, %v17421_v63   ;;  %v17497_v30 = vld [vmem:[%s18905_s1 + $0x60] sm:$0xff]  ;;  %v8471_v23 = vmul.f32 %v17412_v20, %v8023_v7 }
 0x3ad   :  { %9498 = vperm.xlu0 %14453, %v17429_v25   ;;  %v6474_v8 = vpop.f32.mrf.mxu0  ;;  %14140 = vmatmul.mubr.msk.f32.gmra.mxu0 %vm23_vm0, %v8462_v39 }
 0x3ae   :  { %6698 = vst.msk [vmem:[#allocation3 + $0x148] sm:$0xff] %vm226_vm2, %v6634_v59  ;;  %v6633_v28 = vadd.f32 %v6474_v8, %v5987_v22  ;;  %v8183_v14 = vpop.permute.xlu1 %8182  ;;  %14142 = vmatprep.mubr.msk.f32.mxu0 %vm23_vm0, %v8463_v26  ;;  %v17450_v33 = vpop.permute.xlu0 %8237  ;;  %v5994_v26 = vld [vmem:[#allocation3 + $0x178] sm:$0xff]  ;;  %v17505_v22 = vld [vmem:[%s18905_s1 + $0xb8] sm:$0xff] }
 0x3af   :  { %v8464_v11 = vmul.f32 %v8183_v14, %v8016_v21  ;;  %v13999_v37 = vpop.f32.mrf.mxu0  ;;  %v5996_v14 = vld [vmem:[#allocation3 + $0x188] sm:$0xff] }
 0x3b0   :  { %6697 = vst.msk [vmem:[#allocation3 + $0x140] sm:$0xff] %vm226_vm2, %v6633_v28  ;;  %v6636_v57 = vadd.f32 %v13999_v37, %v5990_v47  ;;  %9453 = vperm.xlu1 %14450, %v17440_v42   ;;  %v5995_v47 = vld [vmem:[#allocation3 + $0x180] sm:$0xff] }
 0x3b1   :  { %9508 = vperm.xlu0 %14453, %v17448_v5   ;;  %v6484_v31 = vpop.f32.mrf.mxu0  ;;  %14143 = vmatmul.mubr.msk.f32.gmra.mxu0 %vm23_vm0, %v8464_v11  ;;  %v8024_v11 = vld [vmem:[#allocation2 + $0xaf] sm:$0xff] }
 0x3b2   :  { %6700 = vst.msk [vmem:[#allocation3 + $0x158] sm:$0xff] %vm226_vm2, %v6636_v57  ;;  %v6635_v51 = vadd.f32 %v6484_v31, %v5989_v10  ;;  %v8193_v34 = vpop.permute.xlu1 %8192  ;;  %14145 = vmatprep.mubr.msk.f32.mxu0 %vm23_vm0, %v8465_v29  ;;  %v17469_v56 = vpop.permute.xlu0 %8247  ;;  %v8025_v29 = vld [vmem:[#allocation2 + $0xb7] sm:$0xff] }
 0x3b3   :  { %v8466_v0 = vmul.f32 %v8193_v34, %v8018_v36  ;;  %v14002_v58 = vpop.f32.mrf.mxu0  ;;  %v17516_v57 = vld [vmem:[%s18905_s1 + $0x70] sm:$0xff]  ;;  %v8473_v36 = vmul.f32 %v17431_v6, %v8025_v29  ;;  %v8027_v34 = vld [vmem:[#allocation2 + $0xc7] sm:$0xff] }
 0x3b4   :  { %6699 = vst.msk [vmem:[#allocation3 + $0x150] sm:$0xff] %vm226_vm2, %v6635_v51  ;;  %v6638_v41 = vadd.f32 %v14002_v58, %v5992_v55  ;;  %9463 = vperm.xlu1 %14450, %v17459_v52   ;;  %v8026_v58 = vld [vmem:[#allocation2 + $0xbf] sm:$0xff] }
 0x3b5   :  { %9518 = vperm.xlu0 %14453, %v17467_v53   ;;  %v6494_v17 = vpop.f32.mrf.mxu0  ;;  %14146 = vmatmul.mubr.msk.f32.gmra.mxu0 %vm23_vm0, %v8466_v0  ;;  %v5998_v0 = vld [vmem:[#allocation3 + $0x198] sm:$0xff] }
 0x3b6   :  { %6702 = vst.msk [vmem:[#allocation3 + $0x168] sm:$0xff] %vm226_vm2, %v6638_v41  ;;  %v6637_v16 = vadd.f32 %v6494_v17, %v5991_v4  ;;  %v8203_v46 = vpop.permute.xlu1 %8202  ;;  %14148 = vmatprep.mubr.msk.f32.mxu0 %vm23_vm0, %v8467_v45  ;;  %v17488_v3 = vpop.permute.xlu0 %8257  ;;  %v17524_v45 = vld [vmem:[%s18905_s1 + $0xc0] sm:$0xff]  ;;  %v8475_v17 = vmul.f32 %v17450_v33, %v8027_v34  ;;  %v8028_v33 = vld [vmem:[#allocation2 + $0xcf] sm:$0xff] }
 0x3b7   :  { %v8468_v2 = vmul.f32 %v8203_v46, %v8020_v38  ;;  %v14005_v18 = vpop.f32.mrf.mxu0  ;;  %v5997_v41 = vld [vmem:[#allocation3 + $0x190] sm:$0xff] }
 0x3b8   :  { %6701 = vst.msk [vmem:[#allocation3 + $0x160] sm:$0xff] %vm226_vm2, %v6637_v16  ;;  %v6640_v35 = vadd.f32 %v14005_v18, %v5994_v26  ;;  %9473 = vperm.xlu1 %14450, %v17478_v15   ;;  %v17535_v4 = vld [vmem:[%s18905_s1 + $0x80] sm:$0xff]  ;;  %v6000_v18 = vld [vmem:[#allocation3 + $0x1a8] sm:$0xff] }
 0x3b9   :  { %9528 = vperm.xlu0 %14453, %v17486_v12   ;;  %v6504_v39 = vpop.f32.mrf.mxu0  ;;  %14149 = vmatmul.mubr.msk.f32.gmra.mxu0 %vm23_vm0, %v8468_v2  ;;  %v9385_v46 = vld [vmem:[%s18905_s1 + $0xe0] sm:$0xff]  ;;  %v8029_v2 = vld [vmem:[#allocation2 + $0xd7] sm:$0xff] }
 0x3ba   :  { %6704 = vst.msk [vmem:[#allocation3 + $0x178] sm:$0xff] %vm226_vm2, %v6640_v35  ;;  %v6639_v59 = vadd.f32 %v6504_v39, %v5993_v40  ;;  %v8213_v21 = vpop.permute.xlu1 %8212  ;;  %14151 = vmatprep.mubr.msk.f32.mxu0 %vm23_vm0, %v8469_v43  ;;  %v17507_v8 = vpop.permute.xlu0 %8267  ;;  %v5999_v40 = vld [vmem:[#allocation3 + $0x1a0] sm:$0xff] }
 0x3bb   :  { %v8470_v28 = vmul.f32 %v8213_v21, %v8022_v19  ;;  %v14008_v32 = vpop.f32.mrf.mxu0 }
 0x3bc   :  { %6703 = vst.msk [vmem:[#allocation3 + $0x170] sm:$0xff] %vm226_vm2, %v6639_v59  ;;  %v6642_v20 = vadd.f32 %v14008_v32, %v5996_v14  ;;  %9483 = vperm.xlu1 %14450, %v17497_v30   ;;  %v8477_v59 = vmul.f32 %v17469_v56, %v8029_v2  ;;  %v8031_v32 = vld [vmem:[#allocation2 + $0xe7] sm:$0xff]  ;;  %v8030_v56 = vld [vmem:[#allocation2 + $0xdf] sm:$0xff]  ;;  %v17583_v2 = vld [vmem:[%s18905_s1 + $0xb0] sm:$0xff] }
 0x3bd   :  { %9538 = vperm.xlu0 %14453, %v17505_v22   ;;  %v6514_v37 = vpop.f32.mrf.mxu0  ;;  %14152 = vmatmul.mubr.msk.f32.gmra.mxu0 %vm23_vm0, %v8470_v28  ;;  %v9389_v28 = vld [vmem:[%s18905_s1 + $0x100] sm:$0xff]  ;;  %v8479_v34 = vmul.f32 %v17488_v3, %v8031_v32  ;;  %v8032_v3 = vld [vmem:[#allocation2 + $0xef] sm:$0xff] }
 0x3be   :  { %6706 = vst.msk [vmem:[#allocation3 + $0x188] sm:$0xff] %vm226_vm2, %v6642_v20  ;;  %v6641_v10 = vadd.f32 %v6514_v37, %v5995_v47  ;;  %v8223_v31 = vpop.permute.xlu1 %8222  ;;  %14154 = vmatprep.mubr.msk.f32.mxu0 %vm23_vm0, %v8471_v23  ;;  %v17526_v51 = vpop.permute.xlu0 %8277  ;;  %v17551_v23 = vld [vmem:[%s18905_s1 + $0x90] sm:$0xff] }
 0x3bf   :  { %v8472_v27 = vmul.f32 %v8223_v31, %v8024_v11  ;;  %v14011_v55 = vpop.f32.mrf.mxu0  ;;  %v6002_v11 = vld [vmem:[#allocation3 + $0x1b8] sm:$0xff]  ;;  %v17567_v31 = vld [vmem:[%s18905_s1 + $0xa0] sm:$0xff] }
 0x3c0   :  { %6705 = vst.msk [vmem:[#allocation3 + $0x180] sm:$0xff] %vm226_vm2, %v6641_v10  ;;  %v6644_v6 = vadd.f32 %v14011_v55, %v5998_v0  ;;  %9493 = vperm.xlu1 %14450, %v17516_v57   ;;  %v9393_v55 = vld [vmem:[%s18905_s1 + $0x120] sm:$0xff] }
 0x3c1   :  { %9543 = vperm.xlu0 %14453, %v17524_v45   ;;  %v6524_v38 = vpop.f32.mrf.mxu0  ;;  %14155 = vmatmul.mubr.msk.f32.gmra.mxu0 %vm23_vm0, %v8472_v27 }
 0x3c2   :  { %6708 = vst.msk [vmem:[#allocation3 + $0x198] sm:$0xff] %vm226_vm2, %v6644_v6  ;;  %v6643_v43 = vadd.f32 %v6524_v38, %v5997_v41  ;;  %v8233_v16 = vpop.permute.xlu1 %8232  ;;  %14157 = vmatprep.mubr.msk.f32.mxu0 %vm23_vm0, %v8473_v36  ;;  %v17543_v7 = vpop.permute.xlu0 %8287  ;;  %v6001_v36 = vld [vmem:[#allocation3 + $0x1b0] sm:$0xff]  ;;  %v6004_v38 = vld [vmem:[#allocation3 + $0x1c8] sm:$0xff] }
 0x3c3   :  { %v8474_v26 = vmul.f32 %v8233_v16, %v8026_v58  ;;  %v14014_v35 = vpop.f32.mrf.mxu0  ;;  %v8033_v58 = vld [vmem:[#allocation2 + $0xf7] sm:$0xff] }
 0x3c4   :  { %6707 = vst.msk [vmem:[#allocation3 + $0x190] sm:$0xff] %vm226_vm2, %v6643_v43  ;;  %v6646_v19 = vadd.f32 %v14014_v35, %v6000_v18  ;;  %9503 = vperm.xlu1 %14450, %v17535_v4   ;;  %v6003_v16 = vld [vmem:[#allocation3 + $0x1c0] sm:$0xff] }
 0x3c5   :  { %9563 = vperm.xlu0 %14453, %v9385_v46   ;;  %v6534_v39 = vpop.f32.mrf.mxu0  ;;  %14158 = vmatmul.mubr.msk.f32.gmra.mxu0 %vm23_vm0, %v8474_v26  ;;  %v8481_v26 = vmul.f32 %v17507_v8, %v8033_v58  ;;  %v8034_v8 = vld [vmem:[#allocation2 + $0xff] sm:$0xff]  ;;  %v8036_v58 = vld [vmem:[#allocation2 + $0x10f] sm:$0xff] }
 0x3c6   :  { %6710 = vst.msk [vmem:[#allocation3 + $0x1a8] sm:$0xff] %vm226_vm2, %v6646_v19  ;;  %v6645_v21 = vadd.f32 %v6534_v39, %v5999_v40  ;;  %v8243_v29 = vpop.permute.xlu1 %8242  ;;  %14160 = vmatprep.mubr.msk.f32.mxu0 %vm23_vm0, %v8475_v17  ;;  %v17559_v14 = vpop.permute.xlu0 %8297  ;;  %v9397_v19 = vld [vmem:[%s18905_s1 + $0x140] sm:$0xff]  ;;  %v6006_v39 = vld [vmem:[#allocation3 + $0x1d8] sm:$0xff] }
 0x3c7   :  { %v8476_v20 = vmul.f32 %v8243_v29, %v8028_v33  ;;  %v14017_v47 = vpop.f32.mrf.mxu0 }
 0x3c8   :  { %6709 = vst.msk [vmem:[#allocation3 + $0x1a0] sm:$0xff] %vm226_vm2, %v6645_v21  ;;  %v6648_v37 = vadd.f32 %v14017_v47, %v6002_v11  ;;  %9513 = vperm.xlu1 %14450, %v17551_v23   ;;  %v8035_v21 = vld [vmem:[#allocation2 + $0x107] sm:$0xff] }
 0x3c9   :  { %9583 = vperm.xlu0 %14453, %v9389_v28   ;;  %v6544_v10 = vpop.f32.mrf.mxu0  ;;  %14161 = vmatmul.mubr.msk.f32.gmra.mxu0 %vm23_vm0, %v8476_v20  ;;  %v6005_v28 = vld [vmem:[#allocation3 + $0x1d0] sm:$0xff] }
 0x3ca   :  { %6712 = vst.msk [vmem:[#allocation3 + $0x1b8] sm:$0xff] %vm226_vm2, %v6648_v37  ;;  %v6647_v27 = vadd.f32 %v6544_v10, %v6001_v36  ;;  %v8253_v0 = vpop.permute.xlu1 %8252  ;;  %14163 = vmatprep.mubr.msk.f32.mxu0 %vm23_vm0, %v8477_v59  ;;  %v17575_v6 = vpop.permute.xlu0 %8307  ;;  %v9401_v47 = vld [vmem:[%s18905_s1 + $0x160] sm:$0xff]  ;;  %v8483_v36 = vmul.f32 %v17526_v51, %v8035_v21 }
 0x3cb   :  { %v8478_v41 = vmul.f32 %v8253_v0, %v8030_v56  ;;  %v14020_v17 = vpop.f32.mrf.mxu0  ;;  %v12889_v56 = vld [vmem:[%s18906_s2 + $0x20] sm:$0xf]  ;;  %v8037_v0 = vld [vmem:[#allocation2 + $0x117] sm:$0xff] }
 0x3cc   :  { %6711 = vst.msk [vmem:[#allocation3 + $0x1b0] sm:$0xff] %vm226_vm2, %v6647_v27  ;;  %v6650_v43 = vadd.f32 %v14020_v17, %v6004_v38  ;;  %9523 = vperm.xlu1 %14450, %v17567_v31   ;;  %14324 = vmatprep.subr.msk.mxu0 %vm1060_vm1, %v12889_v56  ;;  %v9409_v21 = vld [vmem:[%s18905_s1 + $0x1a0] sm:$0xff] }
 0x3cd   :  { %9603 = vperm.xlu0 %14453, %v9393_v55   ;;  %v6554_v46 = vpop.f32.mrf.mxu0  ;;  %14164 = vmatmul.mubr.msk.f32.gmra.mxu0 %vm23_vm0, %v8478_v41  ;;  %v6007_v41 = vld [vmem:[#allocation3 + $0x1e0] sm:$0xff] }
 0x3ce   :  { %6714 = vst.msk [vmem:[#allocation3 + $0x1c8] sm:$0xff] %vm226_vm2, %v6650_v43  ;;  %v6649_v18 = vadd.f32 %v6554_v46, %v6003_v16  ;;  %v8263_v35 = vpop.permute.xlu1 %8262  ;;  %14166 = vmatprep.mubr.msk.f32.mxu0 %vm23_vm0, %v8479_v34  ;;  %v17591_v33 = vpop.permute.xlu0 %8317  ;;  %v6008_v34 = vld [vmem:[#allocation3 + $0x1e8] sm:$0xff]  ;;  %14325 = vmatpush3.msk.msra.mxu0 %vm1060_vm1, %v12889_v56  ;;  %v9405_v43 = vld [vmem:[%s18905_s1 + $0x180] sm:$0xff]  ;;  %v8485_v16 = vmul.f32 %v17543_v7, %v8037_v0 }
 0x3cf   :  { %v8480_v40 = vmul.f32 %v8263_v35, %v8032_v3  ;;  %v14023_v59 = vpop.f32.mrf.mxu0 }
 0x3d0   :  { %6713 = vst.msk [vmem:[#allocation3 + $0x1c0] sm:$0xff] %vm226_vm2, %v6649_v18  ;;  %v6652_v29 = vadd.f32 %v14023_v59, %v6006_v39  ;;  %9533 = vperm.xlu1 %14450, %v17583_v2   ;;  %v8039_v18 = vld [vmem:[#allocation2 + $0x127] sm:$0xff] }
 0x3d1   :  { %9623 = vperm.xlu0 %14453, %v9397_v19   ;;  %v6564_v32 = vpop.f32.mrf.mxu0  ;;  %14167 = vmatmul.mubr.msk.f32.gmra.mxu0 %vm23_vm0, %v8480_v40  ;;  %v8038_v19 = vld [vmem:[#allocation2 + $0x11f] sm:$0xff] }
 0x3d2   :  { %6716 = vst.msk [vmem:[#allocation3 + $0x1d8] sm:$0xff] %vm226_vm2, %v6652_v29  ;;  %v6651_v20 = vadd.f32 %v6564_v32, %v6005_v28  ;;  %v8273_v11 = vpop.permute.xlu1 %8272  ;;  %14169 = vmatprep.mubr.msk.f32.mxu0 %vm23_vm0, %v8481_v26  ;;  %v17601_v37 = vpop.permute.xlu0 %8327  ;;  %v6010_v26 = vld [vmem:[#allocation3 + $0x1f8] sm:$0xff]  ;;  %v6009_v40 = vld [vmem:[#allocation3 + $0x1f0] sm:$0xff]  ;;  %v7234_v32 = vld [vmem:[#allocation3 + $0x8] sm:$0xff] }
 0x3d3   :  { %v8482_v10 = vmul.f32 %v8273_v11, %v8034_v8  ;;  %v14026_v27 = vpop.f32.mrf.mxu0  ;;  %v8487_v8 = vmul.f32 %v17559_v14, %v8039_v18  ;;  %v8040_v11 = vld [vmem:[#allocation2 + $0x12f] sm:$0xff] }
 0x3d4   :  { %6715 = vst.msk [vmem:[#allocation3 + $0x1d0] sm:$0xff] %vm226_vm2, %v6651_v20  ;;  %v6654_v55 = vadd.f32 %v14026_v27, %v6008_v34  ;;  %14451 = vset.pattern.permute.xlu1 %v14549_v9  ;;  %v8044_v18 = vld [vmem:[#allocation2 + $0x14f] sm:$0xff] }
 0x3d5   :  { %10709 = vperm.xlu1 %14451, %v17309_v48   ;;  %9643 = vperm.xlu0 %14453, %v9401_v47   ;;  %v6574_v38 = vpop.f32.mrf.mxu0 }
 0x3d6   :  { %6718 = vst.msk [vmem:[#allocation3 + $0x1e8] sm:$0xff] %vm226_vm2, %v6654_v55  ;;  %v6653_v51 = vadd.f32 %v6574_v38, %v6007_v41  ;;  %14170 = vmatmul.mubr.msk.f32.gmra.mxu0 %vm23_vm0, %v8482_v10  ;;  %v8283_v17 = vpop.permute.xlu1 %8282  ;;  %v17617_v3 = vpop.permute.xlu0 %8337  ;;  %v8043_v55 = vld [vmem:[#allocation2 + $0x147] sm:$0xff] }
 0x3d7   :  { %v8484_v46 = vmul.f32 %v8283_v17, %v8036_v58  ;;  %v14029_v48 = vpop.f32.mrf.mxu0  ;;  %14172 = vmatprep.mubr.msk.f32.mxu0 %vm23_vm0, %v8483_v36  ;;  %v7233_v36 = vld [vmem:[#allocation3] sm:$0xff]  ;;  %v8042_v58 = vld [vmem:[#allocation2 + $0x13f] sm:$0xff]  ;;  %v8491_v17 = vmul.f32 %v17591_v33, %v8043_v55 }
 0x3d8   :  { %6717 = vst.msk [vmem:[#allocation3 + $0x1e0] sm:$0xff] %vm226_vm2, %v6653_v51  ;;  %v6656_v35 = vadd.f32 %v14029_v48, %v6010_v26 }
 0x3d9   :  { %10719 = vperm.xlu1 %14451, %v17402_v61   ;;  %9663 = vperm.xlu0 %14453, %v9405_v43   ;;  %v6584_v39 = vpop.f32.mrf.mxu0  ;;  %v8041_v61 = vld [vmem:[#allocation2 + $0x137] sm:$0xff] }
 0x3da   :  { %6720 = vst.msk [vmem:[#allocation3 + $0x1f8] sm:$0xff] %vm226_vm2, %v6656_v35  ;;  %v6655_v59 = vadd.f32 %v6584_v39, %v6009_v40  ;;  %14173 = vmatmul.mubr.msk.f32.gmra.mxu0 %vm23_vm0, %v8484_v46  ;;  %v8293_v7 = vpop.permute.xlu1 %8292  ;;  %v17628_v29 = vpop.permute.xlu0 %8347  ;;  %v8489_v14 = vmul.f32 %v17575_v6, %v8041_v61  ;;  %v7236_v6 = vld [vmem:[#allocation3 + $0x18] sm:$0xff]  ;;  %v7238_v35 = vld [vmem:[#allocation3 + $0x28] sm:$0xff] }
 0x3db   :  { %v8486_v28 = vmul.f32 %v8293_v7, %v8038_v19  ;;  %14175 = vmatprep.mubr.msk.f32.mxu0 %vm23_vm0, %v8485_v16  ;;  %v7235_v16 = vld [vmem:[#allocation3 + $0x10] sm:$0xff]  ;;  %v7237_v7 = vld [vmem:[#allocation3 + $0x20] sm:$0xff]  ;;  %v7240_v61 = vld [vmem:[#allocation3 + $0x38] sm:$0xff] }
 0x3dc   :  { %6719 = vst.msk [vmem:[#allocation3 + $0x1f0] sm:$0xff] %vm226_vm2, %v6655_v59  ;;  %v14034_v20 = vpop.f32.mrf.mxu1 }
 0x3dd   :  { %v7880_v47 = vadd.f32 %v14034_v20, %v7234_v32  ;;  %10724 = vperm.xlu1 %14451, %v17326_v50   ;;  %9683 = vperm.xlu0 %14453, %v9409_v21   ;;  %v14495_v50 = vld [vmem:[%s18905_s1 + $0x1c0] sm:$0xff] }
 0x3de   :  { %14176 = vmatmul.mubr.msk.f32.gmra.mxu0 %vm23_vm0, %v8486_v28  ;;  %v8303_v56 = vpop.permute.xlu1 %8302  ;;  %v7560_v10 = vpop.f32.mrf.mxu1  ;;  %v8046_v28 = vld [vmem:[#allocation2 + $0x15f] sm:$0xff] }
 0x3df   :  { %7944 = vst.msk [vmem:[#allocation3 + $0x8] sm:$0xff] %vm226_vm2, %v7880_v47  ;;  %v8488_v34 = vmul.f32 %v8303_v56, %v8040_v11  ;;  %v7879_v27 = vadd.f32 %v7560_v10, %v7233_v36  ;;  %14178 = vmatprep.mubr.msk.f32.mxu0 %vm23_vm0, %v8487_v8  ;;  %v17638_v0 = vpop.permute.xlu0 %8357  ;;  %v7239_v56 = vld [vmem:[#allocation3 + $0x30] sm:$0xff]  ;;  %v8049_v10 = vld [vmem:[#allocation2 + $0x177] sm:$0xff] }
 0x3e1   :  { %7943 = vst.msk [vmem:[#allocation3] sm:$0xff] %vm226_vm2, %v7879_v27  ;;  %10734 = vperm.xlu1 %14451, %v17342_v60   ;;  %9703 = vperm.xlu0 %14453, %v14495_v50   ;;  %v14037_v41 = vpop.f32.mrf.mxu1  ;;  %v8045_v60 = vld [vmem:[#allocation2 + $0x157] sm:$0xff] }
 0x3e2   :  { %v7882_v38 = vadd.f32 %v14037_v41, %v7236_v6  ;;  %14179 = vmatmul.mubr.msk.f32.gmra.mxu0 %vm23_vm0, %v8488_v34  ;;  %v8313_v51 = vpop.permute.xlu1 %8312  ;;  %v8493_v39 = vmul.f32 %v17601_v37, %v8045_v60  ;;  %v8048_v34 = vld [vmem:[#allocation2 + $0x16f] sm:$0xff]  ;;  %v7242_v27 = vld [vmem:[#allocation3 + $0x48] sm:$0xff] }
 0x3e3   :  { %v8490_v43 = vmul.f32 %v8313_v51, %v8042_v58  ;;  %v7570_v46 = vpop.f32.mrf.mxu1  ;;  %14181 = vmatprep.mubr.msk.f32.mxu0 %vm23_vm0, %v8489_v14  ;;  %v17648_v26 = vpop.permute.xlu0 %8367  ;;  %v8497_v58 = vmul.f32 %v17628_v29, %v8049_v10  ;;  %v7241_v6 = vld [vmem:[#allocation3 + $0x40] sm:$0xff] }
 0x3e4   :  { %7946 = vst.msk [vmem:[#allocation3 + $0x18] sm:$0xff] %vm226_vm2, %v7882_v38  ;;  %v7881_v48 = vadd.f32 %v7570_v46, %v7235_v16 }
 0x3e5   :  { %10744 = vperm.xlu1 %14451, %v17358_v54   ;;  %9723 = vperm.xlu0 %14453, %v17260_v13   ;;  %v14040_v19 = vpop.f32.mrf.mxu1  ;;  %v8047_v54 = vld [vmem:[#allocation2 + $0x167] sm:$0xff] }
 0x3e6   :  { %7945 = vst.msk [vmem:[#allocation3 + $0x10] sm:$0xff] %vm226_vm2, %v7881_v48  ;;  %v7884_v33 = vadd.f32 %v14040_v19, %v7238_v35  ;;  %14182 = vmatmul.mubr.msk.f32.gmra.mxu0 %vm23_vm0, %v8490_v43  ;;  %v8323_v40 = vpop.permute.xlu1 %8322  ;;  %v8495_v11 = vmul.f32 %v17617_v3, %v8047_v54  ;;  %v7244_v43 = vld [vmem:[#allocation3 + $0x58] sm:$0xff]  ;;  %v7243_v48 = vld [vmem:[#allocation3 + $0x50] sm:$0xff] }
 0x3e7   :  { %v8492_v59 = vmul.f32 %v8323_v40, %v8044_v18  ;;  %v7580_v21 = vpop.f32.mrf.mxu1  ;;  %14184 = vmatprep.mubr.msk.f32.mxu0 %vm23_vm0, %v8491_v17  ;;  %v17657_v8 = vpop.permute.xlu0 %8377  ;;  %v8050_v17 = vld [vmem:[#allocation2 + $0x17f] sm:$0xff] }
 0x3e8   :  { %7948 = vst.msk [vmem:[#allocation3 + $0x28] sm:$0xff] %vm226_vm2, %v7884_v33  ;;  %v7883_v13 = vadd.f32 %v7580_v21, %v7237_v7  ;;  %v8052_v33 = vld [vmem:[#allocation2 + $0x18f] sm:$0xff]  ;;  %v7246_v40 = vld [vmem:[#allocation3 + $0x68] sm:$0xff] }
 0x3e9   :  { %10754 = vperm.xlu1 %14451, %v17373_v24   ;;  %14490 = vset.pattern.permute.xlu0 %v14549_v9  ;;  %v14043_v32 = vpop.f32.mrf.mxu1  ;;  %v7245_v21 = vld [vmem:[#allocation3 + $0x60] sm:$0xff] }
 0x3ea   :  { %7947 = vst.msk [vmem:[#allocation3 + $0x20] sm:$0xff] %vm226_vm2, %v7883_v13  ;;  %v7886_v37 = vadd.f32 %v14043_v32, %v7240_v61  ;;  %14185 = vmatmul.mubr.msk.f32.gmra.mxu0 %vm23_vm0, %v8492_v59  ;;  %v8333_v20 = vpop.permute.xlu1 %8332  ;;  %10729 = vperm.xlu0 %14490, %v17421_v63   ;;  %v8054_v61 = vld [vmem:[#allocation2 + $0x19f] sm:$0xff]  ;;  %v7248_v32 = vld [vmem:[#allocation3 + $0x78] sm:$0xff] }
 0x3eb   :  { %v8494_v47 = vmul.f32 %v8333_v20, %v8046_v28  ;;  %v7590_v36 = vpop.f32.mrf.mxu1  ;;  %14187 = vmatprep.mubr.msk.f32.mxu0 %vm23_vm0, %v8493_v39  ;;  %v17667_v24 = vpop.permute.xlu0 %8387 }
 0x3ec   :  { %7950 = vst.msk [vmem:[#allocation3 + $0x38] sm:$0xff] %vm226_vm2, %v7886_v37  ;;  %v7885_v14 = vadd.f32 %v7590_v36, %v7239_v56 }
 0x3ed   :  { %10764 = vperm.xlu1 %14451, %v17388_v44   ;;  %v14046_v55 = vpop.f32.mrf.mxu1  ;;  %v8051_v44 = vld [vmem:[#allocation2 + $0x187] sm:$0xff] }
 0x3ee   :  { %7949 = vst.msk [vmem:[#allocation3 + $0x30] sm:$0xff] %vm226_vm2, %v7885_v14  ;;  %v7888_v63 = vadd.f32 %v14046_v55, %v7242_v27  ;;  %14188 = vmatmul.mubr.msk.f32.gmra.mxu0 %vm23_vm0, %v8494_v47  ;;  %v8343_v3 = vpop.permute.xlu1 %8342  ;;  %10739 = vperm.xlu0 %14490, %v17440_v42   ;;  %v8499_v46 = vmul.f32 %v17638_v0, %v8051_v44  ;;  %v7247_v47 = vld [vmem:[#allocation3 + $0x70] sm:$0xff]  ;;  %v8056_v14 = vld [vmem:[#allocation2 + $0x1af] sm:$0xff] }
 0x3ef   :  { %v8496_v50 = vmul.f32 %v8343_v3, %v8048_v34  ;;  %v7600_v41 = vpop.f32.mrf.mxu1  ;;  %14190 = vmatprep.mubr.msk.f32.mxu0 %vm23_vm0, %v8495_v11  ;;  %v17676_v38 = vpop.permute.xlu0 %8397  ;;  %v7250_v34 = vld [vmem:[#allocation3 + $0x88] sm:$0xff]  ;;  %v7249_v3 = vld [vmem:[#allocation3 + $0x80] sm:$0xff]  ;;  %v8059_v44 = vld [vmem:[#allocation2 + $0x1c7] sm:$0xff] }
 0x3f0   :  { %7952 = vst.msk [vmem:[#allocation3 + $0x48] sm:$0xff] %vm226_vm2, %v7888_v63  ;;  %v7887_v51 = vadd.f32 %v7600_v41, %v7241_v6  ;;  %v8058_v41 = vld [vmem:[#allocation2 + $0x1bf] sm:$0xff] }
 0x3f1   :  { %10774 = vperm.xlu1 %14451, %v17410_v62   ;;  %v14049_v16 = vpop.f32.mrf.mxu1  ;;  %v8053_v62 = vld [vmem:[#allocation2 + $0x197] sm:$0xff] }
 0x3f2   :  { %7951 = vst.msk [vmem:[#allocation3 + $0x40] sm:$0xff] %vm226_vm2, %v7887_v51  ;;  %v7890_v42 = vadd.f32 %v14049_v16, %v7244_v43  ;;  %14191 = vmatmul.mubr.msk.f32.gmra.mxu0 %vm23_vm0, %v8496_v50  ;;  %v8353_v29 = vpop.permute.xlu1 %8352  ;;  %10749 = vperm.xlu0 %14490, %v17459_v52   ;;  %v8501_v59 = vmul.f32 %v17648_v26, %v8053_v62  ;;  %v7251_v16 = vld [vmem:[#allocation3 + $0x90] sm:$0xff]  ;;  %v7254_v62 = vld [vmem:[#allocation3 + $0xa8] sm:$0xff] }
 0x3f3   :  { %v8498_v60 = vmul.f32 %v8353_v29, %v8050_v17  ;;  %v7610_v18 = vpop.f32.mrf.mxu1  ;;  %14193 = vmatprep.mubr.msk.f32.mxu0 %vm23_vm0, %v8497_v58  ;;  %v17685_v35 = vpop.permute.xlu0 %8407 }
 0x3f4   :  { %7954 = vst.msk [vmem:[#allocation3 + $0x58] sm:$0xff] %vm226_vm2, %v7890_v42  ;;  %v7889_v19 = vadd.f32 %v7610_v18, %v7243_v48  ;;  %v8060_v48 = vld [vmem:[#allocation2 + $0x1cf] sm:$0xff]  ;;  %v8061_v18 = vld [vmem:[#allocation2 + $0x1d7] sm:$0xff] }
 0x3f5   :  { %10784 = vperm.xlu1 %14451, %v17429_v25   ;;  %v14052_v39 = vpop.f32.mrf.mxu1  ;;  %v8055_v25 = vld [vmem:[#allocation2 + $0x1a7] sm:$0xff] }
 0x3f6   :  { %7953 = vst.msk [vmem:[#allocation3 + $0x50] sm:$0xff] %vm226_vm2, %v7889_v19  ;;  %v7892_v52 = vadd.f32 %v14052_v39, %v7246_v40  ;;  %14194 = vmatmul.mubr.msk.f32.gmra.mxu0 %vm23_vm0, %v8498_v60  ;;  %v8363_v0 = vpop.permute.xlu1 %8362  ;;  %10759 = vperm.xlu0 %14490, %v17478_v15   ;;  %v8503_v20 = vmul.f32 %v17657_v8, %v8055_v25 }
 0x3f7   :  { %v8500_v7 = vmul.f32 %v8363_v0, %v8052_v33  ;;  %v7620_v54 = vpop.f32.mrf.mxu1  ;;  %14196 = vmatprep.mubr.msk.f32.mxu0 %vm23_vm0, %v8499_v46  ;;  %v17694_v13 = vpop.permute.xlu0 %8417  ;;  %v8507_v46 = vmul.f32 %v17676_v38, %v8059_v44  ;;  %v7253_v38 = vld [vmem:[#allocation3 + $0xa0] sm:$0xff]  ;;  %v8509_v0 = vmul.f32 %v17685_v35, %v8061_v18 }
 0x3f8   :  { %7956 = vst.msk [vmem:[#allocation3 + $0x68] sm:$0xff] %vm226_vm2, %v7892_v52  ;;  %v7891_v28 = vadd.f32 %v7620_v54, %v7245_v21  ;;  %v8062_v21 = vld [vmem:[#allocation2 + $0x1df] sm:$0xff]  ;;  %v7256_v54 = vld [vmem:[#allocation3 + $0xb8] sm:$0xff] }
 0x3f9   :  { %10794 = vperm.xlu1 %14451, %v17448_v5   ;;  %v14055_v37 = vpop.f32.mrf.mxu1  ;;  %v8057_v5 = vld [vmem:[#allocation2 + $0x1b7] sm:$0xff] }
 0x3fa   :  { %7955 = vst.msk [vmem:[#allocation3 + $0x60] sm:$0xff] %vm226_vm2, %v7891_v28  ;;  %v7894_v15 = vadd.f32 %v14055_v37, %v7248_v32  ;;  %14197 = vmatmul.mubr.msk.f32.gmra.mxu0 %vm23_vm0, %v8500_v7  ;;  %v8373_v26 = vpop.permute.xlu1 %8372  ;;  %10769 = vperm.xlu0 %14490, %v17497_v30   ;;  %v8505_v55 = vmul.f32 %v17667_v24, %v8057_v5  ;;  %v9293_v28 = vld [vmem:[#allocation2 + $0x28] sm:$0xff]  ;;  %v7255_v37 = vld [vmem:[#allocation3 + $0xb0] sm:$0xff]  ;;  %v7258_v5 = vld [vmem:[#allocation3 + $0xc8] sm:$0xff] }
 0x3fb   :  { %v8502_v11 = vmul.f32 %v8373_v26, %v8054_v61  ;;  %v7630_v56 = vpop.f32.mrf.mxu1  ;;  %14199 = vmatprep.mubr.msk.f32.mxu0 %vm23_vm0, %v8501_v59  ;;  %v17703_v36 = vpop.permute.xlu0 %8427  ;;  %v8063_v59 = vld [vmem:[#allocation2 + $0x1e7] sm:$0xff]  ;;  %v8065_v26 = vld [vmem:[#allocation2 + $0x1f7] sm:$0xff] }
 0x3fc   :  { %7958 = vst.msk [vmem:[#allocation3 + $0x78] sm:$0xff] %vm226_vm2, %v7894_v15  ;;  %v7893_v10 = vadd.f32 %v7630_v56, %v7247_v47  ;;  %v8511_v61 = vmul.f32 %v17694_v13, %v8063_v59  ;;  %v8064_v47 = vld [vmem:[#allocation2 + $0x1ef] sm:$0xff] }
 0x3fd   :  { %10804 = vperm.xlu1 %14451, %v17467_v53   ;;  %v14058_v27 = vpop.f32.mrf.mxu1  ;;  %v17717_v53 = vld [vmem:[%s18905_s1 + $0xc8] sm:$0xff] }
 0x3fe   :  { %7957 = vst.msk [vmem:[#allocation3 + $0x70] sm:$0xff] %vm226_vm2, %v7893_v10  ;;  %v7896_v30 = vadd.f32 %v14058_v27, %v7250_v34  ;;  %14200 = vmatmul.mubr.msk.f32.gmra.mxu0 %vm23_vm0, %v8502_v11  ;;  %v8383_v8 = vpop.permute.xlu1 %8382  ;;  %10779 = vperm.xlu0 %14490, %v17516_v57   ;;  %v7252_v57 = vld [vmem:[#allocation3 + $0x98] sm:$0xff]  ;;  %v17756_v10 = vld [vmem:[%s18905_s1 + $0xd8] sm:$0xff]  ;;  %v8513_v34 = vmul.f32 %v17703_v36, %v8065_v26  ;;  %v9296_v26 = vld [vmem:[#allocation2 + $0x40] sm:$0xff] }
 0x3ff   :  { %v8504_v63 = vmul.f32 %v8383_v8, %v8056_v14  ;;  %v7640_v58 = vpop.f32.mrf.mxu1  ;;  %14202 = vmatprep.mubr.msk.f32.mxu0 %vm23_vm0, %v8503_v20  ;;  %v17712_v50 = vpop.permute.xlu0 %8437 }
 0x400   :  { %7960 = vst.msk [vmem:[#allocation3 + $0x88] sm:$0xff] %vm226_vm2, %v7896_v30  ;;  %v7895_v6 = vadd.f32 %v7640_v58, %v7249_v3  ;;  %v7257_v30 = vld [vmem:[#allocation3 + $0xc0] sm:$0xff]  ;;  %v8066_v58 = vld [vmem:[#allocation2 + $0x1ff] sm:$0xff] }
 0x401   :  { %14454 = vset.pattern.permute.xlu1 %v14550_v1  ;;  %v14061_v24 = vpop.f32.mrf.mxu1 }
 0x402   :  { %7959 = vst.msk [vmem:[#allocation3 + $0x80] sm:$0xff] %vm226_vm2, %v7895_v6  ;;  %v7898_v51 = vadd.f32 %v14061_v24, %v7252_v57  ;;  %14203 = vmatmul.mubr.msk.f32.gmra.mxu0 %vm23_vm0, %v8504_v63  ;;  %9548 = vperm.xlu1 %14454, %v17717_v53   ;;  %v8393_v17 = vpop.permute.xlu1 %8392  ;;  %v7260_v6 = vld [vmem:[#allocation3 + $0xd8] sm:$0xff]  ;;  %v7259_v24 = vld [vmem:[#allocation3 + $0xd0] sm:$0xff] }
 0x403   :  { %v8506_v43 = vmul.f32 %v8393_v17, %v8058_v41  ;;  %10789 = vperm.xlu0 %14490, %v17535_v4   ;;  %v7650_v42 = vpop.f32.mrf.mxu1  ;;  %14205 = vmatprep.mubr.msk.f32.mxu0 %vm23_vm0, %v8505_v55  ;;  %v17726_v29 = vpop.permute.xlu0 %8447  ;;  %v8067_v55 = vld [vmem:[#allocation2 + $0x207] sm:$0xff]  ;;  %v8069_v17 = vld [vmem:[#allocation2 + $0x217] sm:$0xff] }
 0x404   :  { %7962 = vst.msk [vmem:[#allocation3 + $0x98] sm:$0xff] %vm226_vm2, %v7898_v51  ;;  %v7897_v60 = vadd.f32 %v7650_v42, %v7251_v16  ;;  %v8068_v42 = vld [vmem:[#allocation2 + $0x20f] sm:$0xff] }
 0x405   :  { %v14064_v19 = vpop.f32.mrf.mxu1 }
 0x406   :  { %7961 = vst.msk [vmem:[#allocation3 + $0x90] sm:$0xff] %vm226_vm2, %v7897_v60  ;;  %v7900_v33 = vadd.f32 %v14064_v19, %v7254_v62  ;;  %14206 = vmatmul.mubr.msk.f32.gmra.mxu0 %vm23_vm0, %v8506_v43  ;;  %14455 = vset.pattern.permute.xlu1 %v14549_v9  ;;  %v8403_v4 = vpop.permute.xlu1 %8402  ;;  %v7261_v62 = vld [vmem:[#allocation3 + $0xe0] sm:$0xff] }
 0x407   :  { %v8508_v40 = vmul.f32 %v8403_v4, %v8060_v48  ;;  %10799 = vperm.xlu0 %14490, %v17551_v23   ;;  %10809 = vperm.xlu1 %14455, %v17567_v31   ;;  %v7660_v39 = vpop.f32.mrf.mxu1  ;;  %v17735_v52 = vpop.permute.xlu0 %10714  ;;  %v17743_v23 = vld [vmem:[%s18905_s1 + $0xd0] sm:$0xff] }
 0x408   :  { %7964 = vst.msk [vmem:[#allocation3 + $0xa8] sm:$0xff] %vm226_vm2, %v7900_v33  ;;  %v7899_v7 = vadd.f32 %v7660_v39, %v7253_v38  ;;  %14208 = vmatprep.mubr.msk.f32.mxu0 %vm23_vm0, %v8507_v46  ;;  %v7262_v46 = vld [vmem:[#allocation3 + $0xe8] sm:$0xff]  ;;  %v9386_v33 = vld [vmem:[%s18905_s1 + $0xe8] sm:$0xff] }
 0x409   :  { %v14067_v25 = vpop.f32.mrf.mxu1 }
 0x40a   :  { %7963 = vst.msk [vmem:[#allocation3 + $0xa0] sm:$0xff] %vm226_vm2, %v7899_v7  ;;  %v7902_v31 = vadd.f32 %v14067_v25, %v7256_v54  ;;  %14209 = vmatmul.mubr.msk.f32.gmra.mxu0 %vm23_vm0, %v8508_v40  ;;  %v8413_v35 = vpop.permute.xlu1 %8412  ;;  %v8070_v40 = vld [vmem:[#allocation2 + $0x21f] sm:$0xff] }
 0x40b   :  { %v8510_v32 = vmul.f32 %v8413_v35, %v8062_v21  ;;  %14456 = vset.pattern.permute.xlu1 %v14550_v1  ;;  %10814 = vperm.xlu0 %14490, %v17486_v12   ;;  %v7670_v15 = vpop.f32.mrf.mxu1  ;;  %v7263_v7 = vld [vmem:[#allocation3 + $0xf0] sm:$0xff]  ;;  %v9294_v35 = vld [vmem:[#allocation2 + $0x30] sm:$0xff] }
 0x40c   :  { %7966 = vst.msk [vmem:[#allocation3 + $0xb8] sm:$0xff] %vm226_vm2, %v7902_v31  ;;  %v7901_v20 = vadd.f32 %v7670_v15, %v7255_v37  ;;  %9553 = vperm.xlu1 %14456, %v17743_v23   ;;  %14211 = vmatprep.mubr.msk.f32.mxu0 %vm23_vm0, %v8509_v0  ;;  %v9424_v11 = vpop.permute.xlu0 %9423  ;;  %v7265_v37 = vld [vmem:[#allocation3 + $0x100] sm:$0xff] }
 0x40d   :  { %v9741_v56 = vmul.f32 %v9424_v11, %v9293_v28  ;;  %v14070_v13 = vpop.f32.mrf.mxu1 }
 0x40e   :  { %7965 = vst.msk [vmem:[#allocation3 + $0xb0] sm:$0xff] %vm226_vm2, %v7901_v20  ;;  %v7904_v12 = vadd.f32 %v14070_v13, %v7258_v5  ;;  %14212 = vmatmul.mubr.msk.f32.gmra.mxu0 %vm23_vm0, %v8510_v32  ;;  %v8423_v14 = vpop.permute.xlu1 %8422  ;;  %v9295_v13 = vld [vmem:[#allocation2 + $0x38] sm:$0xff] }
 0x40f   :  { %v8512_v27 = vmul.f32 %v8423_v14, %v8064_v47  ;;  %v7680_v8 = vpop.f32.mrf.mxu1  ;;  %14214 = vmatprep.mubr.msk.f32.mxu0 %vm23_vm0, %v8511_v61  ;;  %10819 = vperm.xlu0 %14490, %v17583_v2   ;;  %v8515_v2 = vmul.f32 %v17712_v50, %v8067_v55  ;;  %v9387_v61 = vld [vmem:[%s18905_s1 + $0xf0] sm:$0xff] }
 0x410   :  { %7968 = vst.msk [vmem:[#allocation3 + $0xc8] sm:$0xff] %vm226_vm2, %v7904_v12  ;;  %v7903_v63 = vadd.f32 %v7680_v8, %v7257_v30  ;;  %9558 = vperm.xlu1 %14456, %v17756_v10   ;;  %v17765_v3 = vpop.permute.xlu0 %9438  ;;  %14228 = vmatprep.mubr.msk.f32.mxu1 %vm23_vm0, %v9741_v56  ;;  %v7268_v56 = vld [vmem:[#allocation3 + $0x118] sm:$0xff]  ;;  %v9298_v8 = vld [vmem:[#allocation2 + $0x50] sm:$0xff] }
 0x411   :  { %v14073_v36 = vpop.f32.mrf.mxu1  ;;  %v9744_v14 = vmul.f32 %v17765_v3, %v9296_v26  ;;  %v17822_v3 = vld [vmem:[%s18905_s1 + $0xf8] sm:$0xff] }
 0x412   :  { %7967 = vst.msk [vmem:[#allocation3 + $0xc0] sm:$0xff] %vm226_vm2, %v7903_v63  ;;  %v7906_v41 = vadd.f32 %v14073_v36, %v7260_v6  ;;  %14215 = vmatmul.mubr.msk.f32.gmra.mxu0 %vm23_vm0, %v8512_v27  ;;  %v8433_v44 = vpop.permute.xlu1 %8432  ;;  %v7267_v27 = vld [vmem:[#allocation3 + $0x110] sm:$0xff]  ;;  %v7270_v6 = vld [vmem:[#allocation3 + $0x128] sm:$0xff] }
 0x413   :  { %v8514_v57 = vmul.f32 %v8433_v44, %v8066_v58  ;;  %v7690_v51 = vpop.f32.mrf.mxu1  ;;  %14217 = vmatprep.mubr.msk.f32.mxu0 %vm23_vm0, %v8513_v34  ;;  %10834 = vperm.xlu0 %14490, %v17717_v53   ;;  %v8517_v53 = vmul.f32 %v17726_v29, %v8069_v17  ;;  %v7264_v29 = vld [vmem:[#allocation3 + $0xf8] sm:$0xff]  ;;  %v9303_v26 = vld [vmem:[#allocation2 + $0x78] sm:$0xff] }
 0x414   :  { %7970 = vst.msk [vmem:[#allocation3 + $0xd8] sm:$0xff] %vm226_vm2, %v7906_v41  ;;  %v7905_v43 = vadd.f32 %v7690_v51, %v7259_v24  ;;  %14457 = vset.pattern.permute.xlu1 %v14549_v9  ;;  %v17775_v16 = vpop.permute.xlu0 %9448  ;;  %v9297_v41 = vld [vmem:[#allocation2 + $0x48] sm:$0xff]  ;;  %v7269_v51 = vld [vmem:[#allocation3 + $0x120] sm:$0xff] }
 0x415   :  { %10824 = vperm.xlu1 %14457, %v17505_v22   ;;  %v14076_v50 = vpop.f32.mrf.mxu1 }
 0x416   :  { %7969 = vst.msk [vmem:[#allocation3 + $0xd0] sm:$0xff] %vm226_vm2, %v7905_v43  ;;  %v7908_v60 = vadd.f32 %v14076_v50, %v7262_v46  ;;  %14218 = vmatmul.mubr.msk.f32.gmra.mxu0 %vm23_vm0, %v8514_v57  ;;  %v8443_v48 = vpop.permute.xlu1 %8442  ;;  %v9746_v57 = vmul.f32 %v17775_v16, %v9298_v8  ;;  %v9300_v43 = vld [vmem:[#allocation2 + $0x60] sm:$0xff]  ;;  %v9305_v8 = vld [vmem:[#allocation2 + $0x88] sm:$0xff] }
 0x417   :  { %v8516_v18 = vmul.f32 %v8443_v48, %v8068_v42  ;;  %v7700_v19 = vpop.f32.mrf.mxu1  ;;  %14220 = vmatprep.mubr.msk.f32.mxu0 %vm23_vm0, %v8515_v2  ;;  %10839 = vperm.xlu0 %14490, %v17743_v23   ;;  %v7266_v23 = vld [vmem:[#allocation3 + $0x108] sm:$0xff]  ;;  %v17829_v2 = vld [vmem:[%s18905_s1 + $0x110] sm:$0xff] }
 0x418   :  { %7972 = vst.msk [vmem:[#allocation3 + $0xe8] sm:$0xff] %vm226_vm2, %v7908_v60  ;;  %v7907_v22 = vadd.f32 %v7700_v19, %v7261_v62  ;;  %v17787_v4 = vpop.permute.xlu0 %9458  ;;  %v7272_v60 = vld [vmem:[#allocation3 + $0x138] sm:$0xff] }
 0x419   :  { %14458 = vset.pattern.permute.xlu1 %v14550_v1  ;;  %v14079_v38 = vpop.f32.mrf.mxu1  ;;  %v9748_v62 = vmul.f32 %v17787_v4, %v9300_v43  ;;  %v17855_v4 = vld [vmem:[%s18905_s1 + $0x130] sm:$0xff]  ;;  %v7280_v43 = vld [vmem:[#allocation3 + $0x178] sm:$0xff] }
 0x41a   :  { %7971 = vst.msk [vmem:[#allocation3 + $0xe0] sm:$0xff] %vm226_vm2, %v7907_v22  ;;  %v7910_v39 = vadd.f32 %v14079_v38, %v7264_v29  ;;  %14221 = vmatmul.mubr.msk.f32.gmra.mxu0 %vm23_vm0, %v8516_v18  ;;  %9568 = vperm.xlu1 %14458, %v9386_v33   ;;  %v8453_v0 = vpop.permute.xlu1 %8452  ;;  %v17843_v18 = vld [vmem:[%s18905_s1 + $0x128] sm:$0xff] }
 0x41b   :  { %v8518_v59 = vmul.f32 %v8453_v0, %v8070_v40  ;;  %v7710_v21 = vpop.f32.mrf.mxu1  ;;  %14223 = vmatprep.mubr.msk.f32.mxu0 %vm23_vm0, %v8517_v53  ;;  %10854 = vperm.xlu0 %14490, %v9386_v33   ;;  %v9299_v53 = vld [vmem:[#allocation2 + $0x58] sm:$0xff]  ;;  %v7271_v33 = vld [vmem:[#allocation3 + $0x130] sm:$0xff]  ;;  %v9302_v40 = vld [vmem:[#allocation2 + $0x70] sm:$0xff] }
 0x41c   :  { %7974 = vst.msk [vmem:[#allocation3 + $0xf8] sm:$0xff] %vm226_vm2, %v7910_v39  ;;  %v7909_v54 = vadd.f32 %v7710_v21, %v7263_v7  ;;  %v17794_v25 = vpop.permute.xlu0 %9468  ;;  %v7274_v0 = vld [vmem:[#allocation3 + $0x148] sm:$0xff]  ;;  %v9301_v7 = vld [vmem:[#allocation2 + $0x68] sm:$0xff] }
 0x41d   :  { %v14082_v31 = vpop.f32.mrf.mxu1 }
 0x41e   :  { %7973 = vst.msk [vmem:[#allocation3 + $0xf0] sm:$0xff] %vm226_vm2, %v7909_v54  ;;  %v7912_v28 = vadd.f32 %v14082_v31, %v7266_v23  ;;  %14224 = vmatmul.mubr.msk.f32.gmra.mxu0 %vm23_vm0, %v8518_v59  ;;  %14459 = vset.pattern.permute.xlu1 %v14549_v9  ;;  %v9750_v54 = vmul.f32 %v17794_v25, %v9302_v40  ;;  %v7273_v31 = vld [vmem:[#allocation3 + $0x140] sm:$0xff]  ;;  %v7276_v25 = vld [vmem:[#allocation3 + $0x158] sm:$0xff] }
 0x41f   :  { %10829 = vperm.xlu1 %14459, %v17524_v45   ;;  %v9429_v32 = vpop.permute.xlu1 %9428  ;;  %v7720_v15 = vpop.f32.mrf.mxu1  ;;  %10859 = vperm.xlu0 %14490, %v9387_v61   ;;  %v17811_v45 = vld [vmem:[%s18905_s1 + $0x108] sm:$0xff] }
 0x420   :  { %7976 = vst.msk [vmem:[#allocation3 + $0x108] sm:$0xff] %vm226_vm2, %v7912_v28  ;;  %v9742_v20 = vmul.f32 %v9429_v32, %v9294_v35  ;;  %v7911_v11 = vadd.f32 %v7720_v15, %v7265_v37  ;;  %v17804_v47 = vpop.permute.xlu0 %9478  ;;  %v9304_v28 = vld [vmem:[#allocation2 + $0x80] sm:$0xff]  ;;  %v17869_v37 = vld [vmem:[%s18905_s1 + $0x148] sm:$0xff] }
 0x421   :  { %v14085_v5 = vpop.f32.mrf.mxu1 }
 0x422   :  { %7975 = vst.msk [vmem:[#allocation3 + $0x100] sm:$0xff] %vm226_vm2, %v7911_v11  ;;  %v7914_v12 = vadd.f32 %v14085_v5, %v7268_v56  ;;  %14229 = vmatmul.mubr.msk.f32.vlgmr.msra.gmra.mxu1 %vm23_vm0, %v9742_v20  ;;  %v9752_v11 = vmul.f32 %v17804_v47, %v9304_v28  ;;  %v7275_v5 = vld [vmem:[#allocation3 + $0x150] sm:$0xff] }
 0x423   :  { %14460 = vset.pattern.permute.xlu1 %v14550_v1  ;;  %v9434_v34 = vpop.permute.xlu1 %9433  ;;  %v7730_v30 = vpop.f32.mrf.mxu1  ;;  %10874 = vperm.xlu0 %14490, %v17811_v45  }
 0x424   :  { %7978 = vst.msk [vmem:[#allocation3 + $0x118] sm:$0xff] %vm226_vm2, %v7914_v12  ;;  %v9743_v55 = vmul.f32 %v9434_v34, %v9295_v13  ;;  %v7913_v63 = vadd.f32 %v7730_v30, %v7267_v27  ;;  %9573 = vperm.xlu1 %14460, %v9387_v61   ;;  %v17817_v58 = vpop.permute.xlu0 %9488  ;;  %v9306_v12 = vld [vmem:[#allocation2 + $0x90] sm:$0xff]  ;;  %v7278_v30 = vld [vmem:[#allocation3 + $0x168] sm:$0xff] }
 0x425   :  { %v14088_v36 = vpop.f32.mrf.mxu1 }
 0x426   :  { %7977 = vst.msk [vmem:[#allocation3 + $0x110] sm:$0xff] %vm226_vm2, %v7913_v63  ;;  %v7916_v44 = vadd.f32 %v14088_v36, %v7270_v6  ;;  %14231 = vmatprep.mubr.msk.f32.mxu1 %vm23_vm0, %v9743_v55  ;;  %v17887_v55 = vld [vmem:[%s18905_s1 + $0x150] sm:$0xff]  ;;  %v9754_v6 = vmul.f32 %v17817_v58, %v9306_v12  ;;  %v17901_v58 = vld [vmem:[%s18905_s1 + $0x168] sm:$0xff] }
 0x427   :  { %v9444_v24 = vpop.permute.xlu1 %9443  ;;  %v7740_v17 = vpop.f32.mrf.mxu1  ;;  %14232 = vmatmul.mubr.msk.f32.gmra.mxu1 %vm23_vm0, %v9744_v14  ;;  %10879 = vperm.xlu0 %14490, %v17829_v2  }
 0x428   :  { %7980 = vst.msk [vmem:[#allocation3 + $0x128] sm:$0xff] %vm226_vm2, %v7916_v44  ;;  %v9745_v42 = vmul.f32 %v9444_v24, %v9297_v41  ;;  %v7915_v46 = vadd.f32 %v7740_v17, %v7269_v51  ;;  %9578 = vperm.xlu1 %14460, %v17822_v3   ;;  %v17836_v50 = vpop.permute.xlu0 %9498  ;;  %v7277_v41 = vld [vmem:[#allocation3 + $0x160] sm:$0xff] }
 0x429   :  { %v14091_v48 = vpop.f32.mrf.mxu1 }
 0x42a   :  { %7979 = vst.msk [vmem:[#allocation3 + $0x120] sm:$0xff] %vm226_vm2, %v7915_v46  ;;  %v7918_v16 = vadd.f32 %v14091_v48, %v7272_v60  ;;  %14234 = vmatprep.mubr.msk.f32.mxu1 %vm23_vm0, %v9745_v42  ;;  %v9307_v46 = vld [vmem:[#allocation2 + $0x98] sm:$0xff] }
 0x42b   :  { %v9454_v19 = vpop.permute.xlu1 %9453  ;;  %v7750_v22 = vpop.f32.mrf.mxu1  ;;  %14235 = vmatmul.mubr.msk.f32.gmra.mxu1 %vm23_vm0, %v9746_v57  ;;  %10894 = vperm.xlu0 %14490, %v17843_v18   ;;  %v9308_v57 = vld [vmem:[#allocation2 + $0xa0] sm:$0xff] }
 0x42c   :  { %7982 = vst.msk [vmem:[#allocation3 + $0x138] sm:$0xff] %vm226_vm2, %v7918_v16  ;;  %v9747_v29 = vmul.f32 %v9454_v19, %v9299_v53  ;;  %v7917_v38 = vadd.f32 %v7750_v22, %v7271_v33  ;;  %14461 = vset.pattern.permute.xlu1 %v14549_v9  ;;  %v17850_v39 = vpop.permute.xlu0 %9508  ;;  %v9756_v48 = vmul.f32 %v17836_v50, %v9308_v57  ;;  %v7279_v16 = vld [vmem:[#allocation3 + $0x170] sm:$0xff]  ;;  %v9310_v19 = vld [vmem:[#allocation2 + $0xb0] sm:$0xff]  ;;  %v7282_v50 = vld [vmem:[#allocation3 + $0x188] sm:$0xff] }
 0x42d   :  { %10844 = vperm.xlu1 %14461, %v17756_v10   ;;  %v14094_v59 = vpop.f32.mrf.mxu1 }
 0x42e   :  { %7981 = vst.msk [vmem:[#allocation3 + $0x130] sm:$0xff] %vm226_vm2, %v7917_v38  ;;  %v7920_v21 = vadd.f32 %v14094_v59, %v7274_v0  ;;  %14237 = vmatprep.mubr.msk.f32.mxu1 %vm23_vm0, %v9747_v29  ;;  %v9309_v29 = vld [vmem:[#allocation2 + $0xa8] sm:$0xff]  ;;  %v17916_v0 = vld [vmem:[%s18905_s1 + $0x118] sm:$0xff]  ;;  %v17921_v59 = vld [vmem:[%s18905_s1 + $0x170] sm:$0xff] }
 0x42f   :  { %v9464_v23 = vpop.permute.xlu1 %9463  ;;  %v7760_v35 = vpop.f32.mrf.mxu1  ;;  %14238 = vmatmul.mubr.msk.f32.gmra.mxu1 %vm23_vm0, %v9748_v62  ;;  %10899 = vperm.xlu0 %14490, %v17855_v4  }
 0x430   :  { %7984 = vst.msk [vmem:[#allocation3 + $0x148] sm:$0xff] %vm226_vm2, %v7920_v21  ;;  %v9749_v10 = vmul.f32 %v9464_v23, %v9301_v7  ;;  %v7919_v61 = vadd.f32 %v7760_v35, %v7273_v31  ;;  %v17864_v32 = vpop.permute.xlu0 %9518  ;;  %v9758_v7 = vmul.f32 %v17850_v39, %v9310_v19  ;;  %v9312_v31 = vld [vmem:[#allocation2 + $0xc0] sm:$0xff]  ;;  %v17935_v39 = vld [vmem:[%s18905_s1 + $0x188] sm:$0xff] }
 0x431   :  { %14462 = vset.pattern.permute.xlu1 %v14550_v1  ;;  %v14097_v15 = vpop.f32.mrf.mxu1 }
 0x432   :  { %7983 = vst.msk [vmem:[#allocation3 + $0x140] sm:$0xff] %vm226_vm2, %v7919_v61  ;;  %v7922_v20 = vadd.f32 %v14097_v15, %v7276_v25  ;;  %9588 = vperm.xlu1 %14462, %v17811_v45   ;;  %14240 = vmatprep.mubr.msk.f32.mxu1 %vm23_vm0, %v9749_v10  ;;  %v10671_v45 = vld [vmem:[%s18905_s1 + $0xe0] sm:$0xff]  ;;  %v7284_v61 = vld [vmem:[#allocation3 + $0x198] sm:$0xff]  ;;  %v9311_v15 = vld [vmem:[#allocation2 + $0xb8] sm:$0xff] }
 0x433   :  { %v9474_v56 = vpop.permute.xlu1 %9473  ;;  %v7770_v13 = vpop.f32.mrf.mxu1  ;;  %14241 = vmatmul.mubr.msk.f32.gmra.mxu1 %vm23_vm0, %v9750_v54  ;;  %10914 = vperm.xlu0 %14490, %v17869_v37   ;;  %v7281_v54 = vld [vmem:[#allocation3 + $0x180] sm:$0xff] }
 0x434   :  { %7986 = vst.msk [vmem:[#allocation3 + $0x158] sm:$0xff] %vm226_vm2, %v7922_v20  ;;  %v9751_v14 = vmul.f32 %v9474_v56, %v9303_v26  ;;  %v7921_v34 = vadd.f32 %v7770_v13, %v7275_v5  ;;  %v17879_v27 = vpop.permute.xlu0 %9528  ;;  %v9760_v20 = vmul.f32 %v17864_v32, %v9312_v31  ;;  %v7283_v56 = vld [vmem:[#allocation3 + $0x190] sm:$0xff]  ;;  %v9314_v13 = vld [vmem:[#allocation2 + $0xd0] sm:$0xff] }
 0x435   :  { %v14100_v47 = vpop.f32.mrf.mxu1 }
 0x436   :  { %7985 = vst.msk [vmem:[#allocation3 + $0x150] sm:$0xff] %vm226_vm2, %v7921_v34  ;;  %v7924_v63 = vadd.f32 %v14100_v47, %v7278_v30  ;;  %14463 = vset.pattern.permute.xlu1 %v14549_v9  ;;  %14243 = vmatprep.mubr.msk.f32.mxu1 %vm23_vm0, %v9751_v14  ;;  %v9313_v30 = vld [vmem:[#allocation2 + $0xc8] sm:$0xff]  ;;  %v17950_v47 = vld [vmem:[%s18905_s1 + $0x190] sm:$0xff] }
 0x437   :  { %10849 = vperm.xlu1 %14463, %v10671_v45   ;;  %v9484_v36 = vpop.permute.xlu1 %9483  ;;  %v7780_v44 = vpop.f32.mrf.mxu1  ;;  %14244 = vmatmul.mubr.msk.f32.gmra.mxu1 %vm23_vm0, %v9752_v11  ;;  %v7286_v45 = vld [vmem:[#allocation3 + $0x1a8] sm:$0xff] }
 0x438   :  { %7988 = vst.msk [vmem:[#allocation3 + $0x168] sm:$0xff] %vm226_vm2, %v7924_v63  ;;  %v9753_v24 = vmul.f32 %v9484_v36, %v9305_v8  ;;  %v7923_v51 = vadd.f32 %v7780_v44, %v7277_v41  ;;  %v17895_v17 = vpop.permute.xlu0 %9538  ;;  %10919 = vperm.xlu0 %14490, %v17887_v55   ;;  %v9762_v63 = vmul.f32 %v17879_v27, %v9314_v13  ;;  %v7285_v36 = vld [vmem:[#allocation3 + $0x1a0] sm:$0xff]  ;;  %v9317_v44 = vld [vmem:[#allocation2 + $0xe8] sm:$0xff]  ;;  %v9315_v27 = vld [vmem:[#allocation2 + $0xd8] sm:$0xff] }
 0x439   :  { %v14103_v42 = vpop.f32.mrf.mxu1 }
 0x43a   :  { %7987 = vst.msk [vmem:[#allocation3 + $0x160] sm:$0xff] %vm226_vm2, %v7923_v51  ;;  %v7926_v60 = vadd.f32 %v14103_v42, %v7280_v43  ;;  %14246 = vmatprep.mubr.msk.f32.mxu1 %vm23_vm0, %v9753_v24  ;;  %v7288_v43 = vld [vmem:[#allocation3 + $0x1b8] sm:$0xff] }
 0x43b   :  { %14464 = vset.pattern.permute.xlu1 %v14550_v1  ;;  %v9494_v53 = vpop.permute.xlu1 %9493  ;;  %v7790_v62 = vpop.f32.mrf.mxu1  ;;  %14247 = vmatmul.mubr.msk.f32.gmra.mxu1 %vm23_vm0, %v9754_v6 }
 0x43c   :  { %7990 = vst.msk [vmem:[#allocation3 + $0x178] sm:$0xff] %vm226_vm2, %v7926_v60  ;;  %v9755_v33 = vmul.f32 %v9494_v53, %v9307_v46  ;;  %v7925_v22 = vadd.f32 %v7790_v62, %v7279_v16  ;;  %9593 = vperm.xlu1 %14464, %v17829_v2   ;;  %v17910_v40 = vpop.permute.xlu0 %9543  ;;  %10934 = vperm.xlu0 %14490, %v17901_v58   ;;  %v17964_v46 = vld [vmem:[%s18905_s1 + $0x1a8] sm:$0xff]  ;;  %v7287_v16 = vld [vmem:[#allocation3 + $0x1b0] sm:$0xff] }
 0x43d   :  { %v14106_v38 = vpop.f32.mrf.mxu1  ;;  %v9765_v19 = vmul.f32 %v17910_v40, %v9317_v44 }
 0x43e   :  { %7989 = vst.msk [vmem:[#allocation3 + $0x170] sm:$0xff] %vm226_vm2, %v7925_v22  ;;  %v7928_v2 = vadd.f32 %v14106_v38, %v7282_v50  ;;  %14249 = vmatprep.mubr.msk.f32.mxu1 %vm23_vm0, %v9755_v33  ;;  %v7290_v50 = vld [vmem:[#allocation3 + $0x1c8] sm:$0xff] }
 0x43f   :  { %v9504_v21 = vpop.permute.xlu1 %9503  ;;  %v7800_v23 = vpop.f32.mrf.mxu1  ;;  %14250 = vmatmul.mubr.msk.f32.gmra.mxu1 %vm23_vm0, %v9756_v48 }
 0x440   :  { %7992 = vst.msk [vmem:[#allocation3 + $0x188] sm:$0xff] %vm226_vm2, %v7928_v2  ;;  %v9757_v35 = vmul.f32 %v9504_v21, %v9309_v29  ;;  %v7927_v28 = vadd.f32 %v7800_v23, %v7281_v54  ;;  %9598 = vperm.xlu1 %14464, %v17916_v0   ;;  %v17929_v10 = vpop.permute.xlu0 %9563  ;;  %10939 = vperm.xlu0 %14490, %v17921_v59   ;;  %v17982_v2 = vld [vmem:[%s18905_s1 + $0x1b0] sm:$0xff] }
 0x441   :  { %v14109_v25 = vpop.f32.mrf.mxu1  ;;  %v7289_v21 = vld [vmem:[#allocation3 + $0x1c0] sm:$0xff] }
 0x442   :  { %7991 = vst.msk [vmem:[#allocation3 + $0x180] sm:$0xff] %vm226_vm2, %v7927_v28  ;;  %v7930_v26 = vadd.f32 %v14109_v25, %v7284_v61  ;;  %14252 = vmatprep.mubr.msk.f32.mxu1 %vm23_vm0, %v9757_v35  ;;  %v7292_v25 = vld [vmem:[#allocation3 + $0x1d8] sm:$0xff] }
 0x443   :  { %v9514_v11 = vpop.permute.xlu1 %9513  ;;  %v7810_v5 = vpop.f32.mrf.mxu1  ;;  %14253 = vmatmul.mubr.msk.f32.gmra.mxu1 %vm23_vm0, %v9758_v7  ;;  %v10579_v7 = vld [vmem:[#allocation2 + $0x29] sm:$0xff] }
 0x444   :  { %7994 = vst.msk [vmem:[#allocation3 + $0x198] sm:$0xff] %vm226_vm2, %v7930_v26  ;;  %v9759_v12 = vmul.f32 %v9514_v11, %v9311_v15  ;;  %v7929_v14 = vadd.f32 %v7810_v5, %v7283_v56  ;;  %14465 = vset.pattern.permute.xlu1 %v14549_v9  ;;  %v17943_v34 = vpop.permute.xlu0 %9583  ;;  %10954 = vperm.xlu0 %14490, %v17935_v39   ;;  %v7291_v11 = vld [vmem:[#allocation3 + $0x1d0] sm:$0xff] }
 0x445   :  { %10864 = vperm.xlu1 %14465, %v17822_v3   ;;  %v14112_v32 = vpop.f32.mrf.mxu1  ;;  %v9316_v3 = vld [vmem:[#allocation2 + $0xe0] sm:$0xff] }
 0x446   :  { %7993 = vst.msk [vmem:[#allocation3 + $0x190] sm:$0xff] %vm226_vm2, %v7929_v14  ;;  %v7932_v8 = vadd.f32 %v14112_v32, %v7286_v45  ;;  %14255 = vmatprep.mubr.msk.f32.mxu1 %vm23_vm0, %v9759_v12  ;;  %v9764_v48 = vmul.f32 %v17895_v17, %v9316_v3  ;;  %v10580_v17 = vld [vmem:[#allocation2 + $0x31] sm:$0xff] }
 0x447   :  { %v9524_v6 = vpop.permute.xlu1 %9523  ;;  %v7820_v41 = vpop.f32.mrf.mxu1  ;;  %14256 = vmatmul.mubr.msk.f32.gmra.mxu1 %vm23_vm0, %v9760_v20  ;;  %v11028_v23 = vmul.f32 %v17735_v52, %v10580_v17  ;;  %v10581_v20 = vld [vmem:[#allocation2 + $0x39] sm:$0xff]  ;;  %v17998_v52 = vld [vmem:[%s18905_s1 + $0x1c8] sm:$0xff] }
 0x448   :  { %7996 = vst.msk [vmem:[#allocation3 + $0x1a8] sm:$0xff] %vm226_vm2, %v7932_v8  ;;  %v9761_v57 = vmul.f32 %v9524_v6, %v9313_v30  ;;  %v7931_v24 = vadd.f32 %v7820_v41, %v7285_v36  ;;  %v17957_v51 = vpop.permute.xlu0 %9603  ;;  %10959 = vperm.xlu0 %14490, %v17950_v47   ;;  %v7294_v45 = vld [vmem:[#allocation3 + $0x1e8] sm:$0xff]  ;;  %v7293_v6 = vld [vmem:[#allocation3 + $0x1e0] sm:$0xff] }
 0x449   :  { %14466 = vset.pattern.permute.xlu1 %v14550_v1  ;;  %v14115_v42 = vpop.f32.mrf.mxu1  ;;  %v18010_v30 = vld [vmem:[%s18905_s1 + $0x138] sm:$0xff] }
 0x44a   :  { %7995 = vst.msk [vmem:[#allocation3 + $0x1a0] sm:$0xff] %vm226_vm2, %v7931_v24  ;;  %v7934_v60 = vadd.f32 %v14115_v42, %v7288_v43  ;;  %9608 = vperm.xlu1 %14466, %v17843_v18   ;;  %14258 = vmatprep.mubr.msk.f32.mxu1 %vm23_vm0, %v9761_v57  ;;  %v10675_v18 = vld [vmem:[%s18905_s1 + $0x100] sm:$0xff]  ;;  %v7296_v24 = vld [vmem:[#allocation3 + $0x1f8] sm:$0xff] }
 0x44b   :  { %v9534_v53 = vpop.permute.xlu1 %9533  ;;  %v7830_v62 = vpop.f32.mrf.mxu1  ;;  %14259 = vmatmul.mubr.msk.f32.gmra.mxu1 %vm23_vm0, %v9762_v63  ;;  %v10582_v63 = vld [vmem:[#allocation2 + $0x41] sm:$0xff] }
 0x44c   :  { %7998 = vst.msk [vmem:[#allocation3 + $0x1b8] sm:$0xff] %vm226_vm2, %v7934_v60  ;;  %v9763_v33 = vmul.f32 %v9534_v53, %v9315_v27  ;;  %v7933_v22 = vadd.f32 %v7830_v62, %v7287_v16  ;;  %v17973_v29 = vpop.permute.xlu0 %9623  ;;  %10974 = vperm.xlu0 %14490, %v17964_v46   ;;  %v10703_v27 = vld [vmem:[%s18905_s1 + $0x1e0] sm:$0xff] }
 0x44d   :  { %v14118_v38 = vpop.f32.mrf.mxu1  ;;  %v7295_v60 = vld [vmem:[#allocation3 + $0x1f0] sm:$0xff] }
 0x44e   :  { %7997 = vst.msk [vmem:[#allocation3 + $0x1b0] sm:$0xff] %vm226_vm2, %v7933_v22  ;;  %v7936_v40 = vadd.f32 %v14118_v38, %v7290_v50  ;;  %14467 = vset.pattern.permute.xlu1 %v14549_v9  ;;  %14261 = vmatprep.mubr.msk.f32.mxu1 %vm23_vm0, %v9763_v33  ;;  %v10705_v22 = vld [vmem:[%s18905_s1 + $0x1f0] sm:$0xff] }
 0x44f   :  { %10869 = vperm.xlu1 %14467, %v10675_v18   ;;  %v7840_v54 = vpop.f32.mrf.mxu1  ;;  %14262 = vmatmul.mubr.msk.f32.gmra.mxu1 %vm23_vm0, %v9764_v48  ;;  %v8519_v50 = vld [vmem:[#allocation3] sm:$0xff] }
 0x450   :  { %8000 = vst.msk [vmem:[#allocation3 + $0x1c8] sm:$0xff] %vm226_vm2, %v7936_v40  ;;  %v7935_v31 = vadd.f32 %v7840_v54, %v7289_v21  ;;  %v10710_v35 = vpop.permute.xlu1 %10709  ;;  %v17990_v28 = vpop.permute.xlu0 %9643  ;;  %10979 = vperm.xlu0 %14490, %v17982_v2   ;;  %14264 = vmatprep.mubr.msk.f32.mxu1 %vm23_vm0, %v9765_v19  ;;  %v8520_v19 = vld [vmem:[#allocation3 + $0x8] sm:$0xff] }
 0x451   :  { %v11027_v61 = vmul.f32 %v10710_v35, %v10579_v7  ;;  %v14121_v15 = vpop.f32.mrf.mxu1  ;;  %v10584_v21 = vld [vmem:[#allocation2 + $0x51] sm:$0xff]  ;;  %v8522_v35 = vld [vmem:[#allocation3 + $0x18] sm:$0xff] }
 0x452   :  { %7999 = vst.msk [vmem:[#allocation3 + $0x1c0] sm:$0xff] %vm226_vm2, %v7935_v31  ;;  %v7938_v26 = vadd.f32 %v14121_v15, %v7292_v25 }
 0x453   :  { %14468 = vset.pattern.permute.xlu1 %v14550_v1  ;;  %v7850_v56 = vpop.f32.mrf.mxu1  ;;  %14326 = vmatprep.mubr.msk.f32.mxu0 %vm23_vm0, %v11027_v61 }
 0x454   :  { %8002 = vst.msk [vmem:[#allocation3 + $0x1d8] sm:$0xff] %vm226_vm2, %v7938_v26  ;;  %v7937_v5 = vadd.f32 %v7850_v56, %v7291_v11  ;;  %9613 = vperm.xlu1 %14468, %v17855_v4   ;;  %v10720_v13 = vpop.permute.xlu1 %10719  ;;  %14327 = vmatmul.mubr.msk.f32.vlgmr.msra.gmra.mxu0 %vm23_vm0, %v11028_v23  ;;  %v18005_v12 = vpop.permute.xlu0 %9663  ;;  %v18017_v4 = vld [vmem:[%s18905_s1 + $0x1d0] sm:$0xff]  ;;  %v10679_v23 = vld [vmem:[%s18905_s1 + $0x120] sm:$0xff] }
 0x455   :  { %v11029_v14 = vmul.f32 %v10720_v13, %v10581_v20  ;;  %v14124_v32 = vpop.f32.mrf.mxu1  ;;  %10994 = vperm.xlu0 %14490, %v17998_v52   ;;  %v8521_v20 = vld [vmem:[#allocation3 + $0x10] sm:$0xff] }
 0x456   :  { %8001 = vst.msk [vmem:[#allocation3 + $0x1d0] sm:$0xff] %vm226_vm2, %v7937_v5  ;;  %v7940_v8 = vadd.f32 %v14124_v32, %v7294_v45  ;;  %v10585_v11 = vld [vmem:[#allocation2 + $0x59] sm:$0xff]  ;;  %v10586_v56 = vld [vmem:[#allocation2 + $0x61] sm:$0xff] }
 0x457   :  { %v7860_v36 = vpop.f32.mrf.mxu1  ;;  %14329 = vmatprep.mubr.msk.f32.mxu0 %vm23_vm0, %v11029_v14  ;;  %v8524_v45 = vld [vmem:[#allocation3 + $0x28] sm:$0xff] }
 0x458   :  { %8004 = vst.msk [vmem:[#allocation3 + $0x1e8] sm:$0xff] %vm226_vm2, %v7940_v8  ;;  %v7939_v41 = vadd.f32 %v7860_v36, %v7293_v6  ;;  %9618 = vperm.xlu1 %14468, %v18010_v30   ;;  %v10725_v3 = vpop.permute.xlu1 %10724  ;;  %v18022_v44 = vpop.permute.xlu0 %9683  ;;  %v8523_v36 = vld [vmem:[#allocation3 + $0x20] sm:$0xff] }
 0x459   :  { %v11030_v57 = vmul.f32 %v10725_v3, %v10582_v63  ;;  %v14127_v43 = vpop.f32.mrf.mxu1  ;;  %10999 = vperm.xlu0 %14490, %v18017_v4   ;;  %v10587_v3 = vld [vmem:[#allocation2 + $0x69] sm:$0xff] }
 0x45a   :  { %8003 = vst.msk [vmem:[#allocation3 + $0x1e0] sm:$0xff] %vm226_vm2, %v7939_v41  ;;  %v7942_v42 = vadd.f32 %v14127_v43, %v7296_v24 }
 0x45b   :  { %v7870_v48 = vpop.f32.mrf.mxu1  ;;  %14330 = vmatmul.mubr.msk.f32.gmra.mxu0 %vm23_vm0, %v11030_v57  ;;  %v10588_v57 = vld [vmem:[#allocation2 + $0x71] sm:$0xff] }
 0x45c   :  { %8006 = vst.msk [vmem:[#allocation3 + $0x1f8] sm:$0xff] %vm226_vm2, %v7942_v42  ;;  %v7941_v53 = vadd.f32 %v7870_v48, %v7295_v60  ;;  %14469 = vset.pattern.permute.xlu1 %v14549_v9  ;;  %v10735_v16 = vpop.permute.xlu1 %10734  ;;  %v18032_v62 = vpop.permute.xlu0 %9703  ;;  %v18061_v48 = vld [vmem:[%s18905_s1 + $0x158] sm:$0xff] }
 0x45d   :  { %10884 = vperm.xlu1 %14469, %v17916_v0   ;;  %11009 = vperm.xlu0 %14490, %v10703_v27   ;;  %v10583_v0 = vld [vmem:[#allocation2 + $0x49] sm:$0xff]  ;;  %v11032_v26 = vmul.f32 %v10735_v16, %v10584_v21 }
 0x45e   :  { %8005 = vst.msk [vmem:[#allocation3 + $0x1f0] sm:$0xff] %vm226_vm2, %v7941_v53  ;;  %v14132_v33 = vpop.f32.mrf.mxu0  ;;  %v8526_v27 = vld [vmem:[#allocation3 + $0x38] sm:$0xff] }
 0x45f   :  { %v9166_v18 = vadd.f32 %v14132_v33, %v8520_v19  ;;  %v8525_v33 = vld [vmem:[#allocation3 + $0x30] sm:$0xff] }
 0x460   :  { %v10745_v17 = vpop.permute.xlu1 %10744  ;;  %v8846_v38 = vpop.f32.mrf.mxu0 }
 0x461   :  { %9230 = vst.msk [vmem:[#allocation3 + $0x8] sm:$0xff] %vm226_vm2, %v9166_v18  ;;  %v9165_v40 = vadd.f32 %v8846_v38, %v8519_v50  ;;  %14470 = vset.pattern.permute.xlu1 %v14550_v1  ;;  %v18041_v7 = vpop.permute.xlu0 %9723  ;;  %11019 = vperm.xlu0 %14490, %v10705_v22   ;;  %v11034_v6 = vmul.f32 %v10745_v17, %v10586_v56  ;;  %v10589_v22 = vld [vmem:[#allocation2 + $0x79] sm:$0xff]  ;;  %v10590_v18 = vld [vmem:[#allocation2 + $0x81] sm:$0xff] }
 0x462   :  { %9628 = vperm.xlu1 %14470, %v17869_v37  }
 0x463   :  { %9229 = vst.msk [vmem:[#allocation3] sm:$0xff] %vm226_vm2, %v9165_v40  ;;  %v8528_v40 = vld [vmem:[#allocation3 + $0x48] sm:$0xff] }
 0x464   :  { %v10755_v54 = vpop.permute.xlu1 %10754 }
 0x465   :  { %v10730_v31 = vpop.permute.xlu0 %10729  ;;  %v14135_v61 = vpop.f32.mrf.mxu0  ;;  %v11036_v19 = vmul.f32 %v10755_v54, %v10588_v57 }
 0x466   :  { %v11031_v25 = vmul.f32 %v10730_v31, %v10583_v0  ;;  %v9168_v15 = vadd.f32 %v14135_v61, %v8522_v35  ;;  %14471 = vset.pattern.permute.xlu1 %v14549_v9  ;;  %v8527_v31 = vld [vmem:[#allocation3 + $0x40] sm:$0xff] }
 0x467   :  { %10889 = vperm.xlu1 %14471, %v10679_v23   ;;  %v8856_v37 = vpop.f32.mrf.mxu0  ;;  %v10591_v61 = vld [vmem:[#allocation2 + $0x89] sm:$0xff] }
 0x468   :  { %9232 = vst.msk [vmem:[#allocation3 + $0x18] sm:$0xff] %vm226_vm2, %v9168_v15  ;;  %v9167_v5 = vadd.f32 %v8856_v37, %v8521_v20  ;;  %v10765_v13 = vpop.permute.xlu1 %10764  ;;  %14332 = vmatprep.mubr.msk.f32.mxu0 %vm23_vm0, %v11031_v25  ;;  %v10592_v25 = vld [vmem:[#allocation2 + $0x91] sm:$0xff]  ;;  %v8530_v37 = vld [vmem:[#allocation3 + $0x58] sm:$0xff] }
 0x469   :  { %v10740_v14 = vpop.permute.xlu0 %10739  ;;  %v14138_v32 = vpop.f32.mrf.mxu0  ;;  %14333 = vmatmul.mubr.msk.f32.gmra.mxu0 %vm23_vm0, %v11032_v26  ;;  %v11038_v23 = vmul.f32 %v10765_v13, %v10590_v18 }
 0x46a   :  { %9231 = vst.msk [vmem:[#allocation3 + $0x10] sm:$0xff] %vm226_vm2, %v9167_v5  ;;  %v11033_v8 = vmul.f32 %v10740_v14, %v10585_v11  ;;  %v9170_v63 = vadd.f32 %v14138_v32, %v8524_v45  ;;  %v8529_v14 = vld [vmem:[#allocation3 + $0x50] sm:$0xff] }
 0x46b   :  { %14472 = vset.pattern.permute.xlu1 %v14550_v1  ;;  %v8866_v41 = vpop.f32.mrf.mxu0  ;;  %v10593_v32 = vld [vmem:[#allocation2 + $0x99] sm:$0xff] }
 0x46c   :  { %9234 = vst.msk [vmem:[#allocation3 + $0x28] sm:$0xff] %vm226_vm2, %v9170_v63  ;;  %v9169_v24 = vadd.f32 %v8866_v41, %v8523_v36  ;;  %9633 = vperm.xlu1 %14472, %v17887_v55   ;;  %v10775_v43 = vpop.permute.xlu1 %10774  ;;  %14335 = vmatprep.mubr.msk.f32.mxu0 %vm23_vm0, %v11033_v8  ;;  %v10594_v8 = vld [vmem:[#allocation2 + $0xa1] sm:$0xff]  ;;  %v8532_v36 = vld [vmem:[#allocation3 + $0x68] sm:$0xff] }
 0x46d   :  { %v10750_v42 = vpop.permute.xlu0 %10749  ;;  %v14141_v60 = vpop.f32.mrf.mxu0  ;;  %14336 = vmatmul.mubr.msk.f32.gmra.mxu0 %vm23_vm0, %v11034_v6  ;;  %v11040_v13 = vmul.f32 %v10775_v43, %v10592_v25  ;;  %v8531_v43 = vld [vmem:[#allocation3 + $0x60] sm:$0xff] }
 0x46e   :  { %9233 = vst.msk [vmem:[#allocation3 + $0x20] sm:$0xff] %vm226_vm2, %v9169_v24  ;;  %v11035_v53 = vmul.f32 %v10750_v42, %v10587_v3  ;;  %v9172_v16 = vadd.f32 %v14141_v60, %v8526_v27  ;;  %v9318_v27 = vld [vmem:[#allocation2 + $0xf0] sm:$0xff] }
 0x46f   :  { %v8876_v55 = vpop.f32.mrf.mxu0 }
 0x470   :  { %9236 = vst.msk [vmem:[#allocation3 + $0x38] sm:$0xff] %vm226_vm2, %v9172_v16  ;;  %v9171_v17 = vadd.f32 %v8876_v55, %v8525_v33  ;;  %9638 = vperm.xlu1 %14472, %v18061_v48   ;;  %v10785_v50 = vpop.permute.xlu1 %10784  ;;  %14338 = vmatprep.mubr.msk.f32.mxu0 %vm23_vm0, %v11035_v53  ;;  %v10595_v53 = vld [vmem:[#allocation2 + $0xa9] sm:$0xff]  ;;  %v10683_v16 = vld [vmem:[%s18905_s1 + $0x140] sm:$0xff] }
 0x471   :  { %v10760_v38 = vpop.permute.xlu0 %10759  ;;  %v14144_v0 = vpop.f32.mrf.mxu0  ;;  %14339 = vmatmul.mubr.msk.f32.gmra.mxu0 %vm23_vm0, %v11036_v19  ;;  %v11042_v24 = vmul.f32 %v10785_v50, %v10594_v8  ;;  %v10596_v19 = vld [vmem:[#allocation2 + $0xb1] sm:$0xff]  ;;  %v8534_v55 = vld [vmem:[#allocation3 + $0x78] sm:$0xff] }
 0x472   :  { %9235 = vst.msk [vmem:[#allocation3 + $0x30] sm:$0xff] %vm226_vm2, %v9171_v17  ;;  %v11037_v21 = vmul.f32 %v10760_v38, %v10589_v22  ;;  %v9174_v54 = vadd.f32 %v14144_v0, %v8528_v40  ;;  %v8533_v38 = vld [vmem:[#allocation3 + $0x70] sm:$0xff]  ;;  %v9319_v8 = vld [vmem:[#allocation2 + $0xf8] sm:$0xff] }
 0x473   :  { %v8886_v35 = vpop.f32.mrf.mxu0 }
 0x474   :  { %9238 = vst.msk [vmem:[#allocation3 + $0x48] sm:$0xff] %vm226_vm2, %v9174_v54  ;;  %v9173_v15 = vadd.f32 %v8886_v35, %v8527_v31  ;;  %14473 = vset.pattern.permute.xlu1 %v14549_v9  ;;  %v10795_v26 = vpop.permute.xlu1 %10794  ;;  %14341 = vmatprep.mubr.msk.f32.mxu0 %vm23_vm0, %v11037_v21  ;;  %v10597_v54 = vld [vmem:[#allocation2 + $0xb9] sm:$0xff]  ;;  %v10598_v31 = vld [vmem:[#allocation2 + $0xc1] sm:$0xff] }
 0x475   :  { %10904 = vperm.xlu1 %14473, %v18010_v30   ;;  %v10770_v20 = vpop.permute.xlu0 %10769  ;;  %v14147_v11 = vpop.f32.mrf.mxu0  ;;  %14342 = vmatmul.mubr.msk.f32.gmra.mxu0 %vm23_vm0, %v11038_v23  ;;  %v11044_v0 = vmul.f32 %v10795_v26, %v10596_v19  ;;  %v10599_v23 = vld [vmem:[#allocation2 + $0xc9] sm:$0xff]  ;;  %v8536_v35 = vld [vmem:[#allocation3 + $0x88] sm:$0xff] }
 0x476   :  { %9237 = vst.msk [vmem:[#allocation3 + $0x40] sm:$0xff] %vm226_vm2, %v9173_v15  ;;  %v11039_v56 = vmul.f32 %v10770_v20, %v10591_v61  ;;  %v9176_v5 = vadd.f32 %v14147_v11, %v8530_v37  ;;  %v8535_v11 = vld [vmem:[#allocation3 + $0x80] sm:$0xff] }
 0x477   :  { %v8896_v45 = vpop.f32.mrf.mxu0 }
 0x478   :  { %9240 = vst.msk [vmem:[#allocation3 + $0x58] sm:$0xff] %vm226_vm2, %v9176_v5  ;;  %v9175_v63 = vadd.f32 %v8896_v45, %v8529_v14  ;;  %v10805_v6 = vpop.permute.xlu1 %10804  ;;  %14344 = vmatprep.mubr.msk.f32.mxu0 %vm23_vm0, %v11039_v56  ;;  %v10600_v14 = vld [vmem:[#allocation2 + $0xd1] sm:$0xff]  ;;  %v8538_v45 = vld [vmem:[#allocation3 + $0x98] sm:$0xff] }
 0x479   :  { %14474 = vset.pattern.permute.xlu1 %v14550_v1  ;;  %v10780_v30 = vpop.permute.xlu0 %10779  ;;  %v14150_v41 = vpop.f32.mrf.mxu0  ;;  %14345 = vmatmul.mubr.msk.f32.gmra.mxu0 %vm23_vm0, %v11040_v13  ;;  %v11046_v5 = vmul.f32 %v10805_v6, %v10598_v31 }
 0x47a   :  { %9239 = vst.msk [vmem:[#allocation3 + $0x50] sm:$0xff] %vm226_vm2, %v9175_v63  ;;  %v11041_v3 = vmul.f32 %v10780_v30, %v10593_v32  ;;  %v9178_v57 = vadd.f32 %v14150_v41, %v8532_v36  ;;  %9648 = vperm.xlu1 %14474, %v17901_v58   ;;  %v18101_v63 = vld [vmem:[%s18905_s1 + $0x178] sm:$0xff]  ;;  %v8537_v41 = vld [vmem:[#allocation3 + $0x90] sm:$0xff] }
 0x47b   :  { %v8906_v42 = vpop.f32.mrf.mxu0 }
 0x47c   :  { %9242 = vst.msk [vmem:[#allocation3 + $0x68] sm:$0xff] %vm226_vm2, %v9178_v57  ;;  %v9177_v60 = vadd.f32 %v8906_v42, %v8531_v43  ;;  %14347 = vmatprep.mubr.msk.f32.mxu0 %vm23_vm0, %v11041_v3  ;;  %v9321_v57 = vld [vmem:[#allocation2 + $0x108] sm:$0xff]  ;;  %v10601_v42 = vld [vmem:[#allocation2 + $0xd9] sm:$0xff] }
 0x47d   :  { %v9549_v33 = vpop.permute.xlu1 %9548  ;;  %v14153_v22 = vpop.f32.mrf.mxu0  ;;  %14348 = vmatmul.mubr.msk.f32.gmra.mxu0 %vm23_vm0, %v11042_v24 }
 0x47e   :  { %9241 = vst.msk [vmem:[#allocation3 + $0x60] sm:$0xff] %vm226_vm2, %v9177_v60  ;;  %v9766_v58 = vmul.f32 %v9549_v33, %v9318_v27  ;;  %v10790_v18 = vpop.permute.xlu0 %10789  ;;  %v9180_v17 = vadd.f32 %v14153_v22, %v8534_v55  ;;  %14475 = vset.pattern.permute.xlu1 %v14549_v9  ;;  %v8540_v27 = vld [vmem:[#allocation3 + $0xa8] sm:$0xff]  ;;  %v9769_v33 = vmul.f32 %v17929_v10, %v9321_v57  ;;  %v8539_v22 = vld [vmem:[#allocation3 + $0xa0] sm:$0xff]  ;;  %v10602_v10 = vld [vmem:[#allocation2 + $0xe1] sm:$0xff] }
 0x47f   :  { %v11043_v50 = vmul.f32 %v10790_v18, %v10595_v53  ;;  %10909 = vperm.xlu1 %14475, %v10683_v16   ;;  %v8916_v40 = vpop.f32.mrf.mxu0  ;;  %v9320_v53 = vld [vmem:[#allocation2 + $0x100] sm:$0xff] }
 0x480   :  { %9244 = vst.msk [vmem:[#allocation3 + $0x78] sm:$0xff] %vm226_vm2, %v9180_v17  ;;  %v9179_v21 = vadd.f32 %v8916_v40, %v8533_v38  ;;  %14265 = vmatmul.mubr.msk.f32.gmra.mxu1 %vm23_vm0, %v9766_v58  ;;  %v8542_v38 = vld [vmem:[#allocation3 + $0xb8] sm:$0xff] }
 0x481   :  { %14350 = vmatprep.mubr.msk.f32.mxu0 %vm23_vm0, %v11043_v50  ;;  %v14156_v61 = vpop.f32.mrf.mxu0 }
 0x482   :  { %9243 = vst.msk [vmem:[#allocation3 + $0x70] sm:$0xff] %vm226_vm2, %v9179_v21  ;;  %v10800_v25 = vpop.permute.xlu0 %10799  ;;  %v9182_v15 = vadd.f32 %v14156_v61, %v8536_v35  ;;  %14351 = vmatmul.mubr.msk.f32.gmra.mxu0 %vm23_vm0, %v11044_v0  ;;  %v10810_v20 = vpop.permute.xlu1 %10809  ;;  %v8541_v21 = vld [vmem:[#allocation3 + $0xb0] sm:$0xff] }
 0x483   :  { %v11045_v26 = vmul.f32 %v10800_v25, %v10597_v54  ;;  %v11047_v37 = vmul.f32 %v10810_v20, %v10599_v23  ;;  %14476 = vset.pattern.permute.xlu1 %v14550_v1  ;;  %v8926_v56 = vpop.f32.mrf.mxu0 }
 0x484   :  { %9246 = vst.msk [vmem:[#allocation3 + $0x88] sm:$0xff] %vm226_vm2, %v9182_v15  ;;  %v9181_v13 = vadd.f32 %v8926_v56, %v8535_v11  ;;  %9653 = vperm.xlu1 %14476, %v17921_v59   ;;  %v8543_v15 = vld [vmem:[#allocation3 + $0xc0] sm:$0xff]  ;;  %v10687_v11 = vld [vmem:[%s18905_s1 + $0x160] sm:$0xff] }
 0x485   :  { %14353 = vmatprep.mubr.msk.f32.mxu0 %vm23_vm0, %v11045_v26  ;;  %v14159_v32 = vpop.f32.mrf.mxu0  ;;  %v9322_v26 = vld [vmem:[#allocation2 + $0x110] sm:$0xff] }
 0x486   :  { %9245 = vst.msk [vmem:[#allocation3 + $0x80] sm:$0xff] %vm226_vm2, %v9181_v13  ;;  %v9184_v30 = vadd.f32 %v14159_v32, %v8538_v45  ;;  %14354 = vmatmul.mubr.msk.f32.gmra.mxu0 %vm23_vm0, %v11046_v5  ;;  %v10815_v6 = vpop.permute.xlu0 %10814  ;;  %v10604_v32 = vld [vmem:[#allocation2 + $0xf1] sm:$0xff] }
 0x487   :  { %v11048_v36 = vmul.f32 %v10815_v6, %v10600_v14  ;;  %14356 = vmatprep.mubr.msk.f32.mxu0 %vm23_vm0, %v11047_v37  ;;  %v9554_v59 = vpop.permute.xlu1 %9553  ;;  %v8936_v3 = vpop.f32.mrf.mxu0  ;;  %v8546_v14 = vld [vmem:[#allocation3 + $0xd8] sm:$0xff] }
 0x488   :  { %9248 = vst.msk [vmem:[#allocation3 + $0x98] sm:$0xff] %vm226_vm2, %v9184_v30  ;;  %v9767_v24 = vmul.f32 %v9554_v59, %v9319_v8  ;;  %v9183_v43 = vadd.f32 %v8936_v3, %v8537_v41  ;;  %9658 = vperm.xlu1 %14476, %v18101_v63   ;;  %v8545_v8 = vld [vmem:[#allocation3 + $0xd0] sm:$0xff]  ;;  %v10603_v6 = vld [vmem:[#allocation2 + $0xe9] sm:$0xff]  ;;  %v8548_v3 = vld [vmem:[#allocation3 + $0xe8] sm:$0xff] }
 0x489   :  { %v14162_v60 = vpop.f32.mrf.mxu0  ;;  %v10605_v59 = vld [vmem:[#allocation2 + $0xf9] sm:$0xff] }
 0x48a   :  { %9247 = vst.msk [vmem:[#allocation3 + $0x90] sm:$0xff] %vm226_vm2, %v9183_v43  ;;  %v9186_v16 = vadd.f32 %v14162_v60, %v8540_v27  ;;  %14357 = vmatmul.mubr.msk.f32.gmra.mxu0 %vm23_vm0, %v11048_v36  ;;  %14267 = vmatprep.mubr.msk.f32.mxu1 %vm23_vm0, %v9767_v24  ;;  %v10820_v19 = vpop.permute.xlu0 %10819 }
 0x48b   :  { %v9559_v55 = vpop.permute.xlu1 %9558  ;;  %v8946_v58 = vpop.f32.mrf.mxu0  ;;  %v11049_v18 = vmul.f32 %v10820_v19, %v10601_v42 }
 0x48c   :  { %9250 = vst.msk [vmem:[#allocation3 + $0xa8] sm:$0xff] %vm226_vm2, %v9186_v16  ;;  %v9768_v17 = vmul.f32 %v9559_v55, %v9320_v53  ;;  %v9185_v50 = vadd.f32 %v8946_v58, %v8539_v22  ;;  %14477 = vset.pattern.permute.xlu1 %v14549_v9  ;;  %v8547_v53 = vld [vmem:[#allocation3 + $0xe0] sm:$0xff]  ;;  %v18140_v55 = vld [vmem:[%s18905_s1 + $0x198] sm:$0xff]  ;;  %v8550_v22 = vld [vmem:[#allocation3 + $0xf8] sm:$0xff] }
 0x48d   :  { %10924 = vperm.xlu1 %14477, %v18061_v48   ;;  %v14165_v40 = vpop.f32.mrf.mxu0  ;;  %14359 = vmatprep.mubr.msk.f32.mxu0 %vm23_vm0, %v11049_v18  ;;  %v8544_v48 = vld [vmem:[#allocation3 + $0xc8] sm:$0xff] }
 0x48e   :  { %9249 = vst.msk [vmem:[#allocation3 + $0xa0] sm:$0xff] %vm226_vm2, %v9185_v50  ;;  %v9188_v0 = vadd.f32 %v14165_v40, %v8542_v38  ;;  %14268 = vmatmul.mubr.msk.f32.gmra.mxu1 %vm23_vm0, %v9768_v17  ;;  %v10835_v56 = vpop.permute.xlu0 %10834  ;;  %v8549_v50 = vld [vmem:[#allocation3 + $0xf0] sm:$0xff] }
 0x48f   :  { %v8956_v54 = vpop.f32.mrf.mxu0  ;;  %14270 = vmatprep.mubr.msk.f32.mxu1 %vm23_vm0, %v9769_v33  ;;  %v11052_v43 = vmul.f32 %v10835_v56, %v10604_v32  ;;  %v9323_v33 = vld [vmem:[#allocation2 + $0x118] sm:$0xff]  ;;  %v8553_v56 = vld [vmem:[#allocation3 + $0x110] sm:$0xff]  ;;  %v9326_v32 = vld [vmem:[#allocation2 + $0x130] sm:$0xff] }
 0x490   :  { %9252 = vst.msk [vmem:[#allocation3 + $0xb8] sm:$0xff] %vm226_vm2, %v9188_v0  ;;  %v9187_v23 = vadd.f32 %v8956_v54, %v8541_v21  ;;  %v10825_v31 = vpop.permute.xlu1 %10824  ;;  %v9324_v0 = vld [vmem:[#allocation2 + $0x120] sm:$0xff]  ;;  %v8552_v21 = vld [vmem:[#allocation3 + $0x108] sm:$0xff] }
 0x491   :  { %v11050_v35 = vmul.f32 %v10825_v31, %v10602_v10  ;;  %14478 = vset.pattern.permute.xlu1 %v14550_v1  ;;  %v14168_v61 = vpop.f32.mrf.mxu0  ;;  %v9325_v10 = vld [vmem:[#allocation2 + $0x128] sm:$0xff] }
 0x492   :  { %9251 = vst.msk [vmem:[#allocation3 + $0xb0] sm:$0xff] %vm226_vm2, %v9187_v23  ;;  %v9190_v25 = vadd.f32 %v14168_v61, %v8544_v48  ;;  %9668 = vperm.xlu1 %14478, %v17935_v39   ;;  %v10840_v36 = vpop.permute.xlu0 %10839  ;;  %v8551_v48 = vld [vmem:[#allocation3 + $0x100] sm:$0xff] }
 0x493   :  { %v8966_v20 = vpop.f32.mrf.mxu0  ;;  %14360 = vmatmul.mubr.msk.f32.gmra.mxu0 %vm23_vm0, %v11050_v35  ;;  %v11053_v60 = vmul.f32 %v10840_v36, %v10605_v59 }
 0x494   :  { %9254 = vst.msk [vmem:[#allocation3 + $0xc8] sm:$0xff] %vm226_vm2, %v9190_v25  ;;  %v9189_v37 = vadd.f32 %v8966_v20, %v8543_v15  ;;  %v9773_v25 = vmul.f32 %v17943_v34, %v9325_v10  ;;  %v8554_v20 = vld [vmem:[#allocation3 + $0x118] sm:$0xff]  ;;  %v9327_v10 = vld [vmem:[#allocation2 + $0x138] sm:$0xff] }
 0x495   :  { %v9569_v5 = vpop.permute.xlu1 %9568 }
 0x496   :  { %9253 = vst.msk [vmem:[#allocation3 + $0xc0] sm:$0xff] %vm226_vm2, %v9189_v37  ;;  %v9770_v13 = vmul.f32 %v9569_v5, %v9322_v26  ;;  %v14171_v45 = vpop.f32.mrf.mxu0  ;;  %14479 = vset.pattern.permute.xlu1 %v14549_v9  ;;  %v10606_v37 = vld [vmem:[#allocation2 + $0x101] sm:$0xff] }
 0x497   :  { %v9192_v39 = vadd.f32 %v14171_v45, %v8546_v14  ;;  %10929 = vperm.xlu1 %14479, %v10687_v11  }
 0x498   :  { %v8976_v30 = vpop.f32.mrf.mxu0  ;;  %14271 = vmatmul.mubr.msk.f32.gmra.mxu1 %vm23_vm0, %v9770_v13 }
 0x499   :  { %9256 = vst.msk [vmem:[#allocation3 + $0xd8] sm:$0xff] %vm226_vm2, %v9192_v39  ;;  %v9191_v41 = vadd.f32 %v8976_v30, %v8545_v8  ;;  %v8555_v8 = vld [vmem:[#allocation3 + $0x120] sm:$0xff] }
 0x49a   :  { %v14174_v57 = vpop.f32.mrf.mxu0  ;;  %v10830_v24 = vpop.permute.xlu1 %10829 }
 0x49b   :  { %9255 = vst.msk [vmem:[#allocation3 + $0xd0] sm:$0xff] %vm226_vm2, %v9191_v41  ;;  %v9194_v42 = vadd.f32 %v14174_v57, %v8548_v3  ;;  %v11051_v27 = vmul.f32 %v10830_v24, %v10603_v6  ;;  %14480 = vset.pattern.permute.xlu1 %v14550_v1  ;;  %v10691_v6 = vld [vmem:[%s18905_s1 + $0x180] sm:$0xff]  ;;  %v10855_v41 = vpop.permute.xlu0 %10854  ;;  %v8558_v57 = vld [vmem:[#allocation3 + $0x138] sm:$0xff] }
 0x49c   :  { %v8986_v16 = vpop.f32.mrf.mxu0  ;;  %9673 = vperm.xlu1 %14480, %v17950_v47  }
 0x49d   :  { %9258 = vst.msk [vmem:[#allocation3 + $0xe8] sm:$0xff] %vm226_vm2, %v9194_v42  ;;  %v9193_v19 = vadd.f32 %v8986_v16, %v8547_v53  ;;  %14362 = vmatprep.mubr.msk.f32.mxu0 %vm23_vm0, %v11051_v27  ;;  %v8557_v42 = vld [vmem:[#allocation3 + $0x130] sm:$0xff] }
 0x49e   :  { %v14177_v58 = vpop.f32.mrf.mxu0  ;;  %14363 = vmatmul.mubr.msk.f32.gmra.mxu0 %vm23_vm0, %v11052_v43  ;;  %v10608_v43 = vld [vmem:[#allocation2 + $0x111] sm:$0xff]  ;;  %v10609_v53 = vld [vmem:[#allocation2 + $0x119] sm:$0xff] }
 0x49f   :  { %9257 = vst.msk [vmem:[#allocation3 + $0xe0] sm:$0xff] %vm226_vm2, %v9193_v19  ;;  %v9196_v18 = vadd.f32 %v14177_v58, %v8550_v22  ;;  %v9574_v17 = vpop.permute.xlu1 %9573  ;;  %14365 = vmatprep.mubr.msk.f32.mxu0 %vm23_vm0, %v11053_v60  ;;  %v10607_v60 = vld [vmem:[#allocation2 + $0x109] sm:$0xff]  ;;  %v10860_v19 = vpop.permute.xlu0 %10859 }
 0x4a0   :  { %v9771_v47 = vmul.f32 %v9574_v17, %v9323_v33  ;;  %v8996_v38 = vpop.f32.mrf.mxu0  ;;  %9678 = vperm.xlu1 %14480, %v18140_v55   ;;  %v8560_v33 = vld [vmem:[#allocation3 + $0x148] sm:$0xff] }
 0x4a1   :  { %9260 = vst.msk [vmem:[#allocation3 + $0xf8] sm:$0xff] %vm226_vm2, %v9196_v18  ;;  %v9195_v40 = vadd.f32 %v8996_v38, %v8549_v50  ;;  %v11056_v18 = vmul.f32 %v10855_v41, %v10608_v43  ;;  %v11057_v50 = vmul.f32 %v10860_v19, %v10609_v53  ;;  %v8559_v38 = vld [vmem:[#allocation3 + $0x140] sm:$0xff] }
 0x4a2   :  { %v14180_v54 = vpop.f32.mrf.mxu0  ;;  %14273 = vmatprep.mubr.msk.f32.mxu1 %vm23_vm0, %v9771_v47  ;;  %v10612_v19 = vld [vmem:[#allocation2 + $0x131] sm:$0xff] }
 0x4a3   :  { %9259 = vst.msk [vmem:[#allocation3 + $0xf0] sm:$0xff] %vm226_vm2, %v9195_v40  ;;  %v9198_v23 = vadd.f32 %v14180_v54, %v8552_v21  ;;  %v9579_v31 = vpop.permute.xlu1 %9578  ;;  %v18177_v21 = vld [vmem:[%s18905_s1 + $0x1b8] sm:$0xff]  ;;  %v8562_v54 = vld [vmem:[#allocation3 + $0x158] sm:$0xff] }
 0x4a4   :  { %v9772_v35 = vmul.f32 %v9579_v31, %v9324_v0  ;;  %v9006_v61 = vpop.f32.mrf.mxu0  ;;  %14481 = vset.pattern.permute.xlu1 %v14549_v9 }
 0x4a5   :  { %9262 = vst.msk [vmem:[#allocation3 + $0x108] sm:$0xff] %vm226_vm2, %v9198_v23  ;;  %v9197_v15 = vadd.f32 %v9006_v61, %v8551_v48  ;;  %10944 = vperm.xlu1 %14481, %v18101_v63   ;;  %v8556_v63 = vld [vmem:[#allocation3 + $0x128] sm:$0xff]  ;;  %v8561_v48 = vld [vmem:[#allocation3 + $0x150] sm:$0xff] }
 0x4a6   :  { %v14183_v26 = vpop.f32.mrf.mxu0  ;;  %14274 = vmatmul.mubr.msk.f32.gmra.mxu1 %vm23_vm0, %v9772_v35 }
 0x4a7   :  { %9261 = vst.msk [vmem:[#allocation3 + $0x100] sm:$0xff] %vm226_vm2, %v9197_v15  ;;  %v9200_v11 = vadd.f32 %v14183_v26, %v8554_v20  ;;  %14276 = vmatprep.mubr.msk.f32.mxu1 %vm23_vm0, %v9773_v25  ;;  %v9328_v15 = vld [vmem:[#allocation2 + $0x140] sm:$0xff]  ;;  %v9329_v20 = vld [vmem:[#allocation2 + $0x148] sm:$0xff]  ;;  %v8564_v26 = vld [vmem:[#allocation3 + $0x168] sm:$0xff] }
 0x4a8   :  { %v9016_v5 = vpop.f32.mrf.mxu0  ;;  %v10845_v13 = vpop.permute.xlu1 %10844 }
 0x4a9   :  { %9264 = vst.msk [vmem:[#allocation3 + $0x118] sm:$0xff] %vm226_vm2, %v9200_v11  ;;  %v9199_v34 = vadd.f32 %v9016_v5, %v8553_v56  ;;  %v11054_v14 = vmul.f32 %v10845_v13, %v10606_v37  ;;  %14482 = vset.pattern.permute.xlu1 %v14550_v1  ;;  %v8563_v13 = vld [vmem:[#allocation3 + $0x160] sm:$0xff] }
 0x4aa   :  { %v14186_v45 = vpop.f32.mrf.mxu0  ;;  %9688 = vperm.xlu1 %14482, %v17964_v46  }
 0x4ab   :  { %9263 = vst.msk [vmem:[#allocation3 + $0x110] sm:$0xff] %vm226_vm2, %v9199_v34  ;;  %v9202_v39 = vadd.f32 %v14186_v45, %v8556_v63  ;;  %14366 = vmatmul.mubr.msk.f32.gmra.mxu0 %vm23_vm0, %v11054_v14  ;;  %v9777_v14 = vmul.f32 %v17957_v51, %v9329_v20  ;;  %v8566_v45 = vld [vmem:[#allocation3 + $0x178] sm:$0xff] }
 0x4ac   :  { %v9026_v30 = vpop.f32.mrf.mxu0 }
 0x4ad   :  { %9266 = vst.msk [vmem:[#allocation3 + $0x128] sm:$0xff] %vm226_vm2, %v9202_v39  ;;  %v9201_v36 = vadd.f32 %v9026_v30, %v8555_v8  ;;  %v9589_v59 = vpop.permute.xlu1 %9588  ;;  %v8565_v30 = vld [vmem:[#allocation3 + $0x170] sm:$0xff] }
 0x4ae   :  { %v9774_v3 = vmul.f32 %v9589_v59, %v9326_v32  ;;  %v14189_v46 = vpop.f32.mrf.mxu0  ;;  %14483 = vset.pattern.permute.xlu1 %v14549_v9  ;;  %v10610_v32 = vld [vmem:[#allocation2 + $0x121] sm:$0xff] }
 0x4af   :  { %9265 = vst.msk [vmem:[#allocation3 + $0x120] sm:$0xff] %vm226_vm2, %v9201_v36  ;;  %v9204_v24 = vadd.f32 %v14189_v46, %v8558_v57  ;;  %10949 = vperm.xlu1 %14483, %v10691_v6   ;;  %v9330_v46 = vld [vmem:[#allocation2 + $0x150] sm:$0xff] }
 0x4b0   :  { %v9036_v27 = vpop.f32.mrf.mxu0  ;;  %14277 = vmatmul.mubr.msk.f32.gmra.mxu1 %vm23_vm0, %v9774_v3  ;;  %v10875_v3 = vpop.permute.xlu0 %10874 }
 0x4b1   :  { %9268 = vst.msk [vmem:[#allocation3 + $0x138] sm:$0xff] %vm226_vm2, %v9204_v24  ;;  %v9203_v16 = vadd.f32 %v9036_v27, %v8557_v42  ;;  %v8567_v24 = vld [vmem:[#allocation3 + $0x180] sm:$0xff]  ;;  %v10695_v42 = vld [vmem:[%s18905_s1 + $0x1a0] sm:$0xff] }
 0x4b2   :  { %v14192_v22 = vpop.f32.mrf.mxu0  ;;  %v10850_v58 = vpop.permute.xlu1 %10849 }
 0x4b3   :  { %9267 = vst.msk [vmem:[#allocation3 + $0x130] sm:$0xff] %vm226_vm2, %v9203_v16  ;;  %v9206_v17 = vadd.f32 %v14192_v22, %v8560_v33  ;;  %v11055_v47 = vmul.f32 %v10850_v58, %v10607_v60  ;;  %14484 = vset.pattern.permute.xlu1 %v14550_v1  ;;  %v8570_v16 = vld [vmem:[#allocation3 + $0x198] sm:$0xff]  ;;  %v10613_v22 = vld [vmem:[#allocation2 + $0x139] sm:$0xff] }
 0x4b4   :  { %v9046_v40 = vpop.f32.mrf.mxu0  ;;  %9693 = vperm.xlu1 %14484, %v17982_v2   ;;  %v8569_v58 = vld [vmem:[#allocation3 + $0x190] sm:$0xff] }
 0x4b5   :  { %9270 = vst.msk [vmem:[#allocation3 + $0x148] sm:$0xff] %vm226_vm2, %v9206_v17  ;;  %v9205_v0 = vadd.f32 %v9046_v40, %v8559_v38  ;;  %14368 = vmatprep.mubr.msk.f32.mxu0 %vm23_vm0, %v11055_v47  ;;  %v10611_v17 = vld [vmem:[#allocation2 + $0x129] sm:$0xff]  ;;  %v10880_v47 = vpop.permute.xlu0 %10879  ;;  %v11060_v38 = vmul.f32 %v10875_v3, %v10612_v19  ;;  %v8572_v40 = vld [vmem:[#allocation3 + $0x1a8] sm:$0xff]  ;;  %v10699_v19 = vld [vmem:[%s18905_s1 + $0x1c0] sm:$0xff] }
 0x4b6   :  { %v14195_v23 = vpop.f32.mrf.mxu0  ;;  %14369 = vmatmul.mubr.msk.f32.gmra.mxu0 %vm23_vm0, %v11056_v18  ;;  %v18233_v3 = vld [vmem:[%s18905_s1 + $0x1e8] sm:$0xff] }
 0x4b7   :  { %9269 = vst.msk [vmem:[#allocation3 + $0x140] sm:$0xff] %vm226_vm2, %v9205_v0  ;;  %v9208_v31 = vadd.f32 %v14195_v23, %v8562_v54  ;;  %v9594_v35 = vpop.permute.xlu1 %9593  ;;  %14371 = vmatprep.mubr.msk.f32.mxu0 %vm23_vm0, %v11057_v50  ;;  %v11061_v54 = vmul.f32 %v10880_v47, %v10613_v22  ;;  %v10616_v47 = vld [vmem:[#allocation2 + $0x151] sm:$0xff] }
 0x4b8   :  { %v9775_v2 = vmul.f32 %v9594_v35, %v9327_v10  ;;  %v9056_v61 = vpop.f32.mrf.mxu0  ;;  %9698 = vperm.xlu1 %14484, %v18177_v21   ;;  %v8571_v35 = vld [vmem:[#allocation3 + $0x1a0] sm:$0xff] }
 0x4b9   :  { %9272 = vst.msk [vmem:[#allocation3 + $0x158] sm:$0xff] %vm226_vm2, %v9208_v31  ;;  %v9207_v25 = vadd.f32 %v9056_v61, %v8561_v48  ;;  %v9331_v61 = vld [vmem:[#allocation2 + $0x158] sm:$0xff] }
 0x4ba   :  { %v14198_v37 = vpop.f32.mrf.mxu0  ;;  %14279 = vmatprep.mubr.msk.f32.mxu1 %vm23_vm0, %v9775_v2 }
 0x4bb   :  { %9271 = vst.msk [vmem:[#allocation3 + $0x150] sm:$0xff] %vm226_vm2, %v9207_v25  ;;  %v9210_v11 = vadd.f32 %v14198_v37, %v8564_v26  ;;  %v9599_v56 = vpop.permute.xlu1 %9598  ;;  %v18214_v25 = vld [vmem:[%s18905_s1 + $0x1d8] sm:$0xff] }
 0x4bc   :  { %v9776_v5 = vmul.f32 %v9599_v56, %v9328_v15  ;;  %v9066_v34 = vpop.f32.mrf.mxu0  ;;  %14485 = vset.pattern.permute.xlu1 %v14549_v9  ;;  %v8574_v15 = vld [vmem:[#allocation3 + $0x1b8] sm:$0xff] }
 0x4bd   :  { %9274 = vst.msk [vmem:[#allocation3 + $0x168] sm:$0xff] %vm226_vm2, %v9210_v11  ;;  %v9209_v63 = vadd.f32 %v9066_v34, %v8563_v13  ;;  %10964 = vperm.xlu1 %14485, %v18140_v55   ;;  %v8568_v55 = vld [vmem:[#allocation3 + $0x188] sm:$0xff]  ;;  %v8573_v11 = vld [vmem:[#allocation3 + $0x1b0] sm:$0xff]  ;;  %v9333_v34 = vld [vmem:[#allocation2 + $0x168] sm:$0xff] }
 0x4be   :  { %v14201_v39 = vpop.f32.mrf.mxu0  ;;  %14280 = vmatmul.mubr.msk.f32.gmra.mxu1 %vm23_vm0, %v9776_v5  ;;  %v9332_v13 = vld [vmem:[#allocation2 + $0x160] sm:$0xff] }
 0x4bf   :  { %9273 = vst.msk [vmem:[#allocation3 + $0x160] sm:$0xff] %vm226_vm2, %v9209_v63  ;;  %v9212_v8 = vadd.f32 %v14201_v39, %v8566_v45  ;;  %14282 = vmatprep.mubr.msk.f32.mxu1 %vm23_vm0, %v9777_v14  ;;  %v8576_v14 = vld [vmem:[#allocation3 + $0x1c8] sm:$0xff] }
 0x4c0   :  { %v9076_v6 = vpop.f32.mrf.mxu0  ;;  %v10865_v36 = vpop.permute.xlu1 %10864 }
 0x4c1   :  { %9276 = vst.msk [vmem:[#allocation3 + $0x178] sm:$0xff] %vm226_vm2, %v9212_v8  ;;  %v9211_v51 = vadd.f32 %v9076_v6, %v8565_v30  ;;  %v11058_v59 = vmul.f32 %v10865_v36, %v10610_v32  ;;  %14486 = vset.pattern.permute.xlu1 %v14550_v1  ;;  %v8575_v8 = vld [vmem:[#allocation3 + $0x1c0] sm:$0xff]  ;;  %v9781_v6 = vmul.f32 %v17973_v29, %v9333_v34  ;;  %v8577_v29 = vld [vmem:[#allocation3 + $0x1d0] sm:$0xff] }
 0x4c2   :  { %v14204_v41 = vpop.f32.mrf.mxu0  ;;  %9708 = vperm.xlu1 %14486, %v17998_v52  }
 0x4c3   :  { %9275 = vst.msk [vmem:[#allocation3 + $0x170] sm:$0xff] %vm226_vm2, %v9211_v51  ;;  %v9214_v57 = vadd.f32 %v14204_v41, %v8568_v55  ;;  %14372 = vmatmul.mubr.msk.f32.gmra.mxu0 %vm23_vm0, %v11058_v59  ;;  %v8578_v51 = vld [vmem:[#allocation3 + $0x1d8] sm:$0xff] }
 0x4c4   :  { %v9086_v43 = vpop.f32.mrf.mxu0  ;;  %v10614_v55 = vld [vmem:[#allocation2 + $0x141] sm:$0xff] }
 0x4c5   :  { %9278 = vst.msk [vmem:[#allocation3 + $0x188] sm:$0xff] %vm226_vm2, %v9214_v57  ;;  %v9213_v27 = vadd.f32 %v9086_v43, %v8567_v24  ;;  %v9609_v60 = vpop.permute.xlu1 %9608  ;;  %v8580_v43 = vld [vmem:[#allocation3 + $0x1e8] sm:$0xff] }
 0x4c6   :  { %v9778_v53 = vmul.f32 %v9609_v60, %v9330_v46  ;;  %v14207_v52 = vpop.f32.mrf.mxu0  ;;  %14487 = vset.pattern.permute.xlu1 %v14549_v9 }
 0x4c7   :  { %9277 = vst.msk [vmem:[#allocation3 + $0x180] sm:$0xff] %vm226_vm2, %v9213_v27  ;;  %v9216_v33 = vadd.f32 %v14207_v52, %v8570_v16  ;;  %10969 = vperm.xlu1 %14487, %v10695_v42   ;;  %v10895_v27 = vpop.permute.xlu0 %10894  ;;  %v8579_v16 = vld [vmem:[#allocation3 + $0x1e0] sm:$0xff] }
 0x4c8   :  { %v9096_v18 = vpop.f32.mrf.mxu0  ;;  %14283 = vmatmul.mubr.msk.f32.gmra.mxu1 %vm23_vm0, %v9778_v53  ;;  %v9334_v53 = vld [vmem:[#allocation2 + $0x170] sm:$0xff] }
 0x4c9   :  { %9280 = vst.msk [vmem:[#allocation3 + $0x198] sm:$0xff] %vm226_vm2, %v9216_v33  ;;  %v9215_v50 = vadd.f32 %v9096_v18, %v8569_v58  ;;  %v8582_v18 = vld [vmem:[#allocation3 + $0x1f8] sm:$0xff] }
 0x4ca   :  { %v14210_v0 = vpop.f32.mrf.mxu0  ;;  %v10870_v10 = vpop.permute.xlu1 %10869 }
 0x4cb   :  { %9279 = vst.msk [vmem:[#allocation3 + $0x190] sm:$0xff] %vm226_vm2, %v9215_v50  ;;  %v9218_v23 = vadd.f32 %v14210_v0, %v8572_v40  ;;  %v11059_v31 = vmul.f32 %v10870_v10, %v10611_v17  ;;  %14488 = vset.pattern.permute.xlu1 %v14550_v1  ;;  %v8581_v40 = vld [vmem:[#allocation3 + $0x1f0] sm:$0xff]  ;;  %v10615_v10 = vld [vmem:[#allocation2 + $0x149] sm:$0xff] }
 0x4cc   :  { %v9106_v2 = vpop.f32.mrf.mxu0  ;;  %9713 = vperm.xlu1 %14488, %v18017_v4  }
 0x4cd   :  { %9282 = vst.msk [vmem:[#allocation3 + $0x1a8] sm:$0xff] %vm226_vm2, %v9218_v23  ;;  %v9217_v48 = vadd.f32 %v9106_v2, %v8571_v35  ;;  %14374 = vmatprep.mubr.msk.f32.mxu0 %vm23_vm0, %v11059_v31  ;;  %v11064_v31 = vmul.f32 %v10895_v27, %v10616_v47  ;;  %v9806_v2 = vld [vmem:[#allocation3 + $0x8] sm:$0xff] }
 0x4ce   :  { %v14213_v20 = vpop.f32.mrf.mxu0  ;;  %14375 = vmatmul.mubr.msk.f32.gmra.mxu0 %vm23_vm0, %v11060_v38  ;;  %v10617_v38 = vld [vmem:[#allocation2 + $0x159] sm:$0xff]  ;;  %v10620_v47 = vld [vmem:[#allocation2 + $0x171] sm:$0xff] }
 0x4cf   :  { %9281 = vst.msk [vmem:[#allocation3 + $0x1a0] sm:$0xff] %vm226_vm2, %v9217_v48  ;;  %v9220_v26 = vadd.f32 %v14213_v20, %v8574_v15  ;;  %v9614_v37 = vpop.permute.xlu1 %9613  ;;  %14377 = vmatprep.mubr.msk.f32.mxu0 %vm23_vm0, %v11061_v54  ;;  %v10900_v54 = vpop.permute.xlu0 %10899 }
 0x4d0   :  { %v9779_v4 = vmul.f32 %v9614_v37, %v9331_v61  ;;  %v9116_v56 = vpop.f32.mrf.mxu0  ;;  %9718 = vperm.xlu1 %14488, %v18214_v25   ;;  %v11065_v61 = vmul.f32 %v10900_v54, %v10617_v38  ;;  %v9805_v37 = vld [vmem:[#allocation3] sm:$0xff]  ;;  %v9815_v54 = vld [vmem:[#allocation3 + $0x50] sm:$0xff] }
 0x4d1   :  { %9284 = vst.msk [vmem:[#allocation3 + $0x1b8] sm:$0xff] %vm226_vm2, %v9220_v26  ;;  %v9219_v5 = vadd.f32 %v9116_v56, %v8573_v11  ;;  %v14496_v26 = vld [vmem:[%s18905_s1 + $0x1f0] sm:$0xff]  ;;  %v9335_v56 = vld [vmem:[#allocation2 + $0x178] sm:$0xff] }
 0x4d2   :  { %v14216_v63 = vpop.f32.mrf.mxu0  ;;  %14285 = vmatprep.mubr.msk.f32.mxu1 %vm23_vm0, %v9779_v4 }
 0x4d3   :  { %9283 = vst.msk [vmem:[#allocation3 + $0x1b0] sm:$0xff] %vm226_vm2, %v9219_v5  ;;  %v9222_v45 = vadd.f32 %v14216_v63, %v8576_v14  ;;  %v9619_v39 = vpop.permute.xlu1 %9618  ;;  %v9420_v5 = vld [vmem:[%s18905_s1 + $0x1f8] sm:$0xff] }
 0x4d4   :  { %v9780_v32 = vmul.f32 %v9619_v39, %v9332_v13  ;;  %v9126_v30 = vpop.f32.mrf.mxu0  ;;  %14489 = vset.pattern.permute.xlu1 %v14549_v9  ;;  %v9808_v13 = vld [vmem:[#allocation3 + $0x18] sm:$0xff] }
 0x4d5   :  { %9286 = vst.msk [vmem:[#allocation3 + $0x1c8] sm:$0xff] %vm226_vm2, %v9222_v45  ;;  %v9221_v36 = vadd.f32 %v9126_v30, %v8575_v8  ;;  %10984 = vperm.xlu1 %14489, %v18177_v21   ;;  %v9807_v45 = vld [vmem:[#allocation3 + $0x10] sm:$0xff]  ;;  %v9337_v8 = vld [vmem:[#allocation2 + $0x188] sm:$0xff] }
 0x4d6   :  { %v14219_v59 = vpop.f32.mrf.mxu0  ;;  %14286 = vmatmul.mubr.msk.f32.gmra.mxu1 %vm23_vm0, %v9780_v32  ;;  %v9336_v32 = vld [vmem:[#allocation2 + $0x180] sm:$0xff] }
 0x4d7   :  { %9285 = vst.msk [vmem:[#allocation3 + $0x1c0] sm:$0xff] %vm226_vm2, %v9221_v36  ;;  %v9224_v41 = vadd.f32 %v14219_v59, %v8578_v51  ;;  %14288 = vmatprep.mubr.msk.f32.mxu1 %vm23_vm0, %v9781_v6  ;;  %v9810_v36 = vld [vmem:[#allocation3 + $0x28] sm:$0xff] }
 0x4d8   :  { %v9136_v57 = vpop.f32.mrf.mxu0  ;;  %v10885_v46 = vpop.permute.xlu1 %10884 }
 0x4d9   :  { %9288 = vst.msk [vmem:[#allocation3 + $0x1d8] sm:$0xff] %vm226_vm2, %v9224_v41  ;;  %v9223_v21 = vadd.f32 %v9136_v57, %v8577_v29  ;;  %v11062_v24 = vmul.f32 %v10885_v46, %v10614_v55  ;;  %14491 = vset.pattern.permute.xlu1 %v14550_v1  ;;  %v9785_v41 = vmul.f32 %v17990_v28, %v9337_v8  ;;  %v9809_v29 = vld [vmem:[#allocation3 + $0x20] sm:$0xff]  ;;  %v9811_v28 = vld [vmem:[#allocation3 + $0x30] sm:$0xff]  ;;  %v9341_v8 = vld [vmem:[#allocation2 + $0x1a8] sm:$0xff] }
 0x4da   :  { %v14222_v42 = vpop.f32.mrf.mxu0  ;;  %9728 = vperm.xlu1 %14491, %v18233_v3  }
 0x4db   :  { %9287 = vst.msk [vmem:[#allocation3 + $0x1d0] sm:$0xff] %vm226_vm2, %v9223_v21  ;;  %v9226_v60 = vadd.f32 %v14222_v42, %v8580_v43  ;;  %14378 = vmatmul.mubr.msk.f32.gmra.mxu0 %vm23_vm0, %v11062_v24  ;;  %v10618_v21 = vld [vmem:[#allocation2 + $0x161] sm:$0xff] }
 0x4dc   :  { %v9146_v52 = vpop.f32.mrf.mxu0  ;;  %v9812_v24 = vld [vmem:[#allocation3 + $0x38] sm:$0xff] }
 0x4dd   :  { %9290 = vst.msk [vmem:[#allocation3 + $0x1e8] sm:$0xff] %vm226_vm2, %v9226_v60  ;;  %v9225_v33 = vadd.f32 %v9146_v52, %v8579_v16  ;;  %v9629_v22 = vpop.permute.xlu1 %9628  ;;  %v9338_v52 = vld [vmem:[#allocation2 + $0x190] sm:$0xff] }
 0x4de   :  { %v9782_v58 = vmul.f32 %v9629_v22, %v9334_v53  ;;  %v14225_v17 = vpop.f32.mrf.mxu0  ;;  %14492 = vset.pattern.permute.xlu1 %v14549_v9  ;;  %v9814_v53 = vld [vmem:[#allocation3 + $0x48] sm:$0xff] }
 0x4df   :  { %9289 = vst.msk [vmem:[#allocation3 + $0x1e0] sm:$0xff] %vm226_vm2, %v9225_v33  ;;  %v9228_v50 = vadd.f32 %v14225_v17, %v8582_v18  ;;  %10989 = vperm.xlu1 %14492, %v10699_v19   ;;  %v10915_v19 = vpop.permute.xlu0 %10914 }
 0x4e0   :  { %v9156_v0 = vpop.f32.mrf.mxu0  ;;  %14289 = vmatmul.mubr.msk.f32.gmra.mxu1 %vm23_vm0, %v9782_v58  ;;  %v9813_v58 = vld [vmem:[#allocation3 + $0x40] sm:$0xff] }
 0x4e1   :  { %9292 = vst.msk [vmem:[#allocation3 + $0x1f8] sm:$0xff] %vm226_vm2, %v9228_v50  ;;  %v9227_v23 = vadd.f32 %v9156_v0, %v8581_v40  ;;  %v9816_v50 = vld [vmem:[#allocation3 + $0x58] sm:$0xff]  ;;  %v10621_v40 = vld [vmem:[#allocation2 + $0x179] sm:$0xff] }
 0x4e2   :  { %v10890_v35 = vpop.permute.xlu1 %10889  ;;  %v14230_v48 = vpop.f32.mrf.mxu1 }
 0x4e3   :  { %9291 = vst.msk [vmem:[#allocation3 + $0x1f0] sm:$0xff] %vm226_vm2, %v9227_v23  ;;  %v11063_v15 = vmul.f32 %v10890_v35, %v10615_v10  ;;  %v10452_v20 = vadd.f32 %v14230_v48, %v9806_v2  ;;  %14493 = vset.pattern.permute.xlu1 %v14550_v1  ;;  %v10619_v10 = vld [vmem:[#allocation2 + $0x169] sm:$0xff]  ;;  %v10920_v35 = vpop.permute.xlu0 %10919 }
 0x4e4   :  { %9733 = vperm.xlu1 %14493, %v14496_v26   ;;  %v10132_v4 = vpop.f32.mrf.mxu1 }
 0x4e5   :  { %10516 = vst.msk [vmem:[#allocation3 + $0x8] sm:$0xff] %vm226_vm2, %v10452_v20  ;;  %v10451_v11 = vadd.f32 %v10132_v4, %v9805_v37  ;;  %14380 = vmatprep.mubr.msk.f32.mxu0 %vm23_vm0, %v11063_v15  ;;  %v9818_v20 = vld [vmem:[#allocation3 + $0x68] sm:$0xff]  ;;  %v9817_v4 = vld [vmem:[#allocation3 + $0x60] sm:$0xff] }
 0x4e6   :  { %14381 = vmatmul.mubr.msk.f32.gmra.mxu0 %vm23_vm0, %v11064_v31  ;;  %v11068_v31 = vmul.f32 %v10915_v19, %v10620_v47 }
 0x4e7   :  { %10515 = vst.msk [vmem:[#allocation3] sm:$0xff] %vm226_vm2, %v10451_v11  ;;  %v9634_v1 = vpop.permute.xlu1 %9633  ;;  %v14233_v34 = vpop.f32.mrf.mxu1  ;;  %14383 = vmatprep.mubr.msk.f32.mxu0 %vm23_vm0, %v11065_v61  ;;  %v11069_v61 = vmul.f32 %v10920_v35, %v10621_v40  ;;  %v10624_v40 = vld [vmem:[#allocation2 + $0x191] sm:$0xff] }
 0x4e8   :  { %v9783_v14 = vmul.f32 %v9634_v1, %v9335_v56  ;;  %v10454_v63 = vadd.f32 %v14233_v34, %v9808_v13  ;;  %9738 = vperm.xlu1 %14493, %v9420_v5   ;;  %v9339_v56 = vld [vmem:[#allocation2 + $0x198] sm:$0xff]  ;;  %v9820_v13 = vld [vmem:[#allocation3 + $0x78] sm:$0xff] }
 0x4e9   :  { %v10142_v39 = vpop.f32.mrf.mxu1 }
 0x4ea   :  { %10518 = vst.msk [vmem:[#allocation3 + $0x18] sm:$0xff] %vm226_vm2, %v10454_v63  ;;  %v10453_v30 = vadd.f32 %v10142_v39, %v9807_v45  ;;  %14291 = vmatprep.mubr.msk.f32.mxu1 %vm23_vm0, %v9783_v14  ;;  %v9819_v45 = vld [vmem:[#allocation3 + $0x70] sm:$0xff] }
 0x4eb   :  { %v9639_v6 = vpop.permute.xlu1 %9638  ;;  %v14236_v51 = vpop.f32.mrf.mxu1 }
 0x4ec   :  { %10517 = vst.msk [vmem:[#allocation3 + $0x10] sm:$0xff] %vm226_vm2, %v10453_v30  ;;  %v9784_v59 = vmul.f32 %v9639_v6, %v9336_v32  ;;  %v10456_v55 = vadd.f32 %v14236_v51, %v9810_v36  ;;  %14494 = vset.pattern.permute.xlu1 %v14549_v9  ;;  %v9340_v32 = vld [vmem:[#allocation2 + $0x1a0] sm:$0xff]  ;;  %v9822_v36 = vld [vmem:[#allocation3 + $0x88] sm:$0xff] }
 0x4ed   :  { %11004 = vperm.xlu1 %14494, %v18214_v25   ;;  %v10152_v57 = vpop.f32.mrf.mxu1 }
 0x4ee   :  { %10520 = vst.msk [vmem:[#allocation3 + $0x28] sm:$0xff] %vm226_vm2, %v10456_v55  ;;  %v10455_v46 = vadd.f32 %v10152_v57, %v9809_v29  ;;  %14292 = vmatmul.mubr.msk.f32.gmra.mxu1 %vm23_vm0, %v9784_v59  ;;  %v9821_v29 = vld [vmem:[#allocation3 + $0x80] sm:$0xff] }
 0x4ef   :  { %v14239_v43 = vpop.f32.mrf.mxu1  ;;  %14294 = vmatprep.mubr.msk.f32.mxu1 %vm23_vm0, %v9785_v41  ;;  %v9789_v41 = vmul.f32 %v18005_v12, %v9341_v8 }
 0x4f0   :  { %10519 = vst.msk [vmem:[#allocation3 + $0x20] sm:$0xff] %vm226_vm2, %v10455_v46  ;;  %v10458_v42 = vadd.f32 %v14239_v43, %v9812_v24  ;;  %v10905_v9 = vpop.permute.xlu1 %10904  ;;  %v9824_v24 = vld [vmem:[#allocation3 + $0x98] sm:$0xff] }
 0x4f1   :  { %v11066_v27 = vmul.f32 %v10905_v9, %v10618_v21  ;;  %11014 = vperm.xlu1 %14494, %v18233_v3   ;;  %v10162_v25 = vpop.f32.mrf.mxu1  ;;  %v10622_v21 = vld [vmem:[#allocation2 + $0x181] sm:$0xff] }
 0x4f2   :  { %10522 = vst.msk [vmem:[#allocation3 + $0x38] sm:$0xff] %vm226_vm2, %v10458_v42  ;;  %v10457_v60 = vadd.f32 %v10162_v25, %v9811_v28  ;;  %v9823_v28 = vld [vmem:[#allocation3 + $0x90] sm:$0xff] }
 0x4f3   :  { %v14242_v16 = vpop.f32.mrf.mxu1  ;;  %14384 = vmatmul.mubr.msk.f32.gmra.mxu0 %vm23_vm0, %v11066_v27 }
 0x4f4   :  { %10521 = vst.msk [vmem:[#allocation3 + $0x30] sm:$0xff] %vm226_vm2, %v10457_v60  ;;  %v10460_v33 = vadd.f32 %v14242_v16, %v9814_v53  ;;  %v9826_v60 = vld [vmem:[#allocation3 + $0xa8] sm:$0xff]  ;;  %v9342_v16 = vld [vmem:[#allocation2 + $0x1b0] sm:$0xff] }
 0x4f5   :  { %11024 = vperm.xlu1 %14494, %v9420_v5   ;;  %v9649_v22 = vpop.permute.xlu1 %9648  ;;  %v10172_v18 = vpop.f32.mrf.mxu1 }
 0x4f6   :  { %10524 = vst.msk [vmem:[#allocation3 + $0x48] sm:$0xff] %vm226_vm2, %v10460_v33  ;;  %v9786_v3 = vmul.f32 %v9649_v22, %v9338_v52  ;;  %v10459_v17 = vadd.f32 %v10172_v18, %v9813_v58  ;;  %v9825_v33 = vld [vmem:[#allocation3 + $0xa0] sm:$0xff]  ;;  %v10935_v58 = vpop.permute.xlu0 %10934 }
 0x4f7   :  { %v14245_v38 = vpop.f32.mrf.mxu1 }
 0x4f8   :  { %10523 = vst.msk [vmem:[#allocation3 + $0x40] sm:$0xff] %vm226_vm2, %v10459_v17  ;;  %v10462_v0 = vadd.f32 %v14245_v38, %v9816_v50  ;;  %14295 = vmatmul.mubr.msk.f32.gmra.mxu1 %vm23_vm0, %v9786_v3  ;;  %v9828_v17 = vld [vmem:[#allocation3 + $0xb8] sm:$0xff] }
 0x4f9   :  { %v10182_v23 = vpop.f32.mrf.mxu1  ;;  %v10623_v38 = vld [vmem:[#allocation2 + $0x189] sm:$0xff] }
 0x4fa   :  { %10526 = vst.msk [vmem:[#allocation3 + $0x58] sm:$0xff] %vm226_vm2, %v10462_v0  ;;  %v10461_v2 = vadd.f32 %v10182_v23, %v9815_v54  ;;  %v10910_v48 = vpop.permute.xlu1 %10909  ;;  %v9827_v0 = vld [vmem:[#allocation3 + $0xb0] sm:$0xff] }
 0x4fb   :  { %v11067_v15 = vmul.f32 %v10910_v48, %v10619_v10  ;;  %v14248_v26 = vpop.f32.mrf.mxu1  ;;  %v10625_v54 = vld [vmem:[#allocation2 + $0x199] sm:$0xff]  ;;  %v10940_v48 = vpop.permute.xlu0 %10939 }
 0x4fc   :  { %10525 = vst.msk [vmem:[#allocation3 + $0x50] sm:$0xff] %vm226_vm2, %v10461_v2  ;;  %v10464_v37 = vadd.f32 %v14248_v26, %v9818_v20  ;;  %v11072_v2 = vmul.f32 %v10935_v58, %v10624_v40  ;;  %v11073_v20 = vmul.f32 %v10940_v48, %v10625_v54  ;;  %v11095_v54 = vld [vmem:[#allocation3 + $0x20] sm:$0xff] }
 0x4fd   :  { %v10192_v11 = vpop.f32.mrf.mxu1  ;;  %14386 = vmatprep.mubr.msk.f32.mxu0 %vm23_vm0, %v11067_v15 }
 0x4fe   :  { %10528 = vst.msk [vmem:[#allocation3 + $0x68] sm:$0xff] %vm226_vm2, %v10464_v37  ;;  %v10463_v5 = vadd.f32 %v10192_v11, %v9817_v4  ;;  %14387 = vmatmul.mubr.msk.f32.gmra.mxu0 %vm23_vm0, %v11068_v31  ;;  %v9343_v37 = vld [vmem:[#allocation2 + $0x1b8] sm:$0xff]  ;;  %v11091_v4 = vld [vmem:[#allocation3] sm:$0xff] }
 0x4ff   :  { %v9654_v1 = vpop.permute.xlu1 %9653  ;;  %v14251_v34 = vpop.f32.mrf.mxu1  ;;  %14389 = vmatprep.mubr.msk.f32.mxu0 %vm23_vm0, %v11069_v61  ;;  %v11092_v61 = vld [vmem:[#allocation3 + $0x8] sm:$0xff] }
 0x500   :  { %10527 = vst.msk [vmem:[#allocation3 + $0x60] sm:$0xff] %vm226_vm2, %v10463_v5  ;;  %v9787_v14 = vmul.f32 %v9654_v1, %v9339_v56  ;;  %v10466_v63 = vadd.f32 %v14251_v34, %v9820_v13  ;;  %v9344_v13 = vld [vmem:[#allocation2 + $0x1c0] sm:$0xff]  ;;  %v9345_v34 = vld [vmem:[#allocation2 + $0x1c8] sm:$0xff] }
 0x501   :  { %v10202_v39 = vpop.f32.mrf.mxu1  ;;  %v9793_v8 = vmul.f32 %v18022_v44, %v9345_v34 }
 0x502   :  { %10530 = vst.msk [vmem:[#allocation3 + $0x78] sm:$0xff] %vm226_vm2, %v10466_v63  ;;  %v10465_v30 = vadd.f32 %v10202_v39, %v9819_v45  ;;  %14297 = vmatprep.mubr.msk.f32.mxu1 %vm23_vm0, %v9787_v14  ;;  %v11094_v63 = vld [vmem:[#allocation3 + $0x18] sm:$0xff] }
 0x503   :  { %v9659_v6 = vpop.permute.xlu1 %9658  ;;  %v14254_v51 = vpop.f32.mrf.mxu1 }
 0x504   :  { %10529 = vst.msk [vmem:[#allocation3 + $0x70] sm:$0xff] %vm226_vm2, %v10465_v30  ;;  %v9788_v59 = vmul.f32 %v9659_v6, %v9340_v32  ;;  %v10468_v55 = vadd.f32 %v14254_v51, %v9822_v36  ;;  %v11093_v30 = vld [vmem:[#allocation3 + $0x10] sm:$0xff] }
 0x505   :  { %v10212_v57 = vpop.f32.mrf.mxu1 }
 0x506   :  { %10532 = vst.msk [vmem:[#allocation3 + $0x88] sm:$0xff] %vm226_vm2, %v10468_v55  ;;  %v10467_v46 = vadd.f32 %v10212_v57, %v9821_v29  ;;  %14298 = vmatmul.mubr.msk.f32.gmra.mxu1 %vm23_vm0, %v9788_v59  ;;  %v10626_v59 = vld [vmem:[#allocation2 + $0x1a1] sm:$0xff] }
 0x507   :  { %v14257_v43 = vpop.f32.mrf.mxu1  ;;  %14300 = vmatprep.mubr.msk.f32.mxu1 %vm23_vm0, %v9789_v41 }
 0x508   :  { %10531 = vst.msk [vmem:[#allocation3 + $0x80] sm:$0xff] %vm226_vm2, %v10467_v46  ;;  %v10470_v42 = vadd.f32 %v14257_v43, %v9824_v24  ;;  %v10925_v9 = vpop.permute.xlu1 %10924 }
 0x509   :  { %v11070_v27 = vmul.f32 %v10925_v9, %v10622_v21  ;;  %v10222_v25 = vpop.f32.mrf.mxu1  ;;  %v9346_v9 = vld [vmem:[#allocation2 + $0x1d0] sm:$0xff] }
 0x50a   :  { %10534 = vst.msk [vmem:[#allocation3 + $0x98] sm:$0xff] %vm226_vm2, %v10470_v42  ;;  %v10469_v12 = vadd.f32 %v10222_v25, %v9823_v28 }
 0x50b   :  { %v14260_v53 = vpop.f32.mrf.mxu1  ;;  %14390 = vmatmul.mubr.msk.f32.gmra.mxu0 %vm23_vm0, %v11070_v27 }
 0x50c   :  { %10533 = vst.msk [vmem:[#allocation3 + $0x90] sm:$0xff] %vm226_vm2, %v10469_v12  ;;  %v10472_v52 = vadd.f32 %v14260_v53, %v9826_v60  ;;  %v10955_v12 = vpop.permute.xlu0 %10954 }
 0x50d   :  { %v9669_v19 = vpop.permute.xlu1 %9668  ;;  %v10232_v22 = vpop.f32.mrf.mxu1 }
 0x50e   :  { %10536 = vst.msk [vmem:[#allocation3 + $0xa8] sm:$0xff] %vm226_vm2, %v10472_v52  ;;  %v9790_v18 = vmul.f32 %v9669_v19, %v9342_v16  ;;  %v10471_v3 = vadd.f32 %v10232_v22, %v9825_v33  ;;  %v10627_v33 = vld [vmem:[#allocation2 + $0x1a9] sm:$0xff]  ;;  %v10628_v22 = vld [vmem:[#allocation2 + $0x1b1] sm:$0xff] }
 0x50f   :  { %v14263_v47 = vpop.f32.mrf.mxu1 }
 0x510   :  { %10535 = vst.msk [vmem:[#allocation3 + $0xa0] sm:$0xff] %vm226_vm2, %v10471_v3  ;;  %v10474_v50 = vadd.f32 %v14263_v47, %v9828_v17  ;;  %14301 = vmatmul.mubr.msk.f32.gmra.mxu1 %vm23_vm0, %v9790_v18  ;;  %v11096_v18 = vld [vmem:[#allocation3 + $0x28] sm:$0xff] }
 0x511   :  { %v10242_v10 = vpop.f32.mrf.mxu1  ;;  %v10629_v17 = vld [vmem:[#allocation2 + $0x1b9] sm:$0xff] }
 0x512   :  { %10538 = vst.msk [vmem:[#allocation3 + $0xb8] sm:$0xff] %vm226_vm2, %v10474_v50  ;;  %v10473_v23 = vadd.f32 %v10242_v10, %v9827_v0  ;;  %v10930_v31 = vpop.permute.xlu1 %10929 }
 0x513   :  { %v11071_v35 = vmul.f32 %v10930_v31, %v10623_v38 }
 0x514   :  { %10537 = vst.msk [vmem:[#allocation3 + $0xb0] sm:$0xff] %vm226_vm2, %v10473_v23  ;;  %v14328_v15 = vpop.f32.mrf.mxu0 }
 0x515   :  { %v11738_v26 = vadd.f32 %v14328_v15, %v11092_v61  ;;  %14392 = vmatprep.mubr.msk.f32.mxu0 %vm23_vm0, %v11071_v35  ;;  %v11076_v35 = vmul.f32 %v10955_v12, %v10628_v22  ;;  %v11104_v22 = vld [vmem:[#allocation3 + $0x68] sm:$0xff] }
 0x516   :  { %v11418_v11 = vpop.f32.mrf.mxu0  ;;  %14393 = vmatmul.mubr.msk.f32.gmra.mxu0 %vm23_vm0, %v11072_v2  ;;  %v10960_v2 = vpop.permute.xlu0 %10959 }
 0x517   :  { %11802 = vst.msk [vmem:[#allocation3 + $0x8] sm:$0xff] %vm226_vm2, %v11738_v26  ;;  %v11737_v56 = vadd.f32 %v11418_v11, %v11091_v4  ;;  %v9674_v5 = vpop.permute.xlu1 %9673  ;;  %14395 = vmatprep.mubr.msk.f32.mxu0 %vm23_vm0, %v11073_v20  ;;  %v11077_v15 = vmul.f32 %v10960_v2, %v10629_v17  ;;  %v11098_v26 = vld [vmem:[#allocation3 + $0x38] sm:$0xff]  ;;  %v9347_v4 = vld [vmem:[#allocation2 + $0x1d8] sm:$0xff] }
 0x518   :  { %v9791_v1 = vmul.f32 %v9674_v5, %v9343_v37  ;;  %v11097_v5 = vld [vmem:[#allocation3 + $0x30] sm:$0xff] }
 0x519   :  { %11801 = vst.msk [vmem:[#allocation3] sm:$0xff] %vm226_vm2, %v11737_v56 }
 0x51a   :  { %14303 = vmatprep.mubr.msk.f32.mxu1 %vm23_vm0, %v9791_v1 }
 0x51b   :  { %v9679_v14 = vpop.permute.xlu1 %9678  ;;  %v14331_v45 = vpop.f32.mrf.mxu0 }
 0x51c   :  { %v9792_v39 = vmul.f32 %v9679_v14, %v9344_v13  ;;  %v11740_v32 = vadd.f32 %v14331_v45, %v11094_v63  ;;  %v11100_v14 = vld [vmem:[#allocation3 + $0x48] sm:$0xff]  ;;  %v9348_v45 = vld [vmem:[#allocation2 + $0x1e0] sm:$0xff] }
 0x51d   :  { %v11428_v6 = vpop.f32.mrf.mxu0 }
 0x51e   :  { %v11866_v36 = vld [vmem:[#allocation3 + $0x8] sm:$0xff]  ;;  %11804 = vst.msk [vmem:[#allocation3 + $0x18] sm:$0xff] %vm226_vm2, %v11740_v32  ;;  %v11739_v51 = vadd.f32 %v11428_v6, %v11093_v30  ;;  %14304 = vmatmul.mubr.msk.f32.gmra.mxu1 %vm23_vm0, %v9792_v39  ;;  %v9349_v39 = vld [vmem:[#allocation2 + $0x1e8] sm:$0xff]  ;;  %v11099_v6 = vld [vmem:[#allocation3 + $0x40] sm:$0xff] }
 0x51f   :  { %11930 = vst.msk [vmem:[%s18907_s3 + $0x8] sm:$0xff] %vm226_vm2, %v11866_v36  ;;  %v12132_v55 = vmul.f32 %v11866_v36, %v11866_v36  ;;  %14306 = vmatprep.mubr.msk.f32.mxu1 %vm23_vm0, %v9793_v8  ;;  %v11995_v29 = vsel %vm226_vm2, %v11866_v36, 0.0 }
 0x520   :  { %v11865_v41 = vld [vmem:[#allocation3] sm:$0xff]  ;;  %11803 = vst.msk [vmem:[#allocation3 + $0x10] sm:$0xff] %vm226_vm2, %v11739_v51  ;;  %v10945_v44 = vpop.permute.xlu1 %10944 }
 0x521   :  { %11929 = vst.msk [vmem:[%s18907_s3] sm:$0xff] %vm226_vm2, %v11865_v41  ;;  %v11994_v57 = vsel %vm226_vm2, %v11865_v41, 0.0  ;;  %v12131_v46 = vmul.f32 %v11865_v41, %v11865_v41  ;;  %v11074_v21 = vmul.f32 %v10945_v44, %v10626_v59  ;;  %v12196_v43 = vsel %vm226_vm2, %v12132_v55, 0.0  ;;  %v11102_v44 = vld [vmem:[#allocation3 + $0x58] sm:$0xff] }
 0x522   :  { %v11996_v24 = vadd.f32 %v11995_v29, %v11994_v57  ;;  %v9797_v55 = vmul.f32 %v18032_v62, %v9349_v39  ;;  %v11105_v39 = vld [vmem:[#allocation3 + $0x70] sm:$0xff] }
 0x523   :  { %v12195_v42 = vsel %vm226_vm2, %v12131_v46, 0.0  ;;  %14396 = vmatmul.mubr.msk.f32.gmra.mxu0 %vm23_vm0, %v11074_v21 }
 0x524   :  { %v12197_v27 = vadd.f32 %v12196_v43, %v12195_v42  ;;  %v10630_v43 = vld [vmem:[#allocation2 + $0x1c1] sm:$0xff] }
 0x525   :  { %v11868_v28 = vld [vmem:[#allocation3 + $0x18] sm:$0xff]  ;;  %v9689_v25 = vpop.permute.xlu1 %9688 }
 0x526   :  { %11932 = vst.msk [vmem:[%s18907_s3 + $0x18] sm:$0xff] %vm226_vm2, %v11868_v28  ;;  %v9794_v60 = vmul.f32 %v9689_v25, %v9346_v9  ;;  %v12134_v16 = vmul.f32 %v11868_v28, %v11868_v28  ;;  %v11999_v47 = vsel %vm226_vm2, %v11868_v28, 0.0  ;;  %v11101_v9 = vld [vmem:[#allocation3 + $0x50] sm:$0xff] }
 0x527   :  { %v11867_v53 = vld [vmem:[#allocation3 + $0x10] sm:$0xff] }
 0x528   :  { %11931 = vst.msk [vmem:[%s18907_s3 + $0x10] sm:$0xff] %vm226_vm2, %v11867_v53  ;;  %v11997_v52 = vsel %vm226_vm2, %v11867_v53, 0.0  ;;  %v12133_v19 = vmul.f32 %v11867_v53, %v11867_v53  ;;  %14307 = vmatmul.mubr.msk.f32.gmra.mxu1 %vm23_vm0, %v9794_v60  ;;  %v12200_v48 = vsel %vm226_vm2, %v12134_v16, 0.0 }
 0x529   :  { %v11998_v58 = vadd.f32 %v11997_v52, %v11996_v24  ;;  %v14334_v3 = vpop.f32.mrf.mxu0 }
 0x52a   :  { %v12198_v50 = vsel %vm226_vm2, %v12133_v19, 0.0  ;;  %v11742_v38 = vadd.f32 %v14334_v3, %v11096_v18  ;;  %v10950_v40 = vpop.permute.xlu1 %10949 }
 0x52b   :  { %v12199_v0 = vadd.f32 %v12198_v50, %v12197_v27  ;;  %v11075_v10 = vmul.f32 %v10950_v40, %v10627_v33  ;;  %v11438_v23 = vpop.f32.mrf.mxu0  ;;  %v12000_v31 = vadd.f32 %v11999_v47, %v11998_v58 }
 0x52c   :  { %11806 = vst.msk [vmem:[#allocation3 + $0x28] sm:$0xff] %vm226_vm2, %v11742_v38  ;;  %v11741_v61 = vadd.f32 %v11438_v23, %v11095_v54  ;;  %v9350_v54 = vld [vmem:[#allocation2 + $0x1f0] sm:$0xff]  ;;  %v10975_v23 = vpop.permute.xlu0 %10974 }
 0x52d   :  { %v12201_v20 = vadd.f32 %v12200_v48, %v12199_v0  ;;  %v14337_v37 = vpop.f32.mrf.mxu0  ;;  %14398 = vmatprep.mubr.msk.f32.mxu0 %vm23_vm0, %v11075_v10  ;;  %v11103_v0 = vld [vmem:[#allocation3 + $0x60] sm:$0xff] }
 0x52e   :  { %11805 = vst.msk [vmem:[#allocation3 + $0x20] sm:$0xff] %vm226_vm2, %v11741_v61  ;;  %v11744_v11 = vadd.f32 %v14337_v37, %v11098_v26  ;;  %14399 = vmatmul.mubr.msk.f32.gmra.mxu0 %vm23_vm0, %v11076_v35 }
 0x52f   :  { %v9694_v56 = vpop.permute.xlu1 %9693  ;;  %v11448_v1 = vpop.f32.mrf.mxu0  ;;  %14401 = vmatprep.mubr.msk.f32.mxu0 %vm23_vm0, %v11077_v15 }
 0x530   :  { %11808 = vst.msk [vmem:[#allocation3 + $0x38] sm:$0xff] %vm226_vm2, %v11744_v11  ;;  %v9795_v13 = vmul.f32 %v9694_v56, %v9347_v4  ;;  %v11743_v34 = vadd.f32 %v11448_v1, %v11097_v5  ;;  %v10632_v4 = vld [vmem:[#allocation2 + $0x1d1] sm:$0xff] }
 0x531   :  { %v14340_v63 = vpop.f32.mrf.mxu0 }
 0x532   :  { %11807 = vst.msk [vmem:[#allocation3 + $0x30] sm:$0xff] %vm226_vm2, %v11743_v34  ;;  %v11746_v32 = vadd.f32 %v14340_v63, %v11100_v14  ;;  %14309 = vmatprep.mubr.msk.f32.mxu1 %vm23_vm0, %v9795_v13  ;;  %v11106_v13 = vld [vmem:[#allocation3 + $0x78] sm:$0xff] }
 0x533   :  { %v11870_v8 = vld [vmem:[#allocation3 + $0x28] sm:$0xff]  ;;  %v9699_v30 = vpop.permute.xlu1 %9698  ;;  %v11458_v36 = vpop.f32.mrf.mxu0 }
 0x534   :  { %11934 = vst.msk [vmem:[%s18907_s3 + $0x28] sm:$0xff] %vm226_vm2, %v11870_v8  ;;  %11810 = vst.msk [vmem:[#allocation3 + $0x48] sm:$0xff] %vm226_vm2, %v11746_v32  ;;  %v9796_v51 = vmul.f32 %v9699_v30, %v9348_v45  ;;  %v11745_v59 = vadd.f32 %v11458_v36, %v11099_v6  ;;  %v12136_v57 = vmul.f32 %v11870_v8, %v11870_v8  ;;  %v12003_v28 = vsel %vm226_vm2, %v11870_v8, 0.0  ;;  %v9830_v36 = vld [vmem:[#allocation3 + $0xc8] sm:$0xff] }
 0x535   :  { %v11869_v41 = vld [vmem:[#allocation3 + $0x20] sm:$0xff]  ;;  %v14343_v29 = vpop.f32.mrf.mxu0 }
 0x536   :  { %11933 = vst.msk [vmem:[%s18907_s3 + $0x20] sm:$0xff] %vm226_vm2, %v11869_v41  ;;  %v12001_v46 = vsel %vm226_vm2, %v11869_v41, 0.0  ;;  %v12135_v21 = vmul.f32 %v11869_v41, %v11869_v41  ;;  %11809 = vst.msk [vmem:[#allocation3 + $0x40] sm:$0xff] %vm226_vm2, %v11745_v59  ;;  %v11748_v24 = vadd.f32 %v14343_v29, %v11102_v44  ;;  %14310 = vmatmul.mubr.msk.f32.gmra.mxu1 %vm23_vm0, %v9796_v51  ;;  %v12204_v18 = vsel %vm226_vm2, %v12136_v57, 0.0  ;;  %v10631_v59 = vld [vmem:[#allocation2 + $0x1c9] sm:$0xff]  ;;  %v10633_v41 = vld [vmem:[#allocation2 + $0x1d9] sm:$0xff] }
 0x537   :  { %v12002_v42 = vadd.f32 %v12001_v46, %v12000_v31  ;;  %v11872_v62 = vld [vmem:[#allocation3 + $0x38] sm:$0xff]  ;;  %14312 = vmatprep.mubr.msk.f32.mxu1 %vm23_vm0, %v9797_v55  ;;  %v11468_v27 = vpop.f32.mrf.mxu0  ;;  %v11080_v55 = vmul.f32 %v10975_v23, %v10632_v4 }
 0x538   :  { %v12202_v25 = vsel %vm226_vm2, %v12135_v21, 0.0  ;;  %11936 = vst.msk [vmem:[%s18907_s3 + $0x38] sm:$0xff] %vm226_vm2, %v11872_v62  ;;  %11812 = vst.msk [vmem:[#allocation3 + $0x58] sm:$0xff] %vm226_vm2, %v11748_v24  ;;  %v11747_v12 = vadd.f32 %v11468_v27, %v11101_v9  ;;  %v10965_v60 = vpop.permute.xlu1 %10964  ;;  %v12138_v16 = vmul.f32 %v11872_v62, %v11872_v62  ;;  %v12007_v31 = vsel %vm226_vm2, %v11872_v62, 0.0  ;;  %v11108_v62 = vld [vmem:[#allocation3 + $0x88] sm:$0xff] }
 0x539   :  { %v12203_v53 = vadd.f32 %v12202_v25, %v12201_v20  ;;  %v11871_v52 = vld [vmem:[#allocation3 + $0x30] sm:$0xff]  ;;  %v12004_v19 = vadd.f32 %v12003_v28, %v12002_v42  ;;  %v11078_v33 = vmul.f32 %v10965_v60, %v10630_v43  ;;  %v14346_v58 = vpop.f32.mrf.mxu0  ;;  %v10980_v28 = vpop.permute.xlu0 %10979 }
 0x53a   :  { %11935 = vst.msk [vmem:[%s18907_s3 + $0x30] sm:$0xff] %vm226_vm2, %v11871_v52  ;;  %v12005_v3 = vsel %vm226_vm2, %v11871_v52, 0.0  ;;  %v12137_v17 = vmul.f32 %v11871_v52, %v11871_v52  ;;  %11811 = vst.msk [vmem:[#allocation3 + $0x50] sm:$0xff] %vm226_vm2, %v11747_v12  ;;  %v11750_v47 = vadd.f32 %v14346_v58, %v11104_v22  ;;  %v12208_v48 = vsel %vm226_vm2, %v12138_v16, 0.0  ;;  %v9829_v52 = vld [vmem:[#allocation3 + $0xc0] sm:$0xff] }
 0x53b   :  { %v12006_v50 = vadd.f32 %v12005_v3, %v12004_v19  ;;  %v12205_v38 = vadd.f32 %v12204_v18, %v12203_v53  ;;  %v11874_v40 = vld [vmem:[#allocation3 + $0x48] sm:$0xff]  ;;  %v11478_v10 = vpop.f32.mrf.mxu0  ;;  %14402 = vmatmul.mubr.msk.f32.gmra.mxu0 %vm23_vm0, %v11078_v33  ;;  %v11081_v33 = vmul.f32 %v10980_v28, %v10633_v41  ;;  %v11107_v3 = vld [vmem:[#allocation3 + $0x80] sm:$0xff] }
 0x53c   :  { %v12206_v35 = vsel %vm226_vm2, %v12137_v17, 0.0  ;;  %11938 = vst.msk [vmem:[%s18907_s3 + $0x48] sm:$0xff] %vm226_vm2, %v11874_v40  ;;  %11814 = vst.msk [vmem:[#allocation3 + $0x68] sm:$0xff] %vm226_vm2, %v11750_v47  ;;  %v11749_v2 = vadd.f32 %v11478_v10, %v11103_v0  ;;  %v12140_v11 = vmul.f32 %v11874_v40, %v11874_v40  ;;  %v12011_v8 = vsel %vm226_vm2, %v11874_v40, 0.0  ;;  %v9351_v10 = vld [vmem:[#allocation2 + $0x1f8] sm:$0xff] }
 0x53d   :  { %v12207_v61 = vadd.f32 %v12206_v35, %v12205_v38  ;;  %v11873_v15 = vld [vmem:[#allocation3 + $0x40] sm:$0xff]  ;;  %v12008_v20 = vadd.f32 %v12007_v31, %v12006_v50  ;;  %v9709_v26 = vpop.permute.xlu1 %9708  ;;  %v14349_v37 = vpop.f32.mrf.mxu0  ;;  %v11110_v35 = vld [vmem:[#allocation3 + $0x98] sm:$0xff] }
 0x53e   :  { %11937 = vst.msk [vmem:[%s18907_s3 + $0x40] sm:$0xff] %vm226_vm2, %v11873_v15  ;;  %v12009_v56 = vsel %vm226_vm2, %v11873_v15, 0.0  ;;  %v12139_v5 = vmul.f32 %v11873_v15, %v11873_v15  ;;  %11813 = vst.msk [vmem:[#allocation3 + $0x60] sm:$0xff] %vm226_vm2, %v11749_v2  ;;  %v9798_v1 = vmul.f32 %v9709_v26, %v9350_v54  ;;  %v11752_v45 = vadd.f32 %v14349_v37, %v11106_v13 }
 0x53f   :  { %v12010_v34 = vadd.f32 %v12009_v56, %v12008_v20  ;;  %v12209_v14 = vadd.f32 %v12208_v48, %v12207_v61  ;;  %v11876_v63 = vld [vmem:[#allocation3 + $0x58] sm:$0xff]  ;;  %v11488_v32 = vpop.f32.mrf.mxu0  ;;  %v12212_v21 = vsel %vm226_vm2, %v12140_v11, 0.0 }
 0x540   :  { %v12210_v30 = vsel %vm226_vm2, %v12139_v5, 0.0  ;;  %11940 = vst.msk [vmem:[%s18907_s3 + $0x58] sm:$0xff] %vm226_vm2, %v11876_v63  ;;  %v11751_v6 = vadd.f32 %v11488_v32, %v11105_v39  ;;  %v14266_v51 = vpop.f32.mrf.mxu1  ;;  %14313 = vmatmul.mubr.msk.f32.gmra.mxu1 %vm23_vm0, %v9798_v1  ;;  %11816 = vst.msk [vmem:[#allocation3 + $0x78] sm:$0xff] %vm226_vm2, %v11752_v45  ;;  %v12142_v24 = vmul.f32 %v11876_v63, %v11876_v63  ;;  %v12015_v22 = vsel %vm226_vm2, %v11876_v63, 0.0  ;;  %v9352_v63 = vld [vmem:[#allocation2 + $0x200] sm:$0xff]  ;;  %v9353_v45 = vld [vmem:[#allocation2 + $0x208] sm:$0xff] }
 0x541   :  { %v12211_v44 = vadd.f32 %v12210_v30, %v12209_v14  ;;  %v11875_v29 = vld [vmem:[#allocation3 + $0x50] sm:$0xff]  ;;  %v12012_v57 = vadd.f32 %v12011_v8, %v12010_v34  ;;  %v10476_v46 = vadd.f32 %v14266_v51, %v9830_v36 }
 0x542   :  { %11939 = vst.msk [vmem:[%s18907_s3 + $0x50] sm:$0xff] %vm226_vm2, %v11875_v29  ;;  %v12013_v43 = vsel %vm226_vm2, %v11875_v29, 0.0  ;;  %v12141_v42 = vmul.f32 %v11875_v29, %v11875_v29  ;;  %11815 = vst.msk [vmem:[#allocation3 + $0x70] sm:$0xff] %vm226_vm2, %v11751_v6  ;;  %v14352_v9 = vpop.f32.mrf.mxu0  ;;  %v10970_v27 = vpop.permute.xlu1 %10969  ;;  %v12216_v54 = vsel %vm226_vm2, %v12142_v24, 0.0  ;;  %v11109_v14 = vld [vmem:[#allocation3 + $0x90] sm:$0xff]  ;;  %v11112_v6 = vld [vmem:[#allocation3 + $0xa8] sm:$0xff]  ;;  %v9801_v24 = vmul.f32 %v18041_v7, %v9353_v45 }
 0x543   :  { %v12014_v25 = vadd.f32 %v12013_v43, %v12012_v57  ;;  %v12213_v12 = vadd.f32 %v12212_v21, %v12211_v44  ;;  %v11878_v60 = vld [vmem:[#allocation3 + $0x68] sm:$0xff]  ;;  %10540 = vst.msk [vmem:[#allocation3 + $0xc8] sm:$0xff] %vm226_vm2, %v10476_v46  ;;  %v11754_v53 = vadd.f32 %v14352_v9, %v11108_v62  ;;  %v11079_v16 = vmul.f32 %v10970_v27, %v10631_v59  ;;  %v10252_v19 = vpop.f32.mrf.mxu1  ;;  %v11111_v62 = vld [vmem:[#allocation3 + $0xa0] sm:$0xff] }
 0x544   :  { %v12214_v58 = vsel %vm226_vm2, %v12141_v42, 0.0  ;;  %11942 = vst.msk [vmem:[%s18907_s3 + $0x68] sm:$0xff] %vm226_vm2, %v11878_v60  ;;  %v10475_v18 = vadd.f32 %v10252_v19, %v9829_v52  ;;  %v11498_v17 = vpop.f32.mrf.mxu0  ;;  %v12144_v50 = vmul.f32 %v11878_v60, %v11878_v60  ;;  %v12019_v26 = vsel %vm226_vm2, %v11878_v60, 0.0  ;;  %v9832_v52 = vld [vmem:[#allocation3 + $0xd8] sm:$0xff] }
 0x545   :  { %v12215_v47 = vadd.f32 %v12214_v58, %v12213_v12  ;;  %v11877_v38 = vld [vmem:[#allocation3 + $0x60] sm:$0xff]  ;;  %v12016_v40 = vadd.f32 %v12015_v22, %v12014_v25  ;;  %11818 = vst.msk [vmem:[#allocation3 + $0x88] sm:$0xff] %vm226_vm2, %v11754_v53  ;;  %v11753_v0 = vadd.f32 %v11498_v17, %v11107_v3  ;;  %14404 = vmatprep.mubr.msk.f32.mxu0 %vm23_vm0, %v11079_v16  ;;  %v10634_v12 = vld [vmem:[#allocation2 + $0x1e1] sm:$0xff] }
 0x546   :  { %11941 = vst.msk [vmem:[%s18907_s3 + $0x60] sm:$0xff] %vm226_vm2, %v11877_v38  ;;  %v12017_v23 = vsel %vm226_vm2, %v11877_v38, 0.0  ;;  %v12143_v31 = vmul.f32 %v11877_v38, %v11877_v38  ;;  %10539 = vst.msk [vmem:[#allocation3 + $0xc0] sm:$0xff] %vm226_vm2, %v10475_v18  ;;  %v14355_v2 = vpop.f32.mrf.mxu0  ;;  %14405 = vmatmul.mubr.msk.f32.gmra.mxu0 %vm23_vm0, %v11080_v55  ;;  %v12220_v5 = vsel %vm226_vm2, %v12144_v50, 0.0  ;;  %v9831_v50 = vld [vmem:[#allocation3 + $0xd0] sm:$0xff] }
 0x547   :  { %v12018_v48 = vadd.f32 %v12017_v23, %v12016_v40  ;;  %v12217_v61 = vadd.f32 %v12216_v54, %v12215_v47  ;;  %11817 = vst.msk [vmem:[#allocation3 + $0x80] sm:$0xff] %vm226_vm2, %v11753_v0  ;;  %v11756_v15 = vadd.f32 %v14355_v2, %v11110_v35  ;;  %v9714_v20 = vpop.permute.xlu1 %9713  ;;  %14407 = vmatprep.mubr.msk.f32.mxu0 %vm23_vm0, %v11081_v33  ;;  %v11880_v4 = vld [vmem:[#allocation3 + $0x78] sm:$0xff]  ;;  %v9354_v2 = vld [vmem:[#allocation2 + $0x210] sm:$0xff] }
 0x548   :  { %v12218_v37 = vsel %vm226_vm2, %v12143_v31, 0.0  ;;  %v9799_v11 = vmul.f32 %v9714_v20, %v9351_v10  ;;  %v11508_v56 = vpop.f32.mrf.mxu0  ;;  %11944 = vst.msk [vmem:[%s18907_s3 + $0x78] sm:$0xff] %vm226_vm2, %v11880_v4  ;;  %v12146_v39 = vmul.f32 %v11880_v4, %v11880_v4  ;;  %v12023_v44 = vsel %vm226_vm2, %v11880_v4, 0.0  ;;  %v11114_v31 = vld [vmem:[#allocation3 + $0xb8] sm:$0xff] }
 0x549   :  { %v12219_v1 = vadd.f32 %v12218_v37, %v12217_v61  ;;  %v11879_v13 = vld [vmem:[#allocation3 + $0x70] sm:$0xff]  ;;  %v12020_v34 = vadd.f32 %v12019_v26, %v12018_v48  ;;  %11820 = vst.msk [vmem:[#allocation3 + $0x98] sm:$0xff] %vm226_vm2, %v11756_v15  ;;  %v11755_v30 = vadd.f32 %v11508_v56, %v11109_v14 }
 0x54a   :  { %11943 = vst.msk [vmem:[%s18907_s3 + $0x70] sm:$0xff] %vm226_vm2, %v11879_v13  ;;  %v12021_v32 = vsel %vm226_vm2, %v11879_v13, 0.0  ;;  %v12145_v8 = vmul.f32 %v11879_v13, %v11879_v13  ;;  %v14358_v36 = vpop.f32.mrf.mxu0  ;;  %14315 = vmatprep.mubr.msk.f32.mxu1 %vm23_vm0, %v9799_v11  ;;  %v12224_v9 = vsel %vm226_vm2, %v12146_v39, 0.0  ;;  %v11113_v11 = vld [vmem:[#allocation3 + $0xb0] sm:$0xff] }
 0x54b   :  { %v12022_v51 = vadd.f32 %v12021_v32, %v12020_v34  ;;  %v12221_v59 = vadd.f32 %v12220_v5, %v12219_v1  ;;  %v11758_v55 = vadd.f32 %v14358_v36, %v11112_v6  ;;  %v9719_v41 = vpop.permute.xlu1 %9718  ;;  %11819 = vst.msk [vmem:[#allocation3 + $0x90] sm:$0xff] %vm226_vm2, %v11755_v30  ;;  %v10995_v5 = vpop.permute.xlu0 %10994  ;;  %v9834_v36 = vld [vmem:[#allocation3 + $0xe8] sm:$0xff] }
 0x54c   :  { %v12222_v29 = vsel %vm226_vm2, %v12145_v8, 0.0  ;;  %v11882_v57 = vld [vmem:[#allocation3 + $0x88] sm:$0xff]  ;;  %v9800_v46 = vmul.f32 %v9719_v41, %v9352_v63  ;;  %v11518_v21 = vpop.f32.mrf.mxu0 }
 0x54d   :  { %v12223_v43 = vadd.f32 %v12222_v29, %v12221_v59  ;;  %11946 = vst.msk [vmem:[%s18907_s3 + $0x88] sm:$0xff] %vm226_vm2, %v11882_v57  ;;  %v12024_v42 = vadd.f32 %v12023_v44, %v12022_v51  ;;  %11822 = vst.msk [vmem:[#allocation3 + $0xa8] sm:$0xff] %vm226_vm2, %v11758_v55  ;;  %v11757_v28 = vadd.f32 %v11518_v21, %v11111_v62  ;;  %v12027_v3 = vsel %vm226_vm2, %v11882_v57, 0.0  ;;  %v10635_v59 = vld [vmem:[#allocation2 + $0x1e9] sm:$0xff]  ;;  %v10636_v55 = vld [vmem:[#allocation2 + $0x1f1] sm:$0xff] }
 0x54e   :  { %v11881_v27 = vld [vmem:[#allocation3 + $0x80] sm:$0xff]  ;;  %v14269_v25 = vpop.f32.mrf.mxu1  ;;  %14316 = vmatmul.mubr.msk.f32.gmra.mxu1 %vm23_vm0, %v9800_v46  ;;  %v12148_v60 = vmul.f32 %v11882_v57, %v11882_v57  ;;  %v10637_v57 = vld [vmem:[#allocation2 + $0x1f9] sm:$0xff] }
 0x54f   :  { %11945 = vst.msk [vmem:[%s18907_s3 + $0x80] sm:$0xff] %vm226_vm2, %v11881_v27  ;;  %v12025_v7 = vsel %vm226_vm2, %v11881_v27, 0.0  ;;  %v12147_v53 = vmul.f32 %v11881_v27, %v11881_v27  ;;  %v12225_v16 = vadd.f32 %v12224_v9, %v12223_v43  ;;  %14318 = vmatprep.mubr.msk.f32.mxu1 %vm23_vm0, %v9801_v24  ;;  %11821 = vst.msk [vmem:[#allocation3 + $0xa0] sm:$0xff] %vm226_vm2, %v11757_v28  ;;  %v9833_v43 = vld [vmem:[#allocation3 + $0xe0] sm:$0xff] }
 0x550   :  { %v12026_v19 = vadd.f32 %v12025_v7, %v12024_v42  ;;  %v11884_v33 = vld [vmem:[#allocation3 + $0x98] sm:$0xff]  ;;  %v10478_v22 = vadd.f32 %v14269_v25, %v9832_v52  ;;  %v10985_v58 = vpop.permute.xlu1 %10984  ;;  %v10262_v18 = vpop.f32.mrf.mxu1  ;;  %v12228_v10 = vsel %vm226_vm2, %v12148_v60, 0.0  ;;  %v11084_v25 = vmul.f32 %v10995_v5, %v10636_v55  ;;  %v9355_v52 = vld [vmem:[#allocation2 + $0x218] sm:$0xff] }
 0x551   :  { %v12226_v17 = vsel %vm226_vm2, %v12147_v53, 0.0  ;;  %11948 = vst.msk [vmem:[%s18907_s3 + $0x98] sm:$0xff] %vm226_vm2, %v11884_v33  ;;  %v11082_v47 = vmul.f32 %v10985_v58, %v10634_v12  ;;  %v10477_v0 = vadd.f32 %v10262_v18, %v9831_v50  ;;  %v12150_v54 = vmul.f32 %v11884_v33, %v11884_v33  ;;  %v11000_v12 = vpop.permute.xlu0 %10999 }
 0x552   :  { %v12227_v38 = vadd.f32 %v12226_v17, %v12225_v16  ;;  %v12028_v40 = vadd.f32 %v12027_v3, %v12026_v19  ;;  %10542 = vst.msk [vmem:[#allocation3 + $0xd8] sm:$0xff] %vm226_vm2, %v10478_v22  ;;  %v11883_v23 = vld [vmem:[#allocation3 + $0x90] sm:$0xff]  ;;  %v12031_v1 = vsel %vm226_vm2, %v11884_v33, 0.0  ;;  %v11085_v7 = vmul.f32 %v11000_v12, %v10637_v57  ;;  %v11116_v19 = vld [vmem:[#allocation3 + $0xc8] sm:$0xff] }
 0x553   :  { %v14361_v35 = vpop.f32.mrf.mxu0  ;;  %14408 = vmatmul.mubr.msk.f32.gmra.mxu0 %vm23_vm0, %v11082_v47  ;;  %11947 = vst.msk [vmem:[%s18907_s3 + $0x90] sm:$0xff] %vm226_vm2, %v11883_v23  ;;  %v12029_v48 = vsel %vm226_vm2, %v11883_v23, 0.0  ;;  %v12149_v61 = vmul.f32 %v11883_v23, %v11883_v23  ;;  %10541 = vst.msk [vmem:[#allocation3 + $0xd0] sm:$0xff] %vm226_vm2, %v10477_v0  ;;  %v12232_v32 = vsel %vm226_vm2, %v12150_v54, 0.0  ;;  %v9356_v54 = vld [vmem:[#allocation2 + $0x220] sm:$0xff] }
 0x554   :  { %v12229_v15 = vadd.f32 %v12228_v10, %v12227_v38  ;;  %v11886_v20 = vld [vmem:[#allocation3 + $0xa8] sm:$0xff]  ;;  %v11760_v26 = vadd.f32 %v14361_v35, %v11114_v31  ;;  %v12030_v37 = vadd.f32 %v12029_v48, %v12028_v40  ;;  %v11115_v38 = vld [vmem:[#allocation3 + $0xc0] sm:$0xff] }
 0x555   :  { %11950 = vst.msk [vmem:[%s18907_s3 + $0xa8] sm:$0xff] %vm226_vm2, %v11886_v20  ;;  %v9729_v4 = vpop.permute.xlu1 %9728  ;;  %v11528_v56 = vpop.f32.mrf.mxu0  ;;  %v12230_v13 = vsel %vm226_vm2, %v12149_v61, 0.0  ;;  %v12152_v8 = vmul.f32 %v11886_v20, %v11886_v20  ;;  %v12035_v46 = vsel %vm226_vm2, %v11886_v20, 0.0 }
 0x556   :  { %11824 = vst.msk [vmem:[#allocation3 + $0xb8] sm:$0xff] %vm226_vm2, %v11760_v26  ;;  %v9802_v34 = vmul.f32 %v9729_v4, %v9354_v2  ;;  %v11759_v14 = vadd.f32 %v11528_v56, %v11113_v11  ;;  %v12231_v63 = vadd.f32 %v12230_v13, %v12229_v15  ;;  %v11885_v45 = vld [vmem:[#allocation3 + $0xa0] sm:$0xff]  ;;  %v12032_v39 = vadd.f32 %v12031_v1, %v12030_v37  ;;  %v11010_v20 = vpop.permute.xlu0 %11009  ;;  %v9836_v37 = vld [vmem:[#allocation3 + $0xf8] sm:$0xff] }
 0x557   :  { %11949 = vst.msk [vmem:[%s18907_s3 + $0xa0] sm:$0xff] %vm226_vm2, %v11885_v45  ;;  %v12033_v30 = vsel %vm226_vm2, %v11885_v45, 0.0  ;;  %v12151_v6 = vmul.f32 %v11885_v45, %v11885_v45  ;;  %v12236_v60 = vsel %vm226_vm2, %v12152_v8, 0.0  ;;  %v10638_v11 = vld [vmem:[#allocation2 + $0x201] sm:$0xff]  ;;  %v10639_v56 = vld [vmem:[#allocation2 + $0x209] sm:$0xff]  ;;  %v10640_v8 = vld [vmem:[#allocation2 + $0x211] sm:$0xff] }
 0x558   :  { %11823 = vst.msk [vmem:[#allocation3 + $0xb0] sm:$0xff] %vm226_vm2, %v11759_v14  ;;  %v14272_v51 = vpop.f32.mrf.mxu1  ;;  %14319 = vmatmul.mubr.msk.f32.gmra.mxu1 %vm23_vm0, %v9802_v34  ;;  %v12034_v41 = vadd.f32 %v12033_v30, %v12032_v39  ;;  %v12233_v44 = vadd.f32 %v12232_v32, %v12231_v63  ;;  %v9835_v34 = vld [vmem:[#allocation3 + $0xf0] sm:$0xff]  ;;  %v11087_v39 = vmul.f32 %v11010_v20, %v10639_v56 }
 0x559   :  { %v10480_v29 = vadd.f32 %v14272_v51, %v9834_v36  ;;  %v12234_v21 = vsel %vm226_vm2, %v12151_v6, 0.0  ;;  %v10641_v6 = vld [vmem:[#allocation2 + $0x219] sm:$0xff]  ;;  %v11118_v55 = vld [vmem:[#allocation3 + $0xd8] sm:$0xff] }
 0x55a   :  { %v10990_v24 = vpop.permute.xlu1 %10989  ;;  %v10272_v42 = vpop.f32.mrf.mxu1  ;;  %v12235_v62 = vadd.f32 %v12234_v21, %v12233_v44  ;;  %v12036_v9 = vadd.f32 %v12035_v46, %v12034_v41  ;;  %v9839_v56 = vld [vmem:[#allocation3 + $0x110] sm:$0xff] }
 0x55b   :  { %10544 = vst.msk [vmem:[#allocation3 + $0xe8] sm:$0xff] %vm226_vm2, %v10480_v29  ;;  %v11083_v27 = vmul.f32 %v10990_v24, %v10635_v59  ;;  %v10479_v28 = vadd.f32 %v10272_v42, %v9833_v43  ;;  %v11020_v30 = vpop.permute.xlu0 %11019  ;;  %v11117_v43 = vld [vmem:[#allocation3 + $0xd0] sm:$0xff] }
 0x55c   :  { %v12237_v16 = vadd.f32 %v12236_v60, %v12235_v62  ;;  %v11089_v62 = vmul.f32 %v11020_v30, %v10641_v6 }
 0x55d   :  { %v11888_v53 = vld [vmem:[#allocation3 + $0xb8] sm:$0xff]  ;;  %10543 = vst.msk [vmem:[#allocation3 + $0xe0] sm:$0xff] %vm226_vm2, %v10479_v28  ;;  %14410 = vmatprep.mubr.msk.f32.mxu0 %vm23_vm0, %v11083_v27 }
 0x55e   :  { %11952 = vst.msk [vmem:[%s18907_s3 + $0xb8] sm:$0xff] %vm226_vm2, %v11888_v53  ;;  %v14364_v33 = vpop.f32.mrf.mxu0  ;;  %14411 = vmatmul.mubr.msk.f32.gmra.mxu0 %vm23_vm0, %v11084_v25  ;;  %v12154_v3 = vmul.f32 %v11888_v53, %v11888_v53  ;;  %v12039_v23 = vsel %vm226_vm2, %v11888_v53, 0.0  ;;  %v10642_v25 = vld [vmem:[#allocation2 + $0x221] sm:$0xff]  ;;  %v9838_v53 = vld [vmem:[#allocation3 + $0x108] sm:$0xff] }
 0x55f   :  { %v11887_v22 = vld [vmem:[#allocation3 + $0xb0] sm:$0xff]  ;;  %v11762_v58 = vadd.f32 %v14364_v33, %v11116_v19  ;;  %v9734_v18 = vpop.permute.xlu1 %9733  ;;  %14413 = vmatprep.mubr.msk.f32.mxu0 %vm23_vm0, %v11085_v7  ;;  %v9837_v33 = vld [vmem:[#allocation3 + $0x100] sm:$0xff] }
 0x560   :  { %11951 = vst.msk [vmem:[%s18907_s3 + $0xb0] sm:$0xff] %vm226_vm2, %v11887_v22  ;;  %v12037_v17 = vsel %vm226_vm2, %v11887_v22, 0.0  ;;  %v12153_v47 = vmul.f32 %v11887_v22, %v11887_v22  ;;  %v9803_v50 = vmul.f32 %v9734_v18, %v9355_v52  ;;  %v11538_v40 = vpop.f32.mrf.mxu0  ;;  %v12240_v61 = vsel %vm226_vm2, %v12154_v3, 0.0 }
 0x561   :  { %v12038_v0 = vadd.f32 %v12037_v17, %v12036_v9  ;;  %11826 = vst.msk [vmem:[#allocation3 + $0xc8] sm:$0xff] %vm226_vm2, %v11762_v58  ;;  %v11761_v10 = vadd.f32 %v11538_v40, %v11115_v38 }
 0x562   :  { %v12238_v31 = vsel %vm226_vm2, %v12153_v47, 0.0  ;;  %14321 = vmatprep.mubr.msk.f32.mxu1 %vm23_vm0, %v9803_v50  ;;  %v11120_v3 = vld [vmem:[#allocation3 + $0xe8] sm:$0xff] }
 0x563   :  { %v12239_v35 = vadd.f32 %v12238_v31, %v12237_v16  ;;  %11825 = vst.msk [vmem:[#allocation3 + $0xc0] sm:$0xff] %vm226_vm2, %v11761_v10  ;;  %v12040_v2 = vadd.f32 %v12039_v23, %v12038_v0  ;;  %v9739_v48 = vpop.permute.xlu1 %9738 }
 0x564   :  { %v9804_v15 = vmul.f32 %v9739_v48, %v9356_v54  ;;  %v11119_v10 = vld [vmem:[#allocation3 + $0xe0] sm:$0xff] }
 0x565   :  { %v12241_v26 = vadd.f32 %v12240_v61, %v12239_v35 }
 0x566   :  { %v14275_v4 = vpop.f32.mrf.mxu1  ;;  %14322 = vmatmul.mubr.msk.f32.gmra.mxu1 %vm23_vm0, %v9804_v15 }
 0x567   :  { %v10482_v5 = vadd.f32 %v14275_v4, %v9836_v37 }
 0x568   :  { %v11890_v1 = vld [vmem:[#allocation3 + $0xc8] sm:$0xff]  ;;  %v11005_v13 = vpop.permute.xlu1 %11004  ;;  %v10282_v14 = vpop.f32.mrf.mxu1 }
 0x569   :  { %11954 = vst.msk [vmem:[%s18907_s3 + $0xc8] sm:$0xff] %vm226_vm2, %v11890_v1  ;;  %10546 = vst.msk [vmem:[#allocation3 + $0xf8] sm:$0xff] %vm226_vm2, %v10482_v5  ;;  %v11086_v63 = vmul.f32 %v11005_v13, %v10638_v11  ;;  %v10481_v45 = vadd.f32 %v10282_v14, %v9835_v34  ;;  %v12156_v36 = vmul.f32 %v11890_v1, %v11890_v1  ;;  %v12043_v46 = vsel %vm226_vm2, %v11890_v1, 0.0 }
 0x56a   :  { %v11889_v32 = vld [vmem:[#allocation3 + $0xc0] sm:$0xff] }
 0x56b   :  { %11953 = vst.msk [vmem:[%s18907_s3 + $0xc0] sm:$0xff] %vm226_vm2, %v11889_v32  ;;  %v12041_v51 = vsel %vm226_vm2, %v11889_v32, 0.0  ;;  %v12155_v59 = vmul.f32 %v11889_v32, %v11889_v32  ;;  %10545 = vst.msk [vmem:[#allocation3 + $0xf0] sm:$0xff] %vm226_vm2, %v10481_v45  ;;  %v14367_v41 = vpop.f32.mrf.mxu0  ;;  %14414 = vmatmul.mubr.msk.f32.gmra.mxu0 %vm23_vm0, %v11086_v63  ;;  %v12244_v12 = vsel %vm226_vm2, %v12156_v36, 0.0 }
 0x56c   :  { %v12042_v44 = vadd.f32 %v12041_v51, %v12040_v2  ;;  %v11764_v29 = vadd.f32 %v14367_v41, %v11118_v55  ;;  %v11015_v57 = vpop.permute.xlu1 %11014  ;;  %14416 = vmatprep.mubr.msk.f32.mxu0 %vm23_vm0, %v11087_v39 }
 0x56d   :  { %v12242_v21 = vsel %vm226_vm2, %v12155_v59, 0.0  ;;  %v11088_v24 = vmul.f32 %v11015_v57, %v10640_v8  ;;  %v11548_v42 = vpop.f32.mrf.mxu0  ;;  %v9842_v57 = vld [vmem:[#allocation3 + $0x128] sm:$0xff] }
 0x56e   :  { %v12243_v9 = vadd.f32 %v12242_v21, %v12241_v26  ;;  %11828 = vst.msk [vmem:[#allocation3 + $0xd8] sm:$0xff] %vm226_vm2, %v11764_v29  ;;  %v11763_v27 = vadd.f32 %v11548_v42, %v11117_v43  ;;  %v12044_v28 = vadd.f32 %v12043_v46, %v12042_v44  ;;  %v9840_v26 = vld [vmem:[#allocation3 + $0x118] sm:$0xff] }
 0x56f   :  { %14417 = vmatmul.mubr.msk.f32.gmra.mxu0 %vm23_vm0, %v11088_v24  ;;  %v9841_v24 = vld [vmem:[#allocation3 + $0x120] sm:$0xff] }
 0x570   :  { %11827 = vst.msk [vmem:[#allocation3 + $0xd0] sm:$0xff] %vm226_vm2, %v11763_v27  ;;  %v12245_v60 = vadd.f32 %v12244_v12, %v12243_v9  ;;  %v11025_v7 = vpop.permute.xlu1 %11024  ;;  %v14278_v16 = vpop.f32.mrf.mxu1  ;;  %14419 = vmatprep.mubr.msk.f32.mxu0 %vm23_vm0, %v11089_v62  ;;  %v11122_v45 = vld [vmem:[#allocation3 + $0xf8] sm:$0xff] }
 0x571   :  { %v11090_v52 = vmul.f32 %v11025_v7, %v10642_v25  ;;  %v10484_v19 = vadd.f32 %v14278_v16, %v9838_v53 }
 0x572   :  { %v10292_v22 = vpop.f32.mrf.mxu1  ;;  %v11121_v36 = vld [vmem:[#allocation3 + $0xf0] sm:$0xff] }
 0x573   :  { %10548 = vst.msk [vmem:[#allocation3 + $0x108] sm:$0xff] %vm226_vm2, %v10484_v19  ;;  %v10483_v58 = vadd.f32 %v10292_v22, %v9837_v33  ;;  %14420 = vmatmul.mubr.msk.f32.gmra.mxu0 %vm23_vm0, %v11090_v52 }
 0x575   :  { %v11892_v18 = vld [vmem:[#allocation3 + $0xd8] sm:$0xff]  ;;  %10547 = vst.msk [vmem:[#allocation3 + $0x100] sm:$0xff] %vm226_vm2, %v10483_v58 }
 0x576   :  { %11956 = vst.msk [vmem:[%s18907_s3 + $0xd8] sm:$0xff] %vm226_vm2, %v11892_v18  ;;  %v14370_v17 = vpop.f32.mrf.mxu0  ;;  %v12158_v38 = vmul.f32 %v11892_v18, %v11892_v18  ;;  %v12047_v35 = vsel %vm226_vm2, %v11892_v18, 0.0 }
 0x577   :  { %v11891_v47 = vld [vmem:[#allocation3 + $0xd0] sm:$0xff]  ;;  %v11766_v50 = vadd.f32 %v14370_v17, %v11120_v3 }
 0x578   :  { %11955 = vst.msk [vmem:[%s18907_s3 + $0xd0] sm:$0xff] %vm226_vm2, %v11891_v47  ;;  %v12045_v40 = vsel %vm226_vm2, %v11891_v47, 0.0  ;;  %v12157_v0 = vmul.f32 %v11891_v47, %v11891_v47  ;;  %v11558_v54 = vpop.f32.mrf.mxu0  ;;  %v12248_v15 = vsel %vm226_vm2, %v12158_v38, 0.0  ;;  %v9844_v47 = vld [vmem:[#allocation3 + $0x138] sm:$0xff] }
 0x579   :  { %v12046_v23 = vadd.f32 %v12045_v40, %v12044_v28  ;;  %11830 = vst.msk [vmem:[#allocation3 + $0xe8] sm:$0xff] %vm226_vm2, %v11766_v50  ;;  %v11765_v31 = vadd.f32 %v11558_v54, %v11119_v10 }
 0x57a   :  { %v12246_v2 = vsel %vm226_vm2, %v12157_v0, 0.0  ;;  %v11124_v9 = vld [vmem:[#allocation3 + $0x108] sm:$0xff]  ;;  %v9843_v0 = vld [vmem:[#allocation3 + $0x130] sm:$0xff] }
 0x57b   :  { %v12247_v48 = vadd.f32 %v12246_v2, %v12245_v60  ;;  %11829 = vst.msk [vmem:[#allocation3 + $0xe0] sm:$0xff] %vm226_vm2, %v11765_v31  ;;  %v12048_v61 = vadd.f32 %v12047_v35, %v12046_v23 }
 0x57c   :  { %v11123_v53 = vld [vmem:[#allocation3 + $0x100] sm:$0xff] }
 0x57d   :  { %v12249_v20 = vadd.f32 %v12248_v15, %v12247_v48 }
 0x57e   :  { %v14281_v37 = vpop.f32.mrf.mxu1 }
 0x57f   :  { %v10486_v4 = vadd.f32 %v14281_v37, %v9840_v26 }
 0x580   :  { %v11894_v11 = vld [vmem:[#allocation3 + $0xe8] sm:$0xff]  ;;  %v10302_v5 = vpop.f32.mrf.mxu1 }
 0x581   :  { %11958 = vst.msk [vmem:[%s18907_s3 + $0xe8] sm:$0xff] %vm226_vm2, %v11894_v11  ;;  %10550 = vst.msk [vmem:[#allocation3 + $0x118] sm:$0xff] %vm226_vm2, %v10486_v4  ;;  %v10485_v1 = vadd.f32 %v10302_v5, %v9839_v56  ;;  %v12160_v34 = vmul.f32 %v11894_v11, %v11894_v11  ;;  %v12051_v30 = vsel %vm226_vm2, %v11894_v11, 0.0 }
 0x582   :  { %v11893_v13 = vld [vmem:[#allocation3 + $0xe0] sm:$0xff] }
 0x583   :  { %11957 = vst.msk [vmem:[%s18907_s3 + $0xe0] sm:$0xff] %vm226_vm2, %v11893_v13  ;;  %v12049_v14 = vsel %vm226_vm2, %v11893_v13, 0.0  ;;  %v12159_v63 = vmul.f32 %v11893_v13, %v11893_v13  ;;  %10549 = vst.msk [vmem:[#allocation3 + $0x110] sm:$0xff] %vm226_vm2, %v10485_v1  ;;  %v14373_v39 = vpop.f32.mrf.mxu0  ;;  %v12252_v44 = vsel %vm226_vm2, %v12160_v34, 0.0 }
 0x584   :  { %v12050_v32 = vadd.f32 %v12049_v14, %v12048_v61  ;;  %v11768_v8 = vadd.f32 %v14373_v39, %v11122_v45  ;;  %v9846_v14 = vld [vmem:[#allocation3 + $0x148] sm:$0xff]  ;;  %v9845_v39 = vld [vmem:[#allocation3 + $0x140] sm:$0xff] }
 0x585   :  { %v12250_v6 = vsel %vm226_vm2, %v12159_v63, 0.0  ;;  %v11568_v51 = vpop.f32.mrf.mxu0 }
 0x586   :  { %v12251_v59 = vadd.f32 %v12250_v6, %v12249_v20  ;;  %11832 = vst.msk [vmem:[#allocation3 + $0xf8] sm:$0xff] %vm226_vm2, %v11768_v8  ;;  %v11767_v55 = vadd.f32 %v11568_v51, %v11121_v36  ;;  %v12052_v41 = vadd.f32 %v12051_v30, %v12050_v32 }
 0x588   :  { %11831 = vst.msk [vmem:[#allocation3 + $0xf0] sm:$0xff] %vm226_vm2, %v11767_v55  ;;  %v12253_v29 = vadd.f32 %v12252_v44, %v12251_v59  ;;  %v14284_v46 = vpop.f32.mrf.mxu1  ;;  %v11126_v48 = vld [vmem:[#allocation3 + $0x118] sm:$0xff] }
 0x589   :  { %v10488_v21 = vadd.f32 %v14284_v46, %v9842_v57 }
 0x58a   :  { %v10312_v43 = vpop.f32.mrf.mxu1  ;;  %v11125_v4 = vld [vmem:[#allocation3 + $0x110] sm:$0xff] }
 0x58b   :  { %10552 = vst.msk [vmem:[#allocation3 + $0x128] sm:$0xff] %vm226_vm2, %v10488_v21  ;;  %v10487_v42 = vadd.f32 %v10312_v43, %v9841_v24 }
 0x58d   :  { %v11896_v62 = vld [vmem:[#allocation3 + $0xf8] sm:$0xff]  ;;  %10551 = vst.msk [vmem:[#allocation3 + $0x120] sm:$0xff] %vm226_vm2, %v10487_v42 }
 0x58e   :  { %11960 = vst.msk [vmem:[%s18907_s3 + $0xf8] sm:$0xff] %vm226_vm2, %v11896_v62  ;;  %v14376_v27 = vpop.f32.mrf.mxu0  ;;  %v12162_v12 = vmul.f32 %v11896_v62, %v11896_v62  ;;  %v12055_v33 = vsel %vm226_vm2, %v11896_v62, 0.0 }
 0x58f   :  { %v11895_v28 = vld [vmem:[#allocation3 + $0xf0] sm:$0xff]  ;;  %v11770_v25 = vadd.f32 %v14376_v27, %v11124_v9 }
 0x590   :  { %11959 = vst.msk [vmem:[%s18907_s3 + $0xf0] sm:$0xff] %vm226_vm2, %v11895_v28  ;;  %v12053_v60 = vsel %vm226_vm2, %v11895_v28, 0.0  ;;  %v12161_v7 = vmul.f32 %v11895_v28, %v11895_v28  ;;  %v11578_v16 = vpop.f32.mrf.mxu0  ;;  %v12256_v3 = vsel %vm226_vm2, %v12162_v12, 0.0  ;;  %v9848_v28 = vld [vmem:[#allocation3 + $0x158] sm:$0xff] }
 0x591   :  { %v12054_v52 = vadd.f32 %v12053_v60, %v12052_v41  ;;  %11834 = vst.msk [vmem:[#allocation3 + $0x108] sm:$0xff] %vm226_vm2, %v11770_v25  ;;  %v11769_v19 = vadd.f32 %v11578_v16, %v11123_v53 }
 0x592   :  { %v12254_v22 = vsel %vm226_vm2, %v12161_v7, 0.0  ;;  %v11128_v6 = vld [vmem:[#allocation3 + $0x128] sm:$0xff]  ;;  %v9847_v7 = vld [vmem:[#allocation3 + $0x150] sm:$0xff] }
 0x593   :  { %v12255_v58 = vadd.f32 %v12254_v22, %v12253_v29  ;;  %11833 = vst.msk [vmem:[#allocation3 + $0x100] sm:$0xff] %vm226_vm2, %v11769_v19  ;;  %v12056_v18 = vadd.f32 %v12055_v33, %v12054_v52 }
 0x594   :  { %v11127_v29 = vld [vmem:[#allocation3 + $0x120] sm:$0xff] }
 0x595   :  { %v12257_v17 = vadd.f32 %v12256_v3, %v12255_v58 }
 0x596   :  { %v14287_v50 = vpop.f32.mrf.mxu1 }
 0x597   :  { %v10490_v38 = vadd.f32 %v14287_v50, %v9844_v47 }
 0x598   :  { %v11898_v40 = vld [vmem:[#allocation3 + $0x108] sm:$0xff]  ;;  %v10322_v10 = vpop.f32.mrf.mxu1 }
 0x599   :  { %11962 = vst.msk [vmem:[%s18907_s3 + $0x108] sm:$0xff] %vm226_vm2, %v11898_v40  ;;  %10554 = vst.msk [vmem:[#allocation3 + $0x138] sm:$0xff] %vm226_vm2, %v10490_v38  ;;  %v10489_v54 = vadd.f32 %v10322_v10, %v9843_v0  ;;  %v12164_v31 = vmul.f32 %v11898_v40, %v11898_v40  ;;  %v12059_v26 = vsel %vm226_vm2, %v11898_v40, 0.0 }
 0x59a   :  { %v11897_v23 = vld [vmem:[#allocation3 + $0x100] sm:$0xff] }
 0x59b   :  { %11961 = vst.msk [vmem:[%s18907_s3 + $0x100] sm:$0xff] %vm226_vm2, %v11897_v23  ;;  %v12057_v35 = vsel %vm226_vm2, %v11897_v23, 0.0  ;;  %v12163_v2 = vmul.f32 %v11897_v23, %v11897_v23  ;;  %10553 = vst.msk [vmem:[#allocation3 + $0x130] sm:$0xff] %vm226_vm2, %v10489_v54  ;;  %v14379_v61 = vpop.f32.mrf.mxu0  ;;  %v12260_v13 = vsel %vm226_vm2, %v12164_v31, 0.0 }
 0x59c   :  { %v12058_v15 = vadd.f32 %v12057_v35, %v12056_v18  ;;  %v11772_v20 = vadd.f32 %v14379_v61, %v11126_v48  ;;  %v9850_v35 = vld [vmem:[#allocation3 + $0x168] sm:$0xff]  ;;  %v9849_v61 = vld [vmem:[#allocation3 + $0x160] sm:$0xff] }
 0x59d   :  { %v12258_v37 = vsel %vm226_vm2, %v12163_v2, 0.0  ;;  %v11588_v11 = vpop.f32.mrf.mxu0 }
 0x59e   :  { %v12259_v56 = vadd.f32 %v12258_v37, %v12257_v17  ;;  %11836 = vst.msk [vmem:[#allocation3 + $0x118] sm:$0xff] %vm226_vm2, %v11772_v20  ;;  %v11771_v5 = vadd.f32 %v11588_v11, %v11125_v4  ;;  %v12060_v1 = vadd.f32 %v12059_v26, %v12058_v15 }
 0x5a0   :  { %11835 = vst.msk [vmem:[#allocation3 + $0x110] sm:$0xff] %vm226_vm2, %v11771_v5  ;;  %v12261_v34 = vadd.f32 %v12260_v13, %v12259_v56  ;;  %v14290_v63 = vpop.f32.mrf.mxu1  ;;  %v11130_v58 = vld [vmem:[#allocation3 + $0x138] sm:$0xff] }
 0x5a1   :  { %v10492_v45 = vadd.f32 %v14290_v63, %v9846_v14 }
 0x5a2   :  { %v10332_v32 = vpop.f32.mrf.mxu1  ;;  %v11129_v38 = vld [vmem:[#allocation3 + $0x130] sm:$0xff] }
 0x5a3   :  { %10556 = vst.msk [vmem:[#allocation3 + $0x148] sm:$0xff] %vm226_vm2, %v10492_v45  ;;  %v10491_v8 = vadd.f32 %v10332_v32, %v9845_v39 }
 0x5a5   :  { %v11900_v30 = vld [vmem:[#allocation3 + $0x118] sm:$0xff]  ;;  %10555 = vst.msk [vmem:[#allocation3 + $0x140] sm:$0xff] %vm226_vm2, %v10491_v8 }
 0x5a6   :  { %11964 = vst.msk [vmem:[%s18907_s3 + $0x118] sm:$0xff] %vm226_vm2, %v11900_v30  ;;  %v14382_v36 = vpop.f32.mrf.mxu0  ;;  %v12166_v55 = vmul.f32 %v11900_v30, %v11900_v30  ;;  %v12063_v24 = vsel %vm226_vm2, %v11900_v30, 0.0 }
 0x5a7   :  { %v11899_v51 = vld [vmem:[#allocation3 + $0x110] sm:$0xff]  ;;  %v11774_v59 = vadd.f32 %v14382_v36, %v11128_v6  ;;  %v9852_v36 = vld [vmem:[#allocation3 + $0x178] sm:$0xff] }
 0x5a8   :  { %11963 = vst.msk [vmem:[%s18907_s3 + $0x110] sm:$0xff] %vm226_vm2, %v11899_v51  ;;  %v12061_v41 = vsel %vm226_vm2, %v11899_v51, 0.0  ;;  %v12165_v44 = vmul.f32 %v11899_v51, %v11899_v51  ;;  %v11598_v57 = vpop.f32.mrf.mxu0  ;;  %v12264_v9 = vsel %vm226_vm2, %v12166_v55, 0.0 }
 0x5a9   :  { %v12062_v46 = vadd.f32 %v12061_v41, %v12060_v1  ;;  %11838 = vst.msk [vmem:[#allocation3 + $0x128] sm:$0xff] %vm226_vm2, %v11774_v59  ;;  %v11773_v21 = vadd.f32 %v11598_v57, %v11127_v29  ;;  %v9851_v41 = vld [vmem:[#allocation3 + $0x170] sm:$0xff] }
 0x5aa   :  { %v12262_v43 = vsel %vm226_vm2, %v12165_v44, 0.0  ;;  %v11132_v37 = vld [vmem:[#allocation3 + $0x148] sm:$0xff] }
 0x5ab   :  { %v12263_v42 = vadd.f32 %v12262_v43, %v12261_v34  ;;  %11837 = vst.msk [vmem:[#allocation3 + $0x120] sm:$0xff] %vm226_vm2, %v11773_v21  ;;  %v12064_v62 = vadd.f32 %v12063_v24, %v12062_v46 }
 0x5ac   :  { %v11131_v13 = vld [vmem:[#allocation3 + $0x140] sm:$0xff] }
 0x5ad   :  { %v12265_v27 = vadd.f32 %v12264_v9, %v12263_v42 }
 0x5ae   :  { %v14293_v25 = vpop.f32.mrf.mxu1 }
 0x5af   :  { %v10494_v12 = vadd.f32 %v14293_v25, %v9848_v28 }
 0x5b0   :  { %v11902_v60 = vld [vmem:[#allocation3 + $0x128] sm:$0xff]  ;;  %v10342_v53 = vpop.f32.mrf.mxu1 }
 0x5b1   :  { %11966 = vst.msk [vmem:[%s18907_s3 + $0x128] sm:$0xff] %vm226_vm2, %v11902_v60  ;;  %10558 = vst.msk [vmem:[#allocation3 + $0x158] sm:$0xff] %vm226_vm2, %v10494_v12  ;;  %v10493_v16 = vadd.f32 %v10342_v53, %v9847_v7  ;;  %v12168_v19 = vmul.f32 %v11902_v60, %v11902_v60  ;;  %v12067_v47 = vsel %vm226_vm2, %v11902_v60, 0.0 }
 0x5b2   :  { %v11901_v52 = vld [vmem:[#allocation3 + $0x120] sm:$0xff] }
 0x5b3   :  { %11965 = vst.msk [vmem:[%s18907_s3 + $0x120] sm:$0xff] %vm226_vm2, %v11901_v52  ;;  %v12065_v33 = vsel %vm226_vm2, %v11901_v52, 0.0  ;;  %v12167_v22 = vmul.f32 %v11901_v52, %v11901_v52  ;;  %10557 = vst.msk [vmem:[#allocation3 + $0x150] sm:$0xff] %vm226_vm2, %v10493_v16  ;;  %v14385_v18 = vpop.f32.mrf.mxu0  ;;  %v12268_v23 = vsel %vm226_vm2, %v12168_v19, 0.0  ;;  %v9854_v19 = vld [vmem:[#allocation3 + $0x188] sm:$0xff] }
 0x5b4   :  { %v12066_v3 = vadd.f32 %v12065_v33, %v12064_v62  ;;  %v11776_v17 = vadd.f32 %v14385_v18, %v11130_v58  ;;  %v9853_v58 = vld [vmem:[#allocation3 + $0x180] sm:$0xff] }
 0x5b5   :  { %v12266_v50 = vsel %vm226_vm2, %v12167_v22, 0.0  ;;  %v11608_v40 = vpop.f32.mrf.mxu0 }
 0x5b6   :  { %v12267_v0 = vadd.f32 %v12266_v50, %v12265_v27  ;;  %11840 = vst.msk [vmem:[#allocation3 + $0x138] sm:$0xff] %vm226_vm2, %v11776_v17  ;;  %v11775_v10 = vadd.f32 %v11608_v40, %v11129_v38  ;;  %v12068_v54 = vadd.f32 %v12067_v47, %v12066_v3 }
 0x5b8   :  { %11839 = vst.msk [vmem:[#allocation3 + $0x130] sm:$0xff] %vm226_vm2, %v11775_v10  ;;  %v12269_v31 = vadd.f32 %v12268_v23, %v12267_v0  ;;  %v14296_v2 = vpop.f32.mrf.mxu1  ;;  %v11134_v43 = vld [vmem:[#allocation3 + $0x158] sm:$0xff] }
 0x5b9   :  { %v10496_v48 = vadd.f32 %v14296_v2, %v9850_v35 }
 0x5ba   :  { %v10352_v15 = vpop.f32.mrf.mxu1  ;;  %v11133_v25 = vld [vmem:[#allocation3 + $0x150] sm:$0xff] }
 0x5bb   :  { %10560 = vst.msk [vmem:[#allocation3 + $0x168] sm:$0xff] %vm226_vm2, %v10496_v48  ;;  %v10495_v20 = vadd.f32 %v10352_v15, %v9849_v61 }
 0x5bd   :  { %v11904_v26 = vld [vmem:[#allocation3 + $0x138] sm:$0xff]  ;;  %10559 = vst.msk [vmem:[#allocation3 + $0x160] sm:$0xff] %vm226_vm2, %v10495_v20 }
 0x5be   :  { %11968 = vst.msk [vmem:[%s18907_s3 + $0x138] sm:$0xff] %vm226_vm2, %v11904_v26  ;;  %v14388_v4 = vpop.f32.mrf.mxu0  ;;  %v12170_v5 = vmul.f32 %v11904_v26, %v11904_v26  ;;  %v12071_v45 = vsel %vm226_vm2, %v11904_v26, 0.0 }
 0x5bf   :  { %v11903_v11 = vld [vmem:[#allocation3 + $0x130] sm:$0xff]  ;;  %v11778_v56 = vadd.f32 %v14388_v4, %v11132_v37  ;;  %v9856_v4 = vld [vmem:[#allocation3 + $0x198] sm:$0xff] }
 0x5c0   :  { %11967 = vst.msk [vmem:[%s18907_s3 + $0x130] sm:$0xff] %vm226_vm2, %v11903_v11  ;;  %v12069_v49 = vsel %vm226_vm2, %v11903_v11, 0.0  ;;  %v12169_v1 = vmul.f32 %v11903_v11, %v11903_v11  ;;  %v11618_v34 = vpop.f32.mrf.mxu0  ;;  %v12272_v30 = vsel %vm226_vm2, %v12170_v5, 0.0 }
 0x5c1   :  { %v12070_v14 = vadd.f32 %v12069_v49, %v12068_v54  ;;  %11842 = vst.msk [vmem:[#allocation3 + $0x148] sm:$0xff] %vm226_vm2, %v11778_v56  ;;  %v11777_v63 = vadd.f32 %v11618_v34, %v11131_v13  ;;  %v9855_v49 = vld [vmem:[#allocation3 + $0x190] sm:$0xff] }
 0x5c2   :  { %v12270_v39 = vsel %vm226_vm2, %v12169_v1, 0.0  ;;  %v11136_v47 = vld [vmem:[#allocation3 + $0x168] sm:$0xff] }
 0x5c3   :  { %v12271_v32 = vadd.f32 %v12270_v39, %v12269_v31  ;;  %11841 = vst.msk [vmem:[#allocation3 + $0x140] sm:$0xff] %vm226_vm2, %v11777_v63  ;;  %v12072_v8 = vadd.f32 %v12071_v45, %v12070_v14 }
 0x5c4   :  { %v11135_v23 = vld [vmem:[#allocation3 + $0x160] sm:$0xff] }
 0x5c5   :  { %v12273_v6 = vadd.f32 %v12272_v30, %v12271_v32  ;;  %v9858_v30 = vld [vmem:[#allocation3 + $0x1a8] sm:$0xff] }
 0x5c6   :  { %v14299_v51 = vpop.f32.mrf.mxu1 }
 0x5c7   :  { %v10498_v59 = vadd.f32 %v14299_v51, %v9852_v36  ;;  %v9857_v51 = vld [vmem:[#allocation3 + $0x1a0] sm:$0xff] }
 0x5c8   :  { %v11906_v55 = vld [vmem:[#allocation3 + $0x148] sm:$0xff]  ;;  %v10362_v44 = vpop.f32.mrf.mxu1 }
 0x5c9   :  { %11970 = vst.msk [vmem:[%s18907_s3 + $0x148] sm:$0xff] %vm226_vm2, %v11906_v55  ;;  %10562 = vst.msk [vmem:[#allocation3 + $0x178] sm:$0xff] %vm226_vm2, %v10498_v59  ;;  %v10497_v29 = vadd.f32 %v10362_v44, %v9851_v41  ;;  %v12172_v46 = vmul.f32 %v11906_v55, %v11906_v55  ;;  %v12075_v27 = vsel %vm226_vm2, %v11906_v55, 0.0 }
 0x5ca   :  { %v11905_v57 = vld [vmem:[#allocation3 + $0x140] sm:$0xff] }
 0x5cb   :  { %11969 = vst.msk [vmem:[%s18907_s3 + $0x140] sm:$0xff] %vm226_vm2, %v11905_v57  ;;  %v12073_v21 = vsel %vm226_vm2, %v11905_v57, 0.0  ;;  %v12171_v24 = vmul.f32 %v11905_v57, %v11905_v57  ;;  %10561 = vst.msk [vmem:[#allocation3 + $0x170] sm:$0xff] %vm226_vm2, %v10497_v29  ;;  %v14391_v42 = vpop.f32.mrf.mxu0  ;;  %v12276_v16 = vsel %vm226_vm2, %v12172_v46, 0.0 }
 0x5cc   :  { %v12074_v62 = vadd.f32 %v12073_v21, %v12072_v8  ;;  %v11780_v9 = vadd.f32 %v14391_v42, %v11134_v43  ;;  %v9860_v42 = vld [vmem:[#allocation3 + $0x1b8] sm:$0xff] }
 0x5cd   :  { %v12274_v28 = vsel %vm226_vm2, %v12171_v24, 0.0  ;;  %v11628_v12 = vpop.f32.mrf.mxu0 }
 0x5ce   :  { %v12275_v60 = vadd.f32 %v12274_v28, %v12273_v6  ;;  %11844 = vst.msk [vmem:[#allocation3 + $0x158] sm:$0xff] %vm226_vm2, %v11780_v9  ;;  %v11779_v7 = vadd.f32 %v11628_v12, %v11133_v25  ;;  %v12076_v53 = vadd.f32 %v12075_v27, %v12074_v62  ;;  %v9859_v28 = vld [vmem:[#allocation3 + $0x1b0] sm:$0xff] }
 0x5d0   :  { %11843 = vst.msk [vmem:[#allocation3 + $0x150] sm:$0xff] %vm226_vm2, %v11779_v7  ;;  %v12277_v52 = vadd.f32 %v12276_v16, %v12275_v60  ;;  %v14302_v33 = vpop.f32.mrf.mxu1  ;;  %v11138_v14 = vld [vmem:[#allocation3 + $0x178] sm:$0xff] }
 0x5d1   :  { %v10500_v22 = vadd.f32 %v14302_v33, %v9854_v19 }
 0x5d2   :  { %v10372_v18 = vpop.f32.mrf.mxu1  ;;  %v11137_v39 = vld [vmem:[#allocation3 + $0x170] sm:$0xff] }
 0x5d3   :  { %10564 = vst.msk [vmem:[#allocation3 + $0x188] sm:$0xff] %vm226_vm2, %v10500_v22  ;;  %v10499_v3 = vadd.f32 %v10372_v18, %v9853_v58  ;;  %v9862_v22 = vld [vmem:[#allocation3 + $0x1c8] sm:$0xff] }
 0x5d5   :  { %v11908_v17 = vld [vmem:[#allocation3 + $0x158] sm:$0xff]  ;;  %10563 = vst.msk [vmem:[#allocation3 + $0x180] sm:$0xff] %vm226_vm2, %v10499_v3  ;;  %v9861_v3 = vld [vmem:[#allocation3 + $0x1c0] sm:$0xff] }
 0x5d6   :  { %11972 = vst.msk [vmem:[%s18907_s3 + $0x158] sm:$0xff] %vm226_vm2, %v11908_v17  ;;  %v14394_v50 = vpop.f32.mrf.mxu0  ;;  %v12174_v0 = vmul.f32 %v11908_v17, %v11908_v17  ;;  %v12079_v48 = vsel %vm226_vm2, %v11908_v17, 0.0 }
 0x5d7   :  { %v11907_v38 = vld [vmem:[#allocation3 + $0x150] sm:$0xff]  ;;  %v11782_v40 = vadd.f32 %v14394_v50, %v11136_v47 }
 0x5d8   :  { %11971 = vst.msk [vmem:[%s18907_s3 + $0x150] sm:$0xff] %vm226_vm2, %v11907_v38  ;;  %v12077_v10 = vsel %vm226_vm2, %v11907_v38, 0.0  ;;  %v12173_v54 = vmul.f32 %v11907_v38, %v11907_v38  ;;  %v11638_v31 = vpop.f32.mrf.mxu0  ;;  %v12280_v26 = vsel %vm226_vm2, %v12174_v0, 0.0 }
 0x5d9   :  { %v12078_v35 = vadd.f32 %v12077_v10, %v12076_v53  ;;  %11846 = vst.msk [vmem:[#allocation3 + $0x168] sm:$0xff] %vm226_vm2, %v11782_v40  ;;  %v11781_v2 = vadd.f32 %v11638_v31, %v11135_v23 }
 0x5da   :  { %v12278_v61 = vsel %vm226_vm2, %v12173_v54, 0.0  ;;  %v11140_v44 = vld [vmem:[#allocation3 + $0x188] sm:$0xff] }
 0x5db   :  { %v12279_v15 = vadd.f32 %v12278_v61, %v12277_v52  ;;  %11845 = vst.msk [vmem:[#allocation3 + $0x160] sm:$0xff] %vm226_vm2, %v11781_v2  ;;  %v18677_v20 = vadd.f32 %v12079_v48, %v12078_v35  ;;  %v9864_v61 = vld [vmem:[#allocation3 + $0x1d8] sm:$0xff] }
 0x5dc   :  { %v11139_v21 = vld [vmem:[#allocation3 + $0x180] sm:$0xff] }
 0x5dd   :  { %v18680_v37 = vadd.f32 %v12280_v26, %v12279_v15 }
 0x5de   :  { %v14305_v11 = vpop.f32.mrf.mxu1 }
 0x5df   :  { %v10502_v56 = vadd.f32 %v14305_v11, %v9856_v4 }
 0x5e0   :  { %v18682_v5 = vld [vmem:[#allocation3 + $0x168] sm:$0xff]  ;;  %v10382_v1 = vpop.f32.mrf.mxu1 }
 0x5e1   :  { %11974 = vst.msk [vmem:[%s18907_s3 + $0x168] sm:$0xff] %vm226_vm2, %v18682_v5  ;;  %10566 = vst.msk [vmem:[#allocation3 + $0x198] sm:$0xff] %vm226_vm2, %v10502_v56  ;;  %v10501_v13 = vadd.f32 %v10382_v1, %v9855_v49  ;;  %v12176_v11 = vmul.f32 %v18682_v5, %v18682_v5  ;;  %v9863_v49 = vld [vmem:[#allocation3 + $0x1d0] sm:$0xff] }
 0x5e2   :  { %v18690_v34 = vld [vmem:[#allocation3 + $0x160] sm:$0xff] }
 0x5e3   :  { %11973 = vst.msk [vmem:[%s18907_s3 + $0x160] sm:$0xff] %vm226_vm2, %v18690_v34  ;;  %10565 = vst.msk [vmem:[#allocation3 + $0x190] sm:$0xff] %vm226_vm2, %v10501_v13  ;;  %v14397_v63 = vpop.f32.mrf.mxu0  ;;  %v12175_v35 = vmul.f32 %v18690_v34, %v18690_v34  ;;  %v12081_v2 = vsel %vm226_vm2, %v18690_v34, 0.0 }
 0x5e4   :  { %v11784_v45 = vadd.f32 %v14397_v63, %v11138_v14  ;;  %v12082_v26 = vadd.f32 %v12081_v2, %v18677_v20  ;;  %v12083_v20 = vsel %vm226_vm2, %v18682_v5, 0.0 }
 0x5e5   :  { %v11648_v32 = vpop.f32.mrf.mxu0  ;;  %v12282_v48 = vsel %vm226_vm2, %v12175_v35, 0.0 }
 0x5e6   :  { %11848 = vst.msk [vmem:[#allocation3 + $0x178] sm:$0xff] %vm226_vm2, %v11784_v45  ;;  %v11783_v8 = vadd.f32 %v11648_v32, %v11137_v39  ;;  %v12283_v14 = vadd.f32 %v12282_v48, %v18680_v37  ;;  %v12084_v39 = vadd.f32 %v12083_v20, %v12082_v26  ;;  %v9868_v26 = vld [vmem:[#allocation3 + $0x1f8] sm:$0xff] }
 0x5e8   :  { %11847 = vst.msk [vmem:[#allocation3 + $0x170] sm:$0xff] %vm226_vm2, %v11783_v8  ;;  %v14308_v6 = vpop.f32.mrf.mxu1  ;;  %v11142_v7 = vld [vmem:[#allocation3 + $0x198] sm:$0xff]  ;;  %v12284_v8 = vsel %vm226_vm2, %v12176_v11, 0.0 }
 0x5e9   :  { %v10504_v36 = vadd.f32 %v14308_v6, %v9858_v30 }
 0x5ea   :  { %v10392_v59 = vpop.f32.mrf.mxu1  ;;  %v11141_v52 = vld [vmem:[#allocation3 + $0x190] sm:$0xff] }
 0x5eb   :  { %10568 = vst.msk [vmem:[#allocation3 + $0x1a8] sm:$0xff] %vm226_vm2, %v10504_v36  ;;  %v10503_v55 = vadd.f32 %v10392_v59, %v9857_v51  ;;  %v12285_v36 = vadd.f32 %v12284_v8, %v12283_v14 }
 0x5ed   :  { %v18701_v41 = vld [vmem:[#allocation3 + $0x178] sm:$0xff]  ;;  %10567 = vst.msk [vmem:[#allocation3 + $0x1a0] sm:$0xff] %vm226_vm2, %v10503_v55 }
 0x5ee   :  { %11976 = vst.msk [vmem:[%s18907_s3 + $0x178] sm:$0xff] %vm226_vm2, %v18701_v41  ;;  %v14400_v29 = vpop.f32.mrf.mxu0  ;;  %v12178_v55 = vmul.f32 %v18701_v41, %v18701_v41 }
 0x5ef   :  { %v18709_v57 = vld [vmem:[#allocation3 + $0x170] sm:$0xff]  ;;  %v11786_v46 = vadd.f32 %v14400_v29, %v11140_v44 }
 0x5f0   :  { %11975 = vst.msk [vmem:[%s18907_s3 + $0x170] sm:$0xff] %vm226_vm2, %v18709_v57  ;;  %v11658_v24 = vpop.f32.mrf.mxu0  ;;  %v12177_v56 = vmul.f32 %v18709_v57, %v18709_v57  ;;  %v12085_v63 = vsel %vm226_vm2, %v18709_v57, 0.0 }
 0x5f1   :  { %11850 = vst.msk [vmem:[#allocation3 + $0x188] sm:$0xff] %vm226_vm2, %v11786_v46  ;;  %v11785_v43 = vadd.f32 %v11658_v24, %v11139_v21  ;;  %v12086_v5 = vadd.f32 %v12085_v63, %v12084_v39  ;;  %v12087_v46 = vsel %vm226_vm2, %v18701_v41, 0.0  ;;  %v9866_v24 = vld [vmem:[#allocation3 + $0x1e8] sm:$0xff] }
 0x5f2   :  { %v11144_v38 = vld [vmem:[#allocation3 + $0x1a8] sm:$0xff]  ;;  %v12286_v30 = vsel %vm226_vm2, %v12177_v56, 0.0 }
 0x5f3   :  { %11849 = vst.msk [vmem:[#allocation3 + $0x180] sm:$0xff] %vm226_vm2, %v11785_v43  ;;  %v12287_v57 = vadd.f32 %v12286_v30, %v12285_v36 }
 0x5f4   :  { %v11143_v54 = vld [vmem:[#allocation3 + $0x1a0] sm:$0xff] }
 0x5f6   :  { %v14311_v62 = vpop.f32.mrf.mxu1 }
 0x5f7   :  { %v10506_v9 = vadd.f32 %v14311_v62, %v9860_v42  ;;  %v12088_v42 = vadd.f32 %v12087_v46, %v12086_v5 }
 0x5f8   :  { %v18718_v27 = vld [vmem:[#allocation3 + $0x188] sm:$0xff]  ;;  %v10402_v25 = vpop.f32.mrf.mxu1 }
 0x5f9   :  { %11978 = vst.msk [vmem:[%s18907_s3 + $0x188] sm:$0xff] %vm226_vm2, %v18718_v27  ;;  %10570 = vst.msk [vmem:[#allocation3 + $0x1b8] sm:$0xff] %vm226_vm2, %v10506_v9  ;;  %v10505_v12 = vadd.f32 %v10402_v25, %v9859_v28  ;;  %v12288_v9 = vsel %vm226_vm2, %v12178_v55, 0.0  ;;  %v9865_v25 = vld [vmem:[#allocation3 + $0x1e0] sm:$0xff] }
 0x5fa   :  { %v18726_v60 = vld [vmem:[#allocation3 + $0x180] sm:$0xff] }
 0x5fb   :  { %11977 = vst.msk [vmem:[%s18907_s3 + $0x180] sm:$0xff] %vm226_vm2, %v18726_v60  ;;  %10569 = vst.msk [vmem:[#allocation3 + $0x1b0] sm:$0xff] %vm226_vm2, %v10505_v12  ;;  %v14403_v53 = vpop.f32.mrf.mxu0  ;;  %v12179_v44 = vmul.f32 %v18726_v60, %v18726_v60  ;;  %v12089_v21 = vsel %vm226_vm2, %v18726_v60, 0.0  ;;  %v12180_v60 = vmul.f32 %v18718_v27, %v18718_v27 }
 0x5fc   :  { %v11788_v16 = vadd.f32 %v14403_v53, %v11142_v7  ;;  %v12090_v7 = vadd.f32 %v12089_v21, %v12088_v42  ;;  %v12289_v53 = vadd.f32 %v12288_v9, %v12287_v57 }
 0x5fd   :  { %v11668_v19 = vpop.f32.mrf.mxu0  ;;  %v12290_v28 = vsel %vm226_vm2, %v12179_v44, 0.0 }
 0x5fe   :  { %11852 = vst.msk [vmem:[#allocation3 + $0x198] sm:$0xff] %vm226_vm2, %v11788_v16  ;;  %v11787_v33 = vadd.f32 %v11668_v19, %v11141_v52  ;;  %v12291_v52 = vadd.f32 %v12290_v28, %v12289_v53 }
 0x600   :  { %11851 = vst.msk [vmem:[#allocation3 + $0x190] sm:$0xff] %vm226_vm2, %v11787_v33  ;;  %v14314_v58 = vpop.f32.mrf.mxu1  ;;  %v11146_v37 = vld [vmem:[#allocation3 + $0x1b8] sm:$0xff]  ;;  %v12091_v33 = vsel %vm226_vm2, %v18718_v27, 0.0 }
 0x601   :  { %v10508_v18 = vadd.f32 %v14314_v58, %v9862_v22 }
 0x602   :  { %v10412_v17 = vpop.f32.mrf.mxu1  ;;  %v11145_v51 = vld [vmem:[#allocation3 + $0x1b0] sm:$0xff] }
 0x603   :  { %10572 = vst.msk [vmem:[#allocation3 + $0x1c8] sm:$0xff] %vm226_vm2, %v10508_v18  ;;  %v10507_v47 = vadd.f32 %v10412_v17, %v9861_v3 }
 0x605   :  { %v18737_v50 = vld [vmem:[#allocation3 + $0x198] sm:$0xff]  ;;  %10571 = vst.msk [vmem:[#allocation3 + $0x1c0] sm:$0xff] %vm226_vm2, %v10507_v47  ;;  %v12092_v47 = vadd.f32 %v12091_v33, %v12090_v7 }
 0x606   :  { %11980 = vst.msk [vmem:[%s18907_s3 + $0x198] sm:$0xff] %vm226_vm2, %v18737_v50  ;;  %v14406_v40 = vpop.f32.mrf.mxu0  ;;  %v12095_v48 = vsel %vm226_vm2, %v18737_v50, 0.0 }
 0x607   :  { %v18745_v0 = vld [vmem:[#allocation3 + $0x190] sm:$0xff]  ;;  %v11790_v10 = vadd.f32 %v14406_v40, %v11144_v38  ;;  %v12292_v38 = vsel %vm226_vm2, %v12180_v60, 0.0 }
 0x608   :  { %11979 = vst.msk [vmem:[%s18907_s3 + $0x190] sm:$0xff] %vm226_vm2, %v18745_v0  ;;  %v11678_v23 = vpop.f32.mrf.mxu0  ;;  %v12181_v16 = vmul.f32 %v18745_v0, %v18745_v0  ;;  %v12093_v22 = vsel %vm226_vm2, %v18745_v0, 0.0 }
 0x609   :  { %11854 = vst.msk [vmem:[#allocation3 + $0x1a8] sm:$0xff] %vm226_vm2, %v11790_v10  ;;  %v11789_v31 = vadd.f32 %v11678_v23, %v11143_v54  ;;  %v12094_v54 = vadd.f32 %v12093_v22, %v12092_v47  ;;  %v12293_v23 = vadd.f32 %v12292_v38, %v12291_v52 }
 0x60a   :  { %v11148_v58 = vld [vmem:[#allocation3 + $0x1c8] sm:$0xff]  ;;  %v12294_v27 = vsel %vm226_vm2, %v12181_v16, 0.0 }
 0x60b   :  { %11853 = vst.msk [vmem:[#allocation3 + $0x1a0] sm:$0xff] %vm226_vm2, %v11789_v31  ;;  %v12182_v31 = vmul.f32 %v18737_v50, %v18737_v50  ;;  %v12295_v2 = vadd.f32 %v12294_v27, %v12293_v23 }
 0x60c   :  { %v11147_v40 = vld [vmem:[#allocation3 + $0x1c0] sm:$0xff] }
 0x60d   :  { %v12296_v11 = vsel %vm226_vm2, %v12182_v31, 0.0 }
 0x60e   :  { %v14317_v15 = vpop.f32.mrf.mxu1  ;;  %v12297_v14 = vadd.f32 %v12296_v11, %v12295_v2 }
 0x60f   :  { %v10510_v4 = vadd.f32 %v14317_v15, %v9864_v61  ;;  %v12096_v15 = vadd.f32 %v12095_v48, %v12094_v54 }
 0x610   :  { %v10422_v1 = vpop.f32.mrf.mxu1  ;;  %v18764_v13 = vld [vmem:[#allocation3 + $0x1a8] sm:$0xff] }
 0x611   :  { %10574 = vst.msk [vmem:[#allocation3 + $0x1d8] sm:$0xff] %vm226_vm2, %v10510_v4  ;;  %v10509_v34 = vadd.f32 %v10422_v1, %v9863_v49  ;;  %11982 = vst.msk [vmem:[%s18907_s3 + $0x1a8] sm:$0xff] %vm226_vm2, %v18764_v13  ;;  %v12184_v39 = vmul.f32 %v18764_v13, %v18764_v13  ;;  %v12099_v8 = vsel %vm226_vm2, %v18764_v13, 0.0 }
 0x612   :  { %v11917_v45 = vld [vmem:[#allocation3 + $0x1a0] sm:$0xff] }
 0x613   :  { %11981 = vst.msk [vmem:[%s18907_s3 + $0x1a0] sm:$0xff] %vm226_vm2, %v11917_v45  ;;  %10573 = vst.msk [vmem:[#allocation3 + $0x1d0] sm:$0xff] %vm226_vm2, %v10509_v34  ;;  %v14409_v32 = vpop.f32.mrf.mxu0  ;;  %v12183_v35 = vmul.f32 %v11917_v45, %v11917_v45  ;;  %v12097_v61 = vsel %vm226_vm2, %v11917_v45, 0.0  ;;  %v9867_v34 = vld [vmem:[#allocation3 + $0x1f0] sm:$0xff] }
 0x614   :  { %v11792_v6 = vadd.f32 %v14409_v32, %v11146_v37  ;;  %v12098_v1 = vadd.f32 %v12097_v61, %v12096_v15 }
 0x615   :  { %v11688_v59 = vpop.f32.mrf.mxu0  ;;  %v12298_v56 = vsel %vm226_vm2, %v12183_v35, 0.0 }
 0x616   :  { %11856 = vst.msk [vmem:[#allocation3 + $0x1b8] sm:$0xff] %vm226_vm2, %v11792_v6  ;;  %v11791_v29 = vadd.f32 %v11688_v59, %v11145_v51  ;;  %v12299_v45 = vadd.f32 %v12298_v56, %v12297_v14  ;;  %v12100_v36 = vadd.f32 %v12099_v8, %v12098_v1  ;;  %v12300_v59 = vsel %vm226_vm2, %v12184_v39, 0.0 }
 0x618   :  { %11855 = vst.msk [vmem:[#allocation3 + $0x1b0] sm:$0xff] %vm226_vm2, %v11791_v29  ;;  %v14320_v43 = vpop.f32.mrf.mxu1  ;;  %v11150_v6 = vld [vmem:[#allocation3 + $0x1d8] sm:$0xff]  ;;  %v12301_v57 = vadd.f32 %v12300_v59, %v12299_v45 }
 0x619   :  { %v10512_v62 = vadd.f32 %v14320_v43, %v9866_v24 }
 0x61a   :  { %v10432_v12 = vpop.f32.mrf.mxu1  ;;  %v11149_v44 = vld [vmem:[#allocation3 + $0x1d0] sm:$0xff] }
 0x61b   :  { %10576 = vst.msk [vmem:[#allocation3 + $0x1e8] sm:$0xff] %vm226_vm2, %v10512_v62  ;;  %v10511_v41 = vadd.f32 %v10432_v12, %v9865_v25 }
 0x61d   :  { %10575 = vst.msk [vmem:[#allocation3 + $0x1e0] sm:$0xff] %vm226_vm2, %v10511_v41  ;;  %v18802_v19 = vld [vmem:[#allocation3 + $0x1b8] sm:$0xff] }
 0x61e   :  { %v14412_v18 = vpop.f32.mrf.mxu0  ;;  %11984 = vst.msk [vmem:[%s18907_s3 + $0x1b8] sm:$0xff] %vm226_vm2, %v18802_v19  ;;  %v12186_v21 = vmul.f32 %v18802_v19, %v18802_v19  ;;  %v12103_v28 = vsel %vm226_vm2, %v18802_v19, 0.0 }
 0x61f   :  { %v11794_v3 = vadd.f32 %v14412_v18, %v11148_v58  ;;  %v11919_v17 = vld [vmem:[#allocation3 + $0x1b0] sm:$0xff] }
 0x620   :  { %v11698_v10 = vpop.f32.mrf.mxu0  ;;  %11983 = vst.msk [vmem:[%s18907_s3 + $0x1b0] sm:$0xff] %vm226_vm2, %v11919_v17  ;;  %v12185_v37 = vmul.f32 %v11919_v17, %v11919_v17  ;;  %v12101_v30 = vsel %vm226_vm2, %v11919_v17, 0.0  ;;  %v12304_v60 = vsel %vm226_vm2, %v12186_v21, 0.0 }
 0x621   :  { %11858 = vst.msk [vmem:[#allocation3 + $0x1c8] sm:$0xff] %vm226_vm2, %v11794_v3  ;;  %v11793_v0 = vadd.f32 %v11698_v10, %v11147_v40  ;;  %v12102_v13 = vadd.f32 %v12101_v30, %v12100_v36 }
 0x622   :  { %v12302_v55 = vsel %vm226_vm2, %v12185_v37, 0.0  ;;  %v11152_v43 = vld [vmem:[#allocation3 + $0x1e8] sm:$0xff] }
 0x623   :  { %11857 = vst.msk [vmem:[#allocation3 + $0x1c0] sm:$0xff] %vm226_vm2, %v11793_v0  ;;  %v12303_v62 = vadd.f32 %v12302_v55, %v12301_v57  ;;  %v12104_v53 = vadd.f32 %v12103_v28, %v12102_v13 }
 0x624   :  { %v11151_v12 = vld [vmem:[#allocation3 + $0x1e0] sm:$0xff] }
 0x625   :  { %v12305_v58 = vadd.f32 %v12304_v60, %v12303_v62  ;;  %v12130_v60 = vld [vmem:[#allocation6] sm:$0x1] }
 0x626   :  { %v14323_v4 = vpop.f32.mrf.mxu1 }
 0x627   :  { %v10514_v49 = vadd.f32 %v14323_v4, %v9868_v26 }
 0x628   :  { %v10442_v20 = vpop.f32.mrf.mxu1  ;;  %v11922_v63 = vld [vmem:[#allocation3 + $0x1c8] sm:$0xff] }
 0x629   :  { %10578 = vst.msk [vmem:[#allocation3 + $0x1f8] sm:$0xff] %vm226_vm2, %v10514_v49  ;;  %v10513_v50 = vadd.f32 %v10442_v20, %v9867_v34  ;;  %11986 = vst.msk [vmem:[%s18907_s3 + $0x1c8] sm:$0xff] %vm226_vm2, %v11922_v63  ;;  %v12188_v19 = vmul.f32 %v11922_v63, %v11922_v63  ;;  %v12107_v10 = vsel %vm226_vm2, %v11922_v63, 0.0 }
 0x62a   :  { %v11921_v32 = vld [vmem:[#allocation3 + $0x1c0] sm:$0xff] }
 0x62b   :  { %10577 = vst.msk [vmem:[#allocation3 + $0x1f0] sm:$0xff] %vm226_vm2, %v10513_v50  ;;  %v14415_v5 = vpop.f32.mrf.mxu0  ;;  %11985 = vst.msk [vmem:[%s18907_s3 + $0x1c0] sm:$0xff] %vm226_vm2, %v11921_v32  ;;  %v12187_v24 = vmul.f32 %v11921_v32, %v11921_v32  ;;  %v12105_v25 = vsel %vm226_vm2, %v11921_v32, 0.0  ;;  %v12308_v35 = vsel %vm226_vm2, %v12188_v19, 0.0 }
 0x62c   :  { %v11796_v51 = vadd.f32 %v14415_v5, %v11150_v6  ;;  %v12106_v22 = vadd.f32 %v12105_v25, %v12104_v53 }
 0x62d   :  { %v11708_v29 = vpop.f32.mrf.mxu0  ;;  %v12306_v16 = vsel %vm226_vm2, %v12187_v24, 0.0 }
 0x62e   :  { %11860 = vst.msk [vmem:[#allocation3 + $0x1d8] sm:$0xff] %vm226_vm2, %v11796_v51  ;;  %v11795_v46 = vadd.f32 %v11708_v29, %v11149_v44  ;;  %v12307_v38 = vadd.f32 %v12306_v16, %v12305_v58  ;;  %v12108_v0 = vadd.f32 %v12107_v10, %v12106_v22 }
 0x62f   :  { %v14418_v42 = vpop.f32.mrf.mxu0 }
 0x630   :  { %11859 = vst.msk [vmem:[#allocation3 + $0x1d0] sm:$0xff] %vm226_vm2, %v11795_v46  ;;  %v11798_v9 = vadd.f32 %v14418_v42, %v11152_v43  ;;  %v11154_v52 = vld [vmem:[#allocation3 + $0x1f8] sm:$0xff]  ;;  %v12309_v61 = vadd.f32 %v12308_v35, %v12307_v38 }
 0x631   :  { %v11718_v7 = vpop.f32.mrf.mxu0 }
 0x632   :  { %11862 = vst.msk [vmem:[#allocation3 + $0x1e8] sm:$0xff] %vm226_vm2, %v11798_v9  ;;  %v11797_v41 = vadd.f32 %v11718_v7, %v11151_v12  ;;  %v11153_v3 = vld [vmem:[#allocation3 + $0x1f0] sm:$0xff]  ;;  %v11993_v7 = vld [vmem:[#allocation4] sm:$0x1] }
 0x633   :  { %v14421_v33 = vpop.f32.mrf.mxu0 }
 0x634   :  { %11861 = vst.msk [vmem:[#allocation3 + $0x1e0] sm:$0xff] %vm226_vm2, %v11797_v41  ;;  %v11800_v18 = vadd.f32 %v14421_v33, %v11154_v52 }
 0x635   :  { %v11728_v17 = vpop.f32.mrf.mxu0  ;;  %v11924_v47 = vld [vmem:[#allocation3 + $0x1d8] sm:$0xff] }
 0x636   :  { %11864 = vst.msk [vmem:[#allocation3 + $0x1f8] sm:$0xff] %vm226_vm2, %v11800_v18  ;;  %v11799_v40 = vadd.f32 %v11728_v17, %v11153_v3  ;;  %11988 = vst.msk [vmem:[%s18907_s3 + $0x1d8] sm:$0xff] %vm226_vm2, %v11924_v47  ;;  %v12190_v31 = vmul.f32 %v11924_v47, %v11924_v47  ;;  %v12111_v15 = vsel %vm226_vm2, %v11924_v47, 0.0 }
 0x637   :  { %v11923_v27 = vld [vmem:[#allocation3 + $0x1d0] sm:$0xff] }
 0x638   :  { %11863 = vst.msk [vmem:[#allocation3 + $0x1f0] sm:$0xff] %vm226_vm2, %v11799_v40  ;;  %11987 = vst.msk [vmem:[%s18907_s3 + $0x1d0] sm:$0xff] %vm226_vm2, %v11923_v27  ;;  %v12109_v54 = vsel %vm226_vm2, %v11923_v27, 0.0  ;;  %v12189_v23 = vmul.f32 %v11923_v27, %v11923_v27  ;;  %v12312_v34 = vsel %vm226_vm2, %v12190_v31, 0.0 }
 0x639   :  { %v11926_v2 = vld [vmem:[#allocation3 + $0x1e8] sm:$0xff]  ;;  %v12110_v48 = vadd.f32 %v12109_v54, %v12108_v0 }
 0x63a   :  { %11990 = vst.msk [vmem:[%s18907_s3 + $0x1e8] sm:$0xff] %vm226_vm2, %v11926_v2  ;;  %v12310_v26 = vsel %vm226_vm2, %v12189_v23, 0.0  ;;  %v12192_v14 = vmul.f32 %v11926_v2, %v11926_v2  ;;  %v12115_v37 = vsel %vm226_vm2, %v11926_v2, 0.0 }
 0x63b   :  { %v11925_v4 = vld [vmem:[#allocation3 + $0x1e0] sm:$0xff]  ;;  %v12112_v11 = vadd.f32 %v12111_v15, %v12110_v48  ;;  %v12311_v56 = vadd.f32 %v12310_v26, %v12309_v61 }
 0x63c   :  { %11989 = vst.msk [vmem:[%s18907_s3 + $0x1e0] sm:$0xff] %vm226_vm2, %v11925_v4  ;;  %v12113_v49 = vsel %vm226_vm2, %v11925_v4, 0.0  ;;  %v12191_v1 = vmul.f32 %v11925_v4, %v11925_v4  ;;  %v12316_v36 = vsel %vm226_vm2, %v12192_v14, 0.0 }
 0x63d   :  { %v11928_v20 = vld [vmem:[#allocation3 + $0x1f8] sm:$0xff]  ;;  %v12114_v63 = vadd.f32 %v12113_v49, %v12112_v11  ;;  %v12313_v39 = vadd.f32 %v12312_v34, %v12311_v56 }
 0x63e   :  { %11992 = vst.msk [vmem:[%s18907_s3 + $0x1f8] sm:$0xff] %vm226_vm2, %v11928_v20  ;;  %v12314_v50 = vsel %vm226_vm2, %v12191_v1, 0.0  ;;  %v12194_v5 = vmul.f32 %v11928_v20, %v11928_v20  ;;  %v12119_v55 = vsel %vm226_vm2, %v11928_v20, 0.0 }
 0x63f   :  { %v11927_v45 = vld [vmem:[#allocation3 + $0x1f0] sm:$0xff]  ;;  %v12116_v32 = vadd.f32 %v12115_v37, %v12114_v63  ;;  %v12315_v8 = vadd.f32 %v12314_v50, %v12313_v39 }
 0x640   :  { %11991 = vst.msk [vmem:[%s18907_s3 + $0x1f0] sm:$0xff] %vm226_vm2, %v11927_v45  ;;  %v12117_v30 = vsel %vm226_vm2, %v11927_v45, 0.0  ;;  %v12193_v6 = vmul.f32 %v11927_v45, %v11927_v45  ;;  %v12320_v57 = vsel %vm226_vm2, %v12194_v5, 0.0  ;;  %s14551_s3 = smov [#allocation4]  }
 0x641   :  { %v12118_v51 = vadd.f32 %v12117_v30, %v12116_v32  ;;  %v12317_v59 = vadd.f32 %v12316_v36, %v12315_v8  ;;  %s12338_s24 = sshll.u32 %s14551_s3, 4  ;;  %s12339_s24 = int_to_ptr.vmem [resolvable:$true] %s12338_s24 }
 0x642   :  { %v12318_v44 = vsel %vm226_vm2, %v12193_v6, 0.0  ;;  %s14497_s27 = scalar_lea.vmem %s12339_s24, 16  ;;  %s14501_s28 = scalar_lea.vmem %s12339_s24, 32 }
 0x643   :  { %v12120_v29 = vadd.f32 %v12119_v55, %v12118_v51  ;;  %v12319_v13 = vadd.f32 %v12318_v44, %v12317_v59  ;;  %p14498_p0 = scmp.ne.s32.totalorder %s12339_s24, %s14497_s27  ;;  %p14502_p1 = scmp.lt.s32.totalorder %s12339_s24, %s12339_s24 }
 0x644   :  { %p14503_p2 = scmp.lt.s32.totalorder %s14501_s28, %s14497_s27 }
 0x645   :  { %v12121_v46 = vrot.slane %v12120_v29, 4  ;;  %v12321_v21 = vadd.f32 %v12320_v57, %v12319_v13 }
 0x646   :  { %p14504_p3 = por %p14503_p2, %p14502_p1 }
 0x647   :  { %v12122_v24 = vadd.f32 %v12121_v46, %v12120_v29  ;;  %v12322_v43 = vrot.slane %v12321_v21, 4 }
 0x648   :  { %p14505_p4 = pnand %p14504_p3, %p14498_p0 }
 0x649   :  { %v12123_v42 = vrot.slane %v12122_v24, 2  ;;  %v12323_v62 = vadd.f32 %v12322_v43, %v12321_v21 }
 0x64b   :  { %v12124_v9 = vadd.f32 %v12123_v42, %v12122_v24  ;;  %v12324_v28 = vrot.slane %v12323_v62, 2 }
 0x64d   :  { %v12125_v25 = vrot.slane %v12124_v9, 1  ;;  %v12325_v12 = vadd.f32 %v12324_v28, %v12323_v62 }
 0x64f   :  { %v12126_v53 = vadd.f32 %v12125_v25, %v12124_v9  ;;  %v12326_v41 = vrot.slane %v12325_v12, 1 }
 0x651   :  { %v12127_v16 = vadd.f32 %v12126_v53, %v11993_v7  ;;  %v12327_v52 = vadd.f32 %v12326_v41, %v12325_v12 }
 0x653   :  { %12129 = vst.msk [vmem:[#allocation4] sm:$0x1] %vm94_vm3, %v12127_v16  ;;  %v12328_v33 = vadd.f32 %v12327_v52, %v12130_v60 }
 0x654   :  { %14508 = shalt.err (!%p14505_p4)
}
 0x655   :  { %12341 = dma.vmem_to_hbm [thread:$0]  %s12339_s24, 16, %s18908_s4, [#allocation5]   ;;  %12329 = vst.msk [vmem:[#allocation6] sm:$0x1] %vm94_vm3, %v12328_v33 }
 0x656   :  { %s14517_s2 = scalar_lea.vmem %s12349_s26, 16  ;;  %s14521_s6 = scalar_lea.vmem %s12349_s26, 32 }
 0x657   :  { %p14518_p5 = scmp.ne.s32.totalorder %s12349_s26, %s14517_s2  ;;  %p14522_p6 = scmp.lt.s32.totalorder %s12349_s26, %s12349_s26 }
 0x658   :  { %p14523_p7 = scmp.lt.s32.totalorder %s14521_s6, %s14517_s2 }
 0x65a   :  { %p14524_p8 = por %p14523_p7, %p14522_p6 }
 0x65c   :  { %p14525_p9 = pnand %p14524_p8, %p14518_p5 }
 0x65e   :  { %14528 = shalt.err (!%p14525_p9)
}
 0x65f   :  { %12351 = dma.vmem_to_hbm [thread:$0]  %s12349_s26, 16, %s18909_s5, [#allocation7]  }
 0x660   :  { %14537 = dma.done.wait [#allocation5], 16  }
 0x661   :  { %14538 = vsyncadd [#allocation5], 4294967280 }
 0x662   :  { %14539 = dma.done.wait [#allocation7], 16  }
 0x663   :  { %14540 = vsyncadd [#allocation7], 4294967280 }
 0x664   :  { %12360 = vsyncpa [#allocation5], 1 }
 0x665   :  { %12361 = vsyncpa [#allocation7], 1 }

</bundles_post_ra>
